<compile_context>
chip_gen: v7x
topology: tpu7x:2x2x1
jax: 0.10.0
libtpu: 0.0.40
codegen_flags: <defaults>
</compile_context>

<pallas_src>
import jax
import jax.numpy as jnp
from jax.experimental import pallas as pl
from jax.experimental.pallas import tpu as pltpu


# ------------------------------- the kernel ---------------------------------
#
# Row layout of the conv1 im2col ("patches") per image, 1024 rows:
#   row = (((r*2 + s)*2 + p)*2 + q)*64 + u*8 + v
# holds the 5x5 patch around conv1-output pixel (Y, X) = (4u + 2r + p, 4v + 2s + q)
# (u, v valid 0..5; rows with u or v in {6,7} are zero padding).
# (r, s)  = pool1-output phase, (p, q) = position inside the 2x2 pool window.

def _lenet_fused_kernel(patches_ref, w1_ref, b1_ref, w2_ref, b2_ref,
                        wf1_ref, bf1_ref, wf2_ref, bf2_ref, o_ref, p1_ref):
    f32 = jnp.float32
    w1 = w1_ref[...]                              # [32, 128]   (taps, oc)
    b1 = b1_ref[...]                              # [1, 128]

    # ---- conv1 (MXU) + ReLU + 2x2 max-pool, phase-major --------------------
    for rs in range(4):                           # rs = r*2 + s
        blk = patches_ref[rs * 256:(rs + 1) * 256, :]          # [256, 32]
        h = jnp.dot(blk, w1, preferred_element_type=f32) + b1  # [256, 128]
        h = jnp.maximum(h, 0.0)
        # the four 64-row sub-blocks are the (p, q) corners of each pool window
        p1 = jnp.maximum(jnp.maximum(h[0:64], h[64:128]),
                         jnp.maximum(h[128:192], h[192:256]))  # [64, 128]
        p1_ref[rs] = p1     # pool1 phase (r, s): row u*8 + v, channels 0..19 valid

    # ---- conv2 (25 accumulated MXU matmuls) + ReLU + 2x2 max-pool ----------
    b2 = b2_ref[...]                              # [1, 128]
    p2 = None                                     # pooled [32, 128], rows y*8+x valid
    for p in range(2):
        for q in range(2):
            acc = jnp.zeros((32, 128), f32)
            for i in range(5):
                for j in range(5):
                    r, du = (p + i) % 2, (p + i) // 2
                    s, dv = (q + j) % 2, (q + j) // 2
                    off = du * 8 + dv
                    # contiguous 32-row slab of the pool1 phase buffer
                    lhs = p1_ref[r * 2 + s, off:off + 32, 0:32]      # [32, 32]
                    acc = acc + jnp.dot(lhs, w2_ref[i * 5 + j],
                                        preferred_element_type=f32)  # [32, 128]
            a = jnp.maximum(acc + b2, 0.0)        # ReLU(conv2) at phase (p, q)
            p2 = a if p2 is None else jnp.maximum(p2, a)             # max-pool2

    # ---- fc1 (16 accumulated MXU matmuls, one per pooled spatial position) --
    a1 = bf1_ref[...]                             # [1, 512]
    for idx in range(16):                         # idx = y*4 + x (PyTorch flatten)
        z = (idx // 4) * 8 + (idx % 4)
        a1 = a1 + jnp.dot(p2[z:z + 1, 0:64], wf1_ref[idx],
                          preferred_element_type=f32)                # [1, 512]
    a1 = jnp.maximum(a1, 0.0)

    # ---- fc2 + log_softmax (padded classes carry a -1e30 bias) -------------
    logits = jnp.dot(a1, wf2_ref[...], preferred_element_type=f32) + bf2_ref[...]
    m = jnp.max(logits, axis=-1, keepdims=True)
    sh = logits - m
    lse = jnp.log(jnp.sum(jnp.exp(sh), axis=-1, keepdims=True))
    o_ref[...] = (sh - lse).astype(o_ref.dtype)


# ------------------------------- wrappers -----------------------------------

def _conv1_patches(x):
    """x: [B, 28, 28] -> conv1 im2col rows in pool-phase-major order, [B, 1024, 32].

    Tiny XLA glue on the raw input only (~100KB/image); everything downstream
    of conv1 (pool1, conv2 im2col, pool2, fcs) happens inside the kernel.
    """
    B = x.shape[0]
    taps = [x[:, i:i + 24, j:j + 24] for i in range(5) for j in range(5)]
    pt = jnp.stack(taps, axis=-1)                 # [B, 24, 24, 25], t = i*5+j
    pt = pt.reshape(B, 6, 2, 2, 6, 2, 2, 25)      # [B, u, r, p, v, s, q, t]
    pt = pt.transpose(0, 2, 5, 3, 6, 1, 4, 7)     # [B, r, s, p, q, u, v, t]
    pt = jnp.pad(pt, ((0, 0),) * 5 + ((0, 2), (0, 2), (0, 7)))  # u,v->8, t->32
    return pt.reshape(B, 1024, 32)


@jax.jit
def net_forward(packed, x_nchw):
    """x_nchw: [B, 1, 28, 28] float32 -> log-probs [B, 10]."""
    B = x_nchw.shape[0]
    x = x_nchw.reshape(B, 28, 28).astype(jnp.float32)
    patches = _conv1_patches(x)                   # [B, 1024, 32]

    out = pl.pallas_call(
        _lenet_fused_kernel,
        out_shape=jax.ShapeDtypeStruct((B, 1, 128), jnp.float32),
        grid_spec=pltpu.PrefetchScalarGridSpec(
            num_scalar_prefetch=0,
            grid=(B,),
            in_specs=[
                pl.BlockSpec((None, 1024, 32), lambda b: (b, 0, 0)),  # patches
                pl.BlockSpec((32, 128), lambda b: (0, 0)),            # w1
                pl.BlockSpec((1, 128), lambda b: (0, 0)),             # b1
                pl.BlockSpec((25, 32, 128), lambda b: (0, 0, 0)),     # w2
                pl.BlockSpec((1, 128), lambda b: (0, 0)),             # b2
                pl.BlockSpec((16, 64, 512), lambda b: (0, 0, 0)),     # fc1 blocks
                pl.BlockSpec((1, 512), lambda b: (0, 0)),             # fc1 bias
                pl.BlockSpec((512, 128), lambda b: (0, 0)),           # fc2
                pl.BlockSpec((1, 128), lambda b: (0, 0)),             # fc2 bias
            ],
            out_specs=pl.BlockSpec((None, 1, 128), lambda b: (b, 0, 0)),
            scratch_shapes=[pltpu.VMEM((4, 64, 128), jnp.float32)],   # pool1 phases
        ),
        compiler_params=pltpu.CompilerParams(
            dimension_semantics=("parallel",),
            vmem_limit_bytes=32 * 1024 * 1024,
        ),
    )(patches, packed["w1"], packed["b1"], packed["w2"], packed["b2"],
      packed["wf1"], packed["bf1"], packed["wf2"], packed["bf2"])

    return out.reshape(B, 128)[:, :10]


# ------------------------- params (PyTorch layout) ---------------------------

def init_params(key):
    ks = jax.random.split(key, 8)
    s = 0.05
    return {
        "conv1_w": s * jax.random.normal(ks[0], (20, 1, 5, 5), jnp.float32),
        "conv1_b": s * jax.random.normal(ks[1], (20,), jnp.float32),
        "conv2_w": s * jax.random.normal(ks[2], (50, 20, 5, 5), jnp.float32),
        "conv2_b": s * jax.random.normal(ks[3], (50,), jnp.float32),
        "fc1_w": s * jax.random.normal(ks[4], (500, 800), jnp.float32),
        "fc1_b": s * jax.random.normal(ks[5], (500,), jnp.float32),
        "fc2_w": s * jax.random.normal(ks[6], (10, 500), jnp.float32),
        "fc2_b": s * jax.random.normal(ks[7], (10,), jnp.float32),
    }


def pack_params(p):
    """One-time repack of PyTorch-shaped weights into kernel layouts (hoisted)."""
    NEG = -1e30
    # conv1 [oc,1,5,5] -> [tap, oc] padded to [32, 128]
    w1 = jnp.transpose(p["conv1_w"][:, 0], (1, 2, 0)).reshape(25, 20)
    w1 = jnp.pad(w1, ((0, 7), (0, 108)))
    b1 = jnp.pad(p["conv1_b"].reshape(1, 20), ((0, 0), (0, 108)))
    # conv2 [oc,c,5,5] -> [tap, c, oc] padded to [25, 32, 128]
    w2 = jnp.transpose(p["conv2_w"], (2, 3, 1, 0)).reshape(25, 20, 50)
    w2 = jnp.pad(w2, ((0, 0), (0, 12), (0, 78)))
    b2 = jnp.pad(p["conv2_b"].reshape(1, 50), ((0, 0), (0, 78)))
    # fc1 [n, c*16 + y*4 + x] -> [idx=y*4+x, c, n] padded to [16, 64, 512]
    wf1 = jnp.transpose(p["fc1_w"].reshape(500, 50, 16), (2, 1, 0))
    wf1 = jnp.pad(wf1, ((0, 0), (0, 14), (0, 12)))
    bf1 = jnp.pad(p["fc1_b"].reshape(1, 500), ((0, 0), (0, 12)))
    # fc2 [m, n] -> [n, m] padded to [512, 128]; padded-class bias = -1e30
    wf2 = jnp.pad(jnp.transpose(p["fc2_w"]), ((0, 12), (0, 118)))
    bf2 = jnp.concatenate(
        [p["fc2_b"].reshape(1, 10), jnp.full((1, 118), NEG, jnp.float32)], axis=1)
    return {"w1": w1, "b1": b1, "w2": w2, "b2": b2,
            "wf1": wf1, "bf1": bf1, "wf2": wf2, "bf2": bf2}


# --------------------------- pure-JAX reference ------------------------------

def reference_forward(params, x_nchw):
    hi = jax.lax.Precision.HIGHEST
    x = x_nchw.astype(jnp.float32)
    y = jax.lax.conv_general_dilated(
        x, params["conv1_w"], (1, 1), "VALID",
        dimension_numbers=("NCHW", "OIHW", "NCHW"), precision=hi)
    y = jax.nn.relu(y + params["conv1_b"].reshape(1, 20, 1, 1))
    y = jax.lax.reduce_window(y, -jnp.inf, jax.lax.max,
                              (1, 1, 2, 2), (1, 1, 2, 2), "VALID")
    y = jax.lax.conv_general_dilated(
        y, params["conv2_w"], (1, 1), "VALID",
        dimension_numbers=("NCHW", "OIHW", "NCHW"), precision=hi)
    y = jax.nn.relu(y + params["conv2_b"].reshape(1, 50, 1, 1))
    y = jax.lax.reduce_window(y, -jnp.inf, jax.lax.max,
                              (1, 1, 2, 2), (1, 1, 2, 2), "VALID")
    y = y.reshape(y.shape[0], 800)
    y = jax.nn.relu(jnp.dot(y, params["fc1_w"].T, precision=hi) + params["fc1_b"])
    y = jnp.dot(y, params["fc2_w"].T, precision=hi) + params["fc2_b"]
    return jax.nn.log_softmax(y, axis=-1)


if __name__ == "__main__":
    key = jax.random.PRNGKey(0)
    pkey, xkey = jax.random.split(key)
    params = init_params(pkey)
    packed = pack_params(params)

    x = jax.random.normal(xkey, (2, 1, 28, 28), jnp.float32)
    out = jax.block_until_ready(net_forward(packed, x))

    assert out.shape == (2, 10)
    # rows must be valid log-probabilities
    assert bool(jnp.all(jnp.abs(jnp.sum(jnp.exp(out), axis=1) - 1.0) < 1e-4))
    # and match the pure-JAX reference of the PyTorch module
    ref = reference_forward(params, x)
    assert bool(jnp.max(jnp.abs(out - ref)) < 2e-2)
    print("KERNEL_OK")
</pallas_src>

<mosaic_0001>
module attributes {stable_mosaic.version = 11 : i64} {
  func.func @_lenet_fused_kernel(%arg0: i32, %arg1: memref<1x1024x32xf32, #tpu.memory_space<vmem>>, %arg2: memref<32x128xf32, #tpu.memory_space<vmem>>, %arg3: memref<1x128xf32, #tpu.memory_space<vmem>>, %arg4: memref<25x32x128xf32, #tpu.memory_space<vmem>>, %arg5: memref<1x128xf32, #tpu.memory_space<vmem>>, %arg6: memref<16x64x512xf32, #tpu.memory_space<vmem>>, %arg7: memref<1x512xf32, #tpu.memory_space<vmem>>, %arg8: memref<512x128xf32, #tpu.memory_space<vmem>>, %arg9: memref<1x128xf32, #tpu.memory_space<vmem>>, %arg10: memref<1x1x128xf32, #tpu.memory_space<vmem>>, %arg11: memref<4x64x128xf32, #tpu.memory_space<vmem>>) attributes {dimension_semantics = [#tpu.dimension_semantics<parallel>], iteration_bounds = array<i64: 2>, scalar_prefetch = 0 : i64, scratch_operands = 1 : i64, tpu.core_type = #tpu.core_type<tc>, window_params = [{transform_indices = @transform_0, window_bounds = array<i64: 1, 1024, 32>}, {pipeline_mode = #tpu.pipeline_mode<synchronous>, transform_indices = @transform_1, window_bounds = array<i64: 32, 128>}, {pipeline_mode = #tpu.pipeline_mode<synchronous>, transform_indices = @transform_2, window_bounds = array<i64: 1, 128>}, {pipeline_mode = #tpu.pipeline_mode<synchronous>, transform_indices = @transform_3, window_bounds = array<i64: 25, 32, 128>}, {pipeline_mode = #tpu.pipeline_mode<synchronous>, transform_indices = @transform_4, window_bounds = array<i64: 1, 128>}, {pipeline_mode = #tpu.pipeline_mode<synchronous>, transform_indices = @transform_5, window_bounds = array<i64: 16, 64, 512>}, {pipeline_mode = #tpu.pipeline_mode<synchronous>, transform_indices = @transform_6, window_bounds = array<i64: 1, 512>}, {pipeline_mode = #tpu.pipeline_mode<synchronous>, transform_indices = @transform_7, window_bounds = array<i64: 512, 128>}, {pipeline_mode = #tpu.pipeline_mode<synchronous>, transform_indices = @transform_8, window_bounds = array<i64: 1, 128>}, {transform_indices = @transform_9, window_bounds = array<i64: 1, 1, 128>}]} {
    %c0 = arith.constant 0 : index
    %c0_0 = arith.constant 0 : index
    %0 = vector.load %arg2[%c0, %c0_0] : memref<32x128xf32, #tpu.memory_space<vmem>>, vector<32x128xf32>
    %c0_1 = arith.constant 0 : index
    %c0_2 = arith.constant 0 : index
    %1 = vector.load %arg3[%c0_1, %c0_2] : memref<1x128xf32, #tpu.memory_space<vmem>>, vector<1x128xf32>
    %c0_3 = arith.constant 0 : index
    %c0_4 = arith.constant 0 : index
    %c0_5 = arith.constant 0 : index
    %2 = vector.load %arg1[%c0_3, %c0_4, %c0_5] : memref<1x1024x32xf32, #tpu.memory_space<vmem>>, vector<1x256x32xf32>
    %3 = vector.shape_cast %2 : vector<1x256x32xf32> to vector<256x32xf32>
    %cst = arith.constant dense<0.000000e+00> : vector<256x128xf32>
    %4 = tpu.matmul %3, %0, %cst {dimension_numbers = #tpu.dot_dimension_numbers<[1], [0], [0], [1], [0, 0, 1, 1], [], []>} : vector<256x32xf32>, vector<32x128xf32>, vector<256x128xf32> -> vector<256x128xf32>
    %5 = vector.broadcast %1 : vector<1x128xf32> to vector<256x128xf32>
    %6 = arith.addf %4, %5 : vector<256x128xf32>
    %cst_6 = arith.constant 0.000000e+00 : f32
    %7 = vector.broadcast %cst_6 : f32 to vector<256x128xf32>
    %8 = arith.maximumf %6, %7 : vector<256x128xf32>
    %9 = vector.extract_strided_slice %8 {offsets = [0, 0], sizes = [64, 128], strides = [1, 1]} : vector<256x128xf32> to vector<64x128xf32>
    %10 = vector.extract_strided_slice %8 {offsets = [64, 0], sizes = [64, 128], strides = [1, 1]} : vector<256x128xf32> to vector<64x128xf32>
    %11 = arith.maximumf %9, %10 : vector<64x128xf32>
    %12 = vector.extract_strided_slice %8 {offsets = [128, 0], sizes = [64, 128], strides = [1, 1]} : vector<256x128xf32> to vector<64x128xf32>
    %13 = vector.extract_strided_slice %8 {offsets = [192, 0], sizes = [64, 128], strides = [1, 1]} : vector<256x128xf32> to vector<64x128xf32>
    %14 = arith.maximumf %12, %13 : vector<64x128xf32>
    %15 = arith.maximumf %11, %14 : vector<64x128xf32>
    %c0_7 = arith.constant 0 : index
    %c0_8 = arith.constant 0 : index
    %c0_9 = arith.constant 0 : index
    %16 = vector.load %arg11[%c0_7, %c0_8, %c0_9] : memref<4x64x128xf32, #tpu.memory_space<vmem>>, vector<1x64x128xf32>
    %17 = vector.shape_cast %16 : vector<1x64x128xf32> to vector<64x128xf32>
    %18 = vector.shape_cast %15 : vector<64x128xf32> to vector<1x64x128xf32>
    tpu.vector_store %arg11[%c0_7, %c0_8, %c0_9], %18 {strides = array<i32>} : memref<4x64x128xf32, #tpu.memory_space<vmem>>, vector<1x64x128xf32>,
    %c0_10 = arith.constant 0 : index
    %c256 = arith.constant 256 : index
    %c0_11 = arith.constant 0 : index
    %19 = vector.load %arg1[%c0_10, %c256, %c0_11] : memref<1x1024x32xf32, #tpu.memory_space<vmem>>, vector<1x256x32xf32>
    %20 = vector.shape_cast %19 : vector<1x256x32xf32> to vector<256x32xf32>
    %cst_12 = arith.constant dense<0.000000e+00> : vector<256x128xf32>
    %21 = tpu.matmul %20, %0, %cst_12 {dimension_numbers = #tpu.dot_dimension_numbers<[1], [0], [0], [1], [0, 0, 1, 1], [], []>} : vector<256x32xf32>, vector<32x128xf32>, vector<256x128xf32> -> vector<256x128xf32>
    %22 = vector.broadcast %1 : vector<1x128xf32> to vector<256x128xf32>
    %23 = arith.addf %21, %22 : vector<256x128xf32>
    %cst_13 = arith.constant 0.000000e+00 : f32
    %24 = vector.broadcast %cst_13 : f32 to vector<256x128xf32>
    %25 = arith.maximumf %23, %24 : vector<256x128xf32>
    %26 = vector.extract_strided_slice %25 {offsets = [0, 0], sizes = [64, 128], strides = [1, 1]} : vector<256x128xf32> to vector<64x128xf32>
    %27 = vector.extract_strided_slice %25 {offsets = [64, 0], sizes = [64, 128], strides = [1, 1]} : vector<256x128xf32> to vector<64x128xf32>
    %28 = arith.maximumf %26, %27 : vector<64x128xf32>
    %29 = vector.extract_strided_slice %25 {offsets = [128, 0], sizes = [64, 128], strides = [1, 1]} : vector<256x128xf32> to vector<64x128xf32>
    %30 = vector.extract_strided_slice %25 {offsets = [192, 0], sizes = [64, 128], strides = [1, 1]} : vector<256x128xf32> to vector<64x128xf32>
    %31 = arith.maximumf %29, %30 : vector<64x128xf32>
    %32 = arith.maximumf %28, %31 : vector<64x128xf32>
    %c1 = arith.constant 1 : index
    %c0_14 = arith.constant 0 : index
    %c0_15 = arith.constant 0 : index
    %33 = vector.load %arg11[%c1, %c0_14, %c0_15] : memref<4x64x128xf32, #tpu.memory_space<vmem>>, vector<1x64x128xf32>
    %34 = vector.shape_cast %33 : vector<1x64x128xf32> to vector<64x128xf32>
    %35 = vector.shape_cast %32 : vector<64x128xf32> to vector<1x64x128xf32>
    tpu.vector_store %arg11[%c1, %c0_14, %c0_15], %35 {strides = array<i32>} : memref<4x64x128xf32, #tpu.memory_space<vmem>>, vector<1x64x128xf32>,
    %c0_16 = arith.constant 0 : index
    %c512 = arith.constant 512 : index
    %c0_17 = arith.constant 0 : index
    %36 = vector.load %arg1[%c0_16, %c512, %c0_17] : memref<1x1024x32xf32, #tpu.memory_space<vmem>>, vector<1x256x32xf32>
    %37 = vector.shape_cast %36 : vector<1x256x32xf32> to vector<256x32xf32>
    %cst_18 = arith.constant dense<0.000000e+00> : vector<256x128xf32>
    %38 = tpu.matmul %37, %0, %cst_18 {dimension_numbers = #tpu.dot_dimension_numbers<[1], [0], [0], [1], [0, 0, 1, 1], [], []>} : vector<256x32xf32>, vector<32x128xf32>, vector<256x128xf32> -> vector<256x128xf32>
    %39 = vector.broadcast %1 : vector<1x128xf32> to vector<256x128xf32>
    %40 = arith.addf %38, %39 : vector<256x128xf32>
    %cst_19 = arith.constant 0.000000e+00 : f32
    %41 = vector.broadcast %cst_19 : f32 to vector<256x128xf32>
    %42 = arith.maximumf %40, %41 : vector<256x128xf32>
    %43 = vector.extract_strided_slice %42 {offsets = [0, 0], sizes = [64, 128], strides = [1, 1]} : vector<256x128xf32> to vector<64x128xf32>
    %44 = vector.extract_strided_slice %42 {offsets = [64, 0], sizes = [64, 128], strides = [1, 1]} : vector<256x128xf32> to vector<64x128xf32>
    %45 = arith.maximumf %43, %44 : vector<64x128xf32>
    %46 = vector.extract_strided_slice %42 {offsets = [128, 0], sizes = [64, 128], strides = [1, 1]} : vector<256x128xf32> to vector<64x128xf32>
    %47 = vector.extract_strided_slice %42 {offsets = [192, 0], sizes = [64, 128], strides = [1, 1]} : vector<256x128xf32> to vector<64x128xf32>
    %48 = arith.maximumf %46, %47 : vector<64x128xf32>
    %49 = arith.maximumf %45, %48 : vector<64x128xf32>
    %c2 = arith.constant 2 : index
    %c0_20 = arith.constant 0 : index
    %c0_21 = arith.constant 0 : index
    %50 = vector.load %arg11[%c2, %c0_20, %c0_21] : memref<4x64x128xf32, #tpu.memory_space<vmem>>, vector<1x64x128xf32>
    %51 = vector.shape_cast %50 : vector<1x64x128xf32> to vector<64x128xf32>
    %52 = vector.shape_cast %49 : vector<64x128xf32> to vector<1x64x128xf32>
    tpu.vector_store %arg11[%c2, %c0_20, %c0_21], %52 {strides = array<i32>} : memref<4x64x128xf32, #tpu.memory_space<vmem>>, vector<1x64x128xf32>,
    %c0_22 = arith.constant 0 : index
    %c768 = arith.constant 768 : index
    %c0_23 = arith.constant 0 : index
    %53 = vector.load %arg1[%c0_22, %c768, %c0_23] : memref<1x1024x32xf32, #tpu.memory_space<vmem>>, vector<1x256x32xf32>
    %54 = vector.shape_cast %53 : vector<1x256x32xf32> to vector<256x32xf32>
    %cst_24 = arith.constant dense<0.000000e+00> : vector<256x128xf32>
    %55 = tpu.matmul %54, %0, %cst_24 {dimension_numbers = #tpu.dot_dimension_numbers<[1], [0], [0], [1], [0, 0, 1, 1], [], []>} : vector<256x32xf32>, vector<32x128xf32>, vector<256x128xf32> -> vector<256x128xf32>
    %56 = vector.broadcast %1 : vector<1x128xf32> to vector<256x128xf32>
    %57 = arith.addf %55, %56 : vector<256x128xf32>
    %cst_25 = arith.constant 0.000000e+00 : f32
    %58 = vector.broadcast %cst_25 : f32 to vector<256x128xf32>
    %59 = arith.maximumf %57, %58 : vector<256x128xf32>
    %60 = vector.extract_strided_slice %59 {offsets = [0, 0], sizes = [64, 128], strides = [1, 1]} : vector<256x128xf32> to vector<64x128xf32>
    %61 = vector.extract_strided_slice %59 {offsets = [64, 0], sizes = [64, 128], strides = [1, 1]} : vector<256x128xf32> to vector<64x128xf32>
    %62 = arith.maximumf %60, %61 : vector<64x128xf32>
    %63 = vector.extract_strided_slice %59 {offsets = [128, 0], sizes = [64, 128], strides = [1, 1]} : vector<256x128xf32> to vector<64x128xf32>
    %64 = vector.extract_strided_slice %59 {offsets = [192, 0], sizes = [64, 128], strides = [1, 1]} : vector<256x128xf32> to vector<64x128xf32>
    %65 = arith.maximumf %63, %64 : vector<64x128xf32>
    %66 = arith.maximumf %62, %65 : vector<64x128xf32>
    %c3 = arith.constant 3 : index
    %c0_26 = arith.constant 0 : index
    %c0_27 = arith.constant 0 : index
    %67 = vector.load %arg11[%c3, %c0_26, %c0_27] : memref<4x64x128xf32, #tpu.memory_space<vmem>>, vector<1x64x128xf32>
    %68 = vector.shape_cast %67 : vector<1x64x128xf32> to vector<64x128xf32>
    %69 = vector.shape_cast %66 : vector<64x128xf32> to vector<1x64x128xf32>
    tpu.vector_store %arg11[%c3, %c0_26, %c0_27], %69 {strides = array<i32>} : memref<4x64x128xf32, #tpu.memory_space<vmem>>, vector<1x64x128xf32>,
    %c0_28 = arith.constant 0 : index
    %c0_29 = arith.constant 0 : index
    %70 = vector.load %arg5[%c0_28, %c0_29] : memref<1x128xf32, #tpu.memory_space<vmem>>, vector<1x128xf32>
    %cst_30 = arith.constant 0.000000e+00 : f32
    %71 = vector.broadcast %cst_30 : f32 to vector<32x128xf32>
    %c0_31 = arith.constant 0 : index
    %c0_32 = arith.constant 0 : index
    %c0_33 = arith.constant 0 : index
    %72 = vector.load %arg11[%c0_31, %c0_32, %c0_33] : memref<4x64x128xf32, #tpu.memory_space<vmem>>, vector<1x32x32xf32>
    %73 = vector.shape_cast %72 : vector<1x32x32xf32> to vector<32x32xf32>
    %c0_34 = arith.constant 0 : index
    %c0_35 = arith.constant 0 : index
    %c0_36 = arith.constant 0 : index
    %74 = vector.load %arg4[%c0_34, %c0_35, %c0_36] : memref<25x32x128xf32, #tpu.memory_space<vmem>>, vector<1x32x128xf32>
    %75 = vector.shape_cast %74 : vector<1x32x128xf32> to vector<32x128xf32>
    %cst_37 = arith.constant dense<0.000000e+00> : vector<32x128xf32>
    %76 = tpu.matmul %73, %75, %cst_37 {dimension_numbers = #tpu.dot_dimension_numbers<[1], [0], [0], [1], [0, 0, 1, 1], [], []>} : vector<32x32xf32>, vector<32x128xf32>, vector<32x128xf32> -> vector<32x128xf32>
    %77 = arith.addf %71, %76 : vector<32x128xf32>
    %c1_38 = arith.constant 1 : index
    %c0_39 = arith.constant 0 : index
    %c0_40 = arith.constant 0 : index
    %78 = vector.load %arg11[%c1_38, %c0_39, %c0_40] : memref<4x64x128xf32, #tpu.memory_space<vmem>>, vector<1x32x32xf32>
    %79 = vector.shape_cast %78 : vector<1x32x32xf32> to vector<32x32xf32>
    %c1_41 = arith.constant 1 : index
    %c0_42 = arith.constant 0 : index
    %c0_43 = arith.constant 0 : index
    %80 = vector.load %arg4[%c1_41, %c0_42, %c0_43] : memref<25x32x128xf32, #tpu.memory_space<vmem>>, vector<1x32x128xf32>
    %81 = vector.shape_cast %80 : vector<1x32x128xf32> to vector<32x128xf32>
    %cst_44 = arith.constant dense<0.000000e+00> : vector<32x128xf32>
    %82 = tpu.matmul %79, %81, %cst_44 {dimension_numbers = #tpu.dot_dimension_numbers<[1], [0], [0], [1], [0, 0, 1, 1], [], []>} : vector<32x32xf32>, vector<32x128xf32>, vector<32x128xf32> -> vector<32x128xf32>
    %83 = arith.addf %77, %82 : vector<32x128xf32>
    %c0_45 = arith.constant 0 : index
    %c1_46 = arith.constant 1 : index
    %c0_47 = arith.constant 0 : index
    %84 = vector.load %arg11[%c0_45, %c1_46, %c0_47] : memref<4x64x128xf32, #tpu.memory_space<vmem>>, vector<1x32x32xf32>
    %85 = vector.shape_cast %84 : vector<1x32x32xf32> to vector<32x32xf32>
    %c2_48 = arith.constant 2 : index
    %c0_49 = arith.constant 0 : index
    %c0_50 = arith.constant 0 : index
    %86 = vector.load %arg4[%c2_48, %c0_49, %c0_50] : memref<25x32x128xf32, #tpu.memory_space<vmem>>, vector<1x32x128xf32>
    %87 = vector.shape_cast %86 : vector<1x32x128xf32> to vector<32x128xf32>
    %cst_51 = arith.constant dense<0.000000e+00> : vector<32x128xf32>
    %88 = tpu.matmul %85, %87, %cst_51 {dimension_numbers = #tpu.dot_dimension_numbers<[1], [0], [0], [1], [0, 0, 1, 1], [], []>} : vector<32x32xf32>, vector<32x128xf32>, vector<32x128xf32> -> vector<32x128xf32>
    %89 = arith.addf %83, %88 : vector<32x128xf32>
    %c1_52 = arith.constant 1 : index
    %c1_53 = arith.constant 1 : index
    %c0_54 = arith.constant 0 : index
    %90 = vector.load %arg11[%c1_52, %c1_53, %c0_54] : memref<4x64x128xf32, #tpu.memory_space<vmem>>, vector<1x32x32xf32>
    %91 = vector.shape_cast %90 : vector<1x32x32xf32> to vector<32x32xf32>
    %c3_55 = arith.constant 3 : index
    %c0_56 = arith.constant 0 : index
    %c0_57 = arith.constant 0 : index
    %92 = vector.load %arg4[%c3_55, %c0_56, %c0_57] : memref<25x32x128xf32, #tpu.memory_space<vmem>>, vector<1x32x128xf32>
    %93 = vector.shape_cast %92 : vector<1x32x128xf32> to vector<32x128xf32>
    %cst_58 = arith.constant dense<0.000000e+00> : vector<32x128xf32>
    %94 = tpu.matmul %91, %93, %cst_58 {dimension_numbers = #tpu.dot_dimension_numbers<[1], [0], [0], [1], [0, 0, 1, 1], [], []>} : vector<32x32xf32>, vector<32x128xf32>, vector<32x128xf32> -> vector<32x128xf32>
    %95 = arith.addf %89, %94 : vector<32x128xf32>
    %c0_59 = arith.constant 0 : index
    %c2_60 = arith.constant 2 : index
    %c0_61 = arith.constant 0 : index
    %96 = vector.load %arg11[%c0_59, %c2_60, %c0_61] : memref<4x64x128xf32, #tpu.memory_space<vmem>>, vector<1x32x32xf32>
    %97 = vector.shape_cast %96 : vector<1x32x32xf32> to vector<32x32xf32>
    %c4 = arith.constant 4 : index
    %c0_62 = arith.constant 0 : index
    %c0_63 = arith.constant 0 : index
    %98 = vector.load %arg4[%c4, %c0_62, %c0_63] : memref<25x32x128xf32, #tpu.memory_space<vmem>>, vector<1x32x128xf32>
    %99 = vector.shape_cast %98 : vector<1x32x128xf32> to vector<32x128xf32>
    %cst_64 = arith.constant dense<0.000000e+00> : vector<32x128xf32>
    %100 = tpu.matmul %97, %99, %cst_64 {dimension_numbers = #tpu.dot_dimension_numbers<[1], [0], [0], [1], [0, 0, 1, 1], [], []>} : vector<32x32xf32>, vector<32x128xf32>, vector<32x128xf32> -> vector<32x128xf32>
    %101 = arith.addf %95, %100 : vector<32x128xf32>
    %c2_65 = arith.constant 2 : index
    %c0_66 = arith.constant 0 : index
    %c0_67 = arith.constant 0 : index
    %102 = vector.load %arg11[%c2_65, %c0_66, %c0_67] : memref<4x64x128xf32, #tpu.memory_space<vmem>>, vector<1x32x32xf32>
    %103 = vector.shape_cast %102 : vector<1x32x32xf32> to vector<32x32xf32>
    %c5 = arith.constant 5 : index
    %c0_68 = arith.constant 0 : index
    %c0_69 = arith.constant 0 : index
    %104 = vector.load %arg4[%c5, %c0_68, %c0_69] : memref<25x32x128xf32, #tpu.memory_space<vmem>>, vector<1x32x128xf32>
    %105 = vector.shape_cast %104 : vector<1x32x128xf32> to vector<32x128xf32>
    %cst_70 = arith.constant dense<0.000000e+00> : vector<32x128xf32>
    %106 = tpu.matmul %103, %105, %cst_70 {dimension_numbers = #tpu.dot_dimension_numbers<[1], [0], [0], [1], [0, 0, 1, 1], [], []>} : vector<32x32xf32>, vector<32x128xf32>, vector<32x128xf32> -> vector<32x128xf32>
    %107 = arith.addf %101, %106 : vector<32x128xf32>
    %c3_71 = arith.constant 3 : index
    %c0_72 = arith.constant 0 : index
    %c0_73 = arith.constant 0 : index
    %108 = vector.load %arg11[%c3_71, %c0_72, %c0_73] : memref<4x64x128xf32, #tpu.memory_space<vmem>>, vector<1x32x32xf32>
    %109 = vector.shape_cast %108 : vector<1x32x32xf32> to vector<32x32xf32>
    %c6 = arith.constant 6 : index
    %c0_74 = arith.constant 0 : index
    %c0_75 = arith.constant 0 : index
    %110 = vector.load %arg4[%c6, %c0_74, %c0_75] : memref<25x32x128xf32, #tpu.memory_space<vmem>>, vector<1x32x128xf32>
    %111 = vector.shape_cast %110 : vector<1x32x128xf32> to vector<32x128xf32>
    %cst_76 = arith.constant dense<0.000000e+00> : vector<32x128xf32>
    %112 = tpu.matmul %109, %111, %cst_76 {dimension_numbers = #tpu.dot_dimension_numbers<[1], [0], [0], [1], [0, 0, 1, 1], [], []>} : vector<32x32xf32>, vector<32x128xf32>, vector<32x128xf32> -> vector<32x128xf32>
    %113 = arith.addf %107, %112 : vector<32x128xf32>
    %c2_77 = arith.constant 2 : index
    %c1_78 = arith.constant 1 : index
    %c0_79 = arith.constant 0 : index
    %114 = vector.load %arg11[%c2_77, %c1_78, %c0_79] : memref<4x64x128xf32, #tpu.memory_space<vmem>>, vector<1x32x32xf32>
    %115 = vector.shape_cast %114 : vector<1x32x32xf32> to vector<32x32xf32>
    %c7 = arith.constant 7 : index
    %c0_80 = arith.constant 0 : index
    %c0_81 = arith.constant 0 : index
    %116 = vector.load %arg4[%c7, %c0_80, %c0_81] : memref<25x32x128xf32, #tpu.memory_space<vmem>>, vector<1x32x128xf32>
    %117 = vector.shape_cast %116 : vector<1x32x128xf32> to vector<32x128xf32>
    %cst_82 = arith.constant dense<0.000000e+00> : vector<32x128xf32>
    %118 = tpu.matmul %115, %117, %cst_82 {dimension_numbers = #tpu.dot_dimension_numbers<[1], [0], [0], [1], [0, 0, 1, 1], [], []>} : vector<32x32xf32>, vector<32x128xf32>, vector<32x128xf32> -> vector<32x128xf32>
    %119 = arith.addf %113, %118 : vector<32x128xf32>
    %c3_83 = arith.constant 3 : index
    %c1_84 = arith.constant 1 : index
    %c0_85 = arith.constant 0 : index
    %120 = vector.load %arg11[%c3_83, %c1_84, %c0_85] : memref<4x64x128xf32, #tpu.memory_space<vmem>>, vector<1x32x32xf32>
    %121 = vector.shape_cast %120 : vector<1x32x32xf32> to vector<32x32xf32>
    %c8 = arith.constant 8 : index
    %c0_86 = arith.constant 0 : index
    %c0_87 = arith.constant 0 : index
    %122 = vector.load %arg4[%c8, %c0_86, %c0_87] : memref<25x32x128xf32, #tpu.memory_space<vmem>>, vector<1x32x128xf32>
    %123 = vector.shape_cast %122 : vector<1x32x128xf32> to vector<32x128xf32>
    %cst_88 = arith.constant dense<0.000000e+00> : vector<32x128xf32>
    %124 = tpu.matmul %121, %123, %cst_88 {dimension_numbers = #tpu.dot_dimension_numbers<[1], [0], [0], [1], [0, 0, 1, 1], [], []>} : vector<32x32xf32>, vector<32x128xf32>, vector<32x128xf32> -> vector<32x128xf32>
    %125 = arith.addf %119, %124 : vector<32x128xf32>
    %c2_89 = arith.constant 2 : index
    %c2_90 = arith.constant 2 : index
    %c0_91 = arith.constant 0 : index
    %126 = vector.load %arg11[%c2_89, %c2_90, %c0_91] : memref<4x64x128xf32, #tpu.memory_space<vmem>>, vector<1x32x32xf32>
    %127 = vector.shape_cast %126 : vector<1x32x32xf32> to vector<32x32xf32>
    %c9 = arith.constant 9 : index
    %c0_92 = arith.constant 0 : index
    %c0_93 = arith.constant 0 : index
    %128 = vector.load %arg4[%c9, %c0_92, %c0_93] : memref<25x32x128xf32, #tpu.memory_space<vmem>>, vector<1x32x128xf32>
    %129 = vector.shape_cast %128 : vector<1x32x128xf32> to vector<32x128xf32>
    %cst_94 = arith.constant dense<0.000000e+00> : vector<32x128xf32>
    %130 = tpu.matmul %127, %129, %cst_94 {dimension_numbers = #tpu.dot_dimension_numbers<[1], [0], [0], [1], [0, 0, 1, 1], [], []>} : vector<32x32xf32>, vector<32x128xf32>, vector<32x128xf32> -> vector<32x128xf32>
    %131 = arith.addf %125, %130 : vector<32x128xf32>
    %c0_95 = arith.constant 0 : index
    %c8_96 = arith.constant 8 : index
    %c0_97 = arith.constant 0 : index
    %132 = vector.load %arg11[%c0_95, %c8_96, %c0_97] : memref<4x64x128xf32, #tpu.memory_space<vmem>>, vector<1x32x32xf32>
    %133 = vector.shape_cast %132 : vector<1x32x32xf32> to vector<32x32xf32>
    %c10 = arith.constant 10 : index
    %c0_98 = arith.constant 0 : index
    %c0_99 = arith.constant 0 : index
    %134 = vector.load %arg4[%c10, %c0_98, %c0_99] : memref<25x32x128xf32, #tpu.memory_space<vmem>>, vector<1x32x128xf32>
    %135 = vector.shape_cast %134 : vector<1x32x128xf32> to vector<32x128xf32>
    %cst_100 = arith.constant dense<0.000000e+00> : vector<32x128xf32>
    %136 = tpu.matmul %133, %135, %cst_100 {dimension_numbers = #tpu.dot_dimension_numbers<[1], [0], [0], [1], [0, 0, 1, 1], [], []>} : vector<32x32xf32>, vector<32x128xf32>, vector<32x128xf32> -> vector<32x128xf32>
    %137 = arith.addf %131, %136 : vector<32x128xf32>
    %c1_101 = arith.constant 1 : index
    %c8_102 = arith.constant 8 : index
    %c0_103 = arith.constant 0 : index
    %138 = vector.load %arg11[%c1_101, %c8_102, %c0_103] : memref<4x64x128xf32, #tpu.memory_space<vmem>>, vector<1x32x32xf32>
    %139 = vector.shape_cast %138 : vector<1x32x32xf32> to vector<32x32xf32>
    %c11 = arith.constant 11 : index
    %c0_104 = arith.constant 0 : index
    %c0_105 = arith.constant 0 : index
    %140 = vector.load %arg4[%c11, %c0_104, %c0_105] : memref<25x32x128xf32, #tpu.memory_space<vmem>>, vector<1x32x128xf32>
    %141 = vector.shape_cast %140 : vector<1x32x128xf32> to vector<32x128xf32>
    %cst_106 = arith.constant dense<0.000000e+00> : vector<32x128xf32>
    %142 = tpu.matmul %139, %141, %cst_106 {dimension_numbers = #tpu.dot_dimension_numbers<[1], [0], [0], [1], [0, 0, 1, 1], [], []>} : vector<32x32xf32>, vector<32x128xf32>, vector<32x128xf32> -> vector<32x128xf32>
    %143 = arith.addf %137, %142 : vector<32x128xf32>
    %c0_107 = arith.constant 0 : index
    %c9_108 = arith.constant 9 : index
    %c0_109 = arith.constant 0 : index
    %144 = vector.load %arg11[%c0_107, %c9_108, %c0_109] : memref<4x64x128xf32, #tpu.memory_space<vmem>>, vector<1x32x32xf32>
    %145 = vector.shape_cast %144 : vector<1x32x32xf32> to vector<32x32xf32>
    %c12 = arith.constant 12 : index
    %c0_110 = arith.constant 0 : index
    %c0_111 = arith.constant 0 : index
    %146 = vector.load %arg4[%c12, %c0_110, %c0_111] : memref<25x32x128xf32, #tpu.memory_space<vmem>>, vector<1x32x128xf32>
    %147 = vector.shape_cast %146 : vector<1x32x128xf32> to vector<32x128xf32>
    %cst_112 = arith.constant dense<0.000000e+00> : vector<32x128xf32>
    %148 = tpu.matmul %145, %147, %cst_112 {dimension_numbers = #tpu.dot_dimension_numbers<[1], [0], [0], [1], [0, 0, 1, 1], [], []>} : vector<32x32xf32>, vector<32x128xf32>, vector<32x128xf32> -> vector<32x128xf32>
    %149 = arith.addf %143, %148 : vector<32x128xf32>
    %c1_113 = arith.constant 1 : index
    %c9_114 = arith.constant 9 : index
    %c0_115 = arith.constant 0 : index
    %150 = vector.load %arg11[%c1_113, %c9_114, %c0_115] : memref<4x64x128xf32, #tpu.memory_space<vmem>>, vector<1x32x32xf32>
    %151 = vector.shape_cast %150 : vector<1x32x32xf32> to vector<32x32xf32>
    %c13 = arith.constant 13 : index
    %c0_116 = arith.constant 0 : index
    %c0_117 = arith.constant 0 : index
    %152 = vector.load %arg4[%c13, %c0_116, %c0_117] : memref<25x32x128xf32, #tpu.memory_space<vmem>>, vector<1x32x128xf32>
    %153 = vector.shape_cast %152 : vector<1x32x128xf32> to vector<32x128xf32>
    %cst_118 = arith.constant dense<0.000000e+00> : vector<32x128xf32>
    %154 = tpu.matmul %151, %153, %cst_118 {dimension_numbers = #tpu.dot_dimension_numbers<[1], [0], [0], [1], [0, 0, 1, 1], [], []>} : vector<32x32xf32>, vector<32x128xf32>, vector<32x128xf32> -> vector<32x128xf32>
    %155 = arith.addf %149, %154 : vector<32x128xf32>
    %c0_119 = arith.constant 0 : index
    %c10_120 = arith.constant 10 : index
    %c0_121 = arith.constant 0 : index
    %156 = vector.load %arg11[%c0_119, %c10_120, %c0_121] : memref<4x64x128xf32, #tpu.memory_space<vmem>>, vector<1x32x32xf32>
    %157 = vector.shape_cast %156 : vector<1x32x32xf32> to vector<32x32xf32>
    %c14 = arith.constant 14 : index
    %c0_122 = arith.constant 0 : index
    %c0_123 = arith.constant 0 : index
    %158 = vector.load %arg4[%c14, %c0_122, %c0_123] : memref<25x32x128xf32, #tpu.memory_space<vmem>>, vector<1x32x128xf32>
    %159 = vector.shape_cast %158 : vector<1x32x128xf32> to vector<32x128xf32>
    %cst_124 = arith.constant dense<0.000000e+00> : vector<32x128xf32>
    %160 = tpu.matmul %157, %159, %cst_124 {dimension_numbers = #tpu.dot_dimension_numbers<[1], [0], [0], [1], [0, 0, 1, 1], [], []>} : vector<32x32xf32>, vector<32x128xf32>, vector<32x128xf32> -> vector<32x128xf32>
    %161 = arith.addf %155, %160 : vector<32x128xf32>
    %c2_125 = arith.constant 2 : index
    %c8_126 = arith.constant 8 : index
    %c0_127 = arith.constant 0 : index
    %162 = vector.load %arg11[%c2_125, %c8_126, %c0_127] : memref<4x64x128xf32, #tpu.memory_space<vmem>>, vector<1x32x32xf32>
    %163 = vector.shape_cast %162 : vector<1x32x32xf32> to vector<32x32xf32>
    %c15 = arith.constant 15 : index
    %c0_128 = arith.constant 0 : index
    %c0_129 = arith.constant 0 : index
    %164 = vector.load %arg4[%c15, %c0_128, %c0_129] : memref<25x32x128xf32, #tpu.memory_space<vmem>>, vector<1x32x128xf32>
    %165 = vector.shape_cast %164 : vector<1x32x128xf32> to vector<32x128xf32>
    %cst_130 = arith.constant dense<0.000000e+00> : vector<32x128xf32>
    %166 = tpu.matmul %163, %165, %cst_130 {dimension_numbers = #tpu.dot_dimension_numbers<[1], [0], [0], [1], [0, 0, 1, 1], [], []>} : vector<32x32xf32>, vector<32x128xf32>, vector<32x128xf32> -> vector<32x128xf32>
    %167 = arith.addf %161, %166 : vector<32x128xf32>
    %c3_131 = arith.constant 3 : index
    %c8_132 = arith.constant 8 : index
    %c0_133 = arith.constant 0 : index
    %168 = vector.load %arg11[%c3_131, %c8_132, %c0_133] : memref<4x64x128xf32, #tpu.memory_space<vmem>>, vector<1x32x32xf32>
    %169 = vector.shape_cast %168 : vector<1x32x32xf32> to vector<32x32xf32>
    %c16 = arith.constant 16 : index
    %c0_134 = arith.constant 0 : index
    %c0_135 = arith.constant 0 : index
    %170 = vector.load %arg4[%c16, %c0_134, %c0_135] : memref<25x32x128xf32, #tpu.memory_space<vmem>>, vector<1x32x128xf32>
    %171 = vector.shape_cast %170 : vector<1x32x128xf32> to vector<32x128xf32>
    %cst_136 = arith.constant dense<0.000000e+00> : vector<32x128xf32>
    %172 = tpu.matmul %169, %171, %cst_136 {dimension_numbers = #tpu.dot_dimension_numbers<[1], [0], [0], [1], [0, 0, 1, 1], [], []>} : vector<32x32xf32>, vector<32x128xf32>, vector<32x128xf32> -> vector<32x128xf32>
    %173 = arith.addf %167, %172 : vector<32x128xf32>
    %c2_137 = arith.constant 2 : index
    %c9_138 = arith.constant 9 : index
    %c0_139 = arith.constant 0 : index
    %174 = vector.load %arg11[%c2_137, %c9_138, %c0_139] : memref<4x64x128xf32, #tpu.memory_space<vmem>>, vector<1x32x32xf32>
    %175 = vector.shape_cast %174 : vector<1x32x32xf32> to vector<32x32xf32>
    %c17 = arith.constant 17 : index
    %c0_140 = arith.constant 0 : index
    %c0_141 = arith.constant 0 : index
    %176 = vector.load %arg4[%c17, %c0_140, %c0_141] : memref<25x32x128xf32, #tpu.memory_space<vmem>>, vector<1x32x128xf32>
    %177 = vector.shape_cast %176 : vector<1x32x128xf32> to vector<32x128xf32>
    %cst_142 = arith.constant dense<0.000000e+00> : vector<32x128xf32>
    %178 = tpu.matmul %175, %177, %cst_142 {dimension_numbers = #tpu.dot_dimension_numbers<[1], [0], [0], [1], [0, 0, 1, 1], [], []>} : vector<32x32xf32>, vector<32x128xf32>, vector<32x128xf32> -> vector<32x128xf32>
    %179 = arith.addf %173, %178 : vector<32x128xf32>
    %c3_143 = arith.constant 3 : index
    %c9_144 = arith.constant 9 : index
    %c0_145 = arith.constant 0 : index
    %180 = vector.load %arg11[%c3_143, %c9_144, %c0_145] : memref<4x64x128xf32, #tpu.memory_space<vmem>>, vector<1x32x32xf32>
    %181 = vector.shape_cast %180 : vector<1x32x32xf32> to vector<32x32xf32>
    %c18 = arith.constant 18 : index
    %c0_146 = arith.constant 0 : index
    %c0_147 = arith.constant 0 : index
    %182 = vector.load %arg4[%c18, %c0_146, %c0_147] : memref<25x32x128xf32, #tpu.memory_space<vmem>>, vector<1x32x128xf32>
    %183 = vector.shape_cast %182 : vector<1x32x128xf32> to vector<32x128xf32>
    %cst_148 = arith.constant dense<0.000000e+00> : vector<32x128xf32>
    %184 = tpu.matmul %181, %183, %cst_148 {dimension_numbers = #tpu.dot_dimension_numbers<[1], [0], [0], [1], [0, 0, 1, 1], [], []>} : vector<32x32xf32>, vector<32x128xf32>, vector<32x128xf32> -> vector<32x128xf32>
    %185 = arith.addf %179, %184 : vector<32x128xf32>
    %c2_149 = arith.constant 2 : index
    %c10_150 = arith.constant 10 : index
    %c0_151 = arith.constant 0 : index
    %186 = vector.load %arg11[%c2_149, %c10_150, %c0_151] : memref<4x64x128xf32, #tpu.memory_space<vmem>>, vector<1x32x32xf32>
    %187 = vector.shape_cast %186 : vector<1x32x32xf32> to vector<32x32xf32>
    %c19 = arith.constant 19 : index
    %c0_152 = arith.constant 0 : index
    %c0_153 = arith.constant 0 : index
    %188 = vector.load %arg4[%c19, %c0_152, %c0_153] : memref<25x32x128xf32, #tpu.memory_space<vmem>>, vector<1x32x128xf32>
    %189 = vector.shape_cast %188 : vector<1x32x128xf32> to vector<32x128xf32>
    %cst_154 = arith.constant dense<0.000000e+00> : vector<32x128xf32>
    %190 = tpu.matmul %187, %189, %cst_154 {dimension_numbers = #tpu.dot_dimension_numbers<[1], [0], [0], [1], [0, 0, 1, 1], [], []>} : vector<32x32xf32>, vector<32x128xf32>, vector<32x128xf32> -> vector<32x128xf32>
    %191 = arith.addf %185, %190 : vector<32x128xf32>
    %c0_155 = arith.constant 0 : index
    %c16_156 = arith.constant 16 : index
    %c0_157 = arith.constant 0 : index
    %192 = vector.load %arg11[%c0_155, %c16_156, %c0_157] : memref<4x64x128xf32, #tpu.memory_space<vmem>>, vector<1x32x32xf32>
    %193 = vector.shape_cast %192 : vector<1x32x32xf32> to vector<32x32xf32>
    %c20 = arith.constant 20 : index
    %c0_158 = arith.constant 0 : index
    %c0_159 = arith.constant 0 : index
    %194 = vector.load %arg4[%c20, %c0_158, %c0_159] : memref<25x32x128xf32, #tpu.memory_space<vmem>>, vector<1x32x128xf32>
    %195 = vector.shape_cast %194 : vector<1x32x128xf32> to vector<32x128xf32>
    %cst_160 = arith.constant dense<0.000000e+00> : vector<32x128xf32>
    %196 = tpu.matmul %193, %195, %cst_160 {dimension_numbers = #tpu.dot_dimension_numbers<[1], [0], [0], [1], [0, 0, 1, 1], [], []>} : vector<32x32xf32>, vector<32x128xf32>, vector<32x128xf32> -> vector<32x128xf32>
    %197 = arith.addf %191, %196 : vector<32x128xf32>
    %c1_161 = arith.constant 1 : index
    %c16_162 = arith.constant 16 : index
    %c0_163 = arith.constant 0 : index
    %198 = vector.load %arg11[%c1_161, %c16_162, %c0_163] : memref<4x64x128xf32, #tpu.memory_space<vmem>>, vector<1x32x32xf32>
    %199 = vector.shape_cast %198 : vector<1x32x32xf32> to vector<32x32xf32>
    %c21 = arith.constant 21 : index
    %c0_164 = arith.constant 0 : index
    %c0_165 = arith.constant 0 : index
    %200 = vector.load %arg4[%c21, %c0_164, %c0_165] : memref<25x32x128xf32, #tpu.memory_space<vmem>>, vector<1x32x128xf32>
    %201 = vector.shape_cast %200 : vector<1x32x128xf32> to vector<32x128xf32>
    %cst_166 = arith.constant dense<0.000000e+00> : vector<32x128xf32>
    %202 = tpu.matmul %199, %201, %cst_166 {dimension_numbers = #tpu.dot_dimension_numbers<[1], [0], [0], [1], [0, 0, 1, 1], [], []>} : vector<32x32xf32>, vector<32x128xf32>, vector<32x128xf32> -> vector<32x128xf32>
    %203 = arith.addf %197, %202 : vector<32x128xf32>
    %c0_167 = arith.constant 0 : index
    %c17_168 = arith.constant 17 : index
    %c0_169 = arith.constant 0 : index
    %204 = vector.load %arg11[%c0_167, %c17_168, %c0_169] : memref<4x64x128xf32, #tpu.memory_space<vmem>>, vector<1x32x32xf32>
    %205 = vector.shape_cast %204 : vector<1x32x32xf32> to vector<32x32xf32>
    %c22 = arith.constant 22 : index
    %c0_170 = arith.constant 0 : index
    %c0_171 = arith.constant 0 : index
    %206 = vector.load %arg4[%c22, %c0_170, %c0_171] : memref<25x32x128xf32, #tpu.memory_space<vmem>>, vector<1x32x128xf32>
    %207 = vector.shape_cast %206 : vector<1x32x128xf32> to vector<32x128xf32>
    %cst_172 = arith.constant dense<0.000000e+00> : vector<32x128xf32>
    %208 = tpu.matmul %205, %207, %cst_172 {dimension_numbers = #tpu.dot_dimension_numbers<[1], [0], [0], [1], [0, 0, 1, 1], [], []>} : vector<32x32xf32>, vector<32x128xf32>, vector<32x128xf32> -> vector<32x128xf32>
    %209 = arith.addf %203, %208 : vector<32x128xf32>
    %c1_173 = arith.constant 1 : index
    %c17_174 = arith.constant 17 : index
    %c0_175 = arith.constant 0 : index
    %210 = vector.load %arg11[%c1_173, %c17_174, %c0_175] : memref<4x64x128xf32, #tpu.memory_space<vmem>>, vector<1x32x32xf32>
    %211 = vector.shape_cast %210 : vector<1x32x32xf32> to vector<32x32xf32>
    %c23 = arith.constant 23 : index
    %c0_176 = arith.constant 0 : index
    %c0_177 = arith.constant 0 : index
    %212 = vector.load %arg4[%c23, %c0_176, %c0_177] : memref<25x32x128xf32, #tpu.memory_space<vmem>>, vector<1x32x128xf32>
    %213 = vector.shape_cast %212 : vector<1x32x128xf32> to vector<32x128xf32>
    %cst_178 = arith.constant dense<0.000000e+00> : vector<32x128xf32>
    %214 = tpu.matmul %211, %213, %cst_178 {dimension_numbers = #tpu.dot_dimension_numbers<[1], [0], [0], [1], [0, 0, 1, 1], [], []>} : vector<32x32xf32>, vector<32x128xf32>, vector<32x128xf32> -> vector<32x128xf32>
    %215 = arith.addf %209, %214 : vector<32x128xf32>
    %c0_179 = arith.constant 0 : index
    %c18_180 = arith.constant 18 : index
    %c0_181 = arith.constant 0 : index
    %216 = vector.load %arg11[%c0_179, %c18_180, %c0_181] : memref<4x64x128xf32, #tpu.memory_space<vmem>>, vector<1x32x32xf32>
    %217 = vector.shape_cast %216 : vector<1x32x32xf32> to vector<32x32xf32>
    %c24 = arith.constant 24 : index
    %c0_182 = arith.constant 0 : index
    %c0_183 = arith.constant 0 : index
    %218 = vector.load %arg4[%c24, %c0_182, %c0_183] : memref<25x32x128xf32, #tpu.memory_space<vmem>>, vector<1x32x128xf32>
    %219 = vector.shape_cast %218 : vector<1x32x128xf32> to vector<32x128xf32>
    %cst_184 = arith.constant dense<0.000000e+00> : vector<32x128xf32>
    %220 = tpu.matmul %217, %219, %cst_184 {dimension_numbers = #tpu.dot_dimension_numbers<[1], [0], [0], [1], [0, 0, 1, 1], [], []>} : vector<32x32xf32>, vector<32x128xf32>, vector<32x128xf32> -> vector<32x128xf32>
    %221 = arith.addf %215, %220 : vector<32x128xf32>
    %222 = vector.broadcast %70 : vector<1x128xf32> to vector<32x128xf32>
    %223 = arith.addf %221, %222 : vector<32x128xf32>
    %cst_185 = arith.constant 0.000000e+00 : f32
    %224 = vector.broadcast %cst_185 : f32 to vector<32x128xf32>
    %225 = arith.maximumf %223, %224 : vector<32x128xf32>
    %cst_186 = arith.constant 0.000000e+00 : f32
    %226 = vector.broadcast %cst_186 : f32 to vector<32x128xf32>
    %c1_187 = arith.constant 1 : index
    %c0_188 = arith.constant 0 : index
    %c0_189 = arith.constant 0 : index
    %227 = vector.load %arg11[%c1_187, %c0_188, %c0_189] : memref<4x64x128xf32, #tpu.memory_space<vmem>>, vector<1x32x32xf32>
    %228 = vector.shape_cast %227 : vector<1x32x32xf32> to vector<32x32xf32>
    %c0_190 = arith.constant 0 : index
    %c0_191 = arith.constant 0 : index
    %c0_192 = arith.constant 0 : index
    %229 = vector.load %arg4[%c0_190, %c0_191, %c0_192] : memref<25x32x128xf32, #tpu.memory_space<vmem>>, vector<1x32x128xf32>
    %230 = vector.shape_cast %229 : vector<1x32x128xf32> to vector<32x128xf32>
    %cst_193 = arith.constant dense<0.000000e+00> : vector<32x128xf32>
    %231 = tpu.matmul %228, %230, %cst_193 {dimension_numbers = #tpu.dot_dimension_numbers<[1], [0], [0], [1], [0, 0, 1, 1], [], []>} : vector<32x32xf32>, vector<32x128xf32>, vector<32x128xf32> -> vector<32x128xf32>
    %232 = arith.addf %226, %231 : vector<32x128xf32>
    %c0_194 = arith.constant 0 : index
    %c1_195 = arith.constant 1 : index
    %c0_196 = arith.constant 0 : index
    %233 = vector.load %arg11[%c0_194, %c1_195, %c0_196] : memref<4x64x128xf32, #tpu.memory_space<vmem>>, vector<1x32x32xf32>
    %234 = vector.shape_cast %233 : vector<1x32x32xf32> to vector<32x32xf32>
    %c1_197 = arith.constant 1 : index
    %c0_198 = arith.constant 0 : index
    %c0_199 = arith.constant 0 : index
    %235 = vector.load %arg4[%c1_197, %c0_198, %c0_199] : memref<25x32x128xf32, #tpu.memory_space<vmem>>, vector<1x32x128xf32>
    %236 = vector.shape_cast %235 : vector<1x32x128xf32> to vector<32x128xf32>
    %cst_200 = arith.constant dense<0.000000e+00> : vector<32x128xf32>
    %237 = tpu.matmul %234, %236, %cst_200 {dimension_numbers = #tpu.dot_dimension_numbers<[1], [0], [0], [1], [0, 0, 1, 1], [], []>} : vector<32x32xf32>, vector<32x128xf32>, vector<32x128xf32> -> vector<32x128xf32>
    %238 = arith.addf %232, %237 : vector<32x128xf32>
    %c1_201 = arith.constant 1 : index
    %c1_202 = arith.constant 1 : index
    %c0_203 = arith.constant 0 : index
    %239 = vector.load %arg11[%c1_201, %c1_202, %c0_203] : memref<4x64x128xf32, #tpu.memory_space<vmem>>, vector<1x32x32xf32>
    %240 = vector.shape_cast %239 : vector<1x32x32xf32> to vector<32x32xf32>
    %c2_204 = arith.constant 2 : index
    %c0_205 = arith.constant 0 : index
    %c0_206 = arith.constant 0 : index
    %241 = vector.load %arg4[%c2_204, %c0_205, %c0_206] : memref<25x32x128xf32, #tpu.memory_space<vmem>>, vector<1x32x128xf32>
    %242 = vector.shape_cast %241 : vector<1x32x128xf32> to vector<32x128xf32>
    %cst_207 = arith.constant dense<0.000000e+00> : vector<32x128xf32>
    %243 = tpu.matmul %240, %242, %cst_207 {dimension_numbers = #tpu.dot_dimension_numbers<[1], [0], [0], [1], [0, 0, 1, 1], [], []>} : vector<32x32xf32>, vector<32x128xf32>, vector<32x128xf32> -> vector<32x128xf32>
    %244 = arith.addf %238, %243 : vector<32x128xf32>
    %c0_208 = arith.constant 0 : index
    %c2_209 = arith.constant 2 : index
    %c0_210 = arith.constant 0 : index
    %245 = vector.load %arg11[%c0_208, %c2_209, %c0_210] : memref<4x64x128xf32, #tpu.memory_space<vmem>>, vector<1x32x32xf32>
    %246 = vector.shape_cast %245 : vector<1x32x32xf32> to vector<32x32xf32>
    %c3_211 = arith.constant 3 : index
    %c0_212 = arith.constant 0 : index
    %c0_213 = arith.constant 0 : index
    %247 = vector.load %arg4[%c3_211, %c0_212, %c0_213] : memref<25x32x128xf32, #tpu.memory_space<vmem>>, vector<1x32x128xf32>
    %248 = vector.shape_cast %247 : vector<1x32x128xf32> to vector<32x128xf32>
    %cst_214 = arith.constant dense<0.000000e+00> : vector<32x128xf32>
    %249 = tpu.matmul %246, %248, %cst_214 {dimension_numbers = #tpu.dot_dimension_numbers<[1], [0], [0], [1], [0, 0, 1, 1], [], []>} : vector<32x32xf32>, vector<32x128xf32>, vector<32x128xf32> -> vector<32x128xf32>
    %250 = arith.addf %244, %249 : vector<32x128xf32>
    %c1_215 = arith.constant 1 : index
    %c2_216 = arith.constant 2 : index
    %c0_217 = arith.constant 0 : index
    %251 = vector.load %arg11[%c1_215, %c2_216, %c0_217] : memref<4x64x128xf32, #tpu.memory_space<vmem>>, vector<1x32x32xf32>
    %252 = vector.shape_cast %251 : vector<1x32x32xf32> to vector<32x32xf32>
    %c4_218 = arith.constant 4 : index
    %c0_219 = arith.constant 0 : index
    %c0_220 = arith.constant 0 : index
    %253 = vector.load %arg4[%c4_218, %c0_219, %c0_220] : memref<25x32x128xf32, #tpu.memory_space<vmem>>, vector<1x32x128xf32>
    %254 = vector.shape_cast %253 : vector<1x32x128xf32> to vector<32x128xf32>
    %cst_221 = arith.constant dense<0.000000e+00> : vector<32x128xf32>
    %255 = tpu.matmul %252, %254, %cst_221 {dimension_numbers = #tpu.dot_dimension_numbers<[1], [0], [0], [1], [0, 0, 1, 1], [], []>} : vector<32x32xf32>, vector<32x128xf32>, vector<32x128xf32> -> vector<32x128xf32>
    %256 = arith.addf %250, %255 : vector<32x128xf32>
    %c3_222 = arith.constant 3 : index
    %c0_223 = arith.constant 0 : index
    %c0_224 = arith.constant 0 : index
    %257 = vector.load %arg11[%c3_222, %c0_223, %c0_224] : memref<4x64x128xf32, #tpu.memory_space<vmem>>, vector<1x32x32xf32>
    %258 = vector.shape_cast %257 : vector<1x32x32xf32> to vector<32x32xf32>
    %c5_225 = arith.constant 5 : index
    %c0_226 = arith.constant 0 : index
    %c0_227 = arith.constant 0 : index
    %259 = vector.load %arg4[%c5_225, %c0_226, %c0_227] : memref<25x32x128xf32, #tpu.memory_space<vmem>>, vector<1x32x128xf32>
    %260 = vector.shape_cast %259 : vector<1x32x128xf32> to vector<32x128xf32>
    %cst_228 = arith.constant dense<0.000000e+00> : vector<32x128xf32>
    %261 = tpu.matmul %258, %260, %cst_228 {dimension_numbers = #tpu.dot_dimension_numbers<[1], [0], [0], [1], [0, 0, 1, 1], [], []>} : vector<32x32xf32>, vector<32x128xf32>, vector<32x128xf32> -> vector<32x128xf32>
    %262 = arith.addf %256, %261 : vector<32x128xf32>
    %c2_229 = arith.constant 2 : index
    %c1_230 = arith.constant 1 : index
    %c0_231 = arith.constant 0 : index
    %263 = vector.load %arg11[%c2_229, %c1_230, %c0_231] : memref<4x64x128xf32, #tpu.memory_space<vmem>>, vector<1x32x32xf32>
    %264 = vector.shape_cast %263 : vector<1x32x32xf32> to vector<32x32xf32>
    %c6_232 = arith.constant 6 : index
    %c0_233 = arith.constant 0 : index
    %c0_234 = arith.constant 0 : index
    %265 = vector.load %arg4[%c6_232, %c0_233, %c0_234] : memref<25x32x128xf32, #tpu.memory_space<vmem>>, vector<1x32x128xf32>
    %266 = vector.shape_cast %265 : vector<1x32x128xf32> to vector<32x128xf32>
    %cst_235 = arith.constant dense<0.000000e+00> : vector<32x128xf32>
    %267 = tpu.matmul %264, %266, %cst_235 {dimension_numbers = #tpu.dot_dimension_numbers<[1], [0], [0], [1], [0, 0, 1, 1], [], []>} : vector<32x32xf32>, vector<32x128xf32>, vector<32x128xf32> -> vector<32x128xf32>
    %268 = arith.addf %262, %267 : vector<32x128xf32>
    %c3_236 = arith.constant 3 : index
    %c1_237 = arith.constant 1 : index
    %c0_238 = arith.constant 0 : index
    %269 = vector.load %arg11[%c3_236, %c1_237, %c0_238] : memref<4x64x128xf32, #tpu.memory_space<vmem>>, vector<1x32x32xf32>
    %270 = vector.shape_cast %269 : vector<1x32x32xf32> to vector<32x32xf32>
    %c7_239 = arith.constant 7 : index
    %c0_240 = arith.constant 0 : index
    %c0_241 = arith.constant 0 : index
    %271 = vector.load %arg4[%c7_239, %c0_240, %c0_241] : memref<25x32x128xf32, #tpu.memory_space<vmem>>, vector<1x32x128xf32>
    %272 = vector.shape_cast %271 : vector<1x32x128xf32> to vector<32x128xf32>
    %cst_242 = arith.constant dense<0.000000e+00> : vector<32x128xf32>
    %273 = tpu.matmul %270, %272, %cst_242 {dimension_numbers = #tpu.dot_dimension_numbers<[1], [0], [0], [1], [0, 0, 1, 1], [], []>} : vector<32x32xf32>, vector<32x128xf32>, vector<32x128xf32> -> vector<32x128xf32>
    %274 = arith.addf %268, %273 : vector<32x128xf32>
    %c2_243 = arith.constant 2 : index
    %c2_244 = arith.constant 2 : index
    %c0_245 = arith.constant 0 : index
    %275 = vector.load %arg11[%c2_243, %c2_244, %c0_245] : memref<4x64x128xf32, #tpu.memory_space<vmem>>, vector<1x32x32xf32>
    %276 = vector.shape_cast %275 : vector<1x32x32xf32> to vector<32x32xf32>
    %c8_246 = arith.constant 8 : index
    %c0_247 = arith.constant 0 : index
    %c0_248 = arith.constant 0 : index
    %277 = vector.load %arg4[%c8_246, %c0_247, %c0_248] : memref<25x32x128xf32, #tpu.memory_space<vmem>>, vector<1x32x128xf32>
    %278 = vector.shape_cast %277 : vector<1x32x128xf32> to vector<32x128xf32>
    %cst_249 = arith.constant dense<0.000000e+00> : vector<32x128xf32>
    %279 = tpu.matmul %276, %278, %cst_249 {dimension_numbers = #tpu.dot_dimension_numbers<[1], [0], [0], [1], [0, 0, 1, 1], [], []>} : vector<32x32xf32>, vector<32x128xf32>, vector<32x128xf32> -> vector<32x128xf32>
    %280 = arith.addf %274, %279 : vector<32x128xf32>
    %c3_250 = arith.constant 3 : index
    %c2_251 = arith.constant 2 : index
    %c0_252 = arith.constant 0 : index
    %281 = vector.load %arg11[%c3_250, %c2_251, %c0_252] : memref<4x64x128xf32, #tpu.memory_space<vmem>>, vector<1x32x32xf32>
    %282 = vector.shape_cast %281 : vector<1x32x32xf32> to vector<32x32xf32>
    %c9_253 = arith.constant 9 : index
    %c0_254 = arith.constant 0 : index
    %c0_255 = arith.constant 0 : index
    %283 = vector.load %arg4[%c9_253, %c0_254, %c0_255] : memref<25x32x128xf32, #tpu.memory_space<vmem>>, vector<1x32x128xf32>
    %284 = vector.shape_cast %283 : vector<1x32x128xf32> to vector<32x128xf32>
    %cst_256 = arith.constant dense<0.000000e+00> : vector<32x128xf32>
    %285 = tpu.matmul %282, %284, %cst_256 {dimension_numbers = #tpu.dot_dimension_numbers<[1], [0], [0], [1], [0, 0, 1, 1], [], []>} : vector<32x32xf32>, vector<32x128xf32>, vector<32x128xf32> -> vector<32x128xf32>
    %286 = arith.addf %280, %285 : vector<32x128xf32>
    %c1_257 = arith.constant 1 : index
    %c8_258 = arith.constant 8 : index
    %c0_259 = arith.constant 0 : index
    %287 = vector.load %arg11[%c1_257, %c8_258, %c0_259] : memref<4x64x128xf32, #tpu.memory_space<vmem>>, vector<1x32x32xf32>
    %288 = vector.shape_cast %287 : vector<1x32x32xf32> to vector<32x32xf32>
    %c10_260 = arith.constant 10 : index
    %c0_261 = arith.constant 0 : index
    %c0_262 = arith.constant 0 : index
    %289 = vector.load %arg4[%c10_260, %c0_261, %c0_262] : memref<25x32x128xf32, #tpu.memory_space<vmem>>, vector<1x32x128xf32>
    %290 = vector.shape_cast %289 : vector<1x32x128xf32> to vector<32x128xf32>
    %cst_263 = arith.constant dense<0.000000e+00> : vector<32x128xf32>
    %291 = tpu.matmul %288, %290, %cst_263 {dimension_numbers = #tpu.dot_dimension_numbers<[1], [0], [0], [1], [0, 0, 1, 1], [], []>} : vector<32x32xf32>, vector<32x128xf32>, vector<32x128xf32> -> vector<32x128xf32>
    %292 = arith.addf %286, %291 : vector<32x128xf32>
    %c0_264 = arith.constant 0 : index
    %c9_265 = arith.constant 9 : index
    %c0_266 = arith.constant 0 : index
    %293 = vector.load %arg11[%c0_264, %c9_265, %c0_266] : memref<4x64x128xf32, #tpu.memory_space<vmem>>, vector<1x32x32xf32>
    %294 = vector.shape_cast %293 : vector<1x32x32xf32> to vector<32x32xf32>
    %c11_267 = arith.constant 11 : index
    %c0_268 = arith.constant 0 : index
    %c0_269 = arith.constant 0 : index
    %295 = vector.load %arg4[%c11_267, %c0_268, %c0_269] : memref<25x32x128xf32, #tpu.memory_space<vmem>>, vector<1x32x128xf32>
    %296 = vector.shape_cast %295 : vector<1x32x128xf32> to vector<32x128xf32>
    %cst_270 = arith.constant dense<0.000000e+00> : vector<32x128xf32>
    %297 = tpu.matmul %294, %296, %cst_270 {dimension_numbers = #tpu.dot_dimension_numbers<[1], [0], [0], [1], [0, 0, 1, 1], [], []>} : vector<32x32xf32>, vector<32x128xf32>, vector<32x128xf32> -> vector<32x128xf32>
    %298 = arith.addf %292, %297 : vector<32x128xf32>
    %c1_271 = arith.constant 1 : index
    %c9_272 = arith.constant 9 : index
    %c0_273 = arith.constant 0 : index
    %299 = vector.load %arg11[%c1_271, %c9_272, %c0_273] : memref<4x64x128xf32, #tpu.memory_space<vmem>>, vector<1x32x32xf32>
    %300 = vector.shape_cast %299 : vector<1x32x32xf32> to vector<32x32xf32>
    %c12_274 = arith.constant 12 : index
    %c0_275 = arith.constant 0 : index
    %c0_276 = arith.constant 0 : index
    %301 = vector.load %arg4[%c12_274, %c0_275, %c0_276] : memref<25x32x128xf32, #tpu.memory_space<vmem>>, vector<1x32x128xf32>
    %302 = vector.shape_cast %301 : vector<1x32x128xf32> to vector<32x128xf32>
    %cst_277 = arith.constant dense<0.000000e+00> : vector<32x128xf32>
    %303 = tpu.matmul %300, %302, %cst_277 {dimension_numbers = #tpu.dot_dimension_numbers<[1], [0], [0], [1], [0, 0, 1, 1], [], []>} : vector<32x32xf32>, vector<32x128xf32>, vector<32x128xf32> -> vector<32x128xf32>
    %304 = arith.addf %298, %303 : vector<32x128xf32>
    %c0_278 = arith.constant 0 : index
    %c10_279 = arith.constant 10 : index
    %c0_280 = arith.constant 0 : index
    %305 = vector.load %arg11[%c0_278, %c10_279, %c0_280] : memref<4x64x128xf32, #tpu.memory_space<vmem>>, vector<1x32x32xf32>
    %306 = vector.shape_cast %305 : vector<1x32x32xf32> to vector<32x32xf32>
    %c13_281 = arith.constant 13 : index
    %c0_282 = arith.constant 0 : index
    %c0_283 = arith.constant 0 : index
    %307 = vector.load %arg4[%c13_281, %c0_282, %c0_283] : memref<25x32x128xf32, #tpu.memory_space<vmem>>, vector<1x32x128xf32>
    %308 = vector.shape_cast %307 : vector<1x32x128xf32> to vector<32x128xf32>
    %cst_284 = arith.constant dense<0.000000e+00> : vector<32x128xf32>
    %309 = tpu.matmul %306, %308, %cst_284 {dimension_numbers = #tpu.dot_dimension_numbers<[1], [0], [0], [1], [0, 0, 1, 1], [], []>} : vector<32x32xf32>, vector<32x128xf32>, vector<32x128xf32> -> vector<32x128xf32>
    %310 = arith.addf %304, %309 : vector<32x128xf32>
    %c1_285 = arith.constant 1 : index
    %c10_286 = arith.constant 10 : index
    %c0_287 = arith.constant 0 : index
    %311 = vector.load %arg11[%c1_285, %c10_286, %c0_287] : memref<4x64x128xf32, #tpu.memory_space<vmem>>, vector<1x32x32xf32>
    %312 = vector.shape_cast %311 : vector<1x32x32xf32> to vector<32x32xf32>
    %c14_288 = arith.constant 14 : index
    %c0_289 = arith.constant 0 : index
    %c0_290 = arith.constant 0 : index
    %313 = vector.load %arg4[%c14_288, %c0_289, %c0_290] : memref<25x32x128xf32, #tpu.memory_space<vmem>>, vector<1x32x128xf32>
    %314 = vector.shape_cast %313 : vector<1x32x128xf32> to vector<32x128xf32>
    %cst_291 = arith.constant dense<0.000000e+00> : vector<32x128xf32>
    %315 = tpu.matmul %312, %314, %cst_291 {dimension_numbers = #tpu.dot_dimension_numbers<[1], [0], [0], [1], [0, 0, 1, 1], [], []>} : vector<32x32xf32>, vector<32x128xf32>, vector<32x128xf32> -> vector<32x128xf32>
    %316 = arith.addf %310, %315 : vector<32x128xf32>
    %c3_292 = arith.constant 3 : index
    %c8_293 = arith.constant 8 : index
    %c0_294 = arith.constant 0 : index
    %317 = vector.load %arg11[%c3_292, %c8_293, %c0_294] : memref<4x64x128xf32, #tpu.memory_space<vmem>>, vector<1x32x32xf32>
    %318 = vector.shape_cast %317 : vector<1x32x32xf32> to vector<32x32xf32>
    %c15_295 = arith.constant 15 : index
    %c0_296 = arith.constant 0 : index
    %c0_297 = arith.constant 0 : index
    %319 = vector.load %arg4[%c15_295, %c0_296, %c0_297] : memref<25x32x128xf32, #tpu.memory_space<vmem>>, vector<1x32x128xf32>
    %320 = vector.shape_cast %319 : vector<1x32x128xf32> to vector<32x128xf32>
    %cst_298 = arith.constant dense<0.000000e+00> : vector<32x128xf32>
    %321 = tpu.matmul %318, %320, %cst_298 {dimension_numbers = #tpu.dot_dimension_numbers<[1], [0], [0], [1], [0, 0, 1, 1], [], []>} : vector<32x32xf32>, vector<32x128xf32>, vector<32x128xf32> -> vector<32x128xf32>
    %322 = arith.addf %316, %321 : vector<32x128xf32>
    %c2_299 = arith.constant 2 : index
    %c9_300 = arith.constant 9 : index
    %c0_301 = arith.constant 0 : index
    %323 = vector.load %arg11[%c2_299, %c9_300, %c0_301] : memref<4x64x128xf32, #tpu.memory_space<vmem>>, vector<1x32x32xf32>
    %324 = vector.shape_cast %323 : vector<1x32x32xf32> to vector<32x32xf32>
    %c16_302 = arith.constant 16 : index
    %c0_303 = arith.constant 0 : index
    %c0_304 = arith.constant 0 : index
    %325 = vector.load %arg4[%c16_302, %c0_303, %c0_304] : memref<25x32x128xf32, #tpu.memory_space<vmem>>, vector<1x32x128xf32>
    %326 = vector.shape_cast %325 : vector<1x32x128xf32> to vector<32x128xf32>
    %cst_305 = arith.constant dense<0.000000e+00> : vector<32x128xf32>
    %327 = tpu.matmul %324, %326, %cst_305 {dimension_numbers = #tpu.dot_dimension_numbers<[1], [0], [0], [1], [0, 0, 1, 1], [], []>} : vector<32x32xf32>, vector<32x128xf32>, vector<32x128xf32> -> vector<32x128xf32>
    %328 = arith.addf %322, %327 : vector<32x128xf32>
    %c3_306 = arith.constant 3 : index
    %c9_307 = arith.constant 9 : index
    %c0_308 = arith.constant 0 : index
    %329 = vector.load %arg11[%c3_306, %c9_307, %c0_308] : memref<4x64x128xf32, #tpu.memory_space<vmem>>, vector<1x32x32xf32>
    %330 = vector.shape_cast %329 : vector<1x32x32xf32> to vector<32x32xf32>
    %c17_309 = arith.constant 17 : index
    %c0_310 = arith.constant 0 : index
    %c0_311 = arith.constant 0 : index
    %331 = vector.load %arg4[%c17_309, %c0_310, %c0_311] : memref<25x32x128xf32, #tpu.memory_space<vmem>>, vector<1x32x128xf32>
    %332 = vector.shape_cast %331 : vector<1x32x128xf32> to vector<32x128xf32>
    %cst_312 = arith.constant dense<0.000000e+00> : vector<32x128xf32>
    %333 = tpu.matmul %330, %332, %cst_312 {dimension_numbers = #tpu.dot_dimension_numbers<[1], [0], [0], [1], [0, 0, 1, 1], [], []>} : vector<32x32xf32>, vector<32x128xf32>, vector<32x128xf32> -> vector<32x128xf32>
    %334 = arith.addf %328, %333 : vector<32x128xf32>
    %c2_313 = arith.constant 2 : index
    %c10_314 = arith.constant 10 : index
    %c0_315 = arith.constant 0 : index
    %335 = vector.load %arg11[%c2_313, %c10_314, %c0_315] : memref<4x64x128xf32, #tpu.memory_space<vmem>>, vector<1x32x32xf32>
    %336 = vector.shape_cast %335 : vector<1x32x32xf32> to vector<32x32xf32>
    %c18_316 = arith.constant 18 : index
    %c0_317 = arith.constant 0 : index
    %c0_318 = arith.constant 0 : index
    %337 = vector.load %arg4[%c18_316, %c0_317, %c0_318] : memref<25x32x128xf32, #tpu.memory_space<vmem>>, vector<1x32x128xf32>
    %338 = vector.shape_cast %337 : vector<1x32x128xf32> to vector<32x128xf32>
    %cst_319 = arith.constant dense<0.000000e+00> : vector<32x128xf32>
    %339 = tpu.matmul %336, %338, %cst_319 {dimension_numbers = #tpu.dot_dimension_numbers<[1], [0], [0], [1], [0, 0, 1, 1], [], []>} : vector<32x32xf32>, vector<32x128xf32>, vector<32x128xf32> -> vector<32x128xf32>
    %340 = arith.addf %334, %339 : vector<32x128xf32>
    %c3_320 = arith.constant 3 : index
    %c10_321 = arith.constant 10 : index
    %c0_322 = arith.constant 0 : index
    %341 = vector.load %arg11[%c3_320, %c10_321, %c0_322] : memref<4x64x128xf32, #tpu.memory_space<vmem>>, vector<1x32x32xf32>
    %342 = vector.shape_cast %341 : vector<1x32x32xf32> to vector<32x32xf32>
    %c19_323 = arith.constant 19 : index
    %c0_324 = arith.constant 0 : index
    %c0_325 = arith.constant 0 : index
    %343 = vector.load %arg4[%c19_323, %c0_324, %c0_325] : memref<25x32x128xf32, #tpu.memory_space<vmem>>, vector<1x32x128xf32>
    %344 = vector.shape_cast %343 : vector<1x32x128xf32> to vector<32x128xf32>
    %cst_326 = arith.constant dense<0.000000e+00> : vector<32x128xf32>
    %345 = tpu.matmul %342, %344, %cst_326 {dimension_numbers = #tpu.dot_dimension_numbers<[1], [0], [0], [1], [0, 0, 1, 1], [], []>} : vector<32x32xf32>, vector<32x128xf32>, vector<32x128xf32> -> vector<32x128xf32>
    %346 = arith.addf %340, %345 : vector<32x128xf32>
    %c1_327 = arith.constant 1 : index
    %c16_328 = arith.constant 16 : index
    %c0_329 = arith.constant 0 : index
    %347 = vector.load %arg11[%c1_327, %c16_328, %c0_329] : memref<4x64x128xf32, #tpu.memory_space<vmem>>, vector<1x32x32xf32>
    %348 = vector.shape_cast %347 : vector<1x32x32xf32> to vector<32x32xf32>
    %c20_330 = arith.constant 20 : index
    %c0_331 = arith.constant 0 : index
    %c0_332 = arith.constant 0 : index
    %349 = vector.load %arg4[%c20_330, %c0_331, %c0_332] : memref<25x32x128xf32, #tpu.memory_space<vmem>>, vector<1x32x128xf32>
    %350 = vector.shape_cast %349 : vector<1x32x128xf32> to vector<32x128xf32>
    %cst_333 = arith.constant dense<0.000000e+00> : vector<32x128xf32>
    %351 = tpu.matmul %348, %350, %cst_333 {dimension_numbers = #tpu.dot_dimension_numbers<[1], [0], [0], [1], [0, 0, 1, 1], [], []>} : vector<32x32xf32>, vector<32x128xf32>, vector<32x128xf32> -> vector<32x128xf32>
    %352 = arith.addf %346, %351 : vector<32x128xf32>
    %c0_334 = arith.constant 0 : index
    %c17_335 = arith.constant 17 : index
    %c0_336 = arith.constant 0 : index
    %353 = vector.load %arg11[%c0_334, %c17_335, %c0_336] : memref<4x64x128xf32, #tpu.memory_space<vmem>>, vector<1x32x32xf32>
    %354 = vector.shape_cast %353 : vector<1x32x32xf32> to vector<32x32xf32>
    %c21_337 = arith.constant 21 : index
    %c0_338 = arith.constant 0 : index
    %c0_339 = arith.constant 0 : index
    %355 = vector.load %arg4[%c21_337, %c0_338, %c0_339] : memref<25x32x128xf32, #tpu.memory_space<vmem>>, vector<1x32x128xf32>
    %356 = vector.shape_cast %355 : vector<1x32x128xf32> to vector<32x128xf32>
    %cst_340 = arith.constant dense<0.000000e+00> : vector<32x128xf32>
    %357 = tpu.matmul %354, %356, %cst_340 {dimension_numbers = #tpu.dot_dimension_numbers<[1], [0], [0], [1], [0, 0, 1, 1], [], []>} : vector<32x32xf32>, vector<32x128xf32>, vector<32x128xf32> -> vector<32x128xf32>
    %358 = arith.addf %352, %357 : vector<32x128xf32>
    %c1_341 = arith.constant 1 : index
    %c17_342 = arith.constant 17 : index
    %c0_343 = arith.constant 0 : index
    %359 = vector.load %arg11[%c1_341, %c17_342, %c0_343] : memref<4x64x128xf32, #tpu.memory_space<vmem>>, vector<1x32x32xf32>
    %360 = vector.shape_cast %359 : vector<1x32x32xf32> to vector<32x32xf32>
    %c22_344 = arith.constant 22 : index
    %c0_345 = arith.constant 0 : index
    %c0_346 = arith.constant 0 : index
    %361 = vector.load %arg4[%c22_344, %c0_345, %c0_346] : memref<25x32x128xf32, #tpu.memory_space<vmem>>, vector<1x32x128xf32>
    %362 = vector.shape_cast %361 : vector<1x32x128xf32> to vector<32x128xf32>
    %cst_347 = arith.constant dense<0.000000e+00> : vector<32x128xf32>
    %363 = tpu.matmul %360, %362, %cst_347 {dimension_numbers = #tpu.dot_dimension_numbers<[1], [0], [0], [1], [0, 0, 1, 1], [], []>} : vector<32x32xf32>, vector<32x128xf32>, vector<32x128xf32> -> vector<32x128xf32>
    %364 = arith.addf %358, %363 : vector<32x128xf32>
    %c0_348 = arith.constant 0 : index
    %c18_349 = arith.constant 18 : index
    %c0_350 = arith.constant 0 : index
    %365 = vector.load %arg11[%c0_348, %c18_349, %c0_350] : memref<4x64x128xf32, #tpu.memory_space<vmem>>, vector<1x32x32xf32>
    %366 = vector.shape_cast %365 : vector<1x32x32xf32> to vector<32x32xf32>
    %c23_351 = arith.constant 23 : index
    %c0_352 = arith.constant 0 : index
    %c0_353 = arith.constant 0 : index
    %367 = vector.load %arg4[%c23_351, %c0_352, %c0_353] : memref<25x32x128xf32, #tpu.memory_space<vmem>>, vector<1x32x128xf32>
    %368 = vector.shape_cast %367 : vector<1x32x128xf32> to vector<32x128xf32>
    %cst_354 = arith.constant dense<0.000000e+00> : vector<32x128xf32>
    %369 = tpu.matmul %366, %368, %cst_354 {dimension_numbers = #tpu.dot_dimension_numbers<[1], [0], [0], [1], [0, 0, 1, 1], [], []>} : vector<32x32xf32>, vector<32x128xf32>, vector<32x128xf32> -> vector<32x128xf32>
    %370 = arith.addf %364, %369 : vector<32x128xf32>
    %c1_355 = arith.constant 1 : index
    %c18_356 = arith.constant 18 : index
    %c0_357 = arith.constant 0 : index
    %371 = vector.load %arg11[%c1_355, %c18_356, %c0_357] : memref<4x64x128xf32, #tpu.memory_space<vmem>>, vector<1x32x32xf32>
    %372 = vector.shape_cast %371 : vector<1x32x32xf32> to vector<32x32xf32>
    %c24_358 = arith.constant 24 : index
    %c0_359 = arith.constant 0 : index
    %c0_360 = arith.constant 0 : index
    %373 = vector.load %arg4[%c24_358, %c0_359, %c0_360] : memref<25x32x128xf32, #tpu.memory_space<vmem>>, vector<1x32x128xf32>
    %374 = vector.shape_cast %373 : vector<1x32x128xf32> to vector<32x128xf32>
    %cst_361 = arith.constant dense<0.000000e+00> : vector<32x128xf32>
    %375 = tpu.matmul %372, %374, %cst_361 {dimension_numbers = #tpu.dot_dimension_numbers<[1], [0], [0], [1], [0, 0, 1, 1], [], []>} : vector<32x32xf32>, vector<32x128xf32>, vector<32x128xf32> -> vector<32x128xf32>
    %376 = arith.addf %370, %375 : vector<32x128xf32>
    %377 = vector.broadcast %70 : vector<1x128xf32> to vector<32x128xf32>
    %378 = arith.addf %376, %377 : vector<32x128xf32>
    %cst_362 = arith.constant 0.000000e+00 : f32
    %379 = vector.broadcast %cst_362 : f32 to vector<32x128xf32>
    %380 = arith.maximumf %378, %379 : vector<32x128xf32>
    %381 = arith.maximumf %225, %380 : vector<32x128xf32>
    %cst_363 = arith.constant 0.000000e+00 : f32
    %382 = vector.broadcast %cst_363 : f32 to vector<32x128xf32>
    %c2_364 = arith.constant 2 : index
    %c0_365 = arith.constant 0 : index
    %c0_366 = arith.constant 0 : index
    %383 = vector.load %arg11[%c2_364, %c0_365, %c0_366] : memref<4x64x128xf32, #tpu.memory_space<vmem>>, vector<1x32x32xf32>
    %384 = vector.shape_cast %383 : vector<1x32x32xf32> to vector<32x32xf32>
    %c0_367 = arith.constant 0 : index
    %c0_368 = arith.constant 0 : index
    %c0_369 = arith.constant 0 : index
    %385 = vector.load %arg4[%c0_367, %c0_368, %c0_369] : memref<25x32x128xf32, #tpu.memory_space<vmem>>, vector<1x32x128xf32>
    %386 = vector.shape_cast %385 : vector<1x32x128xf32> to vector<32x128xf32>
    %cst_370 = arith.constant dense<0.000000e+00> : vector<32x128xf32>
    %387 = tpu.matmul %384, %386, %cst_370 {dimension_numbers = #tpu.dot_dimension_numbers<[1], [0], [0], [1], [0, 0, 1, 1], [], []>} : vector<32x32xf32>, vector<32x128xf32>, vector<32x128xf32> -> vector<32x128xf32>
    %388 = arith.addf %382, %387 : vector<32x128xf32>
    %c3_371 = arith.constant 3 : index
    %c0_372 = arith.constant 0 : index
    %c0_373 = arith.constant 0 : index
    %389 = vector.load %arg11[%c3_371, %c0_372, %c0_373] : memref<4x64x128xf32, #tpu.memory_space<vmem>>, vector<1x32x32xf32>
    %390 = vector.shape_cast %389 : vector<1x32x32xf32> to vector<32x32xf32>
    %c1_374 = arith.constant 1 : index
    %c0_375 = arith.constant 0 : index
    %c0_376 = arith.constant 0 : index
    %391 = vector.load %arg4[%c1_374, %c0_375, %c0_376] : memref<25x32x128xf32, #tpu.memory_space<vmem>>, vector<1x32x128xf32>
    %392 = vector.shape_cast %391 : vector<1x32x128xf32> to vector<32x128xf32>
    %cst_377 = arith.constant dense<0.000000e+00> : vector<32x128xf32>
    %393 = tpu.matmul %390, %392, %cst_377 {dimension_numbers = #tpu.dot_dimension_numbers<[1], [0], [0], [1], [0, 0, 1, 1], [], []>} : vector<32x32xf32>, vector<32x128xf32>, vector<32x128xf32> -> vector<32x128xf32>
    %394 = arith.addf %388, %393 : vector<32x128xf32>
    %c2_378 = arith.constant 2 : index
    %c1_379 = arith.constant 1 : index
    %c0_380 = arith.constant 0 : index
    %395 = vector.load %arg11[%c2_378, %c1_379, %c0_380] : memref<4x64x128xf32, #tpu.memory_space<vmem>>, vector<1x32x32xf32>
    %396 = vector.shape_cast %395 : vector<1x32x32xf32> to vector<32x32xf32>
    %c2_381 = arith.constant 2 : index
    %c0_382 = arith.constant 0 : index
    %c0_383 = arith.constant 0 : index
    %397 = vector.load %arg4[%c2_381, %c0_382, %c0_383] : memref<25x32x128xf32, #tpu.memory_space<vmem>>, vector<1x32x128xf32>
    %398 = vector.shape_cast %397 : vector<1x32x128xf32> to vector<32x128xf32>
    %cst_384 = arith.constant dense<0.000000e+00> : vector<32x128xf32>
    %399 = tpu.matmul %396, %398, %cst_384 {dimension_numbers = #tpu.dot_dimension_numbers<[1], [0], [0], [1], [0, 0, 1, 1], [], []>} : vector<32x32xf32>, vector<32x128xf32>, vector<32x128xf32> -> vector<32x128xf32>
    %400 = arith.addf %394, %399 : vector<32x128xf32>
    %c3_385 = arith.constant 3 : index
    %c1_386 = arith.constant 1 : index
    %c0_387 = arith.constant 0 : index
    %401 = vector.load %arg11[%c3_385, %c1_386, %c0_387] : memref<4x64x128xf32, #tpu.memory_space<vmem>>, vector<1x32x32xf32>
    %402 = vector.shape_cast %401 : vector<1x32x32xf32> to vector<32x32xf32>
    %c3_388 = arith.constant 3 : index
    %c0_389 = arith.constant 0 : index
    %c0_390 = arith.constant 0 : index
    %403 = vector.load %arg4[%c3_388, %c0_389, %c0_390] : memref<25x32x128xf32, #tpu.memory_space<vmem>>, vector<1x32x128xf32>
    %404 = vector.shape_cast %403 : vector<1x32x128xf32> to vector<32x128xf32>
    %cst_391 = arith.constant dense<0.000000e+00> : vector<32x128xf32>
    %405 = tpu.matmul %402, %404, %cst_391 {dimension_numbers = #tpu.dot_dimension_numbers<[1], [0], [0], [1], [0, 0, 1, 1], [], []>} : vector<32x32xf32>, vector<32x128xf32>, vector<32x128xf32> -> vector<32x128xf32>
    %406 = arith.addf %400, %405 : vector<32x128xf32>
    %c2_392 = arith.constant 2 : index
    %c2_393 = arith.constant 2 : index
    %c0_394 = arith.constant 0 : index
    %407 = vector.load %arg11[%c2_392, %c2_393, %c0_394] : memref<4x64x128xf32, #tpu.memory_space<vmem>>, vector<1x32x32xf32>
    %408 = vector.shape_cast %407 : vector<1x32x32xf32> to vector<32x32xf32>
    %c4_395 = arith.constant 4 : index
    %c0_396 = arith.constant 0 : index
    %c0_397 = arith.constant 0 : index
    %409 = vector.load %arg4[%c4_395, %c0_396, %c0_397] : memref<25x32x128xf32, #tpu.memory_space<vmem>>, vector<1x32x128xf32>
    %410 = vector.shape_cast %409 : vector<1x32x128xf32> to vector<32x128xf32>
    %cst_398 = arith.constant dense<0.000000e+00> : vector<32x128xf32>
    %411 = tpu.matmul %408, %410, %cst_398 {dimension_numbers = #tpu.dot_dimension_numbers<[1], [0], [0], [1], [0, 0, 1, 1], [], []>} : vector<32x32xf32>, vector<32x128xf32>, vector<32x128xf32> -> vector<32x128xf32>
    %412 = arith.addf %406, %411 : vector<32x128xf32>
    %c0_399 = arith.constant 0 : index
    %c8_400 = arith.constant 8 : index
    %c0_401 = arith.constant 0 : index
    %413 = vector.load %arg11[%c0_399, %c8_400, %c0_401] : memref<4x64x128xf32, #tpu.memory_space<vmem>>, vector<1x32x32xf32>
    %414 = vector.shape_cast %413 : vector<1x32x32xf32> to vector<32x32xf32>
    %c5_402 = arith.constant 5 : index
    %c0_403 = arith.constant 0 : index
    %c0_404 = arith.constant 0 : index
    %415 = vector.load %arg4[%c5_402, %c0_403, %c0_404] : memref<25x32x128xf32, #tpu.memory_space<vmem>>, vector<1x32x128xf32>
    %416 = vector.shape_cast %415 : vector<1x32x128xf32> to vector<32x128xf32>
    %cst_405 = arith.constant dense<0.000000e+00> : vector<32x128xf32>
    %417 = tpu.matmul %414, %416, %cst_405 {dimension_numbers = #tpu.dot_dimension_numbers<[1], [0], [0], [1], [0, 0, 1, 1], [], []>} : vector<32x32xf32>, vector<32x128xf32>, vector<32x128xf32> -> vector<32x128xf32>
    %418 = arith.addf %412, %417 : vector<32x128xf32>
    %c1_406 = arith.constant 1 : index
    %c8_407 = arith.constant 8 : index
    %c0_408 = arith.constant 0 : index
    %419 = vector.load %arg11[%c1_406, %c8_407, %c0_408] : memref<4x64x128xf32, #tpu.memory_space<vmem>>, vector<1x32x32xf32>
    %420 = vector.shape_cast %419 : vector<1x32x32xf32> to vector<32x32xf32>
    %c6_409 = arith.constant 6 : index
    %c0_410 = arith.constant 0 : index
    %c0_411 = arith.constant 0 : index
    %421 = vector.load %arg4[%c6_409, %c0_410, %c0_411] : memref<25x32x128xf32, #tpu.memory_space<vmem>>, vector<1x32x128xf32>
    %422 = vector.shape_cast %421 : vector<1x32x128xf32> to vector<32x128xf32>
    %cst_412 = arith.constant dense<0.000000e+00> : vector<32x128xf32>
    %423 = tpu.matmul %420, %422, %cst_412 {dimension_numbers = #tpu.dot_dimension_numbers<[1], [0], [0], [1], [0, 0, 1, 1], [], []>} : vector<32x32xf32>, vector<32x128xf32>, vector<32x128xf32> -> vector<32x128xf32>
    %424 = arith.addf %418, %423 : vector<32x128xf32>
    %c0_413 = arith.constant 0 : index
    %c9_414 = arith.constant 9 : index
    %c0_415 = arith.constant 0 : index
    %425 = vector.load %arg11[%c0_413, %c9_414, %c0_415] : memref<4x64x128xf32, #tpu.memory_space<vmem>>, vector<1x32x32xf32>
    %426 = vector.shape_cast %425 : vector<1x32x32xf32> to vector<32x32xf32>
    %c7_416 = arith.constant 7 : index
    %c0_417 = arith.constant 0 : index
    %c0_418 = arith.constant 0 : index
    %427 = vector.load %arg4[%c7_416, %c0_417, %c0_418] : memref<25x32x128xf32, #tpu.memory_space<vmem>>, vector<1x32x128xf32>
    %428 = vector.shape_cast %427 : vector<1x32x128xf32> to vector<32x128xf32>
    %cst_419 = arith.constant dense<0.000000e+00> : vector<32x128xf32>
    %429 = tpu.matmul %426, %428, %cst_419 {dimension_numbers = #tpu.dot_dimension_numbers<[1], [0], [0], [1], [0, 0, 1, 1], [], []>} : vector<32x32xf32>, vector<32x128xf32>, vector<32x128xf32> -> vector<32x128xf32>
    %430 = arith.addf %424, %429 : vector<32x128xf32>
    %c1_420 = arith.constant 1 : index
    %c9_421 = arith.constant 9 : index
    %c0_422 = arith.constant 0 : index
    %431 = vector.load %arg11[%c1_420, %c9_421, %c0_422] : memref<4x64x128xf32, #tpu.memory_space<vmem>>, vector<1x32x32xf32>
    %432 = vector.shape_cast %431 : vector<1x32x32xf32> to vector<32x32xf32>
    %c8_423 = arith.constant 8 : index
    %c0_424 = arith.constant 0 : index
    %c0_425 = arith.constant 0 : index
    %433 = vector.load %arg4[%c8_423, %c0_424, %c0_425] : memref<25x32x128xf32, #tpu.memory_space<vmem>>, vector<1x32x128xf32>
    %434 = vector.shape_cast %433 : vector<1x32x128xf32> to vector<32x128xf32>
    %cst_426 = arith.constant dense<0.000000e+00> : vector<32x128xf32>
    %435 = tpu.matmul %432, %434, %cst_426 {dimension_numbers = #tpu.dot_dimension_numbers<[1], [0], [0], [1], [0, 0, 1, 1], [], []>} : vector<32x32xf32>, vector<32x128xf32>, vector<32x128xf32> -> vector<32x128xf32>
    %436 = arith.addf %430, %435 : vector<32x128xf32>
    %c0_427 = arith.constant 0 : index
    %c10_428 = arith.constant 10 : index
    %c0_429 = arith.constant 0 : index
    %437 = vector.load %arg11[%c0_427, %c10_428, %c0_429] : memref<4x64x128xf32, #tpu.memory_space<vmem>>, vector<1x32x32xf32>
    %438 = vector.shape_cast %437 : vector<1x32x32xf32> to vector<32x32xf32>
    %c9_430 = arith.constant 9 : index
    %c0_431 = arith.constant 0 : index
    %c0_432 = arith.constant 0 : index
    %439 = vector.load %arg4[%c9_430, %c0_431, %c0_432] : memref<25x32x128xf32, #tpu.memory_space<vmem>>, vector<1x32x128xf32>
    %440 = vector.shape_cast %439 : vector<1x32x128xf32> to vector<32x128xf32>
    %cst_433 = arith.constant dense<0.000000e+00> : vector<32x128xf32>
    %441 = tpu.matmul %438, %440, %cst_433 {dimension_numbers = #tpu.dot_dimension_numbers<[1], [0], [0], [1], [0, 0, 1, 1], [], []>} : vector<32x32xf32>, vector<32x128xf32>, vector<32x128xf32> -> vector<32x128xf32>
    %442 = arith.addf %436, %441 : vector<32x128xf32>
    %c2_434 = arith.constant 2 : index
    %c8_435 = arith.constant 8 : index
    %c0_436 = arith.constant 0 : index
    %443 = vector.load %arg11[%c2_434, %c8_435, %c0_436] : memref<4x64x128xf32, #tpu.memory_space<vmem>>, vector<1x32x32xf32>
    %444 = vector.shape_cast %443 : vector<1x32x32xf32> to vector<32x32xf32>
    %c10_437 = arith.constant 10 : index
    %c0_438 = arith.constant 0 : index
    %c0_439 = arith.constant 0 : index
    %445 = vector.load %arg4[%c10_437, %c0_438, %c0_439] : memref<25x32x128xf32, #tpu.memory_space<vmem>>, vector<1x32x128xf32>
    %446 = vector.shape_cast %445 : vector<1x32x128xf32> to vector<32x128xf32>
    %cst_440 = arith.constant dense<0.000000e+00> : vector<32x128xf32>
    %447 = tpu.matmul %444, %446, %cst_440 {dimension_numbers = #tpu.dot_dimension_numbers<[1], [0], [0], [1], [0, 0, 1, 1], [], []>} : vector<32x32xf32>, vector<32x128xf32>, vector<32x128xf32> -> vector<32x128xf32>
    %448 = arith.addf %442, %447 : vector<32x128xf32>
    %c3_441 = arith.constant 3 : index
    %c8_442 = arith.constant 8 : index
    %c0_443 = arith.constant 0 : index
    %449 = vector.load %arg11[%c3_441, %c8_442, %c0_443] : memref<4x64x128xf32, #tpu.memory_space<vmem>>, vector<1x32x32xf32>
    %450 = vector.shape_cast %449 : vector<1x32x32xf32> to vector<32x32xf32>
    %c11_444 = arith.constant 11 : index
    %c0_445 = arith.constant 0 : index
    %c0_446 = arith.constant 0 : index
    %451 = vector.load %arg4[%c11_444, %c0_445, %c0_446] : memref<25x32x128xf32, #tpu.memory_space<vmem>>, vector<1x32x128xf32>
    %452 = vector.shape_cast %451 : vector<1x32x128xf32> to vector<32x128xf32>
    %cst_447 = arith.constant dense<0.000000e+00> : vector<32x128xf32>
    %453 = tpu.matmul %450, %452, %cst_447 {dimension_numbers = #tpu.dot_dimension_numbers<[1], [0], [0], [1], [0, 0, 1, 1], [], []>} : vector<32x32xf32>, vector<32x128xf32>, vector<32x128xf32> -> vector<32x128xf32>
    %454 = arith.addf %448, %453 : vector<32x128xf32>
    %c2_448 = arith.constant 2 : index
    %c9_449 = arith.constant 9 : index
    %c0_450 = arith.constant 0 : index
    %455 = vector.load %arg11[%c2_448, %c9_449, %c0_450] : memref<4x64x128xf32, #tpu.memory_space<vmem>>, vector<1x32x32xf32>
    %456 = vector.shape_cast %455 : vector<1x32x32xf32> to vector<32x32xf32>
    %c12_451 = arith.constant 12 : index
    %c0_452 = arith.constant 0 : index
    %c0_453 = arith.constant 0 : index
    %457 = vector.load %arg4[%c12_451, %c0_452, %c0_453] : memref<25x32x128xf32, #tpu.memory_space<vmem>>, vector<1x32x128xf32>
    %458 = vector.shape_cast %457 : vector<1x32x128xf32> to vector<32x128xf32>
    %cst_454 = arith.constant dense<0.000000e+00> : vector<32x128xf32>
    %459 = tpu.matmul %456, %458, %cst_454 {dimension_numbers = #tpu.dot_dimension_numbers<[1], [0], [0], [1], [0, 0, 1, 1], [], []>} : vector<32x32xf32>, vector<32x128xf32>, vector<32x128xf32> -> vector<32x128xf32>
    %460 = arith.addf %454, %459 : vector<32x128xf32>
    %c3_455 = arith.constant 3 : index
    %c9_456 = arith.constant 9 : index
    %c0_457 = arith.constant 0 : index
    %461 = vector.load %arg11[%c3_455, %c9_456, %c0_457] : memref<4x64x128xf32, #tpu.memory_space<vmem>>, vector<1x32x32xf32>
    %462 = vector.shape_cast %461 : vector<1x32x32xf32> to vector<32x32xf32>
    %c13_458 = arith.constant 13 : index
    %c0_459 = arith.constant 0 : index
    %c0_460 = arith.constant 0 : index
    %463 = vector.load %arg4[%c13_458, %c0_459, %c0_460] : memref<25x32x128xf32, #tpu.memory_space<vmem>>, vector<1x32x128xf32>
    %464 = vector.shape_cast %463 : vector<1x32x128xf32> to vector<32x128xf32>
    %cst_461 = arith.constant dense<0.000000e+00> : vector<32x128xf32>
    %465 = tpu.matmul %462, %464, %cst_461 {dimension_numbers = #tpu.dot_dimension_numbers<[1], [0], [0], [1], [0, 0, 1, 1], [], []>} : vector<32x32xf32>, vector<32x128xf32>, vector<32x128xf32> -> vector<32x128xf32>
    %466 = arith.addf %460, %465 : vector<32x128xf32>
    %c2_462 = arith.constant 2 : index
    %c10_463 = arith.constant 10 : index
    %c0_464 = arith.constant 0 : index
    %467 = vector.load %arg11[%c2_462, %c10_463, %c0_464] : memref<4x64x128xf32, #tpu.memory_space<vmem>>, vector<1x32x32xf32>
    %468 = vector.shape_cast %467 : vector<1x32x32xf32> to vector<32x32xf32>
    %c14_465 = arith.constant 14 : index
    %c0_466 = arith.constant 0 : index
    %c0_467 = arith.constant 0 : index
    %469 = vector.load %arg4[%c14_465, %c0_466, %c0_467] : memref<25x32x128xf32, #tpu.memory_space<vmem>>, vector<1x32x128xf32>
    %470 = vector.shape_cast %469 : vector<1x32x128xf32> to vector<32x128xf32>
    %cst_468 = arith.constant dense<0.000000e+00> : vector<32x128xf32>
    %471 = tpu.matmul %468, %470, %cst_468 {dimension_numbers = #tpu.dot_dimension_numbers<[1], [0], [0], [1], [0, 0, 1, 1], [], []>} : vector<32x32xf32>, vector<32x128xf32>, vector<32x128xf32> -> vector<32x128xf32>
    %472 = arith.addf %466, %471 : vector<32x128xf32>
    %c0_469 = arith.constant 0 : index
    %c16_470 = arith.constant 16 : index
    %c0_471 = arith.constant 0 : index
    %473 = vector.load %arg11[%c0_469, %c16_470, %c0_471] : memref<4x64x128xf32, #tpu.memory_space<vmem>>, vector<1x32x32xf32>
    %474 = vector.shape_cast %473 : vector<1x32x32xf32> to vector<32x32xf32>
    %c15_472 = arith.constant 15 : index
    %c0_473 = arith.constant 0 : index
    %c0_474 = arith.constant 0 : index
    %475 = vector.load %arg4[%c15_472, %c0_473, %c0_474] : memref<25x32x128xf32, #tpu.memory_space<vmem>>, vector<1x32x128xf32>
    %476 = vector.shape_cast %475 : vector<1x32x128xf32> to vector<32x128xf32>
    %cst_475 = arith.constant dense<0.000000e+00> : vector<32x128xf32>
    %477 = tpu.matmul %474, %476, %cst_475 {dimension_numbers = #tpu.dot_dimension_numbers<[1], [0], [0], [1], [0, 0, 1, 1], [], []>} : vector<32x32xf32>, vector<32x128xf32>, vector<32x128xf32> -> vector<32x128xf32>
    %478 = arith.addf %472, %477 : vector<32x128xf32>
    %c1_476 = arith.constant 1 : index
    %c16_477 = arith.constant 16 : index
    %c0_478 = arith.constant 0 : index
    %479 = vector.load %arg11[%c1_476, %c16_477, %c0_478] : memref<4x64x128xf32, #tpu.memory_space<vmem>>, vector<1x32x32xf32>
    %480 = vector.shape_cast %479 : vector<1x32x32xf32> to vector<32x32xf32>
    %c16_479 = arith.constant 16 : index
    %c0_480 = arith.constant 0 : index
    %c0_481 = arith.constant 0 : index
    %481 = vector.load %arg4[%c16_479, %c0_480, %c0_481] : memref<25x32x128xf32, #tpu.memory_space<vmem>>, vector<1x32x128xf32>
    %482 = vector.shape_cast %481 : vector<1x32x128xf32> to vector<32x128xf32>
    %cst_482 = arith.constant dense<0.000000e+00> : vector<32x128xf32>
    %483 = tpu.matmul %480, %482, %cst_482 {dimension_numbers = #tpu.dot_dimension_numbers<[1], [0], [0], [1], [0, 0, 1, 1], [], []>} : vector<32x32xf32>, vector<32x128xf32>, vector<32x128xf32> -> vector<32x128xf32>
    %484 = arith.addf %478, %483 : vector<32x128xf32>
    %c0_483 = arith.constant 0 : index
    %c17_484 = arith.constant 17 : index
    %c0_485 = arith.constant 0 : index
    %485 = vector.load %arg11[%c0_483, %c17_484, %c0_485] : memref<4x64x128xf32, #tpu.memory_space<vmem>>, vector<1x32x32xf32>
    %486 = vector.shape_cast %485 : vector<1x32x32xf32> to vector<32x32xf32>
    %c17_486 = arith.constant 17 : index
    %c0_487 = arith.constant 0 : index
    %c0_488 = arith.constant 0 : index
    %487 = vector.load %arg4[%c17_486, %c0_487, %c0_488] : memref<25x32x128xf32, #tpu.memory_space<vmem>>, vector<1x32x128xf32>
    %488 = vector.shape_cast %487 : vector<1x32x128xf32> to vector<32x128xf32>
    %cst_489 = arith.constant dense<0.000000e+00> : vector<32x128xf32>
    %489 = tpu.matmul %486, %488, %cst_489 {dimension_numbers = #tpu.dot_dimension_numbers<[1], [0], [0], [1], [0, 0, 1, 1], [], []>} : vector<32x32xf32>, vector<32x128xf32>, vector<32x128xf32> -> vector<32x128xf32>
    %490 = arith.addf %484, %489 : vector<32x128xf32>
    %c1_490 = arith.constant 1 : index
    %c17_491 = arith.constant 17 : index
    %c0_492 = arith.constant 0 : index
    %491 = vector.load %arg11[%c1_490, %c17_491, %c0_492] : memref<4x64x128xf32, #tpu.memory_space<vmem>>, vector<1x32x32xf32>
    %492 = vector.shape_cast %491 : vector<1x32x32xf32> to vector<32x32xf32>
    %c18_493 = arith.constant 18 : index
    %c0_494 = arith.constant 0 : index
    %c0_495 = arith.constant 0 : index
    %493 = vector.load %arg4[%c18_493, %c0_494, %c0_495] : memref<25x32x128xf32, #tpu.memory_space<vmem>>, vector<1x32x128xf32>
    %494 = vector.shape_cast %493 : vector<1x32x128xf32> to vector<32x128xf32>
    %cst_496 = arith.constant dense<0.000000e+00> : vector<32x128xf32>
    %495 = tpu.matmul %492, %494, %cst_496 {dimension_numbers = #tpu.dot_dimension_numbers<[1], [0], [0], [1], [0, 0, 1, 1], [], []>} : vector<32x32xf32>, vector<32x128xf32>, vector<32x128xf32> -> vector<32x128xf32>
    %496 = arith.addf %490, %495 : vector<32x128xf32>
    %c0_497 = arith.constant 0 : index
    %c18_498 = arith.constant 18 : index
    %c0_499 = arith.constant 0 : index
    %497 = vector.load %arg11[%c0_497, %c18_498, %c0_499] : memref<4x64x128xf32, #tpu.memory_space<vmem>>, vector<1x32x32xf32>
    %498 = vector.shape_cast %497 : vector<1x32x32xf32> to vector<32x32xf32>
    %c19_500 = arith.constant 19 : index
    %c0_501 = arith.constant 0 : index
    %c0_502 = arith.constant 0 : index
    %499 = vector.load %arg4[%c19_500, %c0_501, %c0_502] : memref<25x32x128xf32, #tpu.memory_space<vmem>>, vector<1x32x128xf32>
    %500 = vector.shape_cast %499 : vector<1x32x128xf32> to vector<32x128xf32>
    %cst_503 = arith.constant dense<0.000000e+00> : vector<32x128xf32>
    %501 = tpu.matmul %498, %500, %cst_503 {dimension_numbers = #tpu.dot_dimension_numbers<[1], [0], [0], [1], [0, 0, 1, 1], [], []>} : vector<32x32xf32>, vector<32x128xf32>, vector<32x128xf32> -> vector<32x128xf32>
    %502 = arith.addf %496, %501 : vector<32x128xf32>
    %c2_504 = arith.constant 2 : index
    %c16_505 = arith.constant 16 : index
    %c0_506 = arith.constant 0 : index
    %503 = vector.load %arg11[%c2_504, %c16_505, %c0_506] : memref<4x64x128xf32, #tpu.memory_space<vmem>>, vector<1x32x32xf32>
    %504 = vector.shape_cast %503 : vector<1x32x32xf32> to vector<32x32xf32>
    %c20_507 = arith.constant 20 : index
    %c0_508 = arith.constant 0 : index
    %c0_509 = arith.constant 0 : index
    %505 = vector.load %arg4[%c20_507, %c0_508, %c0_509] : memref<25x32x128xf32, #tpu.memory_space<vmem>>, vector<1x32x128xf32>
    %506 = vector.shape_cast %505 : vector<1x32x128xf32> to vector<32x128xf32>
    %cst_510 = arith.constant dense<0.000000e+00> : vector<32x128xf32>
    %507 = tpu.matmul %504, %506, %cst_510 {dimension_numbers = #tpu.dot_dimension_numbers<[1], [0], [0], [1], [0, 0, 1, 1], [], []>} : vector<32x32xf32>, vector<32x128xf32>, vector<32x128xf32> -> vector<32x128xf32>
    %508 = arith.addf %502, %507 : vector<32x128xf32>
    %c3_511 = arith.constant 3 : index
    %c16_512 = arith.constant 16 : index
    %c0_513 = arith.constant 0 : index
    %509 = vector.load %arg11[%c3_511, %c16_512, %c0_513] : memref<4x64x128xf32, #tpu.memory_space<vmem>>, vector<1x32x32xf32>
    %510 = vector.shape_cast %509 : vector<1x32x32xf32> to vector<32x32xf32>
    %c21_514 = arith.constant 21 : index
    %c0_515 = arith.constant 0 : index
    %c0_516 = arith.constant 0 : index
    %511 = vector.load %arg4[%c21_514, %c0_515, %c0_516] : memref<25x32x128xf32, #tpu.memory_space<vmem>>, vector<1x32x128xf32>
    %512 = vector.shape_cast %511 : vector<1x32x128xf32> to vector<32x128xf32>
    %cst_517 = arith.constant dense<0.000000e+00> : vector<32x128xf32>
    %513 = tpu.matmul %510, %512, %cst_517 {dimension_numbers = #tpu.dot_dimension_numbers<[1], [0], [0], [1], [0, 0, 1, 1], [], []>} : vector<32x32xf32>, vector<32x128xf32>, vector<32x128xf32> -> vector<32x128xf32>
    %514 = arith.addf %508, %513 : vector<32x128xf32>
    %c2_518 = arith.constant 2 : index
    %c17_519 = arith.constant 17 : index
    %c0_520 = arith.constant 0 : index
    %515 = vector.load %arg11[%c2_518, %c17_519, %c0_520] : memref<4x64x128xf32, #tpu.memory_space<vmem>>, vector<1x32x32xf32>
    %516 = vector.shape_cast %515 : vector<1x32x32xf32> to vector<32x32xf32>
    %c22_521 = arith.constant 22 : index
    %c0_522 = arith.constant 0 : index
    %c0_523 = arith.constant 0 : index
    %517 = vector.load %arg4[%c22_521, %c0_522, %c0_523] : memref<25x32x128xf32, #tpu.memory_space<vmem>>, vector<1x32x128xf32>
    %518 = vector.shape_cast %517 : vector<1x32x128xf32> to vector<32x128xf32>
    %cst_524 = arith.constant dense<0.000000e+00> : vector<32x128xf32>
    %519 = tpu.matmul %516, %518, %cst_524 {dimension_numbers = #tpu.dot_dimension_numbers<[1], [0], [0], [1], [0, 0, 1, 1], [], []>} : vector<32x32xf32>, vector<32x128xf32>, vector<32x128xf32> -> vector<32x128xf32>
    %520 = arith.addf %514, %519 : vector<32x128xf32>
    %c3_525 = arith.constant 3 : index
    %c17_526 = arith.constant 17 : index
    %c0_527 = arith.constant 0 : index
    %521 = vector.load %arg11[%c3_525, %c17_526, %c0_527] : memref<4x64x128xf32, #tpu.memory_space<vmem>>, vector<1x32x32xf32>
    %522 = vector.shape_cast %521 : vector<1x32x32xf32> to vector<32x32xf32>
    %c23_528 = arith.constant 23 : index
    %c0_529 = arith.constant 0 : index
    %c0_530 = arith.constant 0 : index
    %523 = vector.load %arg4[%c23_528, %c0_529, %c0_530] : memref<25x32x128xf32, #tpu.memory_space<vmem>>, vector<1x32x128xf32>
    %524 = vector.shape_cast %523 : vector<1x32x128xf32> to vector<32x128xf32>
    %cst_531 = arith.constant dense<0.000000e+00> : vector<32x128xf32>
    %525 = tpu.matmul %522, %524, %cst_531 {dimension_numbers = #tpu.dot_dimension_numbers<[1], [0], [0], [1], [0, 0, 1, 1], [], []>} : vector<32x32xf32>, vector<32x128xf32>, vector<32x128xf32> -> vector<32x128xf32>
    %526 = arith.addf %520, %525 : vector<32x128xf32>
    %c2_532 = arith.constant 2 : index
    %c18_533 = arith.constant 18 : index
    %c0_534 = arith.constant 0 : index
    %527 = vector.load %arg11[%c2_532, %c18_533, %c0_534] : memref<4x64x128xf32, #tpu.memory_space<vmem>>, vector<1x32x32xf32>
    %528 = vector.shape_cast %527 : vector<1x32x32xf32> to vector<32x32xf32>
    %c24_535 = arith.constant 24 : index
    %c0_536 = arith.constant 0 : index
    %c0_537 = arith.constant 0 : index
    %529 = vector.load %arg4[%c24_535, %c0_536, %c0_537] : memref<25x32x128xf32, #tpu.memory_space<vmem>>, vector<1x32x128xf32>
    %530 = vector.shape_cast %529 : vector<1x32x128xf32> to vector<32x128xf32>
    %cst_538 = arith.constant dense<0.000000e+00> : vector<32x128xf32>
    %531 = tpu.matmul %528, %530, %cst_538 {dimension_numbers = #tpu.dot_dimension_numbers<[1], [0], [0], [1], [0, 0, 1, 1], [], []>} : vector<32x32xf32>, vector<32x128xf32>, vector<32x128xf32> -> vector<32x128xf32>
    %532 = arith.addf %526, %531 : vector<32x128xf32>
    %533 = vector.broadcast %70 : vector<1x128xf32> to vector<32x128xf32>
    %534 = arith.addf %532, %533 : vector<32x128xf32>
    %cst_539 = arith.constant 0.000000e+00 : f32
    %535 = vector.broadcast %cst_539 : f32 to vector<32x128xf32>
    %536 = arith.maximumf %534, %535 : vector<32x128xf32>
    %537 = arith.maximumf %381, %536 : vector<32x128xf32>
    %cst_540 = arith.constant 0.000000e+00 : f32
    %538 = vector.broadcast %cst_540 : f32 to vector<32x128xf32>
    %c3_541 = arith.constant 3 : index
    %c0_542 = arith.constant 0 : index
    %c0_543 = arith.constant 0 : index
    %539 = vector.load %arg11[%c3_541, %c0_542, %c0_543] : memref<4x64x128xf32, #tpu.memory_space<vmem>>, vector<1x32x32xf32>
    %540 = vector.shape_cast %539 : vector<1x32x32xf32> to vector<32x32xf32>
    %c0_544 = arith.constant 0 : index
    %c0_545 = arith.constant 0 : index
    %c0_546 = arith.constant 0 : index
    %541 = vector.load %arg4[%c0_544, %c0_545, %c0_546] : memref<25x32x128xf32, #tpu.memory_space<vmem>>, vector<1x32x128xf32>
    %542 = vector.shape_cast %541 : vector<1x32x128xf32> to vector<32x128xf32>
    %cst_547 = arith.constant dense<0.000000e+00> : vector<32x128xf32>
    %543 = tpu.matmul %540, %542, %cst_547 {dimension_numbers = #tpu.dot_dimension_numbers<[1], [0], [0], [1], [0, 0, 1, 1], [], []>} : vector<32x32xf32>, vector<32x128xf32>, vector<32x128xf32> -> vector<32x128xf32>
    %544 = arith.addf %538, %543 : vector<32x128xf32>
    %c2_548 = arith.constant 2 : index
    %c1_549 = arith.constant 1 : index
    %c0_550 = arith.constant 0 : index
    %545 = vector.load %arg11[%c2_548, %c1_549, %c0_550] : memref<4x64x128xf32, #tpu.memory_space<vmem>>, vector<1x32x32xf32>
    %546 = vector.shape_cast %545 : vector<1x32x32xf32> to vector<32x32xf32>
    %c1_551 = arith.constant 1 : index
    %c0_552 = arith.constant 0 : index
    %c0_553 = arith.constant 0 : index
    %547 = vector.load %arg4[%c1_551, %c0_552, %c0_553] : memref<25x32x128xf32, #tpu.memory_space<vmem>>, vector<1x32x128xf32>
    %548 = vector.shape_cast %547 : vector<1x32x128xf32> to vector<32x128xf32>
    %cst_554 = arith.constant dense<0.000000e+00> : vector<32x128xf32>
    %549 = tpu.matmul %546, %548, %cst_554 {dimension_numbers = #tpu.dot_dimension_numbers<[1], [0], [0], [1], [0, 0, 1, 1], [], []>} : vector<32x32xf32>, vector<32x128xf32>, vector<32x128xf32> -> vector<32x128xf32>
    %550 = arith.addf %544, %549 : vector<32x128xf32>
    %c3_555 = arith.constant 3 : index
    %c1_556 = arith.constant 1 : index
    %c0_557 = arith.constant 0 : index
    %551 = vector.load %arg11[%c3_555, %c1_556, %c0_557] : memref<4x64x128xf32, #tpu.memory_space<vmem>>, vector<1x32x32xf32>
    %552 = vector.shape_cast %551 : vector<1x32x32xf32> to vector<32x32xf32>
    %c2_558 = arith.constant 2 : index
    %c0_559 = arith.constant 0 : index
    %c0_560 = arith.constant 0 : index
    %553 = vector.load %arg4[%c2_558, %c0_559, %c0_560] : memref<25x32x128xf32, #tpu.memory_space<vmem>>, vector<1x32x128xf32>
    %554 = vector.shape_cast %553 : vector<1x32x128xf32> to vector<32x128xf32>
    %cst_561 = arith.constant dense<0.000000e+00> : vector<32x128xf32>
    %555 = tpu.matmul %552, %554, %cst_561 {dimension_numbers = #tpu.dot_dimension_numbers<[1], [0], [0], [1], [0, 0, 1, 1], [], []>} : vector<32x32xf32>, vector<32x128xf32>, vector<32x128xf32> -> vector<32x128xf32>
    %556 = arith.addf %550, %555 : vector<32x128xf32>
    %c2_562 = arith.constant 2 : index
    %c2_563 = arith.constant 2 : index
    %c0_564 = arith.constant 0 : index
    %557 = vector.load %arg11[%c2_562, %c2_563, %c0_564] : memref<4x64x128xf32, #tpu.memory_space<vmem>>, vector<1x32x32xf32>
    %558 = vector.shape_cast %557 : vector<1x32x32xf32> to vector<32x32xf32>
    %c3_565 = arith.constant 3 : index
    %c0_566 = arith.constant 0 : index
    %c0_567 = arith.constant 0 : index
    %559 = vector.load %arg4[%c3_565, %c0_566, %c0_567] : memref<25x32x128xf32, #tpu.memory_space<vmem>>, vector<1x32x128xf32>
    %560 = vector.shape_cast %559 : vector<1x32x128xf32> to vector<32x128xf32>
    %cst_568 = arith.constant dense<0.000000e+00> : vector<32x128xf32>
    %561 = tpu.matmul %558, %560, %cst_568 {dimension_numbers = #tpu.dot_dimension_numbers<[1], [0], [0], [1], [0, 0, 1, 1], [], []>} : vector<32x32xf32>, vector<32x128xf32>, vector<32x128xf32> -> vector<32x128xf32>
    %562 = arith.addf %556, %561 : vector<32x128xf32>
    %c3_569 = arith.constant 3 : index
    %c2_570 = arith.constant 2 : index
    %c0_571 = arith.constant 0 : index
    %563 = vector.load %arg11[%c3_569, %c2_570, %c0_571] : memref<4x64x128xf32, #tpu.memory_space<vmem>>, vector<1x32x32xf32>
    %564 = vector.shape_cast %563 : vector<1x32x32xf32> to vector<32x32xf32>
    %c4_572 = arith.constant 4 : index
    %c0_573 = arith.constant 0 : index
    %c0_574 = arith.constant 0 : index
    %565 = vector.load %arg4[%c4_572, %c0_573, %c0_574] : memref<25x32x128xf32, #tpu.memory_space<vmem>>, vector<1x32x128xf32>
    %566 = vector.shape_cast %565 : vector<1x32x128xf32> to vector<32x128xf32>
    %cst_575 = arith.constant dense<0.000000e+00> : vector<32x128xf32>
    %567 = tpu.matmul %564, %566, %cst_575 {dimension_numbers = #tpu.dot_dimension_numbers<[1], [0], [0], [1], [0, 0, 1, 1], [], []>} : vector<32x32xf32>, vector<32x128xf32>, vector<32x128xf32> -> vector<32x128xf32>
    %568 = arith.addf %562, %567 : vector<32x128xf32>
    %c1_576 = arith.constant 1 : index
    %c8_577 = arith.constant 8 : index
    %c0_578 = arith.constant 0 : index
    %569 = vector.load %arg11[%c1_576, %c8_577, %c0_578] : memref<4x64x128xf32, #tpu.memory_space<vmem>>, vector<1x32x32xf32>
    %570 = vector.shape_cast %569 : vector<1x32x32xf32> to vector<32x32xf32>
    %c5_579 = arith.constant 5 : index
    %c0_580 = arith.constant 0 : index
    %c0_581 = arith.constant 0 : index
    %571 = vector.load %arg4[%c5_579, %c0_580, %c0_581] : memref<25x32x128xf32, #tpu.memory_space<vmem>>, vector<1x32x128xf32>
    %572 = vector.shape_cast %571 : vector<1x32x128xf32> to vector<32x128xf32>
    %cst_582 = arith.constant dense<0.000000e+00> : vector<32x128xf32>
    %573 = tpu.matmul %570, %572, %cst_582 {dimension_numbers = #tpu.dot_dimension_numbers<[1], [0], [0], [1], [0, 0, 1, 1], [], []>} : vector<32x32xf32>, vector<32x128xf32>, vector<32x128xf32> -> vector<32x128xf32>
    %574 = arith.addf %568, %573 : vector<32x128xf32>
    %c0_583 = arith.constant 0 : index
    %c9_584 = arith.constant 9 : index
    %c0_585 = arith.constant 0 : index
    %575 = vector.load %arg11[%c0_583, %c9_584, %c0_585] : memref<4x64x128xf32, #tpu.memory_space<vmem>>, vector<1x32x32xf32>
    %576 = vector.shape_cast %575 : vector<1x32x32xf32> to vector<32x32xf32>
    %c6_586 = arith.constant 6 : index
    %c0_587 = arith.constant 0 : index
    %c0_588 = arith.constant 0 : index
    %577 = vector.load %arg4[%c6_586, %c0_587, %c0_588] : memref<25x32x128xf32, #tpu.memory_space<vmem>>, vector<1x32x128xf32>
    %578 = vector.shape_cast %577 : vector<1x32x128xf32> to vector<32x128xf32>
    %cst_589 = arith.constant dense<0.000000e+00> : vector<32x128xf32>
    %579 = tpu.matmul %576, %578, %cst_589 {dimension_numbers = #tpu.dot_dimension_numbers<[1], [0], [0], [1], [0, 0, 1, 1], [], []>} : vector<32x32xf32>, vector<32x128xf32>, vector<32x128xf32> -> vector<32x128xf32>
    %580 = arith.addf %574, %579 : vector<32x128xf32>
    %c1_590 = arith.constant 1 : index
    %c9_591 = arith.constant 9 : index
    %c0_592 = arith.constant 0 : index
    %581 = vector.load %arg11[%c1_590, %c9_591, %c0_592] : memref<4x64x128xf32, #tpu.memory_space<vmem>>, vector<1x32x32xf32>
    %582 = vector.shape_cast %581 : vector<1x32x32xf32> to vector<32x32xf32>
    %c7_593 = arith.constant 7 : index
    %c0_594 = arith.constant 0 : index
    %c0_595 = arith.constant 0 : index
    %583 = vector.load %arg4[%c7_593, %c0_594, %c0_595] : memref<25x32x128xf32, #tpu.memory_space<vmem>>, vector<1x32x128xf32>
    %584 = vector.shape_cast %583 : vector<1x32x128xf32> to vector<32x128xf32>
    %cst_596 = arith.constant dense<0.000000e+00> : vector<32x128xf32>
    %585 = tpu.matmul %582, %584, %cst_596 {dimension_numbers = #tpu.dot_dimension_numbers<[1], [0], [0], [1], [0, 0, 1, 1], [], []>} : vector<32x32xf32>, vector<32x128xf32>, vector<32x128xf32> -> vector<32x128xf32>
    %586 = arith.addf %580, %585 : vector<32x128xf32>
    %c0_597 = arith.constant 0 : index
    %c10_598 = arith.constant 10 : index
    %c0_599 = arith.constant 0 : index
    %587 = vector.load %arg11[%c0_597, %c10_598, %c0_599] : memref<4x64x128xf32, #tpu.memory_space<vmem>>, vector<1x32x32xf32>
    %588 = vector.shape_cast %587 : vector<1x32x32xf32> to vector<32x32xf32>
    %c8_600 = arith.constant 8 : index
    %c0_601 = arith.constant 0 : index
    %c0_602 = arith.constant 0 : index
    %589 = vector.load %arg4[%c8_600, %c0_601, %c0_602] : memref<25x32x128xf32, #tpu.memory_space<vmem>>, vector<1x32x128xf32>
    %590 = vector.shape_cast %589 : vector<1x32x128xf32> to vector<32x128xf32>
    %cst_603 = arith.constant dense<0.000000e+00> : vector<32x128xf32>
    %591 = tpu.matmul %588, %590, %cst_603 {dimension_numbers = #tpu.dot_dimension_numbers<[1], [0], [0], [1], [0, 0, 1, 1], [], []>} : vector<32x32xf32>, vector<32x128xf32>, vector<32x128xf32> -> vector<32x128xf32>
    %592 = arith.addf %586, %591 : vector<32x128xf32>
    %c1_604 = arith.constant 1 : index
    %c10_605 = arith.constant 10 : index
    %c0_606 = arith.constant 0 : index
    %593 = vector.load %arg11[%c1_604, %c10_605, %c0_606] : memref<4x64x128xf32, #tpu.memory_space<vmem>>, vector<1x32x32xf32>
    %594 = vector.shape_cast %593 : vector<1x32x32xf32> to vector<32x32xf32>
    %c9_607 = arith.constant 9 : index
    %c0_608 = arith.constant 0 : index
    %c0_609 = arith.constant 0 : index
    %595 = vector.load %arg4[%c9_607, %c0_608, %c0_609] : memref<25x32x128xf32, #tpu.memory_space<vmem>>, vector<1x32x128xf32>
    %596 = vector.shape_cast %595 : vector<1x32x128xf32> to vector<32x128xf32>
    %cst_610 = arith.constant dense<0.000000e+00> : vector<32x128xf32>
    %597 = tpu.matmul %594, %596, %cst_610 {dimension_numbers = #tpu.dot_dimension_numbers<[1], [0], [0], [1], [0, 0, 1, 1], [], []>} : vector<32x32xf32>, vector<32x128xf32>, vector<32x128xf32> -> vector<32x128xf32>
    %598 = arith.addf %592, %597 : vector<32x128xf32>
    %c3_611 = arith.constant 3 : index
    %c8_612 = arith.constant 8 : index
    %c0_613 = arith.constant 0 : index
    %599 = vector.load %arg11[%c3_611, %c8_612, %c0_613] : memref<4x64x128xf32, #tpu.memory_space<vmem>>, vector<1x32x32xf32>
    %600 = vector.shape_cast %599 : vector<1x32x32xf32> to vector<32x32xf32>
    %c10_614 = arith.constant 10 : index
    %c0_615 = arith.constant 0 : index
    %c0_616 = arith.constant 0 : index
    %601 = vector.load %arg4[%c10_614, %c0_615, %c0_616] : memref<25x32x128xf32, #tpu.memory_space<vmem>>, vector<1x32x128xf32>
    %602 = vector.shape_cast %601 : vector<1x32x128xf32> to vector<32x128xf32>
    %cst_617 = arith.constant dense<0.000000e+00> : vector<32x128xf32>
    %603 = tpu.matmul %600, %602, %cst_617 {dimension_numbers = #tpu.dot_dimension_numbers<[1], [0], [0], [1], [0, 0, 1, 1], [], []>} : vector<32x32xf32>, vector<32x128xf32>, vector<32x128xf32> -> vector<32x128xf32>
    %604 = arith.addf %598, %603 : vector<32x128xf32>
    %c2_618 = arith.constant 2 : index
    %c9_619 = arith.constant 9 : index
    %c0_620 = arith.constant 0 : index
    %605 = vector.load %arg11[%c2_618, %c9_619, %c0_620] : memref<4x64x128xf32, #tpu.memory_space<vmem>>, vector<1x32x32xf32>
    %606 = vector.shape_cast %605 : vector<1x32x32xf32> to vector<32x32xf32>
    %c11_621 = arith.constant 11 : index
    %c0_622 = arith.constant 0 : index
    %c0_623 = arith.constant 0 : index
    %607 = vector.load %arg4[%c11_621, %c0_622, %c0_623] : memref<25x32x128xf32, #tpu.memory_space<vmem>>, vector<1x32x128xf32>
    %608 = vector.shape_cast %607 : vector<1x32x128xf32> to vector<32x128xf32>
    %cst_624 = arith.constant dense<0.000000e+00> : vector<32x128xf32>
    %609 = tpu.matmul %606, %608, %cst_624 {dimension_numbers = #tpu.dot_dimension_numbers<[1], [0], [0], [1], [0, 0, 1, 1], [], []>} : vector<32x32xf32>, vector<32x128xf32>, vector<32x128xf32> -> vector<32x128xf32>
    %610 = arith.addf %604, %609 : vector<32x128xf32>
    %c3_625 = arith.constant 3 : index
    %c9_626 = arith.constant 9 : index
    %c0_627 = arith.constant 0 : index
    %611 = vector.load %arg11[%c3_625, %c9_626, %c0_627] : memref<4x64x128xf32, #tpu.memory_space<vmem>>, vector<1x32x32xf32>
    %612 = vector.shape_cast %611 : vector<1x32x32xf32> to vector<32x32xf32>
    %c12_628 = arith.constant 12 : index
    %c0_629 = arith.constant 0 : index
    %c0_630 = arith.constant 0 : index
    %613 = vector.load %arg4[%c12_628, %c0_629, %c0_630] : memref<25x32x128xf32, #tpu.memory_space<vmem>>, vector<1x32x128xf32>
    %614 = vector.shape_cast %613 : vector<1x32x128xf32> to vector<32x128xf32>
    %cst_631 = arith.constant dense<0.000000e+00> : vector<32x128xf32>
    %615 = tpu.matmul %612, %614, %cst_631 {dimension_numbers = #tpu.dot_dimension_numbers<[1], [0], [0], [1], [0, 0, 1, 1], [], []>} : vector<32x32xf32>, vector<32x128xf32>, vector<32x128xf32> -> vector<32x128xf32>
    %616 = arith.addf %610, %615 : vector<32x128xf32>
    %c2_632 = arith.constant 2 : index
    %c10_633 = arith.constant 10 : index
    %c0_634 = arith.constant 0 : index
    %617 = vector.load %arg11[%c2_632, %c10_633, %c0_634] : memref<4x64x128xf32, #tpu.memory_space<vmem>>, vector<1x32x32xf32>
    %618 = vector.shape_cast %617 : vector<1x32x32xf32> to vector<32x32xf32>
    %c13_635 = arith.constant 13 : index
    %c0_636 = arith.constant 0 : index
    %c0_637 = arith.constant 0 : index
    %619 = vector.load %arg4[%c13_635, %c0_636, %c0_637] : memref<25x32x128xf32, #tpu.memory_space<vmem>>, vector<1x32x128xf32>
    %620 = vector.shape_cast %619 : vector<1x32x128xf32> to vector<32x128xf32>
    %cst_638 = arith.constant dense<0.000000e+00> : vector<32x128xf32>
    %621 = tpu.matmul %618, %620, %cst_638 {dimension_numbers = #tpu.dot_dimension_numbers<[1], [0], [0], [1], [0, 0, 1, 1], [], []>} : vector<32x32xf32>, vector<32x128xf32>, vector<32x128xf32> -> vector<32x128xf32>
    %622 = arith.addf %616, %621 : vector<32x128xf32>
    %c3_639 = arith.constant 3 : index
    %c10_640 = arith.constant 10 : index
    %c0_641 = arith.constant 0 : index
    %623 = vector.load %arg11[%c3_639, %c10_640, %c0_641] : memref<4x64x128xf32, #tpu.memory_space<vmem>>, vector<1x32x32xf32>
    %624 = vector.shape_cast %623 : vector<1x32x32xf32> to vector<32x32xf32>
    %c14_642 = arith.constant 14 : index
    %c0_643 = arith.constant 0 : index
    %c0_644 = arith.constant 0 : index
    %625 = vector.load %arg4[%c14_642, %c0_643, %c0_644] : memref<25x32x128xf32, #tpu.memory_space<vmem>>, vector<1x32x128xf32>
    %626 = vector.shape_cast %625 : vector<1x32x128xf32> to vector<32x128xf32>
    %cst_645 = arith.constant dense<0.000000e+00> : vector<32x128xf32>
    %627 = tpu.matmul %624, %626, %cst_645 {dimension_numbers = #tpu.dot_dimension_numbers<[1], [0], [0], [1], [0, 0, 1, 1], [], []>} : vector<32x32xf32>, vector<32x128xf32>, vector<32x128xf32> -> vector<32x128xf32>
    %628 = arith.addf %622, %627 : vector<32x128xf32>
    %c1_646 = arith.constant 1 : index
    %c16_647 = arith.constant 16 : index
    %c0_648 = arith.constant 0 : index
    %629 = vector.load %arg11[%c1_646, %c16_647, %c0_648] : memref<4x64x128xf32, #tpu.memory_space<vmem>>, vector<1x32x32xf32>
    %630 = vector.shape_cast %629 : vector<1x32x32xf32> to vector<32x32xf32>
    %c15_649 = arith.constant 15 : index
    %c0_650 = arith.constant 0 : index
    %c0_651 = arith.constant 0 : index
    %631 = vector.load %arg4[%c15_649, %c0_650, %c0_651] : memref<25x32x128xf32, #tpu.memory_space<vmem>>, vector<1x32x128xf32>
    %632 = vector.shape_cast %631 : vector<1x32x128xf32> to vector<32x128xf32>
    %cst_652 = arith.constant dense<0.000000e+00> : vector<32x128xf32>
    %633 = tpu.matmul %630, %632, %cst_652 {dimension_numbers = #tpu.dot_dimension_numbers<[1], [0], [0], [1], [0, 0, 1, 1], [], []>} : vector<32x32xf32>, vector<32x128xf32>, vector<32x128xf32> -> vector<32x128xf32>
    %634 = arith.addf %628, %633 : vector<32x128xf32>
    %c0_653 = arith.constant 0 : index
    %c17_654 = arith.constant 17 : index
    %c0_655 = arith.constant 0 : index
    %635 = vector.load %arg11[%c0_653, %c17_654, %c0_655] : memref<4x64x128xf32, #tpu.memory_space<vmem>>, vector<1x32x32xf32>
    %636 = vector.shape_cast %635 : vector<1x32x32xf32> to vector<32x32xf32>
    %c16_656 = arith.constant 16 : index
    %c0_657 = arith.constant 0 : index
    %c0_658 = arith.constant 0 : index
    %637 = vector.load %arg4[%c16_656, %c0_657, %c0_658] : memref<25x32x128xf32, #tpu.memory_space<vmem>>, vector<1x32x128xf32>
    %638 = vector.shape_cast %637 : vector<1x32x128xf32> to vector<32x128xf32>
    %cst_659 = arith.constant dense<0.000000e+00> : vector<32x128xf32>
    %639 = tpu.matmul %636, %638, %cst_659 {dimension_numbers = #tpu.dot_dimension_numbers<[1], [0], [0], [1], [0, 0, 1, 1], [], []>} : vector<32x32xf32>, vector<32x128xf32>, vector<32x128xf32> -> vector<32x128xf32>
    %640 = arith.addf %634, %639 : vector<32x128xf32>
    %c1_660 = arith.constant 1 : index
    %c17_661 = arith.constant 17 : index
    %c0_662 = arith.constant 0 : index
    %641 = vector.load %arg11[%c1_660, %c17_661, %c0_662] : memref<4x64x128xf32, #tpu.memory_space<vmem>>, vector<1x32x32xf32>
    %642 = vector.shape_cast %641 : vector<1x32x32xf32> to vector<32x32xf32>
    %c17_663 = arith.constant 17 : index
    %c0_664 = arith.constant 0 : index
    %c0_665 = arith.constant 0 : index
    %643 = vector.load %arg4[%c17_663, %c0_664, %c0_665] : memref<25x32x128xf32, #tpu.memory_space<vmem>>, vector<1x32x128xf32>
    %644 = vector.shape_cast %643 : vector<1x32x128xf32> to vector<32x128xf32>
    %cst_666 = arith.constant dense<0.000000e+00> : vector<32x128xf32>
    %645 = tpu.matmul %642, %644, %cst_666 {dimension_numbers = #tpu.dot_dimension_numbers<[1], [0], [0], [1], [0, 0, 1, 1], [], []>} : vector<32x32xf32>, vector<32x128xf32>, vector<32x128xf32> -> vector<32x128xf32>
    %646 = arith.addf %640, %645 : vector<32x128xf32>
    %c0_667 = arith.constant 0 : index
    %c18_668 = arith.constant 18 : index
    %c0_669 = arith.constant 0 : index
    %647 = vector.load %arg11[%c0_667, %c18_668, %c0_669] : memref<4x64x128xf32, #tpu.memory_space<vmem>>, vector<1x32x32xf32>
    %648 = vector.shape_cast %647 : vector<1x32x32xf32> to vector<32x32xf32>
    %c18_670 = arith.constant 18 : index
    %c0_671 = arith.constant 0 : index
    %c0_672 = arith.constant 0 : index
    %649 = vector.load %arg4[%c18_670, %c0_671, %c0_672] : memref<25x32x128xf32, #tpu.memory_space<vmem>>, vector<1x32x128xf32>
    %650 = vector.shape_cast %649 : vector<1x32x128xf32> to vector<32x128xf32>
    %cst_673 = arith.constant dense<0.000000e+00> : vector<32x128xf32>
    %651 = tpu.matmul %648, %650, %cst_673 {dimension_numbers = #tpu.dot_dimension_numbers<[1], [0], [0], [1], [0, 0, 1, 1], [], []>} : vector<32x32xf32>, vector<32x128xf32>, vector<32x128xf32> -> vector<32x128xf32>
    %652 = arith.addf %646, %651 : vector<32x128xf32>
    %c1_674 = arith.constant 1 : index
    %c18_675 = arith.constant 18 : index
    %c0_676 = arith.constant 0 : index
    %653 = vector.load %arg11[%c1_674, %c18_675, %c0_676] : memref<4x64x128xf32, #tpu.memory_space<vmem>>, vector<1x32x32xf32>
    %654 = vector.shape_cast %653 : vector<1x32x32xf32> to vector<32x32xf32>
    %c19_677 = arith.constant 19 : index
    %c0_678 = arith.constant 0 : index
    %c0_679 = arith.constant 0 : index
    %655 = vector.load %arg4[%c19_677, %c0_678, %c0_679] : memref<25x32x128xf32, #tpu.memory_space<vmem>>, vector<1x32x128xf32>
    %656 = vector.shape_cast %655 : vector<1x32x128xf32> to vector<32x128xf32>
    %cst_680 = arith.constant dense<0.000000e+00> : vector<32x128xf32>
    %657 = tpu.matmul %654, %656, %cst_680 {dimension_numbers = #tpu.dot_dimension_numbers<[1], [0], [0], [1], [0, 0, 1, 1], [], []>} : vector<32x32xf32>, vector<32x128xf32>, vector<32x128xf32> -> vector<32x128xf32>
    %658 = arith.addf %652, %657 : vector<32x128xf32>
    %c3_681 = arith.constant 3 : index
    %c16_682 = arith.constant 16 : index
    %c0_683 = arith.constant 0 : index
    %659 = vector.load %arg11[%c3_681, %c16_682, %c0_683] : memref<4x64x128xf32, #tpu.memory_space<vmem>>, vector<1x32x32xf32>
    %660 = vector.shape_cast %659 : vector<1x32x32xf32> to vector<32x32xf32>
    %c20_684 = arith.constant 20 : index
    %c0_685 = arith.constant 0 : index
    %c0_686 = arith.constant 0 : index
    %661 = vector.load %arg4[%c20_684, %c0_685, %c0_686] : memref<25x32x128xf32, #tpu.memory_space<vmem>>, vector<1x32x128xf32>
    %662 = vector.shape_cast %661 : vector<1x32x128xf32> to vector<32x128xf32>
    %cst_687 = arith.constant dense<0.000000e+00> : vector<32x128xf32>
    %663 = tpu.matmul %660, %662, %cst_687 {dimension_numbers = #tpu.dot_dimension_numbers<[1], [0], [0], [1], [0, 0, 1, 1], [], []>} : vector<32x32xf32>, vector<32x128xf32>, vector<32x128xf32> -> vector<32x128xf32>
    %664 = arith.addf %658, %663 : vector<32x128xf32>
    %c2_688 = arith.constant 2 : index
    %c17_689 = arith.constant 17 : index
    %c0_690 = arith.constant 0 : index
    %665 = vector.load %arg11[%c2_688, %c17_689, %c0_690] : memref<4x64x128xf32, #tpu.memory_space<vmem>>, vector<1x32x32xf32>
    %666 = vector.shape_cast %665 : vector<1x32x32xf32> to vector<32x32xf32>
    %c21_691 = arith.constant 21 : index
    %c0_692 = arith.constant 0 : index
    %c0_693 = arith.constant 0 : index
    %667 = vector.load %arg4[%c21_691, %c0_692, %c0_693] : memref<25x32x128xf32, #tpu.memory_space<vmem>>, vector<1x32x128xf32>
    %668 = vector.shape_cast %667 : vector<1x32x128xf32> to vector<32x128xf32>
    %cst_694 = arith.constant dense<0.000000e+00> : vector<32x128xf32>
    %669 = tpu.matmul %666, %668, %cst_694 {dimension_numbers = #tpu.dot_dimension_numbers<[1], [0], [0], [1], [0, 0, 1, 1], [], []>} : vector<32x32xf32>, vector<32x128xf32>, vector<32x128xf32> -> vector<32x128xf32>
    %670 = arith.addf %664, %669 : vector<32x128xf32>
    %c3_695 = arith.constant 3 : index
    %c17_696 = arith.constant 17 : index
    %c0_697 = arith.constant 0 : index
    %671 = vector.load %arg11[%c3_695, %c17_696, %c0_697] : memref<4x64x128xf32, #tpu.memory_space<vmem>>, vector<1x32x32xf32>
    %672 = vector.shape_cast %671 : vector<1x32x32xf32> to vector<32x32xf32>
    %c22_698 = arith.constant 22 : index
    %c0_699 = arith.constant 0 : index
    %c0_700 = arith.constant 0 : index
    %673 = vector.load %arg4[%c22_698, %c0_699, %c0_700] : memref<25x32x128xf32, #tpu.memory_space<vmem>>, vector<1x32x128xf32>
    %674 = vector.shape_cast %673 : vector<1x32x128xf32> to vector<32x128xf32>
    %cst_701 = arith.constant dense<0.000000e+00> : vector<32x128xf32>
    %675 = tpu.matmul %672, %674, %cst_701 {dimension_numbers = #tpu.dot_dimension_numbers<[1], [0], [0], [1], [0, 0, 1, 1], [], []>} : vector<32x32xf32>, vector<32x128xf32>, vector<32x128xf32> -> vector<32x128xf32>
    %676 = arith.addf %670, %675 : vector<32x128xf32>
    %c2_702 = arith.constant 2 : index
    %c18_703 = arith.constant 18 : index
    %c0_704 = arith.constant 0 : index
    %677 = vector.load %arg11[%c2_702, %c18_703, %c0_704] : memref<4x64x128xf32, #tpu.memory_space<vmem>>, vector<1x32x32xf32>
    %678 = vector.shape_cast %677 : vector<1x32x32xf32> to vector<32x32xf32>
    %c23_705 = arith.constant 23 : index
    %c0_706 = arith.constant 0 : index
    %c0_707 = arith.constant 0 : index
    %679 = vector.load %arg4[%c23_705, %c0_706, %c0_707] : memref<25x32x128xf32, #tpu.memory_space<vmem>>, vector<1x32x128xf32>
    %680 = vector.shape_cast %679 : vector<1x32x128xf32> to vector<32x128xf32>
    %cst_708 = arith.constant dense<0.000000e+00> : vector<32x128xf32>
    %681 = tpu.matmul %678, %680, %cst_708 {dimension_numbers = #tpu.dot_dimension_numbers<[1], [0], [0], [1], [0, 0, 1, 1], [], []>} : vector<32x32xf32>, vector<32x128xf32>, vector<32x128xf32> -> vector<32x128xf32>
    %682 = arith.addf %676, %681 : vector<32x128xf32>
    %c3_709 = arith.constant 3 : index
    %c18_710 = arith.constant 18 : index
    %c0_711 = arith.constant 0 : index
    %683 = vector.load %arg11[%c3_709, %c18_710, %c0_711] : memref<4x64x128xf32, #tpu.memory_space<vmem>>, vector<1x32x32xf32>
    %684 = vector.shape_cast %683 : vector<1x32x32xf32> to vector<32x32xf32>
    %c24_712 = arith.constant 24 : index
    %c0_713 = arith.constant 0 : index
    %c0_714 = arith.constant 0 : index
    %685 = vector.load %arg4[%c24_712, %c0_713, %c0_714] : memref<25x32x128xf32, #tpu.memory_space<vmem>>, vector<1x32x128xf32>
    %686 = vector.shape_cast %685 : vector<1x32x128xf32> to vector<32x128xf32>
    %cst_715 = arith.constant dense<0.000000e+00> : vector<32x128xf32>
    %687 = tpu.matmul %684, %686, %cst_715 {dimension_numbers = #tpu.dot_dimension_numbers<[1], [0], [0], [1], [0, 0, 1, 1], [], []>} : vector<32x32xf32>, vector<32x128xf32>, vector<32x128xf32> -> vector<32x128xf32>
    %688 = arith.addf %682, %687 : vector<32x128xf32>
    %689 = vector.broadcast %70 : vector<1x128xf32> to vector<32x128xf32>
    %690 = arith.addf %688, %689 : vector<32x128xf32>
    %cst_716 = arith.constant 0.000000e+00 : f32
    %691 = vector.broadcast %cst_716 : f32 to vector<32x128xf32>
    %692 = arith.maximumf %690, %691 : vector<32x128xf32>
    %693 = arith.maximumf %537, %692 : vector<32x128xf32>
    %c0_717 = arith.constant 0 : index
    %c0_718 = arith.constant 0 : index
    %694 = vector.load %arg7[%c0_717, %c0_718] : memref<1x512xf32, #tpu.memory_space<vmem>>, vector<1x512xf32>
    %695 = vector.extract_strided_slice %693 {offsets = [0, 0], sizes = [1, 64], strides = [1, 1]} : vector<32x128xf32> to vector<1x64xf32>
    %c0_719 = arith.constant 0 : index
    %c0_720 = arith.constant 0 : index
    %c0_721 = arith.constant 0 : index
    %696 = vector.load %arg6[%c0_719, %c0_720, %c0_721] : memref<16x64x512xf32, #tpu.memory_space<vmem>>, vector<1x64x512xf32>
    %697 = vector.shape_cast %696 : vector<1x64x512xf32> to vector<64x512xf32>
    %cst_722 = arith.constant dense<0.000000e+00> : vector<1x512xf32>
    %698 = tpu.matmul %695, %697, %cst_722 {dimension_numbers = #tpu.dot_dimension_numbers<[1], [0], [0], [1], [0, 0, 1, 1], [], []>} : vector<1x64xf32>, vector<64x512xf32>, vector<1x512xf32> -> vector<1x512xf32>
    %699 = arith.addf %694, %698 : vector<1x512xf32>
    %700 = vector.extract_strided_slice %693 {offsets = [1, 0], sizes = [1, 64], strides = [1, 1]} : vector<32x128xf32> to vector<1x64xf32>
    %c1_723 = arith.constant 1 : index
    %c0_724 = arith.constant 0 : index
    %c0_725 = arith.constant 0 : index
    %701 = vector.load %arg6[%c1_723, %c0_724, %c0_725] : memref<16x64x512xf32, #tpu.memory_space<vmem>>, vector<1x64x512xf32>
    %702 = vector.shape_cast %701 : vector<1x64x512xf32> to vector<64x512xf32>
    %cst_726 = arith.constant dense<0.000000e+00> : vector<1x512xf32>
    %703 = tpu.matmul %700, %702, %cst_726 {dimension_numbers = #tpu.dot_dimension_numbers<[1], [0], [0], [1], [0, 0, 1, 1], [], []>} : vector<1x64xf32>, vector<64x512xf32>, vector<1x512xf32> -> vector<1x512xf32>
    %704 = arith.addf %699, %703 : vector<1x512xf32>
    %705 = vector.extract_strided_slice %693 {offsets = [2, 0], sizes = [1, 64], strides = [1, 1]} : vector<32x128xf32> to vector<1x64xf32>
    %c2_727 = arith.constant 2 : index
    %c0_728 = arith.constant 0 : index
    %c0_729 = arith.constant 0 : index
    %706 = vector.load %arg6[%c2_727, %c0_728, %c0_729] : memref<16x64x512xf32, #tpu.memory_space<vmem>>, vector<1x64x512xf32>
    %707 = vector.shape_cast %706 : vector<1x64x512xf32> to vector<64x512xf32>
    %cst_730 = arith.constant dense<0.000000e+00> : vector<1x512xf32>
    %708 = tpu.matmul %705, %707, %cst_730 {dimension_numbers = #tpu.dot_dimension_numbers<[1], [0], [0], [1], [0, 0, 1, 1], [], []>} : vector<1x64xf32>, vector<64x512xf32>, vector<1x512xf32> -> vector<1x512xf32>
    %709 = arith.addf %704, %708 : vector<1x512xf32>
    %710 = vector.extract_strided_slice %693 {offsets = [3, 0], sizes = [1, 64], strides = [1, 1]} : vector<32x128xf32> to vector<1x64xf32>
    %c3_731 = arith.constant 3 : index
    %c0_732 = arith.constant 0 : index
    %c0_733 = arith.constant 0 : index
    %711 = vector.load %arg6[%c3_731, %c0_732, %c0_733] : memref<16x64x512xf32, #tpu.memory_space<vmem>>, vector<1x64x512xf32>
    %712 = vector.shape_cast %711 : vector<1x64x512xf32> to vector<64x512xf32>
    %cst_734 = arith.constant dense<0.000000e+00> : vector<1x512xf32>
    %713 = tpu.matmul %710, %712, %cst_734 {dimension_numbers = #tpu.dot_dimension_numbers<[1], [0], [0], [1], [0, 0, 1, 1], [], []>} : vector<1x64xf32>, vector<64x512xf32>, vector<1x512xf32> -> vector<1x512xf32>
    %714 = arith.addf %709, %713 : vector<1x512xf32>
    %715 = vector.extract_strided_slice %693 {offsets = [8, 0], sizes = [1, 64], strides = [1, 1]} : vector<32x128xf32> to vector<1x64xf32>
    %c4_735 = arith.constant 4 : index
    %c0_736 = arith.constant 0 : index
    %c0_737 = arith.constant 0 : index
    %716 = vector.load %arg6[%c4_735, %c0_736, %c0_737] : memref<16x64x512xf32, #tpu.memory_space<vmem>>, vector<1x64x512xf32>
    %717 = vector.shape_cast %716 : vector<1x64x512xf32> to vector<64x512xf32>
    %cst_738 = arith.constant dense<0.000000e+00> : vector<1x512xf32>
    %718 = tpu.matmul %715, %717, %cst_738 {dimension_numbers = #tpu.dot_dimension_numbers<[1], [0], [0], [1], [0, 0, 1, 1], [], []>} : vector<1x64xf32>, vector<64x512xf32>, vector<1x512xf32> -> vector<1x512xf32>
    %719 = arith.addf %714, %718 : vector<1x512xf32>
    %720 = vector.extract_strided_slice %693 {offsets = [9, 0], sizes = [1, 64], strides = [1, 1]} : vector<32x128xf32> to vector<1x64xf32>
    %c5_739 = arith.constant 5 : index
    %c0_740 = arith.constant 0 : index
    %c0_741 = arith.constant 0 : index
    %721 = vector.load %arg6[%c5_739, %c0_740, %c0_741] : memref<16x64x512xf32, #tpu.memory_space<vmem>>, vector<1x64x512xf32>
    %722 = vector.shape_cast %721 : vector<1x64x512xf32> to vector<64x512xf32>
    %cst_742 = arith.constant dense<0.000000e+00> : vector<1x512xf32>
    %723 = tpu.matmul %720, %722, %cst_742 {dimension_numbers = #tpu.dot_dimension_numbers<[1], [0], [0], [1], [0, 0, 1, 1], [], []>} : vector<1x64xf32>, vector<64x512xf32>, vector<1x512xf32> -> vector<1x512xf32>
    %724 = arith.addf %719, %723 : vector<1x512xf32>
    %725 = vector.extract_strided_slice %693 {offsets = [10, 0], sizes = [1, 64], strides = [1, 1]} : vector<32x128xf32> to vector<1x64xf32>
    %c6_743 = arith.constant 6 : index
    %c0_744 = arith.constant 0 : index
    %c0_745 = arith.constant 0 : index
    %726 = vector.load %arg6[%c6_743, %c0_744, %c0_745] : memref<16x64x512xf32, #tpu.memory_space<vmem>>, vector<1x64x512xf32>
    %727 = vector.shape_cast %726 : vector<1x64x512xf32> to vector<64x512xf32>
    %cst_746 = arith.constant dense<0.000000e+00> : vector<1x512xf32>
    %728 = tpu.matmul %725, %727, %cst_746 {dimension_numbers = #tpu.dot_dimension_numbers<[1], [0], [0], [1], [0, 0, 1, 1], [], []>} : vector<1x64xf32>, vector<64x512xf32>, vector<1x512xf32> -> vector<1x512xf32>
    %729 = arith.addf %724, %728 : vector<1x512xf32>
    %730 = vector.extract_strided_slice %693 {offsets = [11, 0], sizes = [1, 64], strides = [1, 1]} : vector<32x128xf32> to vector<1x64xf32>
    %c7_747 = arith.constant 7 : index
    %c0_748 = arith.constant 0 : index
    %c0_749 = arith.constant 0 : index
    %731 = vector.load %arg6[%c7_747, %c0_748, %c0_749] : memref<16x64x512xf32, #tpu.memory_space<vmem>>, vector<1x64x512xf32>
    %732 = vector.shape_cast %731 : vector<1x64x512xf32> to vector<64x512xf32>
    %cst_750 = arith.constant dense<0.000000e+00> : vector<1x512xf32>
    %733 = tpu.matmul %730, %732, %cst_750 {dimension_numbers = #tpu.dot_dimension_numbers<[1], [0], [0], [1], [0, 0, 1, 1], [], []>} : vector<1x64xf32>, vector<64x512xf32>, vector<1x512xf32> -> vector<1x512xf32>
    %734 = arith.addf %729, %733 : vector<1x512xf32>
    %735 = vector.extract_strided_slice %693 {offsets = [16, 0], sizes = [1, 64], strides = [1, 1]} : vector<32x128xf32> to vector<1x64xf32>
    %c8_751 = arith.constant 8 : index
    %c0_752 = arith.constant 0 : index
    %c0_753 = arith.constant 0 : index
    %736 = vector.load %arg6[%c8_751, %c0_752, %c0_753] : memref<16x64x512xf32, #tpu.memory_space<vmem>>, vector<1x64x512xf32>
    %737 = vector.shape_cast %736 : vector<1x64x512xf32> to vector<64x512xf32>
    %cst_754 = arith.constant dense<0.000000e+00> : vector<1x512xf32>
    %738 = tpu.matmul %735, %737, %cst_754 {dimension_numbers = #tpu.dot_dimension_numbers<[1], [0], [0], [1], [0, 0, 1, 1], [], []>} : vector<1x64xf32>, vector<64x512xf32>, vector<1x512xf32> -> vector<1x512xf32>
    %739 = arith.addf %734, %738 : vector<1x512xf32>
    %740 = vector.extract_strided_slice %693 {offsets = [17, 0], sizes = [1, 64], strides = [1, 1]} : vector<32x128xf32> to vector<1x64xf32>
    %c9_755 = arith.constant 9 : index
    %c0_756 = arith.constant 0 : index
    %c0_757 = arith.constant 0 : index
    %741 = vector.load %arg6[%c9_755, %c0_756, %c0_757] : memref<16x64x512xf32, #tpu.memory_space<vmem>>, vector<1x64x512xf32>
    %742 = vector.shape_cast %741 : vector<1x64x512xf32> to vector<64x512xf32>
    %cst_758 = arith.constant dense<0.000000e+00> : vector<1x512xf32>
    %743 = tpu.matmul %740, %742, %cst_758 {dimension_numbers = #tpu.dot_dimension_numbers<[1], [0], [0], [1], [0, 0, 1, 1], [], []>} : vector<1x64xf32>, vector<64x512xf32>, vector<1x512xf32> -> vector<1x512xf32>
    %744 = arith.addf %739, %743 : vector<1x512xf32>
    %745 = vector.extract_strided_slice %693 {offsets = [18, 0], sizes = [1, 64], strides = [1, 1]} : vector<32x128xf32> to vector<1x64xf32>
    %c10_759 = arith.constant 10 : index
    %c0_760 = arith.constant 0 : index
    %c0_761 = arith.constant 0 : index
    %746 = vector.load %arg6[%c10_759, %c0_760, %c0_761] : memref<16x64x512xf32, #tpu.memory_space<vmem>>, vector<1x64x512xf32>
    %747 = vector.shape_cast %746 : vector<1x64x512xf32> to vector<64x512xf32>
    %cst_762 = arith.constant dense<0.000000e+00> : vector<1x512xf32>
    %748 = tpu.matmul %745, %747, %cst_762 {dimension_numbers = #tpu.dot_dimension_numbers<[1], [0], [0], [1], [0, 0, 1, 1], [], []>} : vector<1x64xf32>, vector<64x512xf32>, vector<1x512xf32> -> vector<1x512xf32>
    %749 = arith.addf %744, %748 : vector<1x512xf32>
    %750 = vector.extract_strided_slice %693 {offsets = [19, 0], sizes = [1, 64], strides = [1, 1]} : vector<32x128xf32> to vector<1x64xf32>
    %c11_763 = arith.constant 11 : index
    %c0_764 = arith.constant 0 : index
    %c0_765 = arith.constant 0 : index
    %751 = vector.load %arg6[%c11_763, %c0_764, %c0_765] : memref<16x64x512xf32, #tpu.memory_space<vmem>>, vector<1x64x512xf32>
    %752 = vector.shape_cast %751 : vector<1x64x512xf32> to vector<64x512xf32>
    %cst_766 = arith.constant dense<0.000000e+00> : vector<1x512xf32>
    %753 = tpu.matmul %750, %752, %cst_766 {dimension_numbers = #tpu.dot_dimension_numbers<[1], [0], [0], [1], [0, 0, 1, 1], [], []>} : vector<1x64xf32>, vector<64x512xf32>, vector<1x512xf32> -> vector<1x512xf32>
    %754 = arith.addf %749, %753 : vector<1x512xf32>
    %755 = vector.extract_strided_slice %693 {offsets = [24, 0], sizes = [1, 64], strides = [1, 1]} : vector<32x128xf32> to vector<1x64xf32>
    %c12_767 = arith.constant 12 : index
    %c0_768 = arith.constant 0 : index
    %c0_769 = arith.constant 0 : index
    %756 = vector.load %arg6[%c12_767, %c0_768, %c0_769] : memref<16x64x512xf32, #tpu.memory_space<vmem>>, vector<1x64x512xf32>
    %757 = vector.shape_cast %756 : vector<1x64x512xf32> to vector<64x512xf32>
    %cst_770 = arith.constant dense<0.000000e+00> : vector<1x512xf32>
    %758 = tpu.matmul %755, %757, %cst_770 {dimension_numbers = #tpu.dot_dimension_numbers<[1], [0], [0], [1], [0, 0, 1, 1], [], []>} : vector<1x64xf32>, vector<64x512xf32>, vector<1x512xf32> -> vector<1x512xf32>
    %759 = arith.addf %754, %758 : vector<1x512xf32>
    %760 = vector.extract_strided_slice %693 {offsets = [25, 0], sizes = [1, 64], strides = [1, 1]} : vector<32x128xf32> to vector<1x64xf32>
    %c13_771 = arith.constant 13 : index
    %c0_772 = arith.constant 0 : index
    %c0_773 = arith.constant 0 : index
    %761 = vector.load %arg6[%c13_771, %c0_772, %c0_773] : memref<16x64x512xf32, #tpu.memory_space<vmem>>, vector<1x64x512xf32>
    %762 = vector.shape_cast %761 : vector<1x64x512xf32> to vector<64x512xf32>
    %cst_774 = arith.constant dense<0.000000e+00> : vector<1x512xf32>
    %763 = tpu.matmul %760, %762, %cst_774 {dimension_numbers = #tpu.dot_dimension_numbers<[1], [0], [0], [1], [0, 0, 1, 1], [], []>} : vector<1x64xf32>, vector<64x512xf32>, vector<1x512xf32> -> vector<1x512xf32>
    %764 = arith.addf %759, %763 : vector<1x512xf32>
    %765 = vector.extract_strided_slice %693 {offsets = [26, 0], sizes = [1, 64], strides = [1, 1]} : vector<32x128xf32> to vector<1x64xf32>
    %c14_775 = arith.constant 14 : index
    %c0_776 = arith.constant 0 : index
    %c0_777 = arith.constant 0 : index
    %766 = vector.load %arg6[%c14_775, %c0_776, %c0_777] : memref<16x64x512xf32, #tpu.memory_space<vmem>>, vector<1x64x512xf32>
    %767 = vector.shape_cast %766 : vector<1x64x512xf32> to vector<64x512xf32>
    %cst_778 = arith.constant dense<0.000000e+00> : vector<1x512xf32>
    %768 = tpu.matmul %765, %767, %cst_778 {dimension_numbers = #tpu.dot_dimension_numbers<[1], [0], [0], [1], [0, 0, 1, 1], [], []>} : vector<1x64xf32>, vector<64x512xf32>, vector<1x512xf32> -> vector<1x512xf32>
    %769 = arith.addf %764, %768 : vector<1x512xf32>
    %770 = vector.extract_strided_slice %693 {offsets = [27, 0], sizes = [1, 64], strides = [1, 1]} : vector<32x128xf32> to vector<1x64xf32>
    %c15_779 = arith.constant 15 : index
    %c0_780 = arith.constant 0 : index
    %c0_781 = arith.constant 0 : index
    %771 = vector.load %arg6[%c15_779, %c0_780, %c0_781] : memref<16x64x512xf32, #tpu.memory_space<vmem>>, vector<1x64x512xf32>
    %772 = vector.shape_cast %771 : vector<1x64x512xf32> to vector<64x512xf32>
    %cst_782 = arith.constant dense<0.000000e+00> : vector<1x512xf32>
    %773 = tpu.matmul %770, %772, %cst_782 {dimension_numbers = #tpu.dot_dimension_numbers<[1], [0], [0], [1], [0, 0, 1, 1], [], []>} : vector<1x64xf32>, vector<64x512xf32>, vector<1x512xf32> -> vector<1x512xf32>
    %774 = arith.addf %769, %773 : vector<1x512xf32>
    %cst_783 = arith.constant 0.000000e+00 : f32
    %775 = vector.broadcast %cst_783 : f32 to vector<1x512xf32>
    %776 = arith.maximumf %774, %775 : vector<1x512xf32>
    %c0_784 = arith.constant 0 : index
    %c0_785 = arith.constant 0 : index
    %777 = vector.load %arg8[%c0_784, %c0_785] : memref<512x128xf32, #tpu.memory_space<vmem>>, vector<512x128xf32>
    %cst_786 = arith.constant dense<0.000000e+00> : vector<1x128xf32>
    %778 = tpu.matmul %776, %777, %cst_786 {dimension_numbers = #tpu.dot_dimension_numbers<[1], [0], [0], [1], [0, 0, 1, 1], [], []>} : vector<1x512xf32>, vector<512x128xf32>, vector<1x128xf32> -> vector<1x128xf32>
    %c0_787 = arith.constant 0 : index
    %c0_788 = arith.constant 0 : index
    %779 = vector.load %arg9[%c0_787, %c0_788] : memref<1x128xf32, #tpu.memory_space<vmem>>, vector<1x128xf32>
    %780 = arith.addf %778, %779 : vector<1x128xf32>
    %cst_789 = arith.constant dense<0xFF800000> : vector<1xf32>
    %781 = vector.multi_reduction <maximumf>, %780, %cst_789 [1] : vector<1x128xf32> to vector<1xf32>
    %782 = vector.shape_cast %781 : vector<1xf32> to vector<1x1xf32>
    %783 = vector.broadcast %782 : vector<1x1xf32> to vector<1x128xf32>
    %784 = arith.subf %780, %783 : vector<1x128xf32>
    %785 = math.exp %784 : vector<1x128xf32>
    %cst_790 = arith.constant dense<0.000000e+00> : vector<1xf32>
    %786 = vector.multi_reduction <add>, %785, %cst_790 [1] : vector<1x128xf32> to vector<1xf32>
    %787 = vector.shape_cast %786 : vector<1xf32> to vector<1x1xf32>
    %788 = math.log %787 : vector<1x1xf32>
    %789 = vector.broadcast %788 : vector<1x1xf32> to vector<1x128xf32>
    %790 = arith.subf %784, %789 : vector<1x128xf32>
    %c0_791 = arith.constant 0 : index
    %c0_792 = arith.constant 0 : index
    %c0_793 = arith.constant 0 : index
    %791 = vector.load %arg10[%c0_791, %c0_792, %c0_793] : memref<1x1x128xf32, #tpu.memory_space<vmem>>, vector<1x1x128xf32>
    %792 = vector.shape_cast %791 : vector<1x1x128xf32> to vector<1x128xf32>
    %793 = vector.shape_cast %790 : vector<1x128xf32> to vector<1x1x128xf32>
    tpu.vector_store %arg10[%c0_791, %c0_792, %c0_793], %793 {strides = array<i32>} : memref<1x1x128xf32, #tpu.memory_space<vmem>>, vector<1x1x128xf32>,
    return
  }
  func.func @transform_0(%arg0: i32) -> (i32, i32, i32) {
    %c0_i32 = arith.constant 0 : i32
    %c0_i32_0 = arith.constant 0 : i32
    %c0_i32_1 = arith.constant 0 : i32
    return %arg0, %c0_i32, %c0_i32_0 : i32, i32, i32
  }
  func.func @transform_1(%arg0: i32) -> (i32, i32) {
    %c0_i32 = arith.constant 0 : i32
    %c0_i32_0 = arith.constant 0 : i32
    %c0_i32_1 = arith.constant 0 : i32
    return %c0_i32, %c0_i32_0 : i32, i32
  }
  func.func @transform_2(%arg0: i32) -> (i32, i32) {
    %c0_i32 = arith.constant 0 : i32
    %c0_i32_0 = arith.constant 0 : i32
    %c0_i32_1 = arith.constant 0 : i32
    return %c0_i32, %c0_i32_0 : i32, i32
  }
  func.func @transform_3(%arg0: i32) -> (i32, i32, i32) {
    %c0_i32 = arith.constant 0 : i32
    %c0_i32_0 = arith.constant 0 : i32
    %c0_i32_1 = arith.constant 0 : i32
    %c0_i32_2 = arith.constant 0 : i32
    return %c0_i32, %c0_i32_0, %c0_i32_1 : i32, i32, i32
  }
  func.func @transform_4(%arg0: i32) -> (i32, i32) {
    %c0_i32 = arith.constant 0 : i32
    %c0_i32_0 = arith.constant 0 : i32
    %c0_i32_1 = arith.constant 0 : i32
    return %c0_i32, %c0_i32_0 : i32, i32
  }
  func.func @transform_5(%arg0: i32) -> (i32, i32, i32) {
    %c0_i32 = arith.constant 0 : i32
    %c0_i32_0 = arith.constant 0 : i32
    %c0_i32_1 = arith.constant 0 : i32
    %c0_i32_2 = arith.constant 0 : i32
    return %c0_i32, %c0_i32_0, %c0_i32_1 : i32, i32, i32
  }
  func.func @transform_6(%arg0: i32) -> (i32, i32) {
    %c0_i32 = arith.constant 0 : i32
    %c0_i32_0 = arith.constant 0 : i32
    %c0_i32_1 = arith.constant 0 : i32
    return %c0_i32, %c0_i32_0 : i32, i32
  }
  func.func @transform_7(%arg0: i32) -> (i32, i32) {
    %c0_i32 = arith.constant 0 : i32
    %c0_i32_0 = arith.constant 0 : i32
    %c0_i32_1 = arith.constant 0 : i32
    return %c0_i32, %c0_i32_0 : i32, i32
  }
  func.func @transform_8(%arg0: i32) -> (i32, i32) {
    %c0_i32 = arith.constant 0 : i32
    %c0_i32_0 = arith.constant 0 : i32
    %c0_i32_1 = arith.constant 0 : i32
    return %c0_i32, %c0_i32_0 : i32, i32
  }
  func.func @transform_9(%arg0: i32) -> (i32, i32, i32) {
    %c0_i32 = arith.constant 0 : i32
    %c0_i32_0 = arith.constant 0 : i32
    %c0_i32_1 = arith.constant 0 : i32
    return %arg0, %c0_i32, %c0_i32_0 : i32, i32, i32
  }
}

</mosaic_0001>

<bundles_post_ra>
// kernel: net_forward.1
= control target key start
LH: loop header
LB: loop body
LE: loop exit
PB: predicated region body
PF: predicated region fallthrough
CT: control target
= control target key end

     0   :  { %14 = vsyncpa [#allocation4], 0  ;;  %s25358_s0 = inlined_call_operand.vmem [shape: f32[2,1024,32], index: 0, kind: input, shape index: {}]   ;;  %s25359_s1 = inlined_call_operand.vmem [shape: f32[32,128], index: 1, kind: input, shape index: {}]   ;;  %s25360_s2 = inlined_call_operand.vmem [shape: f32[1,128], index: 2, kind: input, shape index: {}]   ;;  %s25361_s3 = inlined_call_operand.vmem [shape: f32[25,32,128], index: 3, kind: input, shape index: {}]   ;;  %s25362_s4 = inlined_call_operand.vmem [shape: f32[1,128], index: 4, kind: input, shape index: {}]   ;;  %s25363_s5 = inlined_call_operand.vmem [shape: f32[16,64,512], index: 5, kind: input, shape index: {}]   ;;  %s25364_s6 = inlined_call_operand.vmem [shape: f32[1,512], index: 6, kind: input, shape index: {}]   ;;  %s25365_s7 = inlined_call_operand.vmem [shape: f32[512,128], index: 7, kind: input, shape index: {}]   ;;  %s25366_s8 = inlined_call_operand.vmem [shape: f32[1,128], index: 8, kind: input, shape index: {}]   ;;  %s25367_s9 = inlined_call_operand.hbm [shape: f32[2,1,128], index: 9, kind: output, shape index: {}]  }
   0x1   :  { %16 = vsyncpa [#allocation4 + $0x1], 0  ;;  %s21054_s30 = smov 0   ;;  %s21056_s10 = smov 0  }
   0x2   :  { %s21058_s11 = smov 0   ;;  %s21060_s12 = smov 0  }
   0x3 LB: > { %s21075_s13 = sadd.s32 4294967295, %s20999_s12   ;;  %s15270_s14 = sadd.s32 4294967294, %s20999_s12   ;;  %s20999_s12 = sphi %s21060_s12, %s25538_s12   ;;  %s20995_s11 = sphi %s21058_s11, %s25537_s11   ;;  %s20991_s10 = sphi %s21056_s10, %s25536_s10   ;;  %s20987_s30 = sphi %s21054_s30, %s25535_s30  }
   0x4   : > { %s21079_s15 = sadd.s32 1, %s20999_s12   ;;  %s223_s16 = sadd.s32 1, %s20995_s11 }
   0x5   : > { %s220_s17 = ssub.s32 %s20999_s12, %s21079_s15  ;;  %p233_p0 = scmp.ne.s32.totalorder %s20995_s11, %s20991_s10 }
   0x6   : > { %p221_p1 = scmp.eq.s32.totalorder %s220_s17, 0  ;;  %p234_p2 = scmp.eq.s32.totalorder %s21075_s13, 1 }
   0x7   : > { %p239_p3 = scmp.ne.s32.totalorder %s20991_s10, %s20987_s30  ;;  %p240_p4 = scmp.eq.s32.totalorder %s15270_s14, 1 }
   0x8   : > { %s21090_s18 = scalar_select %p221_p1, %s20995_s11, %s223_s16  }
   0x9   : > { %p21092_p5 = por %p234_p2, %p233_p0  ;;  %p21096_p6 = por %p240_p4, %p239_p3 }
   0xa   : > { %p15273_p7 = scmp.ge.s32.totalorder %s20999_s12, 1  ;;  %p290_p8 = scmp.lt.s32.totalorder %s20999_s12, 3 }
   0xc   : > { %p291_p9 = pnand %p15273_p7, %p290_p8 }
   0xe   : > { %294 = sbr.rel (%p291_p9) target bundleno = 1959 (0x7a7), region = 56 }
  0x15   : > { %v330_v0 = vld [vmem:[%s25359_s1] sm:$0xff]  ;;  %v331_v1 = vld [vmem:[%s25359_s1 + $0x8] sm:$0xff]  ;;  %v332_v2 = vld [vmem:[%s25359_s1 + $0x10] sm:$0xff]  ;;  %p325_p10 = scmp.lt.s32.totalorder %s21075_s13, 1  ;;  %vm373_vm0 = vcmask 261120   ;;  %vm11665_vm1 = vcmask 523264  }
  0x16   : > { %v19056_v3 = vpack.c.bf16 %v331_v1, %v330_v0  ;;  %v333_v4 = vld [vmem:[%s25359_s1 + $0x18] sm:$0xff]  ;;  %vm15188_vm2 = vcmask 1040384   ;;  %s323_s28 = sand.u32 1, %s20991_s10  }
  0x17   : > { %v19060_v5 = vpack.c.bf16 %v333_v4, %v332_v2  ;;  %s326_s29 = scalar_select %p325_p10, %s21075_s13, 1 }
  0x18   : > { %19057 = vmatprep.subr.bf16.mxu0 %v19056_v3  ;;  %19065 = vmatprep.subr.bf16.mxu1 %v19056_v3  ;;  %s15203_s23 = scalar_lea.sflag [#allocation4], %s323_s28 }
  0x19   : > { %19059 = vmatpush3.bf16.msra.mxu0 %v19056_v3  ;;  %19067 = vmatpush3.bf16.msra.mxu1 %v19056_v3  ;;  %s16417_s14 = sshll.u32 %s326_s29, 10  ;;  %s16414_s29 = sshll.u32 %s21075_s13, 4 }
  0x1a   : > { %19061 = vmatprep.subr.bf16.mxu0 %v19060_v5  ;;  %19069 = vmatprep.subr.bf16.mxu1 %v19060_v5  ;;  %s21119_s21 = scalar_lea.vmem %s25358_s0, %s16417_s14  ;;  %s324_s14 = scalar_lea.vmem [#allocation3], %s323_s28 }
  0x1b   : > { %v335_v6 = vld [vmem:[%s21119_s21] sm:$0xff]  ;;  %v336_v8 = vld [vmem:[%s21119_s21 + $0x8] sm:$0xff]  ;;  %v337_v10 = vld [vmem:[%s21119_s21 + $0x10] sm:$0xff]  ;;  %s15215_s16 = sshll.u32 %s324_s14, 4  ;;  %s25316_s22 = scalar_lea.hbm %s25367_s9, %s16414_s29  ;;  %s25318_s16 = int_to_ptr.vmem [resolvable:$true] %s15215_s16 }
  0x1c   : > { %v759_v7 = vld [vmem:[%s21119_s21 + $0x100] sm:$0xff]  ;;  %17440 = vmatprep.mubr.msk.f32.mxu0 %vm373_vm0, %v335_v6  ;;  %v760_v9 = vld [vmem:[%s21119_s21 + $0x108] sm:$0xff]  ;;  %v761_v11 = vld [vmem:[%s21119_s21 + $0x110] sm:$0xff]  ;;  %s20937_s24 = scalar_lea.vmem %s25318_s16, 16  ;;  %s21003_s13 = smov [#allocation3]  }
  0x1d   : > { %17496 = vmatprep.mubr.msk.f32.mxu1 %vm373_vm0, %v759_v7  ;;  %19063 = vmatpush3.bf16.msra.mxu0 %v19060_v5  ;;  %v338_v12 = vld [vmem:[%s21119_s21 + $0x18] sm:$0xff]  ;;  %v339_v14 = vld [vmem:[%s21119_s21 + $0x20] sm:$0xff]  ;;  %v340_v16 = vld [vmem:[%s21119_s21 + $0x28] sm:$0xff]  ;;  %p20938_p11 = scmp.ne.s32.totalorder %s25318_s16, %s20937_s24  ;;  %s20941_s25 = sshll.u32 %s21003_s13, 4  ;;  %s20942_s25 = int_to_ptr.vmem [resolvable:$false] %s20941_s25 }
  0x1e   : > { %19071 = vmatpush3.bf16.msra.mxu1 %v19060_v5  ;;  %19073 = vmatprep.subr.bf16.mxu0 %v19056_v3  ;;  %v762_v13 = vld [vmem:[%s21119_s21 + $0x118] sm:$0xff]  ;;  %v763_v15 = vld [vmem:[%s21119_s21 + $0x120] sm:$0xff]  ;;  %v764_v17 = vld [vmem:[%s21119_s21 + $0x128] sm:$0xff]  ;;  %s20943_s26 = scalar_lea.vmem %s20942_s25, 32  ;;  %p20944_p0 = scmp.lt.s32.totalorder %s25318_s16, %s20942_s25 }
  0x1f   : > { %19081 = vmatprep.subr.bf16.mxu1 %v19056_v3  ;;  %v341_v18 = vld [vmem:[%s21119_s21 + $0x30] sm:$0xff]  ;;  %v342_v20 = vld [vmem:[%s21119_s21 + $0x38] sm:$0xff]  ;;  %v343_v22 = vld [vmem:[%s21119_s21 + $0x40] sm:$0xff]  ;;  %p20939_p12 = pnand %p20938_p11, %p21092_p5  ;;  %p20945_p1 = scmp.lt.s32.totalorder %s20943_s26, %s20937_s24 }
  0x20   : > { %17441 = vmatmul.mubr.msk.f32.vlgmr.msra.gmra.mrb[0].mxu0 %vm373_vm0, %v336_v8  ;;  %v765_v19 = vld [vmem:[%s21119_s21 + $0x130] sm:$0xff]  ;;  %v766_v21 = vld [vmem:[%s21119_s21 + $0x138] sm:$0xff]  ;;  %v767_v23 = vld [vmem:[%s21119_s21 + $0x140] sm:$0xff] }
  0x21   : > { %17497 = vmatmul.mubr.msk.f32.vlgmr.msra.gmra.mrb[0].mxu1 %vm373_vm0, %v760_v9  ;;  %19075 = vmatpush3.bf16.msra.mxu0 %v19056_v3  ;;  %v344_v24 = vld [vmem:[%s21119_s21 + $0x48] sm:$0xff]  ;;  %v345_v26 = vld [vmem:[%s21119_s21 + $0x50] sm:$0xff]  ;;  %v346_v28 = vld [vmem:[%s21119_s21 + $0x58] sm:$0xff]  ;;  %p20940_p13 = pneg %p20939_p12  ;;  %p20946_p2 = por %p20945_p1, %p20944_p0 }
  0x22   : > { %17443 = vmatprep.mubr.msk.f32.mxu0 %vm373_vm0, %v337_v10  ;;  %17499 = vmatprep.mubr.msk.f32.mxu1 %vm373_vm0, %v761_v11  ;;  %v768_v25 = vld [vmem:[%s21119_s21 + $0x148] sm:$0xff]  ;;  %v769_v27 = vld [vmem:[%s21119_s21 + $0x150] sm:$0xff]  ;;  %v770_v29 = vld [vmem:[%s21119_s21 + $0x158] sm:$0xff] }
  0x23   : > { %19083 = vmatpush3.bf16.msra.mxu1 %v19056_v3  ;;  %19077 = vmatprep.subr.bf16.mxu0 %v19060_v5  ;;  %v347_v30 = vld [vmem:[%s21119_s21 + $0x60] sm:$0xff]  ;;  %v348_v32 = vld [vmem:[%s21119_s21 + $0x68] sm:$0xff]  ;;  %v349_v34 = vld [vmem:[%s21119_s21 + $0x70] sm:$0xff]  ;;  %p20947_p3 = pnand %p20946_p2, %p20940_p13 }
  0x24   : > { %19085 = vmatprep.subr.bf16.mxu1 %v19060_v5  ;;  %17444 = vmatmul.mubr.msk.f32.gmra.mrb[2].mxu0 %vm373_vm0, %v338_v12  ;;  %v771_v31 = vld [vmem:[%s21119_s21 + $0x160] sm:$0xff]  ;;  %v772_v33 = vld [vmem:[%s21119_s21 + $0x168] sm:$0xff]  ;;  %v773_v35 = vld [vmem:[%s21119_s21 + $0x170] sm:$0xff] }
  0x25   : > { %17500 = vmatmul.mubr.msk.f32.gmra.mrb[2].mxu1 %vm373_vm0, %v762_v13  ;;  %17446 = vmatprep.mubr.msk.f32.mxu0 %vm373_vm0, %v339_v14  ;;  %v350_v36 = vld [vmem:[%s21119_s21 + $0x78] sm:$0xff]  ;;  %v351_v38 = vld [vmem:[%s21119_s21 + $0x80] sm:$0xff]  ;;  %v352_v40 = vld [vmem:[%s21119_s21 + $0x88] sm:$0xff] }
  0x26   : > { %17502 = vmatprep.mubr.msk.f32.mxu1 %vm373_vm0, %v763_v15  ;;  %19079 = vmatpush3.bf16.msra.mxu0 %v19060_v5  ;;  %v774_v37 = vld [vmem:[%s21119_s21 + $0x178] sm:$0xff]  ;;  %v775_v39 = vld [vmem:[%s21119_s21 + $0x180] sm:$0xff]  ;;  %v776_v41 = vld [vmem:[%s21119_s21 + $0x188] sm:$0xff] }
  0x27   : > { %19087 = vmatpush3.bf16.msra.mxu1 %v19060_v5  ;;  %v353_v42 = vld [vmem:[%s21119_s21 + $0x90] sm:$0xff]  ;;  %v354_v44 = vld [vmem:[%s21119_s21 + $0x98] sm:$0xff]  ;;  %v355_v46 = vld [vmem:[%s21119_s21 + $0xa0] sm:$0xff] }
  0x28   : > { %17447 = vmatmul.mubr.msk.f32.gmra.mrb[4].mxu0 %vm373_vm0, %v340_v16  ;;  %v777_v43 = vld [vmem:[%s21119_s21 + $0x190] sm:$0xff]  ;;  %v778_v45 = vld [vmem:[%s21119_s21 + $0x198] sm:$0xff]  ;;  %v779_v47 = vld [vmem:[%s21119_s21 + $0x1a0] sm:$0xff] }
  0x29   : > { %17503 = vmatmul.mubr.msk.f32.gmra.mrb[4].mxu1 %vm373_vm0, %v764_v17  ;;  %17449 = vmatprep.mubr.msk.f32.mxu0 %vm373_vm0, %v341_v18  ;;  %v356_v48 = vld [vmem:[%s21119_s21 + $0xa8] sm:$0xff]  ;;  %v357_v50 = vld [vmem:[%s21119_s21 + $0xb0] sm:$0xff]  ;;  %v358_v52 = vld [vmem:[%s21119_s21 + $0xb8] sm:$0xff] }
  0x2a   : > { %17505 = vmatprep.mubr.msk.f32.mxu1 %vm373_vm0, %v765_v19  ;;  %v780_v49 = vld [vmem:[%s21119_s21 + $0x1a8] sm:$0xff]  ;;  %v781_v51 = vld [vmem:[%s21119_s21 + $0x1b0] sm:$0xff]  ;;  %v782_v53 = vld [vmem:[%s21119_s21 + $0x1b8] sm:$0xff] }
  0x2b   : > { %v359_v54 = vld [vmem:[%s21119_s21 + $0xc0] sm:$0xff]  ;;  %v360_v56 = vld [vmem:[%s21119_s21 + $0xc8] sm:$0xff]  ;;  %v361_v58 = vld [vmem:[%s21119_s21 + $0xd0] sm:$0xff] }
  0x2c   : > { %17450 = vmatmul.mubr.msk.f32.gmra.mrb[6].mxu0 %vm373_vm0, %v342_v20  ;;  %v783_v55 = vld [vmem:[%s21119_s21 + $0x1c0] sm:$0xff]  ;;  %v784_v57 = vld [vmem:[%s21119_s21 + $0x1c8] sm:$0xff]  ;;  %v785_v59 = vld [vmem:[%s21119_s21 + $0x1d0] sm:$0xff] }
  0x2d   : > { %17506 = vmatmul.mubr.msk.f32.gmra.mrb[6].mxu1 %vm373_vm0, %v766_v21  ;;  %17452 = vmatprep.mubr.msk.f32.mxu0 %vm373_vm0, %v343_v22  ;;  %v362_v60 = vld [vmem:[%s21119_s21 + $0xd8] sm:$0xff]  ;;  %v363_v62 = vld [vmem:[%s21119_s21 + $0xe0] sm:$0xff]  ;;  %v364_v0 = vld [vmem:[%s21119_s21 + $0xe8] sm:$0xff] }
  0x2e   : > { %17508 = vmatprep.mubr.msk.f32.mxu1 %vm373_vm0, %v767_v23  ;;  %v786_v61 = vld [vmem:[%s21119_s21 + $0x1d8] sm:$0xff]  ;;  %v787_v63 = vld [vmem:[%s21119_s21 + $0x1e0] sm:$0xff]  ;;  %v788_v1 = vld [vmem:[%s21119_s21 + $0x1e8] sm:$0xff] }
  0x2f   : > { %v365_v2 = vld [vmem:[%s21119_s21 + $0xf0] sm:$0xff]  ;;  %v366_v4 = vld [vmem:[%s21119_s21 + $0xf8] sm:$0xff]  ;;  %v1177_v6 = vld [vmem:[%s21119_s21 + $0x200] sm:$0xff] }
  0x30   : > { %17453 = vmatmul.mubr.msk.f32.gmra.mrb[8].mxu0 %vm373_vm0, %v344_v24  ;;  %v789_v3 = vld [vmem:[%s21119_s21 + $0x1f0] sm:$0xff]  ;;  %v790_v5 = vld [vmem:[%s21119_s21 + $0x1f8] sm:$0xff]  ;;  %v1595_v7 = vld [vmem:[%s21119_s21 + $0x300] sm:$0xff] }
  0x31   : > { %17509 = vmatmul.mubr.msk.f32.gmra.mrb[8].mxu1 %vm373_vm0, %v768_v25  ;;  %17455 = vmatprep.mubr.msk.f32.mxu0 %vm373_vm0, %v345_v26  ;;  %v1178_v8 = vld [vmem:[%s21119_s21 + $0x208] sm:$0xff]  ;;  %v1179_v10 = vld [vmem:[%s21119_s21 + $0x210] sm:$0xff]  ;;  %v1180_v12 = vld [vmem:[%s21119_s21 + $0x218] sm:$0xff] }
  0x32   : > { %17511 = vmatprep.mubr.msk.f32.mxu1 %vm373_vm0, %v769_v27  ;;  %v1596_v9 = vld [vmem:[%s21119_s21 + $0x308] sm:$0xff]  ;;  %v1597_v11 = vld [vmem:[%s21119_s21 + $0x310] sm:$0xff]  ;;  %v1598_v13 = vld [vmem:[%s21119_s21 + $0x318] sm:$0xff] }
  0x33   : > { %v1181_v14 = vld [vmem:[%s21119_s21 + $0x220] sm:$0xff]  ;;  %v1182_v16 = vld [vmem:[%s21119_s21 + $0x228] sm:$0xff]  ;;  %v1183_v18 = vld [vmem:[%s21119_s21 + $0x230] sm:$0xff] }
  0x34   : > { %17456 = vmatmul.mubr.msk.f32.gmra.mrb[10].mxu0 %vm373_vm0, %v346_v28  ;;  %v1599_v15 = vld [vmem:[%s21119_s21 + $0x320] sm:$0xff]  ;;  %v1600_v17 = vld [vmem:[%s21119_s21 + $0x328] sm:$0xff]  ;;  %v1601_v19 = vld [vmem:[%s21119_s21 + $0x330] sm:$0xff] }
  0x35   : > { %17512 = vmatmul.mubr.msk.f32.gmra.mrb[10].mxu1 %vm373_vm0, %v770_v29  ;;  %17458 = vmatprep.mubr.msk.f32.mxu0 %vm373_vm0, %v347_v30  ;;  %v1184_v20 = vld [vmem:[%s21119_s21 + $0x238] sm:$0xff]  ;;  %v1185_v22 = vld [vmem:[%s21119_s21 + $0x240] sm:$0xff]  ;;  %v1186_v24 = vld [vmem:[%s21119_s21 + $0x248] sm:$0xff] }
  0x36   : > { %17514 = vmatprep.mubr.msk.f32.mxu1 %vm373_vm0, %v771_v31  ;;  %v1602_v21 = vld [vmem:[%s21119_s21 + $0x338] sm:$0xff]  ;;  %v1603_v23 = vld [vmem:[%s21119_s21 + $0x340] sm:$0xff]  ;;  %v1604_v25 = vld [vmem:[%s21119_s21 + $0x348] sm:$0xff] }
  0x37   : > { %v1187_v26 = vld [vmem:[%s21119_s21 + $0x250] sm:$0xff]  ;;  %v1188_v28 = vld [vmem:[%s21119_s21 + $0x258] sm:$0xff]  ;;  %v1189_v30 = vld [vmem:[%s21119_s21 + $0x260] sm:$0xff] }
  0x38   : > { %17459 = vmatmul.mubr.msk.f32.gmra.mrb[12].mxu0 %vm373_vm0, %v348_v32  ;;  %v1605_v27 = vld [vmem:[%s21119_s21 + $0x350] sm:$0xff]  ;;  %v1606_v29 = vld [vmem:[%s21119_s21 + $0x358] sm:$0xff]  ;;  %v1607_v31 = vld [vmem:[%s21119_s21 + $0x360] sm:$0xff] }
  0x39   : > { %17515 = vmatmul.mubr.msk.f32.gmra.mrb[12].mxu1 %vm373_vm0, %v772_v33  ;;  %17461 = vmatprep.mubr.msk.f32.mxu0 %vm373_vm0, %v349_v34  ;;  %v1190_v32 = vld [vmem:[%s21119_s21 + $0x268] sm:$0xff]  ;;  %v1191_v34 = vld [vmem:[%s21119_s21 + $0x270] sm:$0xff] }
  0x3a   : > { %17517 = vmatprep.mubr.msk.f32.mxu1 %vm373_vm0, %v773_v35  ;;  %v1608_v33 = vld [vmem:[%s21119_s21 + $0x368] sm:$0xff]  ;;  %v1609_v35 = vld [vmem:[%s21119_s21 + $0x370] sm:$0xff] }
  0x3c   : > { %17462 = vmatmul.mubr.msk.f32.gmra.mrb[14].mxu0 %vm373_vm0, %v350_v36  ;;  %v1192_v36 = vld [vmem:[%s21119_s21 + $0x278] sm:$0xff] }
  0x3d   : > { %17518 = vmatmul.mubr.msk.f32.gmra.mrb[14].mxu1 %vm373_vm0, %v774_v37  ;;  %17464 = vmatprep.mubr.msk.f32.mxu0 %vm373_vm0, %v351_v38  ;;  %v1610_v37 = vld [vmem:[%s21119_s21 + $0x378] sm:$0xff]  ;;  %v1193_v38 = vld [vmem:[%s21119_s21 + $0x280] sm:$0xff] }
  0x3e   : > { %17520 = vmatprep.mubr.msk.f32.mxu1 %vm373_vm0, %v775_v39  ;;  %v1611_v39 = vld [vmem:[%s21119_s21 + $0x380] sm:$0xff] }
  0x40   : > { %17465 = vmatmul.mubr.msk.f32.gmra.mrb[16].mxu0 %vm373_vm0, %v352_v40  ;;  %v1194_v40 = vld [vmem:[%s21119_s21 + $0x288] sm:$0xff] }
  0x41   : > { %17521 = vmatmul.mubr.msk.f32.gmra.mrb[16].mxu1 %vm373_vm0, %v776_v41  ;;  %17467 = vmatprep.mubr.msk.f32.mxu0 %vm373_vm0, %v353_v42  ;;  %v1612_v41 = vld [vmem:[%s21119_s21 + $0x388] sm:$0xff]  ;;  %v1195_v42 = vld [vmem:[%s21119_s21 + $0x290] sm:$0xff] }
  0x42   : > { %17523 = vmatprep.mubr.msk.f32.mxu1 %vm373_vm0, %v777_v43  ;;  %v1613_v43 = vld [vmem:[%s21119_s21 + $0x390] sm:$0xff] }
  0x44   : > { %17468 = vmatmul.mubr.msk.f32.gmra.mrb[18].mxu0 %vm373_vm0, %v354_v44  ;;  %v1196_v44 = vld [vmem:[%s21119_s21 + $0x298] sm:$0xff] }
  0x45   : > { %17524 = vmatmul.mubr.msk.f32.gmra.mrb[18].mxu1 %vm373_vm0, %v778_v45  ;;  %17470 = vmatprep.mubr.msk.f32.mxu0 %vm373_vm0, %v355_v46  ;;  %v1614_v45 = vld [vmem:[%s21119_s21 + $0x398] sm:$0xff]  ;;  %v1197_v46 = vld [vmem:[%s21119_s21 + $0x2a0] sm:$0xff] }
  0x46   : > { %17526 = vmatprep.mubr.msk.f32.mxu1 %vm373_vm0, %v779_v47  ;;  %v1615_v47 = vld [vmem:[%s21119_s21 + $0x3a0] sm:$0xff] }
  0x48   : > { %17471 = vmatmul.mubr.msk.f32.gmra.mrb[20].mxu0 %vm373_vm0, %v356_v48  ;;  %v1198_v48 = vld [vmem:[%s21119_s21 + $0x2a8] sm:$0xff] }
  0x49   : > { %17527 = vmatmul.mubr.msk.f32.gmra.mrb[20].mxu1 %vm373_vm0, %v780_v49  ;;  %17473 = vmatprep.mubr.msk.f32.mxu0 %vm373_vm0, %v357_v50  ;;  %v1616_v49 = vld [vmem:[%s21119_s21 + $0x3a8] sm:$0xff]  ;;  %v1199_v50 = vld [vmem:[%s21119_s21 + $0x2b0] sm:$0xff] }
  0x4a   : > { %17529 = vmatprep.mubr.msk.f32.mxu1 %vm373_vm0, %v781_v51  ;;  %v1617_v51 = vld [vmem:[%s21119_s21 + $0x3b0] sm:$0xff] }
  0x4c   : > { %17474 = vmatmul.mubr.msk.f32.gmra.mrb[22].mxu0 %vm373_vm0, %v358_v52  ;;  %v1200_v52 = vld [vmem:[%s21119_s21 + $0x2b8] sm:$0xff] }
  0x4d   : > { %17530 = vmatmul.mubr.msk.f32.gmra.mrb[22].mxu1 %vm373_vm0, %v782_v53  ;;  %17476 = vmatprep.mubr.msk.f32.mxu0 %vm373_vm0, %v359_v54  ;;  %v1618_v53 = vld [vmem:[%s21119_s21 + $0x3b8] sm:$0xff]  ;;  %v1201_v54 = vld [vmem:[%s21119_s21 + $0x2c0] sm:$0xff] }
  0x4e   : > { %17532 = vmatprep.mubr.msk.f32.mxu1 %vm373_vm0, %v783_v55  ;;  %v1619_v55 = vld [vmem:[%s21119_s21 + $0x3c0] sm:$0xff] }
  0x50   : > { %17477 = vmatmul.mubr.msk.f32.gmra.mrb[24].mxu0 %vm373_vm0, %v360_v56  ;;  %v1202_v56 = vld [vmem:[%s21119_s21 + $0x2c8] sm:$0xff] }
  0x51   : > { %17533 = vmatmul.mubr.msk.f32.gmra.mrb[24].mxu1 %vm373_vm0, %v784_v57  ;;  %17479 = vmatprep.mubr.msk.f32.mxu0 %vm373_vm0, %v361_v58  ;;  %v1620_v57 = vld [vmem:[%s21119_s21 + $0x3c8] sm:$0xff]  ;;  %v1203_v58 = vld [vmem:[%s21119_s21 + $0x2d0] sm:$0xff] }
  0x52   : > { %17535 = vmatprep.mubr.msk.f32.mxu1 %vm373_vm0, %v785_v59  ;;  %v1621_v59 = vld [vmem:[%s21119_s21 + $0x3d0] sm:$0xff] }
  0x54   : > { %17480 = vmatmul.mubr.msk.f32.gmra.mrb[26].mxu0 %vm373_vm0, %v362_v60  ;;  %v1204_v60 = vld [vmem:[%s21119_s21 + $0x2d8] sm:$0xff] }
  0x55   : > { %17536 = vmatmul.mubr.msk.f32.gmra.mrb[26].mxu1 %vm373_vm0, %v786_v61  ;;  %17482 = vmatprep.mubr.msk.f32.mxu0 %vm373_vm0, %v363_v62  ;;  %v1622_v61 = vld [vmem:[%s21119_s21 + $0x3d8] sm:$0xff]  ;;  %v15405_v62 = vld [vmem:[%s25361_s3 + $0x20] sm:$0xff] }
  0x56   : > { %17538 = vmatprep.mubr.msk.f32.mxu1 %vm373_vm0, %v787_v63  ;;  %v15406_v63 = vld [vmem:[%s25361_s3 + $0x28] sm:$0xff] }
  0x58   : > { %17483 = vmatmul.mubr.msk.f32.gmra.mrb[28].mxu0 %vm373_vm0, %v364_v0  ;;  %v1205_v0 = vld [vmem:[%s21119_s21 + $0x2e0] sm:$0xff] }
  0x59   : > { %17539 = vmatmul.mubr.msk.f32.gmra.mrb[28].mxu1 %vm373_vm0, %v788_v1  ;;  %17485 = vmatprep.mubr.msk.f32.mxu0 %vm373_vm0, %v365_v2  ;;  %v1623_v1 = vld [vmem:[%s21119_s21 + $0x3e0] sm:$0xff]  ;;  %v21367_v2 = vpack.c.bf16 %v15406_v63, %v15405_v62 }
  0x5a   : > { %17541 = vmatprep.mubr.msk.f32.mxu1 %vm373_vm0, %v789_v3  ;;  %v1206_v3 = vld [vmem:[%s21119_s21 + $0x2e8] sm:$0xff] }
  0x5b   : > { %19089 = vmatprep.subr.bf16.mxu0 %v21367_v2  ;;  %19289 = vmatprep.subr.bf16.mxu1 %v21367_v2 }
  0x5c   : > { %17486 = vmatmul.mubr.msk.f32.gmra.mrb[30].mxu0 %vm373_vm0, %v366_v4  ;;  %v1624_v4 = vld [vmem:[%s21119_s21 + $0x3e8] sm:$0xff] }
  0x5d   : > { %17542 = vmatmul.mubr.msk.f32.gmra.mrb[30].mxu1 %vm373_vm0, %v790_v5  ;;  %17552 = vmatprep.mubr.msk.f32.mxu0 %vm373_vm0, %v1177_v6  ;;  %v1207_v5 = vld [vmem:[%s21119_s21 + $0x2f0] sm:$0xff] }
  0x5e   : > { %17608 = vmatprep.mubr.msk.f32.mxu1 %vm373_vm0, %v1595_v7  ;;  %v1625_v6 = vld [vmem:[%s21119_s21 + $0x3f0] sm:$0xff]  ;;  %v1208_v7 = vld [vmem:[%s21119_s21 + $0x2f8] sm:$0xff] }
  0x60   : > { %17553 = vmatmul.mubr.msk.f32.vlgmr.msra.gmra.mrb[32].mxu0 %vm373_vm0, %v1178_v8  ;;  %v1626_v8 = vld [vmem:[%s21119_s21 + $0x3f8] sm:$0xff] }
  0x61   : > { %17609 = vmatmul.mubr.msk.f32.vlgmr.msra.gmra.mrb[32].mxu1 %vm373_vm0, %v1596_v9  ;;  %17555 = vmatprep.mubr.msk.f32.mxu0 %vm373_vm0, %v1179_v10  ;;  %v15407_v9 = vld [vmem:[%s25361_s3 + $0x30] sm:$0xff]  ;;  %v15408_v10 = vld [vmem:[%s25361_s3 + $0x38] sm:$0xff] }
  0x62   : > { %17611 = vmatprep.mubr.msk.f32.mxu1 %vm373_vm0, %v1597_v11  ;;  %19091 = vmatpush3.bf16.msra.mxu0 %v21367_v2  ;;  %v21395_v11 = vpack.c.bf16 %v15408_v10, %v15407_v9 }
  0x63   : > { %19291 = vmatpush3.bf16.msra.mxu1 %v21367_v2 }
  0x64   : > { %17556 = vmatmul.mubr.msk.f32.gmra.mrb[34].mxu0 %vm373_vm0, %v1180_v12  ;;  %19093 = vmatprep.subr.bf16.mxu0 %v21395_v11  ;;  %v2018_v12 = vld [vmem:[%s25361_s3] sm:$0xff] }
  0x65   : > { %17612 = vmatmul.mubr.msk.f32.gmra.mrb[34].mxu1 %vm373_vm0, %v1598_v13  ;;  %17558 = vmatprep.mubr.msk.f32.mxu0 %vm373_vm0, %v1181_v14  ;;  %v2019_v13 = vld [vmem:[%s25361_s3 + $0x8] sm:$0xff] }
  0x66   : > { %17614 = vmatprep.mubr.msk.f32.mxu1 %vm373_vm0, %v1599_v15  ;;  %19293 = vmatprep.subr.bf16.mxu1 %v21395_v11  ;;  %v21407_v14 = vpack.c.bf16 %v2019_v13, %v2018_v12 }
  0x67   : > { %19095 = vmatpush3.bf16.msra.mxu0 %v21395_v11  ;;  %19295 = vmatpush3.bf16.msra.mxu1 %v21395_v11 }
  0x68   : > { %17559 = vmatmul.mubr.msk.f32.gmra.mrb[36].mxu0 %vm373_vm0, %v1182_v16  ;;  %25448 = vst [vmem:[#allocation6_spill] sm:$0xff] %v21407_v14  ;;  %19097 = vmatprep.subr.bf16.mxu0 %v21407_v14 }
  0x69   : > { %17615 = vmatmul.mubr.msk.f32.gmra.mrb[36].mxu1 %vm373_vm0, %v1600_v17  ;;  %17561 = vmatprep.mubr.msk.f32.mxu0 %vm373_vm0, %v1183_v18 }
  0x6a   : > { %17617 = vmatprep.mubr.msk.f32.mxu1 %vm373_vm0, %v1601_v19  ;;  %19297 = vmatprep.subr.bf16.mxu1 %v21407_v14 }
  0x6c   : > { %17562 = vmatmul.mubr.msk.f32.gmra.mrb[38].mxu0 %vm373_vm0, %v1184_v20 }
  0x6d   : > { %17618 = vmatmul.mubr.msk.f32.gmra.mrb[38].mxu1 %vm373_vm0, %v1602_v21  ;;  %17564 = vmatprep.mubr.msk.f32.mxu0 %vm373_vm0, %v1185_v22 }
  0x6e   : > { %17620 = vmatprep.mubr.msk.f32.mxu1 %vm373_vm0, %v1603_v23 }
  0x70   : > { %17565 = vmatmul.mubr.msk.f32.gmra.mrb[40].mxu0 %vm373_vm0, %v1186_v24 }
  0x71   : > { %17621 = vmatmul.mubr.msk.f32.gmra.mrb[40].mxu1 %vm373_vm0, %v1604_v25  ;;  %17567 = vmatprep.mubr.msk.f32.mxu0 %vm373_vm0, %v1187_v26  ;;  %v21414_v25 = vld [vmem:[%s25360_s2] ss:$0 sm:$0xff] }
  0x72   : > { %17623 = vmatprep.mubr.msk.f32.mxu1 %vm373_vm0, %v1605_v27 }
  0x74   : > { %17568 = vmatmul.mubr.msk.f32.gmra.mrb[42].mxu0 %vm373_vm0, %v1188_v28 }
  0x75   : > { %17624 = vmatmul.mubr.msk.f32.gmra.mrb[42].mxu1 %vm373_vm0, %v1606_v29  ;;  %17570 = vmatprep.mubr.msk.f32.mxu0 %vm373_vm0, %v1189_v30 }
  0x76   : > { %17626 = vmatprep.mubr.msk.f32.mxu1 %vm373_vm0, %v1607_v31 }
  0x78   : > { %17571 = vmatmul.mubr.msk.f32.gmra.mrb[44].mxu0 %vm373_vm0, %v1190_v32 }
  0x79   : > { %17627 = vmatmul.mubr.msk.f32.gmra.mrb[44].mxu1 %vm373_vm0, %v1608_v33  ;;  %17573 = vmatprep.mubr.msk.f32.mxu0 %vm373_vm0, %v1191_v34 }
  0x7a   : > { %17629 = vmatprep.mubr.msk.f32.mxu1 %vm373_vm0, %v1609_v35 }
  0x7c   : > { %17574 = vmatmul.mubr.msk.f32.gmra.mrb[46].mxu0 %vm373_vm0, %v1192_v36 }
  0x7d   : > { %17630 = vmatmul.mubr.msk.f32.gmra.mrb[46].mxu1 %vm373_vm0, %v1610_v37  ;;  %17576 = vmatprep.mubr.msk.f32.mxu0 %vm373_vm0, %v1193_v38 }
  0x7e   : > { %17632 = vmatprep.mubr.msk.f32.mxu1 %vm373_vm0, %v1611_v39 }
  0x80   : > { %17577 = vmatmul.mubr.msk.f32.gmra.mrb[48].mxu0 %vm373_vm0, %v1194_v40 }
  0x81   : > { %17633 = vmatmul.mubr.msk.f32.gmra.mrb[48].mxu1 %vm373_vm0, %v1612_v41  ;;  %17579 = vmatprep.mubr.msk.f32.mxu0 %vm373_vm0, %v1195_v42 }
  0x82   : > { %17635 = vmatprep.mubr.msk.f32.mxu1 %vm373_vm0, %v1613_v43 }
  0x84   : > { %17580 = vmatmul.mubr.msk.f32.gmra.mrb[50].mxu0 %vm373_vm0, %v1196_v44 }
  0x85   : > { %17636 = vmatmul.mubr.msk.f32.gmra.mrb[50].mxu1 %vm373_vm0, %v1614_v45  ;;  %17582 = vmatprep.mubr.msk.f32.mxu0 %vm373_vm0, %v1197_v46 }
  0x86   : > { %17638 = vmatprep.mubr.msk.f32.mxu1 %vm373_vm0, %v1615_v47 }
  0x88   : > { %17583 = vmatmul.mubr.msk.f32.gmra.mrb[52].mxu0 %vm373_vm0, %v1198_v48 }
  0x89   : > { %17639 = vmatmul.mubr.msk.f32.gmra.mrb[52].mxu1 %vm373_vm0, %v1616_v49  ;;  %17585 = vmatprep.mubr.msk.f32.mxu0 %vm373_vm0, %v1199_v50 }
  0x8a   : > { %17641 = vmatprep.mubr.msk.f32.mxu1 %vm373_vm0, %v1617_v51 }
  0x8c   : > { %17586 = vmatmul.mubr.msk.f32.gmra.mrb[54].mxu0 %vm373_vm0, %v1200_v52 }
  0x8d   : > { %17642 = vmatmul.mubr.msk.f32.gmra.mrb[54].mxu1 %vm373_vm0, %v1618_v53  ;;  %17588 = vmatprep.mubr.msk.f32.mxu0 %vm373_vm0, %v1201_v54 }
  0x8e   : > { %17644 = vmatprep.mubr.msk.f32.mxu1 %vm373_vm0, %v1619_v55 }
  0x90   : > { %17589 = vmatmul.mubr.msk.f32.gmra.mrb[56].mxu0 %vm373_vm0, %v1202_v56 }
  0x91   : > { %17645 = vmatmul.mubr.msk.f32.gmra.mrb[56].mxu1 %vm373_vm0, %v1620_v57  ;;  %17591 = vmatprep.mubr.msk.f32.mxu0 %vm373_vm0, %v1203_v58 }
  0x92   : > { %17647 = vmatprep.mubr.msk.f32.mxu1 %vm373_vm0, %v1621_v59 }
  0x94   : > { %17592 = vmatmul.mubr.msk.f32.gmra.mrb[58].mxu0 %vm373_vm0, %v1204_v60 }
  0x95   : > { %17648 = vmatmul.mubr.msk.f32.gmra.mrb[58].mxu1 %vm373_vm0, %v1622_v61  ;;  %17594 = vmatprep.mubr.msk.f32.mxu0 %vm373_vm0, %v1205_v0 }
  0x96   : > { %17650 = vmatprep.mubr.msk.f32.mxu1 %vm373_vm0, %v1623_v1 }
  0x98   : > { %17595 = vmatmul.mubr.msk.f32.gmra.mrb[60].mxu0 %vm373_vm0, %v1206_v3 }
  0x99   : > { %17651 = vmatmul.mubr.msk.f32.gmra.mrb[60].mxu1 %vm373_vm0, %v1624_v4  ;;  %17597 = vmatprep.mubr.msk.f32.mxu0 %vm373_vm0, %v1207_v5 }
  0x9a   : > { %17653 = vmatprep.mubr.msk.f32.mxu1 %vm373_vm0, %v1625_v6 }
  0x9c   : > { %17598 = vmatmul.mubr.msk.f32.gmra.mrb[62].mxu0 %vm373_vm0, %v1208_v7 }
  0x9d   : > { %17654 = vmatmul.mubr.msk.f32.gmra.mrb[62].mxu1 %vm373_vm0, %v1626_v8 }
  0xf3   : > { %v17442_v15 = vpop.f32.mrb[0].mxu0 }
  0xf4   : > { %v17498_v16 = vpop.f32.mrb[0].mxu1  ;;  %v536_v17 = vpop.f32.mrb[1].mxu0  ;;  %v542_v28 = vadd.f32 %v17442_v15, %v21414_v25 }
  0xf5   : > { %v953_v18 = vpop.f32.mrb[1].mxu1  ;;  %v537_v29 = vadd.f32 %v21414_v25, %v536_v17  ;;  %v959_v30 = vadd.f32 %v17498_v16, %v21414_v25 }
  0xf6   : > { %v954_v31 = vadd.f32 %v21414_v25, %v953_v18  ;;  %v696_v40 = vmax.f32 %v542_v28, 0.0 }
  0xf7   : > { %v17445_v19 = vpop.f32.mrb[2].mxu0  ;;  %v695_v41 = vmax.f32 %v537_v29, 0.0  ;;  %v1113_v42 = vmax.f32 %v959_v30, 0.0 }
  0xf8   : > { %v17501_v20 = vpop.f32.mrb[2].mxu1  ;;  %v546_v21 = vpop.f32.mrb[3].mxu0  ;;  %v552_v34 = vadd.f32 %v17445_v19, %v21414_v25  ;;  %v1112_v43 = vmax.f32 %v954_v31, 0.0 }
  0xf9   : > { %v963_v22 = vpop.f32.mrb[3].mxu1  ;;  %v969_v35 = vadd.f32 %v17501_v20, %v21414_v25  ;;  %v547_v38 = vadd.f32 %v21414_v25, %v546_v21 }
  0xfa   : > { %v964_v39 = vadd.f32 %v21414_v25, %v963_v22  ;;  %v698_v46 = vmax.f32 %v552_v34, 0.0 }
  0xfb   : > { %v17448_v23 = vpop.f32.mrb[4].mxu0  ;;  %v1115_v47 = vmax.f32 %v969_v35, 0.0  ;;  %v697_v52 = vmax.f32 %v547_v38, 0.0 }
  0xfc   : > { %v17504_v24 = vpop.f32.mrb[4].mxu1  ;;  %v556_v26 = vpop.f32.mrb[5].mxu0  ;;  %v1114_v53 = vmax.f32 %v964_v39, 0.0  ;;  %v562_v56 = vadd.f32 %v17448_v23, %v21414_v25 }
  0xfd   : > { %v973_v27 = vpop.f32.mrb[5].mxu1  ;;  %v979_v57 = vadd.f32 %v17504_v24, %v21414_v25  ;;  %v557_v60 = vadd.f32 %v21414_v25, %v556_v26 }
  0xfe   : > { %v974_v61 = vadd.f32 %v21414_v25, %v973_v27  ;;  %v700_v15 = vmax.f32 %v562_v56, 0.0 }
  0xff   : > { %v17451_v32 = vpop.f32.mrb[6].mxu0  ;;  %v1117_v16 = vmax.f32 %v979_v57, 0.0  ;;  %v699_v19 = vmax.f32 %v557_v60, 0.0 }
 0x100   : > { %v17507_v33 = vpop.f32.mrb[6].mxu1  ;;  %v566_v36 = vpop.f32.mrb[7].mxu0  ;;  %v1116_v20 = vmax.f32 %v974_v61, 0.0 }
 0x101   : > { %v983_v37 = vpop.f32.mrb[7].mxu1 }
 0x103   : > { %v17454_v44 = vpop.f32.mrb[8].mxu0 }
 0x104   : > { %v17510_v45 = vpop.f32.mrb[8].mxu1  ;;  %v582_v48 = vadd.f32 %v17454_v44, %v21414_v25  ;;  %v576_v50 = vpop.f32.mrb[9].mxu0 }
 0x105   : > { %v999_v49 = vadd.f32 %v17510_v45, %v21414_v25  ;;  %v993_v51 = vpop.f32.mrb[9].mxu1  ;;  %v577_v54 = vadd.f32 %v21414_v25, %v576_v50 }
 0x106   : > { %v994_v55 = vadd.f32 %v21414_v25, %v993_v51  ;;  %v704_v58 = vmax.f32 %v582_v48, 0.0 }
 0x107   : > { %v1121_v59 = vmax.f32 %v999_v49, 0.0  ;;  %v703_v62 = vmax.f32 %v577_v54, 0.0  ;;  %v17457_v0 = vpop.f32.mrb[10].mxu0 }
 0x108   : > { %v1120_v63 = vmax.f32 %v994_v55, 0.0  ;;  %v17513_v1 = vpop.f32.mrb[10].mxu1  ;;  %v21432_v3 = vmax.f32 %v696_v40, %v704_v58  ;;  %v592_v5 = vadd.f32 %v17457_v0, %v21414_v25  ;;  %v586_v7 = vpop.f32.mrb[11].mxu0  ;;  %v567_v40 = vadd.f32 %v21414_v25, %v566_v36 }
 0x109   : > { %v21434_v4 = vmax.f32 %v1113_v42, %v1121_v59  ;;  %v1009_v6 = vadd.f32 %v17513_v1, %v21414_v25  ;;  %v1003_v8 = vpop.f32.mrb[11].mxu1  ;;  %v21438_v9 = vmax.f32 %v695_v41, %v703_v62  ;;  %v587_v12 = vadd.f32 %v21414_v25, %v586_v7  ;;  %v2020_v7 = vld [vmem:[%s25361_s3 + $0x10] sm:$0xff] }
 0x10a   : > { %v21440_v10 = vmax.f32 %v1112_v43, %v1120_v63  ;;  %v1004_v13 = vadd.f32 %v21414_v25, %v1003_v8  ;;  %v706_v17 = vmax.f32 %v592_v5, 0.0  ;;  %v984_v41 = vadd.f32 %v21414_v25, %v983_v37 }
 0x10b   : > { %v1123_v18 = vmax.f32 %v1009_v6, 0.0  ;;  %v705_v21 = vmax.f32 %v587_v12, 0.0  ;;  %v17460_v23 = vpop.f32.mrb[12].mxu0 }
 0x10c   : > { %v1122_v22 = vmax.f32 %v1004_v13, 0.0  ;;  %v17516_v24 = vpop.f32.mrb[12].mxu1  ;;  %v21444_v26 = vmax.f32 %v698_v46, %v706_v17  ;;  %v602_v28 = vadd.f32 %v17460_v23, %v21414_v25  ;;  %v596_v30 = vpop.f32.mrb[13].mxu0  ;;  %v1118_v37 = vmax.f32 %v984_v41, 0.0  ;;  %v15417_v17 = vld [vmem:[%s25361_s3 + $0x40] sm:$0xff] }
 0x10d   : > { %v21446_v27 = vmax.f32 %v1115_v47, %v1123_v18  ;;  %v1019_v29 = vadd.f32 %v17516_v24, %v21414_v25  ;;  %v1013_v31 = vpop.f32.mrb[13].mxu1  ;;  %v21450_v32 = vmax.f32 %v697_v52, %v705_v21  ;;  %v597_v34 = vadd.f32 %v21414_v25, %v596_v30  ;;  %v15418_v18 = vld [vmem:[%s25361_s3 + $0x48] sm:$0xff] }
 0x10e   : > { %v21452_v33 = vmax.f32 %v1114_v53, %v1122_v22  ;;  %v1014_v35 = vadd.f32 %v21414_v25, %v1013_v31  ;;  %v708_v38 = vmax.f32 %v602_v28, 0.0  ;;  %v701_v53 = vmax.f32 %v567_v40, 0.0 }
 0x10f   : > { %v1125_v39 = vmax.f32 %v1019_v29, 0.0  ;;  %v707_v42 = vmax.f32 %v597_v34, 0.0  ;;  %v17463_v44 = vpop.f32.mrb[14].mxu0  ;;  %v21502_v31 = vpack.c.bf16 %v15418_v18, %v15417_v17 }
 0x110   : > { %v1124_v43 = vmax.f32 %v1014_v35, 0.0  ;;  %v17519_v45 = vpop.f32.mrb[14].mxu1  ;;  %v21458_v46 = vmax.f32 %v700_v15, %v708_v38  ;;  %v606_v48 = vpop.f32.mrb[15].mxu0 }
 0x111   : > { %v21460_v47 = vmax.f32 %v1117_v16, %v1125_v39  ;;  %v1023_v49 = vpop.f32.mrb[15].mxu1  ;;  %v21462_v50 = vmax.f32 %v699_v19, %v707_v42  ;;  %v607_v52 = vadd.f32 %v21414_v25, %v606_v48  ;;  %v2021_v16 = vld [vmem:[%s25361_s3 + $0x18] sm:$0xff]  ;;  %25450 = vst [vmem:[#allocation8_spill] sm:$0xff] %v21502_v31 }
 0x112   : > { %v21464_v51 = vmax.f32 %v1116_v20, %v1124_v43  ;;  %v1024_v36 = vadd.f32 %v21414_v25, %v1023_v49  ;;  %v21500_v30 = vpack.c.bf16 %v2021_v16, %v2020_v7 }
 0x113   : > { %v709_v54 = vmax.f32 %v607_v52, 0.0  ;;  %v17466_v56 = vpop.f32.mrb[16].mxu0 }
 0x114   : > { %v1126_v55 = vmax.f32 %v1024_v36, 0.0  ;;  %v17522_v57 = vpop.f32.mrb[16].mxu1  ;;  %v616_v58 = vpop.f32.mrb[17].mxu0  ;;  %v622_v8 = vadd.f32 %v17466_v56, %v21414_v25  ;;  %25449 = vst [vmem:[#allocation7_spill] sm:$0xff] %v21500_v30 }
 0x115   : > { %v1033_v59 = vpop.f32.mrb[17].mxu1  ;;  %v21468_v60 = vmax.f32 %v701_v53, %v709_v54  ;;  %v1039_v12 = vadd.f32 %v17522_v57, %v21414_v25  ;;  %v617_v19 = vadd.f32 %v21414_v25, %v616_v58 }
 0x116   : > { %v21470_v61 = vmax.f32 %v1118_v37, %v1126_v55  ;;  %v1034_v20 = vadd.f32 %v21414_v25, %v1033_v59  ;;  %v712_v34 = vmax.f32 %v622_v8, 0.0 }
 0x117   : > { %v17469_v62 = vpop.f32.mrb[18].mxu0  ;;  %v1129_v35 = vmax.f32 %v1039_v12, 0.0  ;;  %v711_v42 = vmax.f32 %v617_v19, 0.0 }
 0x118   : > { %v17525_v63 = vpop.f32.mrb[18].mxu1  ;;  %v626_v0 = vpop.f32.mrb[19].mxu0  ;;  %v21489_v21 = vadd.f32 %v17469_v62, %v21414_v25  ;;  %v1128_v43 = vmax.f32 %v1034_v20, 0.0 }
 0x119   : > { %v1043_v1 = vpop.f32.mrb[19].mxu1  ;;  %v21492_v22 = vadd.f32 %v17525_v63, %v21414_v25  ;;  %v21495_v23 = vadd.f32 %v21414_v25, %v626_v0 }
 0x11a   : > { %v21498_v24 = vadd.f32 %v21414_v25, %v1043_v1  ;;  %v714_v48 = vmax.f32 %v21489_v21, 0.0 }
 0x11b   : > { %v17472_v5 = vpop.f32.mrb[20].mxu0  ;;  %v1131_v49 = vmax.f32 %v21492_v22, 0.0  ;;  %v713_v52 = vmax.f32 %v21495_v23, 0.0 }
 0x11c   : > { %v17528_v6 = vpop.f32.mrb[20].mxu1  ;;  %v636_v13 = vpop.f32.mrb[21].mxu0  ;;  %v21505_v38 = vadd.f32 %v17472_v5, %v21414_v25  ;;  %v1130_v36 = vmax.f32 %v21498_v24, 0.0 }
 0x11d   : > { %v1053_v15 = vpop.f32.mrb[21].mxu1  ;;  %v21508_v39 = vadd.f32 %v17528_v6, %v21414_v25  ;;  %v21511_v44 = vadd.f32 %v21414_v25, %v636_v13 }
 0x11e   : > { %v21514_v45 = vadd.f32 %v21414_v25, %v1053_v15  ;;  %v716_v56 = vmax.f32 %v21505_v38, 0.0 }
 0x11f   : > { %v17475_v28 = vpop.f32.mrb[22].mxu0  ;;  %v1133_v57 = vmax.f32 %v21508_v39, 0.0  ;;  %v715_v0 = vmax.f32 %v21511_v44, 0.0  ;;  %v15419_v39 = vld [vmem:[%s25361_s3 + $0x50] sm:$0xff] }
 0x120   : > { %v17531_v29 = vpop.f32.mrb[22].mxu1  ;;  %v646_v40 = vpop.f32.mrb[23].mxu0  ;;  %v1132_v1 = vmax.f32 %v21514_v45, 0.0 }
 0x121   : > { %v1063_v41 = vpop.f32.mrb[23].mxu1  ;;  %v21521_v53 = vadd.f32 %v21414_v25, %v646_v40 }
 0x122   : > { %v21524_v37 = vadd.f32 %v21414_v25, %v1063_v41 }
 0x123   : > { %v17478_v54 = vpop.f32.mrb[24].mxu0  ;;  %v717_v12 = vmax.f32 %v21521_v53, 0.0 }
 0x124   : > { %v17534_v55 = vpop.f32.mrb[24].mxu1  ;;  %v662_v58 = vadd.f32 %v17478_v54, %v21414_v25  ;;  %v656_v62 = vpop.f32.mrb[25].mxu0  ;;  %v1134_v13 = vmax.f32 %v21524_v37, 0.0 }
 0x125   : > { %v1079_v59 = vadd.f32 %v17534_v55, %v21414_v25  ;;  %v1073_v63 = vpop.f32.mrb[25].mxu1  ;;  %v657_v5 = vadd.f32 %v21414_v25, %v656_v62 }
 0x126   : > { %v1074_v6 = vadd.f32 %v21414_v25, %v1073_v63  ;;  %v720_v7 = vmax.f32 %v662_v58, 0.0 }
 0x127   : > { %v1137_v8 = vmax.f32 %v1079_v59, 0.0  ;;  %v719_v15 = vmax.f32 %v657_v5, 0.0  ;;  %v17481_v17 = vpop.f32.mrb[26].mxu0 }
 0x128   : > { %v1136_v16 = vmax.f32 %v1074_v6, 0.0  ;;  %v17537_v18 = vpop.f32.mrb[26].mxu1  ;;  %v736_v19 = vmax.f32 %v712_v34, %v720_v7  ;;  %v672_v21 = vadd.f32 %v17481_v17, %v21414_v25  ;;  %v666_v23 = vpop.f32.mrb[27].mxu0 }
 0x129   : > { %v1153_v20 = vmax.f32 %v1129_v35, %v1137_v8  ;;  %v1089_v22 = vadd.f32 %v17537_v18, %v21414_v25  ;;  %v1083_v24 = vpop.f32.mrb[27].mxu1  ;;  %v735_v28 = vmax.f32 %v711_v42, %v719_v15  ;;  %v667_v40 = vadd.f32 %v21414_v25, %v666_v23 }
 0x12a   : > { %v1152_v29 = vmax.f32 %v1128_v43, %v1136_v16  ;;  %v1084_v41 = vadd.f32 %v21414_v25, %v1083_v24  ;;  %v21541_v54 = vmax.f32 %v21432_v3, %v736_v19  ;;  %v722_v34 = vmax.f32 %v672_v21, 0.0 }
 0x12b   : > { %v21544_v55 = vmax.f32 %v21434_v4, %v1153_v20  ;;  %v1139_v35 = vmax.f32 %v1089_v22, 0.0  ;;  %v743_v58 = vmax.f32 %v21438_v9, %v735_v28  ;;  %v721_v62 = vmax.f32 %v667_v40, 0.0  ;;  %v17484_v43 = vpop.f32.mrb[28].mxu0 }
 0x12c   : > { %v21548_v59 = vmax.f32 %v21440_v10, %v1152_v29  ;;  %v1138_v42 = vmax.f32 %v1084_v41, 0.0  ;;  %v17540_v63 = vpop.f32.mrb[28].mxu1  ;;  %752 = vst [vmem:[#allocation2 + $0x8] sm:$0xff] %v21541_v54  ;;  %v738_v3 = vmax.f32 %v714_v48, %v722_v34  ;;  %v682_v4 = vadd.f32 %v17484_v43, %v21414_v25  ;;  %v676_v7 = vpop.f32.mrb[29].mxu0 }
 0x12d   : > { %1170 = vst [vmem:[#allocation2 + $0x48] sm:$0xff] %v21544_v55  ;;  %v1155_v5 = vmax.f32 %v1131_v49, %v1139_v35  ;;  %v1099_v6 = vadd.f32 %v17540_v63, %v21414_v25  ;;  %v1093_v8 = vpop.f32.mrb[29].mxu1  ;;  %751 = vst [vmem:[#allocation2] sm:$0xff] %v743_v58  ;;  %v737_v9 = vmax.f32 %v713_v52, %v721_v62  ;;  %v15426_v62 = vld [vmem:[%s25361_s3 + $0x68] sm:$0xff] }
 0x12e   : > { %1169 = vst [vmem:[#allocation2 + $0x40] sm:$0xff] %v21548_v59  ;;  %v1154_v10 = vmax.f32 %v1130_v36, %v1138_v42  ;;  %v677_v15 = vadd.f32 %v21414_v25, %v676_v7  ;;  %v1094_v16 = vadd.f32 %v21414_v25, %v1093_v8  ;;  %17664 = vmatprep.mubr.msk.f32.mxu0 %vm373_vm0, %v21548_v59  ;;  %v724_v17 = vmax.f32 %v682_v4, 0.0 }
 0x12f   : > { %v21560_v48 = vmax.f32 %v21444_v26, %v738_v3  ;;  %v21563_v49 = vmax.f32 %v21446_v27, %v1155_v5  ;;  %v1141_v18 = vmax.f32 %v1099_v6, 0.0  ;;  %17665 = vmatmul.mubr.msk.f32.vlgmr.msra.gmra.mrb[64].mxu0 %vm373_vm0, %v21544_v55  ;;  %v745_v52 = vmax.f32 %v21450_v32, %v737_v9  ;;  %v17487_v21 = vpop.f32.mrb[30].mxu0 }
 0x130   : > { %v21569_v36 = vmax.f32 %v21452_v33, %v1154_v10  ;;  %v723_v19 = vmax.f32 %v677_v15, 0.0  ;;  %v1140_v20 = vmax.f32 %v1094_v16, 0.0  ;;  %v17543_v22 = vpop.f32.mrb[30].mxu1  ;;  %19099 = vmatpush3.bf16.msra.mxu0 %v21407_v14  ;;  %v740_v26 = vmax.f32 %v716_v56, %v724_v17  ;;  %v686_v32 = vpop.f32.mrb[31].mxu0  ;;  %v15420_v56 = vld [vmem:[%s25361_s3 + $0x58] sm:$0xff]  ;;  %v15433_v15 = vld [vmem:[%s25361_s3 + $0x80] sm:$0xff] }
 0x131   : > { %754 = vst [vmem:[#allocation2 + $0x18] sm:$0xff] %v21560_v48  ;;  %1172 = vst [vmem:[#allocation2 + $0x58] sm:$0xff] %v21563_v49  ;;  %v1157_v27 = vmax.f32 %v1133_v57, %v1141_v18  ;;  %v1103_v23 = vpop.f32.mrb[31].mxu1  ;;  %19101 = vmatprep.subr.bf16.mxu0 %v21500_v30  ;;  %v687_v28 = vadd.f32 %v21414_v25, %v686_v32  ;;  %v21603_v35 = vpack.c.bf16 %v15420_v56, %v15419_v39  ;;  %v15434_v16 = vld [vmem:[%s25361_s3 + $0x88] sm:$0xff]  ;;  %v15441_v21 = vld [vmem:[%s25361_s3 + $0xa0] sm:$0xff] }
 0x132   : > { %753 = vst [vmem:[#allocation2 + $0x10] sm:$0xff] %v745_v52  ;;  %1171 = vst [vmem:[#allocation2 + $0x50] sm:$0xff] %v21569_v36  ;;  %v739_v33 = vmax.f32 %v715_v0, %v723_v19  ;;  %v1156_v24 = vmax.f32 %v1132_v1, %v1140_v20  ;;  %v1104_v38 = vadd.f32 %v21414_v25, %v1103_v23  ;;  %17667 = vmatprep.mubr.msk.f32.mxu0 %vm373_vm0, %v21569_v36  ;;  %v15436_v20 = vld [vmem:[%s25361_s3 + $0x98] sm:$0xff]  ;;  %v15442_v22 = vld [vmem:[%s25361_s3 + $0xa8] sm:$0xff] }
 0x133   : > { %v748_v44 = vmax.f32 %v21458_v46, %v740_v26  ;;  %v1165_v45 = vmax.f32 %v21460_v47, %v1157_v27  ;;  %17668 = vmatmul.mubr.msk.f32.gmra.mrb[66].mxu0 %vm373_vm0, %v21563_v49  ;;  %v725_v1 = vmax.f32 %v687_v28, 0.0  ;;  %v17554_v40 = vpop.f32.mrb[32].mxu0  ;;  %25451 = vst [vmem:[#allocation9_spill] sm:$0xff] %v21603_v35  ;;  %v21710_v28 = vpack.c.bf16 %v15434_v16, %v15433_v15 }
 0x134   : > { %v747_v57 = vmax.f32 %v21462_v50, %v739_v33  ;;  %v1164_v0 = vmax.f32 %v21464_v51, %v1156_v24  ;;  %v1142_v29 = vmax.f32 %v1104_v38, 0.0  ;;  %v17610_v41 = vpop.f32.mrb[32].mxu1  ;;  %19103 = vmatpush3.bf16.msra.mxu0 %v21500_v30  ;;  %17678 = vmatprep.mubr.msk.f32.mxu0 %vm373_vm0, %v743_v58  ;;  %v1371_v46 = vpop.f32.mrb[33].mxu0  ;;  %v2225_v34 = vld [vmem:[#allocation2 + $0x1] sm:$0xff]  ;;  %v21655_v10 = vadd.f32 %v17554_v40, %v21414_v25 }
 0x135   : > { %756 = vst [vmem:[#allocation2 + $0x28] sm:$0xff] %v748_v44  ;;  %1174 = vst [vmem:[#allocation2 + $0x68] sm:$0xff] %v1165_v45  ;;  %v1789_v47 = vpop.f32.mrb[33].mxu1  ;;  %19105 = vmatprep.subr.bf16.mxu0 %v21502_v31  ;;  %v741_v50 = vmax.f32 %v717_v12, %v725_v1  ;;  %18014 = vmatprep.mubr.msk.f32.mxu1 %vm373_vm0, %v2225_v34  ;;  %v15425_v58 = vld [vmem:[%s25361_s3 + $0x60] sm:$0xff]  ;;  %v21670_v17 = vadd.f32 %v21414_v25, %v1371_v46 }
 0x136   : > { %755 = vst [vmem:[#allocation2 + $0x20] sm:$0xff] %v747_v57  ;;  %1173 = vst [vmem:[#allocation2 + $0x60] sm:$0xff] %v1164_v0  ;;  %v1158_v51 = vmax.f32 %v1134_v13, %v1142_v29  ;;  %v21624_v3 = vpack.c.bf16 %v15426_v62, %v15425_v58  ;;  %v21673_v18 = vadd.f32 %v17610_v41, %v21414_v25  ;;  %v2335_v38 = vld [vmem:[#allocation2 + $0x41] sm:$0xff]  ;;  %v1531_v44 = vmax.f32 %v21655_v10, 0.0 }
 0x137   : > { %17679 = vmatmul.mubr.msk.f32.vlgmr.msra.gmra.mrb[64].mxu0 %vm373_vm0, %v21541_v54  ;;  %v749_v42 = vmax.f32 %v21468_v60, %v741_v50  ;;  %v17557_v12 = vpop.f32.mrb[34].mxu0  ;;  %v15427_v60 = vld [vmem:[%s25361_s3 + $0x70] sm:$0xff]  ;;  %25454 = vst [vmem:[#allocation12_spill] sm:$0xff] %v21710_v28  ;;  %v21717_v56 = vpack.c.bf16 %v15442_v22, %v15441_v21  ;;  %v1530_v45 = vmax.f32 %v21670_v17, 0.0 }
 0x138   : > { %v1166_v53 = vmax.f32 %v21470_v61, %v1158_v51  ;;  %v17613_v37 = vpop.f32.mrb[34].mxu1  ;;  %17681 = vmatprep.mubr.msk.f32.mxu0 %vm373_vm0, %v745_v52  ;;  %19107 = vmatpush3.bf16.msra.mxu0 %v21502_v31  ;;  %v1381_v13 = vpop.f32.mrb[35].mxu0  ;;  %25452 = vst [vmem:[#allocation10_spill] sm:$0xff] %v21624_v3  ;;  %v15428_v61 = vld [vmem:[%s25361_s3 + $0x78] sm:$0xff]  ;;  %v21690_v26 = vadd.f32 %v17557_v12, %v21414_v25 }
 0x139   : > { %v2226_v54 = vld [vmem:[#allocation2 + $0x9] sm:$0xff]  ;;  %v1799_v43 = vpop.f32.mrb[35].mxu1  ;;  %v2227_v63 = vld [vmem:[#allocation2 + $0x11] sm:$0xff]  ;;  %19109 = vmatprep.subr.bf16.mxu0 %v21603_v35  ;;  %757 = vst [vmem:[#allocation2 + $0x30] sm:$0xff] %v749_v42  ;;  %v21652_v9 = vpack.c.bf16 %v15428_v61, %v15427_v60  ;;  %v21693_v27 = vadd.f32 %v17613_v37, %v21414_v25  ;;  %v21702_v33 = vadd.f32 %v21414_v25, %v1381_v13  ;;  %25456 = vst [vmem:[#allocation14_spill] sm:$0xff] %v21717_v56 }
 0x13a   : > { %1175 = vst [vmem:[#allocation2 + $0x70] sm:$0xff] %v1166_v53  ;;  %18015 = vmatmul.mubr.msk.f32.vlgmr.msra.gmra.mrb[64].mxu1 %vm373_vm0, %v2226_v54  ;;  %v21705_v24 = vadd.f32 %v21414_v25, %v1799_v43  ;;  %v21749_v37 = vld [vmem:[#allocation2 + $0x49] sm:$0xff]  ;;  %v21760_v61 = vld [vmem:[#allocation2 + $0x51] sm:$0xff] }
 0x13b   : > { %18017 = vmatprep.mubr.msk.f32.mxu1 %vm373_vm0, %v2227_v63  ;;  %19299 = vmatpush3.bf16.msra.mxu1 %v21407_v14  ;;  %v21634_v5 = vpop.f32.mrb[36].mxu0  ;;  %25453 = vst [vmem:[#allocation11_spill] sm:$0xff] %v21652_v9  ;;  %v1951_v29 = vmax.f32 %v21693_v27, 0.0 }
 0x13c   : > { %v21636_v4 = vpop.f32.mrb[36].mxu1  ;;  %19301 = vmatprep.subr.bf16.mxu1 %v21500_v30  ;;  %17682 = vmatmul.mubr.msk.f32.gmra.mrb[66].mxu0 %vm373_vm0, %v21560_v48  ;;  %v21641_v6 = vpop.f32.mrb[37].mxu0  ;;  %v15435_v48 = vld [vmem:[%s25361_s3 + $0x90] sm:$0xff]  ;;  %v1950_v50 = vmax.f32 %v21705_v24, 0.0  ;;  %v21741_v62 = vadd.f32 %v21634_v5, %v21414_v25 }
 0x13d   : > { %v21643_v7 = vld [vmem:[#allocation2 + $0x19] sm:$0xff]  ;;  %v21645_v8 = vpop.f32.mrb[37].mxu1  ;;  %19111 = vmatpush3.bf16.msra.mxu0 %v21603_v35  ;;  %17692 = vmatprep.mubr.msk.f32.mxu0 %vm373_vm0, %v2225_v34  ;;  %v21715_v39 = vpack.c.bf16 %v15436_v20, %v15435_v48  ;;  %v21745_v42 = vadd.f32 %v21636_v4, %v21414_v25 }
 0x13e   : > { %18018 = vmatmul.mubr.msk.f32.gmra.mrb[66].mxu1 %vm373_vm0, %v21643_v7  ;;  %19113 = vmatprep.subr.bf16.mxu0 %v21624_v3  ;;  %v21757_v13 = vadd.f32 %v21414_v25, %v21645_v8  ;;  %v21785_v21 = vld [vmem:[#allocation2 + $0x59] sm:$0xff] }
 0x13f   : > { %19303 = vmatpush3.bf16.msra.mxu1 %v21500_v30  ;;  %18028 = vmatprep.mubr.msk.f32.mxu1 %vm373_vm0, %v21548_v59  ;;  %v21676_v59 = vadd.f32 %v21414_v25, %v1789_v47  ;;  %v17563_v52 = vpop.f32.mrb[38].mxu0  ;;  %25455 = vst [vmem:[#allocation13_spill] sm:$0xff] %v21715_v39  ;;  %v1532_v47 = vmax.f32 %v21702_v33, 0.0 }
 0x140   : > { %v17619_v19 = vpop.f32.mrb[38].mxu1  ;;  %19305 = vmatprep.subr.bf16.mxu1 %v21502_v31  ;;  %17693 = vmatmul.mubr.msk.f32.vlgmr.msra.gmra.mrb[64].mxu0 %vm373_vm0, %v2226_v54  ;;  %v21695_v32 = vpop.f32.mrb[39].mxu0  ;;  %v1953_v52 = vmax.f32 %v21745_v42, 0.0 }
 0x141   : > { %v21697_v23 = vpop.f32.mrb[39].mxu1  ;;  %17695 = vmatprep.mubr.msk.f32.mxu0 %vm373_vm0, %v2227_v63  ;;  %19115 = vmatpush3.bf16.msra.mxu0 %v21624_v3  ;;  %v1948_v57 = vmax.f32 %v21676_v59, 0.0  ;;  %v1535_v59 = vmax.f32 %v21741_v62, 0.0 }
 0x142   : > { %18029 = vmatmul.mubr.msk.f32.vlgmr.msra.gmra.mrb[64].mxu1 %vm373_vm0, %v21544_v55  ;;  %19117 = vmatprep.subr.bf16.mxu0 %v21652_v9  ;;  %v1949_v55 = vmax.f32 %v21673_v18, 0.0 }
 0x143   : > { %18031 = vmatprep.mubr.msk.f32.mxu1 %vm373_vm0, %v21569_v36  ;;  %19307 = vmatpush3.bf16.msra.mxu1 %v21502_v31  ;;  %v17566_v0 = vpop.f32.mrb[40].mxu0  ;;  %v1533_v36 = vmax.f32 %v21690_v26, 0.0  ;;  %v1952_v26 = vmax.f32 %v21757_v13, 0.0 }
 0x144   : > { %v17622_v1 = vpop.f32.mrb[40].mxu1  ;;  %19309 = vmatprep.subr.bf16.mxu1 %v21603_v35  ;;  %17696 = vmatmul.mubr.msk.f32.gmra.mrb[66].mxu0 %vm373_vm0, %v21643_v7  ;;  %v1417_v40 = vadd.f32 %v17566_v0, %v21414_v25  ;;  %v1411_v46 = vpop.f32.mrb[41].mxu0 }
 0x145   : > { %v1835_v41 = vadd.f32 %v17622_v1, %v21414_v25  ;;  %v1829_v34 = vpop.f32.mrb[41].mxu1  ;;  %19119 = vmatpush3.bf16.msra.mxu0 %v21652_v9  ;;  %17706 = vmatprep.mubr.msk.f32.mxu0 %vm373_vm0, %v2335_v38  ;;  %v1412_v51 = vadd.f32 %v21414_v25, %v1411_v46 }
 0x146   : > { %v1830_v58 = vadd.f32 %v21414_v25, %v1829_v34  ;;  %18032 = vmatmul.mubr.msk.f32.gmra.mrb[66].mxu1 %vm373_vm0, %v21563_v49  ;;  %19121 = vmatprep.subr.bf16.mxu0 %v21710_v28  ;;  %v1539_v53 = vmax.f32 %v1417_v40, 0.0  ;;  %v21753_v49 = vadd.f32 %v21414_v25, %v21641_v6 }
 0x147   : > { %v1957_v12 = vmax.f32 %v1835_v41, 0.0  ;;  %19311 = vmatpush3.bf16.msra.mxu1 %v21603_v35  ;;  %18042 = vmatprep.mubr.msk.f32.mxu1 %vm373_vm0, %v2335_v38  ;;  %v1538_v54 = vmax.f32 %v1412_v51, 0.0  ;;  %v17569_v63 = vpop.f32.mrb[42].mxu0 }
 0x148   : > { %v1956_v43 = vmax.f32 %v1830_v58, 0.0  ;;  %v17625_v60 = vpop.f32.mrb[42].mxu1  ;;  %19313 = vmatprep.subr.bf16.mxu1 %v21624_v3  ;;  %17707 = vmatmul.mubr.msk.f32.vlgmr.msra.gmra.mrb[64].mxu0 %vm373_vm0, %v21749_v37  ;;  %v21764_v5 = vmax.f32 %v1531_v44, %v1539_v53  ;;  %v1427_v6 = vadd.f32 %v17569_v63, %v21414_v25  ;;  %v1421_v10 = vpop.f32.mrb[43].mxu0  ;;  %v1534_v22 = vmax.f32 %v21753_v49, 0.0 }
 0x149   : > { %v21766_v4 = vmax.f32 %v1949_v55, %v1957_v12  ;;  %v1845_v8 = vadd.f32 %v17625_v60, %v21414_v25  ;;  %v1839_v15 = vpop.f32.mrb[43].mxu1  ;;  %17709 = vmatprep.mubr.msk.f32.mxu0 %vm373_vm0, %v21760_v61  ;;  %v21772_v16 = vmax.f32 %v1530_v45, %v1538_v54  ;;  %v1422_v17 = vadd.f32 %v21414_v25, %v1421_v10 }
 0x14a   : > { %v21774_v48 = vmax.f32 %v1948_v57, %v1956_v43  ;;  %v1840_v18 = vadd.f32 %v21414_v25, %v1839_v15  ;;  %18043 = vmatmul.mubr.msk.f32.vlgmr.msra.gmra.mrb[64].mxu1 %vm373_vm0, %v21749_v37  ;;  %v1541_v19 = vmax.f32 %v1427_v6, 0.0  ;;  %19123 = vmatpush3.bf16.msra.mxu0 %v21710_v28  ;;  %v21819_v43 = vld [vmem:[#allocation2 + $0xa] sm:$0xff]  ;;  %v21830_v6 = vld [vmem:[#allocation2 + $0x12] sm:$0xff] }
 0x14b   : > { %v1959_v20 = vmax.f32 %v1845_v8, 0.0  ;;  %18045 = vmatprep.mubr.msk.f32.mxu1 %vm373_vm0, %v21760_v61  ;;  %19315 = vmatpush3.bf16.msra.mxu1 %v21624_v3  ;;  %v1540_v27 = vmax.f32 %v1422_v17, 0.0  ;;  %v17572_v24 = vpop.f32.mrb[44].mxu0 }
 0x14c   : > { %v1958_v33 = vmax.f32 %v1840_v18, 0.0  ;;  %v17628_v38 = vpop.f32.mrb[44].mxu1  ;;  %19317 = vmatprep.subr.bf16.mxu1 %v21652_v9  ;;  %v21791_v44 = vmax.f32 %v1533_v36, %v1541_v19  ;;  %v1437_v55 = vadd.f32 %v17572_v24, %v21414_v25  ;;  %v1431_v0 = vpop.f32.mrb[45].mxu0  ;;  %17710 = vmatmul.mubr.msk.f32.gmra.mrb[66].mxu0 %vm373_vm0, %v21785_v21  ;;  %v21837_v19 = vld [vmem:[#allocation2 + $0x1a] sm:$0xff]  ;;  %v5117_v24 = vld [vmem:[#allocation2 + $0x42] sm:$0xff] }
 0x14d   : > { %v21793_v45 = vmax.f32 %v1951_v29, %v1959_v20  ;;  %v1855_v57 = vadd.f32 %v17628_v38, %v21414_v25  ;;  %v1849_v1 = vpop.f32.mrb[45].mxu1  ;;  %v21799_v40 = vmax.f32 %v1532_v47, %v1540_v27  ;;  %v1432_v46 = vadd.f32 %v21414_v25, %v1431_v0  ;;  %v2445_v29 = vld [vmem:[#allocation2 + $0x2] sm:$0xff]  ;;  %19125 = vmatprep.subr.bf16.mxu0 %v21715_v39 }
 0x14e   : > { %v21801_v41 = vmax.f32 %v1950_v50, %v1958_v33  ;;  %v1850_v36 = vadd.f32 %v21414_v25, %v1849_v1  ;;  %18046 = vmatmul.mubr.msk.f32.gmra.mrb[66].mxu1 %vm373_vm0, %v21785_v21  ;;  %v1543_v34 = vmax.f32 %v1437_v55, 0.0  ;;  %v1402_v47 = vadd.f32 %v21414_v25, %v21695_v32  ;;  %19127 = vmatpush3.bf16.msra.mxu0 %v21715_v39  ;;  %v15449_v0 = vld [vmem:[%s25361_s3 + $0xc0] sm:$0xff]  ;;  %v15450_v1 = vld [vmem:[%s25361_s3 + $0xc8] sm:$0xff] }
 0x14f   : > { %v1961_v51 = vmax.f32 %v1855_v57, 0.0  ;;  %19319 = vmatpush3.bf16.msra.mxu1 %v21652_v9  ;;  %18056 = vmatprep.mubr.msk.f32.mxu1 %vm373_vm0, %v2445_v29  ;;  %v1820_v50 = vadd.f32 %v21414_v25, %v21697_v23  ;;  %v1542_v58 = vmax.f32 %v1432_v46, 0.0  ;;  %v17575_v42 = vpop.f32.mrb[46].mxu0 }
 0x150   : > { %v1960_v62 = vmax.f32 %v1850_v36, 0.0  ;;  %v17631_v53 = vpop.f32.mrb[46].mxu1  ;;  %19321 = vmatprep.subr.bf16.mxu1 %v21710_v28  ;;  %v21815_v12 = vmax.f32 %v1535_v59, %v1543_v34  ;;  %v1441_v13 = vpop.f32.mrb[47].mxu0  ;;  %v1536_v8 = vmax.f32 %v1402_v47, 0.0  ;;  %17720 = vmatprep.mubr.msk.f32.mxu0 %vm373_vm0, %v2445_v29  ;;  %v21866_v36 = vld [vmem:[#allocation2 + $0x4a] sm:$0xff]  ;;  %v21873_v34 = vld [vmem:[#allocation2 + $0x52] sm:$0xff] }
 0x151   : > { %v21817_v49 = vmax.f32 %v1953_v52, %v1961_v51  ;;  %v1859_v54 = vpop.f32.mrb[47].mxu1  ;;  %v21822_v32 = vmax.f32 %v1534_v22, %v1542_v58  ;;  %v1442_v63 = vadd.f32 %v21414_v25, %v1441_v13  ;;  %v1954_v10 = vmax.f32 %v1820_v50, 0.0  ;;  %17721 = vmatmul.mubr.msk.f32.vlgmr.msra.gmra.mrb[64].mxu0 %vm373_vm0, %v21819_v43  ;;  %v15443_v22 = vld [vmem:[%s25361_s3 + $0xb0] sm:$0xff]  ;;  %19129 = vmatprep.subr.bf16.mxu0 %v21717_v56 }
 0x152   : > { %v21824_v23 = vmax.f32 %v1952_v26, %v1960_v62  ;;  %v1860_v60 = vadd.f32 %v21414_v25, %v1859_v54  ;;  %18057 = vmatmul.mubr.msk.f32.vlgmr.msra.gmra.mrb[64].mxu1 %vm373_vm0, %v21819_v43  ;;  %v15444_v26 = vld [vmem:[%s25361_s3 + $0xb8] sm:$0xff]  ;;  %17723 = vmatprep.mubr.msk.f32.mxu0 %vm373_vm0, %v21830_v6  ;;  %v21879_v51 = vpack.c.bf16 %v15450_v1, %v15449_v0  ;;  %v15451_v58 = vld [vmem:[%s25361_s3 + $0xd0] sm:$0xff]  ;;  %v21926_v0 = vld [vmem:[%s25360_s2] ss:$0 sm:$0xff] }
 0x153   : > { %18059 = vmatprep.mubr.msk.f32.mxu1 %vm373_vm0, %v21830_v6  ;;  %19323 = vmatpush3.bf16.msra.mxu1 %v21710_v28  ;;  %v1544_v15 = vmax.f32 %v1442_v63, 0.0  ;;  %v17578_v18 = vpop.f32.mrb[48].mxu0  ;;  %v21858_v57 = vpack.c.bf16 %v15444_v26, %v15443_v22  ;;  %v15452_v62 = vld [vmem:[%s25361_s3 + $0xd8] sm:$0xff] }
 0x154   : > { %v1962_v17 = vmax.f32 %v1860_v60, 0.0  ;;  %v17634_v59 = vpop.f32.mrb[48].mxu1  ;;  %19325 = vmatprep.subr.bf16.mxu1 %v21715_v39  ;;  %v1451_v52 = vpop.f32.mrb[49].mxu0  ;;  %19131 = vmatpush3.bf16.msra.mxu0 %v21717_v56  ;;  %v1457_v42 = vadd.f32 %v17578_v18, %v21414_v25  ;;  %v21891_v54 = vld [vmem:[#allocation2 + $0x5a] sm:$0xff]  ;;  %v21919_v26 = vpack.c.bf16 %v15452_v62, %v15451_v58 }
 0x155   : > { %v1869_v20 = vpop.f32.mrb[49].mxu1  ;;  %v21847_v27 = vmax.f32 %v1536_v8, %v1544_v15  ;;  %25457 = vst [vmem:[#allocation15_spill] sm:$0xff] %v21858_v57  ;;  %17724 = vmatmul.mubr.msk.f32.gmra.mrb[66].mxu0 %vm373_vm0, %v21837_v19  ;;  %19133 = vmatprep.subr.bf16.mxu0 %v21858_v57  ;;  %v1875_v53 = vadd.f32 %v17634_v59, %v21414_v25  ;;  %v15457_v60 = vld [vmem:[%s25361_s3 + $0xe0] sm:$0xff]  ;;  %v15458_v8 = vld [vmem:[%s25361_s3 + $0xe8] sm:$0xff] }
 0x156   : > { %v21849_v33 = vmax.f32 %v1954_v10, %v1962_v17  ;;  %18060 = vmatmul.mubr.msk.f32.gmra.mrb[66].mxu1 %vm373_vm0, %v21837_v19  ;;  %v1452_v10 = vadd.f32 %v21414_v25, %v1451_v52  ;;  %v1870_v15 = vadd.f32 %v21414_v25, %v1869_v20 }
 0x157   : > { %19327 = vmatpush3.bf16.msra.mxu1 %v21715_v39  ;;  %18070 = vmatprep.mubr.msk.f32.mxu1 %vm373_vm0, %v5117_v24  ;;  %v17581_v38 = vpop.f32.mrb[50].mxu0  ;;  %v21921_v24 = vpack.c.bf16 %v15458_v8, %v15457_v60 }
 0x158   : > { %v17637_v55 = vpop.f32.mrb[50].mxu1  ;;  %v1461_v46 = vpop.f32.mrb[51].mxu0  ;;  %19329 = vmatprep.subr.bf16.mxu1 %v21717_v56  ;;  %19135 = vmatpush3.bf16.msra.mxu0 %v21858_v57  ;;  %v21905_v17 = vadd.f32 %v17581_v38, %v21414_v25  ;;  %v1547_v38 = vmax.f32 %v1457_v42, 0.0  ;;  %v1964_v58 = vmax.f32 %v1870_v15, 0.0 }
 0x159   : > { %v1879_v29 = vpop.f32.mrb[51].mxu1  ;;  %v21908_v18 = vadd.f32 %v17637_v55, %v21414_v25  ;;  %19137 = vmatprep.subr.bf16.mxu0 %v21879_v51  ;;  %v21913_v59 = vadd.f32 %v21414_v25, %v1461_v46  ;;  %v1965_v55 = vmax.f32 %v1875_v53, 0.0 }
 0x15a   : > { %18071 = vmatmul.mubr.msk.f32.vlgmr.msra.gmra.mrb[64].mxu1 %vm373_vm0, %v21866_v36  ;;  %v21916_v52 = vadd.f32 %v21414_v25, %v1879_v29  ;;  %v1549_v53 = vmax.f32 %v21905_v17, 0.0 }
 0x15b   : > { %18073 = vmatprep.mubr.msk.f32.mxu1 %vm373_vm0, %v21873_v34  ;;  %19331 = vmatpush3.bf16.msra.mxu1 %v21717_v56  ;;  %v17584_v47 = vpop.f32.mrb[52].mxu0  ;;  %v1967_v60 = vmax.f32 %v21908_v18, 0.0 }
 0x15c   : > { %v17640_v50 = vpop.f32.mrb[52].mxu1  ;;  %19333 = vmatprep.subr.bf16.mxu1 %v21858_v57  ;;  %v1471_v13 = vpop.f32.mrb[53].mxu0  ;;  %v21929_v1 = vadd.f32 %v21926_v0, %v17584_v47  ;;  %v1548_v47 = vmax.f32 %v21913_v59, 0.0  ;;  %v1966_v8 = vmax.f32 %v21916_v52, 0.0 }
 0x15d   : > { %v1889_v63 = vpop.f32.mrb[53].mxu1  ;;  %v21932_v25 = vadd.f32 %v21926_v0, %v17640_v50  ;;  %v21935_v62 = vadd.f32 %v21926_v0, %v1471_v13 }
 0x15e   : > { %18074 = vmatmul.mubr.msk.f32.gmra.mrb[66].mxu1 %vm373_vm0, %v21891_v54  ;;  %v21938_v42 = vadd.f32 %v21926_v0, %v1889_v63 }
 0x15f   : > { %19335 = vmatpush3.bf16.msra.mxu1 %v21858_v57  ;;  %v17587_v20 = vpop.f32.mrb[54].mxu0 }
 0x160   : > { %v17643_v22 = vpop.f32.mrb[54].mxu1  ;;  %19337 = vmatprep.subr.bf16.mxu1 %v21879_v51  ;;  %v1481_v46 = vpop.f32.mrb[55].mxu0  ;;  %v1546_v20 = vmax.f32 %v1452_v10, 0.0 }
 0x161   : > { %v1899_v29 = vpop.f32.mrb[55].mxu1  ;;  %v21945_v50 = vadd.f32 %v21926_v0, %v1481_v46 }
 0x162   : > { %v21948_v10 = vadd.f32 %v21926_v0, %v1899_v29 }
 0x163   : > { %v17590_v15 = vpop.f32.mrb[56].mxu0  ;;  %v1552_v22 = vmax.f32 %v21945_v50, 0.0  ;;  %v15465_v50 = vld [vmem:[%s25361_s3 + $0x100] sm:$0xff] }
 0x164   : > { %v17646_v13 = vpop.f32.mrb[56].mxu1  ;;  %v1497_v17 = vadd.f32 %v21926_v0, %v17590_v15  ;;  %v1491_v57 = vpop.f32.mrb[57].mxu0 }
 0x165   : > { %v1915_v18 = vadd.f32 %v21926_v0, %v17646_v13  ;;  %v1909_v59 = vpop.f32.mrb[57].mxu1  ;;  %v1492_v56 = vadd.f32 %v21926_v0, %v1491_v57 }
 0x166   : > { %v1910_v29 = vadd.f32 %v21926_v0, %v1909_v59  ;;  %v1555_v39 = vmax.f32 %v1497_v17, 0.0 }
 0x167   : > { %v1973_v28 = vmax.f32 %v1915_v18, 0.0  ;;  %v1554_v9 = vmax.f32 %v1492_v56, 0.0  ;;  %v17593_v3 = vpop.f32.mrb[58].mxu0 }
 0x168   : > { %v1972_v15 = vmax.f32 %v1910_v29, 0.0  ;;  %v17649_v13 = vpop.f32.mrb[58].mxu1  ;;  %v1571_v35 = vmax.f32 %v1547_v38, %v1555_v39  ;;  %v1507_v52 = vadd.f32 %v21926_v0, %v17593_v3  ;;  %v1501_v30 = vpop.f32.mrb[59].mxu0 }
 0x169   : > { %v1989_v31 = vmax.f32 %v1965_v55, %v1973_v28  ;;  %v1925_v46 = vadd.f32 %v21926_v0, %v17649_v13  ;;  %v1919_v57 = vpop.f32.mrb[59].mxu1  ;;  %v1570_v14 = vmax.f32 %v1546_v20, %v1554_v9  ;;  %v1502_v17 = vadd.f32 %v21926_v0, %v1501_v30 }
 0x16a   : > { %v1988_v59 = vmax.f32 %v1964_v58, %v1972_v15  ;;  %v1920_v18 = vadd.f32 %v21926_v0, %v1919_v57  ;;  %v21965_v63 = vmax.f32 %v21764_v5, %v1571_v35  ;;  %v1557_v39 = vmax.f32 %v1507_v52, 0.0 }
 0x16b   : > { %v21968_v56 = vmax.f32 %v21766_v4, %v1989_v31  ;;  %v1975_v28 = vmax.f32 %v1925_v46, 0.0  ;;  %v1578_v3 = vmax.f32 %v21772_v16, %v1570_v14  ;;  %v1556_v55 = vmax.f32 %v1502_v17, 0.0  ;;  %v17596_v20 = vpop.f32.mrb[60].mxu0 }
 0x16c   : > { %v21972_v38 = vmax.f32 %v21774_v48, %v1988_v59  ;;  %v1974_v9 = vmax.f32 %v1920_v18, 0.0  ;;  %v17652_v58 = vpop.f32.mrb[60].mxu1  ;;  %1588 = vst [vmem:[#allocation2 + $0x88] sm:$0xff] %v21965_v63  ;;  %v1573_v30 = vmax.f32 %v1549_v53, %v1557_v39  ;;  %v1517_v31 = vadd.f32 %v21926_v0, %v17596_v20  ;;  %v1511_v4 = vpop.f32.mrb[61].mxu0 }
 0x16d   : > { %2006 = vst [vmem:[#allocation2 + $0xc8] sm:$0xff] %v21968_v56  ;;  %v1991_v35 = vmax.f32 %v1967_v60, %v1975_v28  ;;  %v1935_v5 = vadd.f32 %v21926_v0, %v17652_v58  ;;  %v1929_v52 = vpop.f32.mrb[61].mxu1  ;;  %1587 = vst [vmem:[#allocation2 + $0x80] sm:$0xff] %v1578_v3  ;;  %v1572_v14 = vmax.f32 %v1548_v47, %v1556_v55  ;;  %17734 = vmatprep.mubr.msk.f32.mxu0 %vm373_vm0, %v1578_v3 }
 0x16e   : > { %2005 = vst [vmem:[#allocation2 + $0xc0] sm:$0xff] %v21972_v38  ;;  %v1990_v16 = vmax.f32 %v1966_v8, %v1974_v9  ;;  %v1512_v48 = vadd.f32 %v21926_v0, %v1511_v4  ;;  %v1930_v46 = vadd.f32 %v21926_v0, %v1929_v52  ;;  %v21983_v53 = vmax.f32 %v21791_v44, %v1573_v30 }
 0x16f   : > { %v21986_v60 = vmax.f32 %v21793_v45, %v1991_v35  ;;  %v1559_v29 = vmax.f32 %v1517_v31, 0.0  ;;  %v1977_v15 = vmax.f32 %v1935_v5, 0.0  ;;  %18084 = vmatprep.mubr.msk.f32.mxu1 %vm373_vm0, %v21972_v38  ;;  %17735 = vmatmul.mubr.msk.f32.vlgmr.msra.gmra.mrb[64].mxu0 %vm373_vm0, %v21965_v63  ;;  %v21993_v47 = vmax.f32 %v21799_v40, %v1572_v14  ;;  %v17599_v57 = vpop.f32.mrb[62].mxu0  ;;  %v15468_v14 = vld [vmem:[%s25361_s3 + $0x118] sm:$0xff] }
 0x170   : > { %v21996_v8 = vmax.f32 %v21801_v41, %v1990_v16  ;;  %v1558_v13 = vmax.f32 %v1512_v48, 0.0  ;;  %v1976_v44 = vmax.f32 %v1930_v46, 0.0  ;;  %v17655_v59 = vpop.f32.mrb[62].mxu1  ;;  %18085 = vmatmul.mubr.msk.f32.vlgmr.msra.gmra.mrb[64].mxu1 %vm373_vm0, %v21968_v56  ;;  %19139 = vmatpush3.bf16.msra.mxu0 %v21879_v51  ;;  %1590 = vst [vmem:[#allocation2 + $0x98] sm:$0xff] %v21983_v53  ;;  %v25458_v45 = vmax.f32 %v21929_v1, 0.0  ;;  %v1521_v18 = vpop.f32.mrb[63].mxu0 }
 0x171   : > { %2008 = vst [vmem:[#allocation2 + $0xd8] sm:$0xff] %v21986_v60  ;;  %v25459_v17 = vmax.f32 %v21932_v25, 0.0  ;;  %v1939_v39 = vpop.f32.mrb[63].mxu1  ;;  %19339 = vmatpush3.bf16.msra.mxu1 %v21879_v51  ;;  %1589 = vst [vmem:[#allocation2 + $0x90] sm:$0xff] %v21993_v47  ;;  %v25460_v28 = vmax.f32 %v21935_v62, 0.0  ;;  %v25461_v55 = vmax.f32 %v21938_v42, 0.0  ;;  %v1522_v1 = vadd.f32 %v21926_v0, %v1521_v18  ;;  %17737 = vmatprep.mubr.msk.f32.mxu0 %vm373_vm0, %v21993_v47 }
 0x172   : > { %v1575_v40 = vmax.f32 %v25458_v45, %v1559_v29  ;;  %2007 = vst [vmem:[#allocation2 + $0xd0] sm:$0xff] %v21996_v8  ;;  %v1940_v20 = vadd.f32 %v21926_v0, %v1939_v39  ;;  %18087 = vmatprep.mubr.msk.f32.mxu1 %vm373_vm0, %v21996_v8  ;;  %v15459_v62 = vld [vmem:[%s25361_s3 + $0xf0] sm:$0xff]  ;;  %v15460_v0 = vld [vmem:[%s25361_s3 + $0xf8] sm:$0xff]  ;;  %19141 = vmatprep.subr.bf16.mxu0 %v21919_v26  ;;  %v15473_v29 = vld [vmem:[%s25361_s3 + $0x120] sm:$0xff] }
 0x173   : > { %v1993_v41 = vmax.f32 %v25459_v17, %v1977_v15  ;;  %v1574_v3 = vmax.f32 %v25460_v28, %v1558_v13  ;;  %v1992_v9 = vmax.f32 %v25461_v55, %v1976_v44  ;;  %17738 = vmatmul.mubr.msk.f32.gmra.mrb[66].mxu0 %vm373_vm0, %v21983_v53  ;;  %19341 = vmatprep.subr.bf16.mxu1 %v21919_v26  ;;  %v15474_v15 = vld [vmem:[%s25361_s3 + $0x128] sm:$0xff]  ;;  %v15475_v59 = vld [vmem:[%s25361_s3 + $0x130] sm:$0xff]  ;;  %v15476_v45 = vld [vmem:[%s25361_s3 + $0x138] sm:$0xff] }
 0x174   : > { %v1583_v25 = vmax.f32 %v21815_v12, %v1575_v40  ;;  %v1978_v30 = vmax.f32 %v1940_v20, 0.0  ;;  %18088 = vmatmul.mubr.msk.f32.gmra.mrb[66].mxu1 %vm373_vm0, %v21986_v60  ;;  %19143 = vmatpush3.bf16.msra.mxu0 %v21919_v26  ;;  %v22041_v35 = vld [vmem:[#allocation2 + $0x81] sm:$0xff]  ;;  %v22052_v5 = vpack.c.bf16 %v15460_v0, %v15459_v62  ;;  %v22126_v57 = vpack.c.bf16 %v15474_v15, %v15473_v29  ;;  %v22264_v15 = vld [vmem:[#allocation2 + $0x18] sm:$0xff] }
 0x175   : > { %v2001_v58 = vmax.f32 %v21817_v49, %v1993_v41  ;;  %v22031_v42 = vmax.f32 %v21822_v32, %v1574_v3  ;;  %v22034_v12 = vmax.f32 %v21824_v23, %v1992_v9  ;;  %v1560_v49 = vmax.f32 %v1522_v1, 0.0  ;;  %17748 = vmatprep.mubr.msk.f32.mxu0 %vm373_vm0, %v21972_v38  ;;  %19343 = vmatpush3.bf16.msra.mxu1 %v21919_v26  ;;  %v22099_v48 = vld [vmem:[#allocation2 + $0xc1] sm:$0xff]  ;;  %v15483_v9 = vld [vmem:[%s25361_s3 + $0x150] sm:$0xff]  ;;  %v15484_v1 = vld [vmem:[%s25361_s3 + $0x158] sm:$0xff] }
 0x176   : > { %1592 = vst [vmem:[#allocation2 + $0xa8] sm:$0xff] %v1583_v25  ;;  %v25462_v23 = vmax.f32 %v21948_v10, 0.0  ;;  %18098 = vmatprep.mubr.msk.f32.mxu1 %vm373_vm0, %v22041_v35  ;;  %19145 = vmatprep.subr.bf16.mxu0 %v21921_v24  ;;  %v15466_v10 = vld [vmem:[%s25361_s3 + $0x108] sm:$0xff]  ;;  %v22150_v41 = vpack.c.bf16 %v15476_v45, %v15475_v59  ;;  %v15481_v18 = vld [vmem:[%s25361_s3 + $0x140] sm:$0xff]  ;;  %v22266_v59 = vld [vmem:[#allocation2 + $0x50] sm:$0xff] }
 0x177   : > { %2010 = vst [vmem:[#allocation2 + $0xe8] sm:$0xff] %v2001_v58  ;;  %1591 = vst [vmem:[#allocation2 + $0xa0] sm:$0xff] %v22031_v42  ;;  %v1576_v32 = vmax.f32 %v1552_v22, %v1560_v49  ;;  %17749 = vmatmul.mubr.msk.f32.vlgmr.msra.gmra.mrb[64].mxu0 %vm373_vm0, %v21968_v56  ;;  %19345 = vmatprep.subr.bf16.mxu1 %v21921_v24  ;;  %v22147_v17 = vld [vmem:[#allocation2 + $0x82] sm:$0xff]  ;;  %v22198_v58 = vpack.c.bf16 %v15484_v1, %v15483_v9  ;;  %v22273_v45 = vld [vmem:[#allocation2 + $0x58] sm:$0xff] }
 0x178   : > { %2009 = vst [vmem:[#allocation2 + $0xe0] sm:$0xff] %v22034_v12  ;;  %v1994_v31 = vmax.f32 %v25462_v23, %v1978_v30  ;;  %v22068_v4 = vld [vmem:[#allocation2 + $0x89] sm:$0xff]  ;;  %17751 = vmatprep.mubr.msk.f32.mxu0 %vm373_vm0, %v21996_v8  ;;  %19147 = vmatpush3.bf16.msra.mxu0 %v21921_v24  ;;  %v22073_v52 = vld [vmem:[#allocation2 + $0x91] sm:$0xff]  ;;  %v15489_v62 = vld [vmem:[%s25361_s3 + $0x160] sm:$0xff] }
 0x179   : > { %v1584_v22 = vmax.f32 %v21847_v27, %v1576_v32  ;;  %18099 = vmatmul.mubr.msk.f32.vlgmr.msra.gmra.mrb[64].mxu1 %vm373_vm0, %v22068_v4  ;;  %19149 = vmatprep.subr.bf16.mxu0 %v22052_v5  ;;  %v22078_v27 = vpack.c.bf16 %v15466_v10, %v15465_v50  ;;  %v22116_v13 = vld [vmem:[#allocation2 + $0xc9] sm:$0xff]  ;;  %v22123_v44 = vld [vmem:[#allocation2 + $0xd1] sm:$0xff] }
 0x17a   : > { %v2002_v38 = vmax.f32 %v21849_v33, %v1994_v31  ;;  %18101 = vmatprep.mubr.msk.f32.mxu1 %vm373_vm0, %v22073_v52  ;;  %19347 = vmatpush3.bf16.msra.mxu1 %v21921_v24  ;;  %v15467_v33 = vld [vmem:[%s25361_s3 + $0x110] sm:$0xff]  ;;  %v15482_v39 = vld [vmem:[%s25361_s3 + $0x148] sm:$0xff]  ;;  %v15492_v31 = vld [vmem:[%s25361_s3 + $0x178] sm:$0xff] }
 0x17b   : > { %1593 = vst [vmem:[#allocation2 + $0xb0] sm:$0xff] %v1584_v22  ;;  %17752 = vmatmul.mubr.msk.f32.gmra.mrb[66].mxu0 %vm373_vm0, %v21986_v60  ;;  %19349 = vmatprep.subr.bf16.mxu1 %v22052_v5  ;;  %v22102_v46 = vpack.c.bf16 %v15468_v14, %v15467_v33  ;;  %v22164_v28 = vld [vmem:[#allocation2 + $0x8a] sm:$0xff]  ;;  %v22171_v3 = vld [vmem:[#allocation2 + $0x92] sm:$0xff]  ;;  %v22174_v55 = vpack.c.bf16 %v15482_v39, %v15481_v18  ;;  %v22195_v25 = vld [vmem:[#allocation2 + $0xc2] sm:$0xff] }
 0x17c   : > { %2011 = vst [vmem:[#allocation2 + $0xf0] sm:$0xff] %v2002_v38  ;;  %19151 = vmatpush3.bf16.msra.mxu0 %v22052_v5  ;;  %17762 = vmatprep.mubr.msk.f32.mxu0 %vm373_vm0, %v22041_v35  ;;  %v15490_v0 = vld [vmem:[%s25361_s3 + $0x168] sm:$0xff]  ;;  %v22219_v30 = vld [vmem:[#allocation2 + $0xd2] sm:$0xff]  ;;  %v15497_v14 = vld [vmem:[%s25361_s3 + $0x180] sm:$0xff] }
 0x17d   : > { %19153 = vmatprep.subr.bf16.mxu0 %v22078_v27  ;;  %v22212_v49 = vld [vmem:[#allocation2 + $0xca] sm:$0xff]  ;;  %v22222_v32 = vpack.c.bf16 %v15490_v0, %v15489_v62  ;;  %v22281_v39 = vld [vmem:[#allocation2 + $0x20] sm:$0xff]  ;;  %v15500_v1 = vld [vmem:[%s25361_s3 + $0x198] sm:$0xff] }
 0x17e   : > { %v22092_v16 = vld [vmem:[#allocation2 + $0x99] sm:$0xff]  ;;  %19351 = vmatpush3.bf16.msra.mxu1 %v22052_v5  ;;  %v15491_v23 = vld [vmem:[%s25361_s3 + $0x170] sm:$0xff]  ;;  %v22236_v50 = vld [vmem:[#allocation2 + $0x8] sm:$0xff] }
 0x17f   : > { %18102 = vmatmul.mubr.msk.f32.gmra.mrb[66].mxu1 %vm373_vm0, %v22092_v16  ;;  %17763 = vmatmul.mubr.msk.f32.vlgmr.msra.gmra.mrb[64].mxu0 %vm373_vm0, %v22068_v4  ;;  %v22140_v40 = vld [vmem:[#allocation2 + $0xd9] sm:$0xff]  ;;  %25463 = vst [vmem:[#allocation16_spill] sm:$0xff] %v22222_v32  ;;  %v22245_v22 = vld [vmem:[#allocation2 + $0x48] sm:$0xff]  ;;  %v22248_v38 = vpack.c.bf16 %v15492_v31, %v15491_v23  ;;  %v22253_v33 = vld [vmem:[#allocation2 + $0x10] sm:$0xff] }
 0x180   : > { %18112 = vmatprep.mubr.msk.f32.mxu1 %vm373_vm0, %v22099_v48  ;;  %19353 = vmatprep.subr.bf16.mxu1 %v22078_v27  ;;  %v22188_v20 = vld [vmem:[#allocation2 + $0x9a] sm:$0xff]  ;;  %v15498_v29 = vld [vmem:[%s25361_s3 + $0x188] sm:$0xff]  ;;  %v15499_v9 = vld [vmem:[%s25361_s3 + $0x190] sm:$0xff] }
 0x181   : > { %17765 = vmatprep.mubr.msk.f32.mxu0 %vm373_vm0, %v22073_v52  ;;  %19155 = vmatpush3.bf16.msra.mxu0 %v22078_v27  ;;  %v22238_v10 = vld [vmem:[#allocation2 + $0xda] sm:$0xff]  ;;  %25464 = vst [vmem:[#allocation17_spill] sm:$0xff] %v22248_v38  ;;  %v22276_v18 = vpack.c.bf16 %v15498_v29, %v15497_v14  ;;  %v22299_v0 = vld [vmem:[#allocation2 + $0x9] sm:$0xff]  ;;  %v22302_v23 = vpack.c.bf16 %v15500_v1, %v15499_v9  ;;  %v22316_v29 = vld [vmem:[#allocation2 + $0x11] sm:$0xff] }
 0x182   : > { %19157 = vmatprep.subr.bf16.mxu0 %v22102_v46  ;;  %v22292_v62 = vld [vmem:[#allocation2 + $0x60] sm:$0xff]  ;;  %v15506_v14 = vld [vmem:[%s25361_s3 + $0x1a8] sm:$0xff]  ;;  %v15507_v1 = vld [vmem:[%s25361_s3 + $0x1b0] sm:$0xff] }
 0x183   : > { %18113 = vmatmul.mubr.msk.f32.vlgmr.msra.gmra.mrb[64].mxu1 %vm373_vm0, %v22116_v13  ;;  %17766 = vmatmul.mubr.msk.f32.gmra.mrb[66].mxu0 %vm373_vm0, %v22092_v16  ;;  %25465 = vst [vmem:[#allocation18_spill] sm:$0xff] %v22276_v18  ;;  %25466 = vst [vmem:[#allocation19_spill] sm:$0xff] %v22302_v23  ;;  %v15505_v31 = vld [vmem:[%s25361_s3 + $0x1a0] sm:$0xff] }
 0x184   : > { %18115 = vmatprep.mubr.msk.f32.mxu1 %vm373_vm0, %v22123_v44  ;;  %19355 = vmatpush3.bf16.msra.mxu1 %v22078_v27  ;;  %v22324_v9 = vpack.c.bf16 %v15506_v14, %v15505_v31  ;;  %v22338_v31 = vld [vmem:[#allocation2 + $0x21] sm:$0xff] }
 0x185   : > { %19357 = vmatprep.subr.bf16.mxu1 %v22102_v46  ;;  %19159 = vmatpush3.bf16.msra.mxu0 %v22102_v46  ;;  %v15513_v14 = vld [vmem:[%s25361_s3 + $0x1c0] sm:$0xff] }
 0x186   : > { %17776 = vmatprep.mubr.msk.f32.mxu0 %vm373_vm0, %v22099_v48  ;;  %19161 = vmatprep.subr.bf16.mxu0 %v22126_v57  ;;  %25467 = vst [vmem:[#allocation20_spill] sm:$0xff] %v22324_v9 }
 0x187   : > { %18116 = vmatmul.mubr.msk.f32.gmra.mrb[66].mxu1 %vm373_vm0, %v22140_v40 }
 0x188   : > { %19359 = vmatpush3.bf16.msra.mxu1 %v22102_v46  ;;  %18126 = vmatprep.mubr.msk.f32.mxu1 %vm373_vm0, %v22147_v17 }
 0x189   : > { %17777 = vmatmul.mubr.msk.f32.vlgmr.msra.gmra.mrb[64].mxu0 %vm373_vm0, %v22116_v13  ;;  %19361 = vmatprep.subr.bf16.mxu1 %v22126_v57 }
 0x18a   : > { %17779 = vmatprep.mubr.msk.f32.mxu0 %vm373_vm0, %v22123_v44  ;;  %19163 = vmatpush3.bf16.msra.mxu0 %v22126_v57 }
 0x18b   : > { %18127 = vmatmul.mubr.msk.f32.vlgmr.msra.gmra.mrb[64].mxu1 %vm373_vm0, %v22164_v28  ;;  %19165 = vmatprep.subr.bf16.mxu0 %v22150_v41 }
 0x18c   : > { %18129 = vmatprep.mubr.msk.f32.mxu1 %vm373_vm0, %v22171_v3  ;;  %19363 = vmatpush3.bf16.msra.mxu1 %v22126_v57 }
 0x18d   : > { %17780 = vmatmul.mubr.msk.f32.gmra.mrb[66].mxu0 %vm373_vm0, %v22140_v40  ;;  %19365 = vmatprep.subr.bf16.mxu1 %v22150_v41 }
 0x18e   : > { %19167 = vmatpush3.bf16.msra.mxu0 %v22150_v41  ;;  %17790 = vmatprep.mubr.msk.f32.mxu0 %vm373_vm0, %v22147_v17 }
 0x18f   : > { %18130 = vmatmul.mubr.msk.f32.gmra.mrb[66].mxu1 %vm373_vm0, %v22188_v20  ;;  %19169 = vmatprep.subr.bf16.mxu0 %v22174_v55 }
 0x190   : > { %19367 = vmatpush3.bf16.msra.mxu1 %v22150_v41  ;;  %18140 = vmatprep.mubr.msk.f32.mxu1 %vm373_vm0, %v22195_v25 }
 0x191   : > { %17791 = vmatmul.mubr.msk.f32.vlgmr.msra.gmra.mrb[64].mxu0 %vm373_vm0, %v22164_v28  ;;  %19369 = vmatprep.subr.bf16.mxu1 %v22174_v55 }
 0x192   : > { %17793 = vmatprep.mubr.msk.f32.mxu0 %vm373_vm0, %v22171_v3  ;;  %19171 = vmatpush3.bf16.msra.mxu0 %v22174_v55 }
 0x193   : > { %18141 = vmatmul.mubr.msk.f32.vlgmr.msra.gmra.mrb[64].mxu1 %vm373_vm0, %v22212_v49  ;;  %19173 = vmatprep.subr.bf16.mxu0 %v22198_v58 }
 0x194   : > { %18143 = vmatprep.mubr.msk.f32.mxu1 %vm373_vm0, %v22219_v30  ;;  %19371 = vmatpush3.bf16.msra.mxu1 %v22174_v55 }
 0x195   : > { %17794 = vmatmul.mubr.msk.f32.gmra.mrb[66].mxu0 %vm373_vm0, %v22188_v20  ;;  %19373 = vmatprep.subr.bf16.mxu1 %v22198_v58 }
 0x196   : > { %19175 = vmatpush3.bf16.msra.mxu0 %v22198_v58  ;;  %17804 = vmatprep.mubr.msk.f32.mxu0 %vm373_vm0, %v22236_v50 }
 0x197   : > { %18144 = vmatmul.mubr.msk.f32.gmra.mrb[66].mxu1 %vm373_vm0, %v22238_v10  ;;  %19177 = vmatprep.subr.bf16.mxu0 %v22222_v32 }
 0x198   : > { %19375 = vmatpush3.bf16.msra.mxu1 %v22198_v58  ;;  %18154 = vmatprep.mubr.msk.f32.mxu1 %vm373_vm0, %v22245_v22 }
 0x199   : > { %17805 = vmatmul.mubr.msk.f32.vlgmr.msra.gmra.mrb[64].mxu0 %vm373_vm0, %v22253_v33  ;;  %19377 = vmatprep.subr.bf16.mxu1 %v22222_v32 }
 0x19a   : > { %17807 = vmatprep.mubr.msk.f32.mxu0 %vm373_vm0, %v22264_v15  ;;  %19179 = vmatpush3.bf16.msra.mxu0 %v22222_v32 }
 0x19b   : > { %18155 = vmatmul.mubr.msk.f32.vlgmr.msra.gmra.mrb[64].mxu1 %vm373_vm0, %v22266_v59  ;;  %19181 = vmatprep.subr.bf16.mxu0 %v22248_v38 }
 0x19c   : > { %18157 = vmatprep.mubr.msk.f32.mxu1 %vm373_vm0, %v22273_v45  ;;  %19379 = vmatpush3.bf16.msra.mxu1 %v22222_v32  ;;  %v15516_v32 = vld [vmem:[%s25361_s3 + $0x1d8] sm:$0xff] }
 0x19d   : > { %17808 = vmatmul.mubr.msk.f32.gmra.mrb[66].mxu0 %vm373_vm0, %v22281_v39  ;;  %19381 = vmatprep.subr.bf16.mxu1 %v22248_v38 }
 0x19e   : > { %19183 = vmatpush3.bf16.msra.mxu0 %v22248_v38  ;;  %17818 = vmatprep.mubr.msk.f32.mxu0 %vm373_vm0, %v22245_v22 }
 0x19f   : > { %18158 = vmatmul.mubr.msk.f32.gmra.mrb[66].mxu1 %vm373_vm0, %v22292_v62  ;;  %19185 = vmatprep.subr.bf16.mxu0 %v22276_v18 }
 0x1a0   : > { %19383 = vmatpush3.bf16.msra.mxu1 %v22248_v38  ;;  %18168 = vmatprep.mubr.msk.f32.mxu1 %vm373_vm0, %v22299_v0  ;;  %v15508_v38 = vld [vmem:[%s25361_s3 + $0x1b8] sm:$0xff] }
 0x1a1   : > { %17819 = vmatmul.mubr.msk.f32.vlgmr.msra.gmra.mrb[64].mxu0 %vm373_vm0, %v22266_v59  ;;  %19385 = vmatprep.subr.bf16.mxu1 %v22276_v18 }
 0x1a2   : > { %17821 = vmatprep.mubr.msk.f32.mxu0 %vm373_vm0, %v22273_v45  ;;  %19187 = vmatpush3.bf16.msra.mxu0 %v22276_v18 }
 0x1a3   : > { %18169 = vmatmul.mubr.msk.f32.vlgmr.msra.gmra.mrb[64].mxu1 %vm373_vm0, %v22316_v29  ;;  %19189 = vmatprep.subr.bf16.mxu0 %v22302_v23 }
 0x1a4   : > { %18171 = vmatprep.mubr.msk.f32.mxu1 %vm373_vm0, %v21643_v7  ;;  %19387 = vmatpush3.bf16.msra.mxu1 %v22276_v18  ;;  %v22346_v7 = vpack.c.bf16 %v15508_v38, %v15507_v1  ;;  %v15514_v18 = vld [vmem:[%s25361_s3 + $0x1c8] sm:$0xff]  ;;  %v22360_v38 = vld [vmem:[#allocation2 + $0x19] sm:$0xff] }
 0x1a5   : > { %17822 = vmatmul.mubr.msk.f32.gmra.mrb[66].mxu0 %vm373_vm0, %v22292_v62  ;;  %19389 = vmatprep.subr.bf16.mxu1 %v22302_v23  ;;  %v22368_v1 = vpack.c.bf16 %v15514_v18, %v15513_v14  ;;  %v22382_v18 = vld [vmem:[#allocation2 + $0x61] sm:$0xff] }
 0x1a6   : > { %19191 = vmatpush3.bf16.msra.mxu0 %v22302_v23  ;;  %17832 = vmatprep.mubr.msk.f32.mxu0 %vm373_vm0, %v22299_v0 }
 0x1a7   : > { %18172 = vmatmul.mubr.msk.f32.gmra.mrb[66].mxu1 %vm373_vm0, %v22338_v31  ;;  %19193 = vmatprep.subr.bf16.mxu0 %v22324_v9 }
 0x1a8   : > { %19391 = vmatpush3.bf16.msra.mxu1 %v22302_v23  ;;  %18182 = vmatprep.mubr.msk.f32.mxu1 %vm373_vm0, %v21749_v37  ;;  %v15515_v23 = vld [vmem:[%s25361_s3 + $0x1d0] sm:$0xff] }
 0x1a9   : > { %17833 = vmatmul.mubr.msk.f32.vlgmr.msra.gmra.mrb[64].mxu0 %vm373_vm0, %v22316_v29  ;;  %19393 = vmatprep.subr.bf16.mxu1 %v22324_v9  ;;  %v22390_v14 = vpack.c.bf16 %v15516_v32, %v15515_v23  ;;  %v22424_v23 = vld [vmem:[#allocation2 + $0x22] sm:$0xff] }
 0x1aa   : > { %17835 = vmatprep.mubr.msk.f32.mxu0 %vm373_vm0, %v22360_v38  ;;  %19195 = vmatpush3.bf16.msra.mxu0 %v22324_v9 }
 0x1ab   : > { %18183 = vmatmul.mubr.msk.f32.vlgmr.msra.gmra.mrb[64].mxu1 %vm373_vm0, %v21760_v61  ;;  %19197 = vmatprep.subr.bf16.mxu0 %v22346_v7 }
 0x1ac   : > { %18185 = vmatprep.mubr.msk.f32.mxu1 %vm373_vm0, %v21785_v21  ;;  %19395 = vmatpush3.bf16.msra.mxu1 %v22324_v9  ;;  %v15521_v9 = vld [vmem:[%s25361_s3 + $0x1e0] sm:$0xff] }
 0x1ad   : > { %17836 = vmatmul.mubr.msk.f32.gmra.mrb[66].mxu0 %vm373_vm0, %v22338_v31  ;;  %19397 = vmatprep.subr.bf16.mxu1 %v22346_v7 }
 0x1ae   : > { %19199 = vmatpush3.bf16.msra.mxu0 %v22346_v7  ;;  %17846 = vmatprep.mubr.msk.f32.mxu0 %vm373_vm0, %v21749_v37  ;;  %v15522_v37 = vld [vmem:[%s25361_s3 + $0x1e8] sm:$0xff] }
 0x1af   : > { %18186 = vmatmul.mubr.msk.f32.gmra.mrb[66].mxu1 %vm373_vm0, %v22382_v18  ;;  %19201 = vmatprep.subr.bf16.mxu0 %v22368_v1  ;;  %v22410_v32 = vpack.c.bf16 %v15522_v37, %v15521_v9  ;;  %v15529_v37 = vld [vmem:[%s25361_s3 + $0x200] sm:$0xff] }
 0x1b0   : > { %19399 = vmatpush3.bf16.msra.mxu1 %v22346_v7  ;;  %18196 = vmatprep.mubr.msk.f32.mxu1 %vm373_vm0, %v21819_v43 }
 0x1b1   : > { %17847 = vmatmul.mubr.msk.f32.vlgmr.msra.gmra.mrb[64].mxu0 %vm373_vm0, %v21760_v61  ;;  %19401 = vmatprep.subr.bf16.mxu1 %v22368_v1  ;;  %v15523_v61 = vld [vmem:[%s25361_s3 + $0x1f0] sm:$0xff] }
 0x1b2   : > { %17849 = vmatprep.mubr.msk.f32.mxu0 %vm373_vm0, %v21785_v21  ;;  %19203 = vmatpush3.bf16.msra.mxu0 %v22368_v1  ;;  %v15524_v21 = vld [vmem:[%s25361_s3 + $0x1f8] sm:$0xff] }
 0x1b3   : > { %18197 = vmatmul.mubr.msk.f32.vlgmr.msra.gmra.mrb[64].mxu1 %vm373_vm0, %v21830_v6  ;;  %19205 = vmatprep.subr.bf16.mxu0 %v22390_v14  ;;  %v22432_v9 = vpack.c.bf16 %v15524_v21, %v15523_v61  ;;  %v15537_v61 = vld [vmem:[%s25361_s3 + $0x220] sm:$0xff] }
 0x1b4   : > { %18199 = vmatprep.mubr.msk.f32.mxu1 %vm373_vm0, %v21837_v19  ;;  %19403 = vmatpush3.bf16.msra.mxu1 %v22368_v1 }
 0x1b5   : > { %17850 = vmatmul.mubr.msk.f32.gmra.mrb[66].mxu0 %vm373_vm0, %v22382_v18  ;;  %19405 = vmatprep.subr.bf16.mxu1 %v22390_v14 }
 0x1b6   : > { %19207 = vmatpush3.bf16.msra.mxu0 %v22390_v14  ;;  %17860 = vmatprep.mubr.msk.f32.mxu0 %vm373_vm0, %v21819_v43  ;;  %v15530_v43 = vld [vmem:[%s25361_s3 + $0x208] sm:$0xff] }
 0x1b7   : > { %18200 = vmatmul.mubr.msk.f32.gmra.mrb[66].mxu1 %vm373_vm0, %v22424_v23  ;;  %19209 = vmatprep.subr.bf16.mxu0 %v22410_v32 }
 0x1b8   : > { %19407 = vmatpush3.bf16.msra.mxu1 %v22390_v14  ;;  %18210 = vmatprep.mubr.msk.f32.mxu1 %vm373_vm0, %v21866_v36  ;;  %v22452_v36 = vpack.c.bf16 %v15530_v43, %v15529_v37 }
 0x1b9   : > { %17861 = vmatmul.mubr.msk.f32.vlgmr.msra.gmra.mrb[64].mxu0 %vm373_vm0, %v21830_v6  ;;  %19409 = vmatprep.subr.bf16.mxu1 %v22410_v32  ;;  %v15531_v6 = vld [vmem:[%s25361_s3 + $0x210] sm:$0xff] }
 0x1ba   : > { %17863 = vmatprep.mubr.msk.f32.mxu0 %vm373_vm0, %v21837_v19  ;;  %19211 = vmatpush3.bf16.msra.mxu0 %v22410_v32  ;;  %v15532_v19 = vld [vmem:[%s25361_s3 + $0x218] sm:$0xff] }
 0x1bb   : > { %18211 = vmatmul.mubr.msk.f32.vlgmr.msra.gmra.mrb[64].mxu1 %vm373_vm0, %v21873_v34  ;;  %19213 = vmatprep.subr.bf16.mxu0 %v22432_v9  ;;  %v22466_v34 = vld [vmem:[#allocation2 + $0x62] sm:$0xff] }
 0x1bc   : > { %18213 = vmatprep.mubr.msk.f32.mxu1 %vm373_vm0, %v21891_v54  ;;  %19411 = vmatpush3.bf16.msra.mxu1 %v22410_v32  ;;  %v22474_v54 = vpack.c.bf16 %v15532_v19, %v15531_v6  ;;  %v15547_v6 = vld [vmem:[%s25361_s3 + $0x250] sm:$0xff]  ;;  %v22548_v19 = vld [vmem:[#allocation2 + $0xa1] sm:$0xff] }
 0x1bd   : > { %17864 = vmatmul.mubr.msk.f32.gmra.mrb[66].mxu0 %vm373_vm0, %v22424_v23  ;;  %19413 = vmatprep.subr.bf16.mxu1 %v22432_v9 }
 0x1be   : > { %19215 = vmatpush3.bf16.msra.mxu0 %v22432_v9  ;;  %17874 = vmatprep.mubr.msk.f32.mxu0 %vm373_vm0, %v21965_v63  ;;  %25468 = vst [vmem:[#allocation21_spill] sm:$0xff] %v22474_v54  ;;  %v15538_v63 = vld [vmem:[%s25361_s3 + $0x228] sm:$0xff] }
 0x1bf   : > { %18214 = vmatmul.mubr.msk.f32.gmra.mrb[66].mxu1 %vm373_vm0, %v22466_v34  ;;  %19217 = vmatprep.subr.bf16.mxu0 %v22452_v36  ;;  %v22494_v21 = vpack.c.bf16 %v15538_v63, %v15537_v61  ;;  %v15554_v63 = vld [vmem:[%s25361_s3 + $0x268] sm:$0xff] }
 0x1c0   : > { %19415 = vmatpush3.bf16.msra.mxu1 %v22432_v9  ;;  %18224 = vmatprep.mubr.msk.f32.mxu1 %vm373_vm0, %v21968_v56 }
 0x1c1   : > { %17875 = vmatmul.mubr.msk.f32.vlgmr.msra.gmra.mrb[64].mxu0 %vm373_vm0, %v21993_v47  ;;  %19417 = vmatprep.subr.bf16.mxu1 %v22452_v36  ;;  %25469 = vst [vmem:[#allocation22_spill] sm:$0xff] %v22494_v21  ;;  %v15539_v47 = vld [vmem:[%s25361_s3 + $0x230] sm:$0xff] }
 0x1c2   : > { %17877 = vmatprep.mubr.msk.f32.mxu0 %vm373_vm0, %v21983_v53  ;;  %19219 = vmatpush3.bf16.msra.mxu0 %v22452_v36  ;;  %v15540_v53 = vld [vmem:[%s25361_s3 + $0x238] sm:$0xff] }
 0x1c3   : > { %18225 = vmatmul.mubr.msk.f32.vlgmr.msra.gmra.mrb[64].mxu1 %vm373_vm0, %v21996_v8  ;;  %19221 = vmatprep.subr.bf16.mxu0 %v22474_v54  ;;  %v22514_v37 = vpack.c.bf16 %v15540_v53, %v15539_v47  ;;  %v15555_v53 = vld [vmem:[%s25361_s3 + $0x270] sm:$0xff] }
 0x1c4   : > { %18227 = vmatprep.mubr.msk.f32.mxu1 %vm373_vm0, %v21986_v60  ;;  %19419 = vmatpush3.bf16.msra.mxu1 %v22452_v36 }
 0x1c5   : > { %17878 = vmatmul.mubr.msk.f32.gmra.mrb[66].mxu0 %vm373_vm0, %v22031_v42  ;;  %19421 = vmatprep.subr.bf16.mxu1 %v22474_v54  ;;  %25470 = vst [vmem:[#allocation23_spill] sm:$0xff] %v22514_v37  ;;  %v15545_v42 = vld [vmem:[%s25361_s3 + $0x240] sm:$0xff] }
 0x1c6   : > { %19223 = vmatpush3.bf16.msra.mxu0 %v22474_v54  ;;  %17888 = vmatprep.mubr.msk.f32.mxu0 %vm373_vm0, %v21968_v56  ;;  %v15546_v56 = vld [vmem:[%s25361_s3 + $0x248] sm:$0xff] }
 0x1c7   : > { %18228 = vmatmul.mubr.msk.f32.gmra.mrb[66].mxu1 %vm373_vm0, %v22034_v12  ;;  %19225 = vmatprep.subr.bf16.mxu0 %v22494_v21  ;;  %v22534_v43 = vpack.c.bf16 %v15546_v56, %v15545_v42  ;;  %v15556_v42 = vld [vmem:[%s25361_s3 + $0x278] sm:$0xff]  ;;  %v22590_v56 = vld [vmem:[#allocation2 + $0xe1] sm:$0xff] }
 0x1c8   : > { %19423 = vmatpush3.bf16.msra.mxu1 %v22474_v54  ;;  %18238 = vmatprep.mubr.msk.f32.mxu1 %vm373_vm0, %v22068_v4  ;;  %v15594_v54 = vld [vmem:[%s25361_s3 + $0x308] sm:$0xff] }
 0x1c9   : > { %17889 = vmatmul.mubr.msk.f32.vlgmr.msra.gmra.mrb[64].mxu0 %vm373_vm0, %v21996_v8  ;;  %19425 = vmatprep.subr.bf16.mxu1 %v22494_v21  ;;  %25471 = vst [vmem:[#allocation24_spill] sm:$0xff] %v22534_v43 }
 0x1ca   : > { %17891 = vmatprep.mubr.msk.f32.mxu0 %vm373_vm0, %v21986_v60  ;;  %19227 = vmatpush3.bf16.msra.mxu0 %v22494_v21  ;;  %v15548_v60 = vld [vmem:[%s25361_s3 + $0x258] sm:$0xff] }
 0x1cb   : > { %18239 = vmatmul.mubr.msk.f32.vlgmr.msra.gmra.mrb[64].mxu1 %vm373_vm0, %v22073_v52  ;;  %19229 = vmatprep.subr.bf16.mxu0 %v22514_v37  ;;  %v22556_v61 = vpack.c.bf16 %v15548_v60, %v15547_v6  ;;  %v22598_v6 = vpack.c.bf16 %v15556_v42, %v15555_v53  ;;  %v15561_v60 = vld [vmem:[%s25361_s3 + $0x280] sm:$0xff]  ;;  %v15563_v53 = vld [vmem:[%s25361_s3 + $0x290] sm:$0xff]  ;;  %v15564_v42 = vld [vmem:[%s25361_s3 + $0x298] sm:$0xff] }
 0x1cc   : > { %18241 = vmatprep.mubr.msk.f32.mxu1 %vm373_vm0, %v22092_v16  ;;  %19427 = vmatpush3.bf16.msra.mxu1 %v22494_v21  ;;  %v15586_v21 = vld [vmem:[%s25361_s3 + $0x2e8] sm:$0xff] }
 0x1cd   : > { %17892 = vmatmul.mubr.msk.f32.gmra.mrb[66].mxu0 %vm373_vm0, %v22034_v12  ;;  %19429 = vmatprep.subr.bf16.mxu1 %v22514_v37  ;;  %25472 = vst [vmem:[#allocation25_spill] sm:$0xff] %v22556_v61  ;;  %v15553_v12 = vld [vmem:[%s25361_s3 + $0x260] sm:$0xff]  ;;  %25474 = vst [vmem:[#allocation27_spill] sm:$0xff] %v22598_v6 }
 0x1ce   : > { %19231 = vmatpush3.bf16.msra.mxu0 %v22514_v37  ;;  %17902 = vmatprep.mubr.msk.f32.mxu0 %vm373_vm0, %v22068_v4  ;;  %v22576_v47 = vpack.c.bf16 %v15554_v63, %v15553_v12  ;;  %v15562_v12 = vld [vmem:[%s25361_s3 + $0x288] sm:$0xff] }
 0x1cf   : > { %18242 = vmatmul.mubr.msk.f32.gmra.mrb[66].mxu1 %vm373_vm0, %v22548_v19  ;;  %19233 = vmatprep.subr.bf16.mxu0 %v22534_v43  ;;  %v22618_v63 = vpack.c.bf16 %v15562_v12, %v15561_v60  ;;  %v22632_v60 = vld [vmem:[#allocation2 + $0xa2] sm:$0xff]  ;;  %v22640_v12 = vpack.c.bf16 %v15564_v42, %v15563_v53  ;;  %v15571_v42 = vld [vmem:[%s25361_s3 + $0x2b0] sm:$0xff] }
 0x1d0   : > { %19431 = vmatpush3.bf16.msra.mxu1 %v22514_v37  ;;  %18252 = vmatprep.mubr.msk.f32.mxu1 %vm373_vm0, %v22116_v13  ;;  %25473 = vst [vmem:[#allocation26_spill] sm:$0xff] %v22576_v47  ;;  %v15580_v37 = vld [vmem:[%s25361_s3 + $0x2d8] sm:$0xff] }
 0x1d1   : > { %17903 = vmatmul.mubr.msk.f32.vlgmr.msra.gmra.mrb[64].mxu0 %vm373_vm0, %v22073_v52  ;;  %19433 = vmatprep.subr.bf16.mxu1 %v22534_v43  ;;  %25475 = vst [vmem:[#allocation28_spill] sm:$0xff] %v22618_v63  ;;  %25476 = vst [vmem:[#allocation29_spill] sm:$0xff] %v22640_v12 }
 0x1d2   : > { %17905 = vmatprep.mubr.msk.f32.mxu0 %vm373_vm0, %v22092_v16  ;;  %19235 = vmatpush3.bf16.msra.mxu0 %v22534_v43 }
 0x1d3   : > { %18253 = vmatmul.mubr.msk.f32.vlgmr.msra.gmra.mrb[64].mxu1 %vm373_vm0, %v22123_v44  ;;  %19237 = vmatprep.subr.bf16.mxu0 %v22556_v61 }
 0x1d4   : > { %18255 = vmatprep.mubr.msk.f32.mxu1 %vm373_vm0, %v22140_v40  ;;  %19435 = vmatpush3.bf16.msra.mxu1 %v22534_v43  ;;  %v15578_v43 = vld [vmem:[%s25361_s3 + $0x2c8] sm:$0xff] }
 0x1d5   : > { %17906 = vmatmul.mubr.msk.f32.gmra.mrb[66].mxu0 %vm373_vm0, %v22548_v19  ;;  %19437 = vmatprep.subr.bf16.mxu1 %v22556_v61 }
 0x1d6   : > { %19239 = vmatpush3.bf16.msra.mxu0 %v22556_v61  ;;  %17916 = vmatprep.mubr.msk.f32.mxu0 %vm373_vm0, %v22116_v13 }
 0x1d7   : > { %18256 = vmatmul.mubr.msk.f32.gmra.mrb[66].mxu1 %vm373_vm0, %v22590_v56  ;;  %19241 = vmatprep.subr.bf16.mxu0 %v22576_v47 }
 0x1d8   : > { %19439 = vmatpush3.bf16.msra.mxu1 %v22556_v61  ;;  %18266 = vmatprep.mubr.msk.f32.mxu1 %vm373_vm0, %v22164_v28  ;;  %v15570_v61 = vld [vmem:[%s25361_s3 + $0x2a8] sm:$0xff] }
 0x1d9   : > { %17917 = vmatmul.mubr.msk.f32.vlgmr.msra.gmra.mrb[64].mxu0 %vm373_vm0, %v22123_v44  ;;  %19441 = vmatprep.subr.bf16.mxu1 %v22576_v47 }
 0x1da   : > { %17919 = vmatprep.mubr.msk.f32.mxu0 %vm373_vm0, %v22140_v40  ;;  %19243 = vmatpush3.bf16.msra.mxu0 %v22576_v47 }
 0x1db   : > { %18267 = vmatmul.mubr.msk.f32.vlgmr.msra.gmra.mrb[64].mxu1 %vm373_vm0, %v22171_v3  ;;  %19245 = vmatprep.subr.bf16.mxu0 %v22598_v6 }
 0x1dc   : > { %18269 = vmatprep.mubr.msk.f32.mxu1 %vm373_vm0, %v22188_v20  ;;  %19443 = vmatpush3.bf16.msra.mxu1 %v22576_v47  ;;  %v15569_v47 = vld [vmem:[%s25361_s3 + $0x2a0] sm:$0xff] }
 0x1dd   : > { %17920 = vmatmul.mubr.msk.f32.gmra.mrb[66].mxu0 %vm373_vm0, %v22590_v56  ;;  %19445 = vmatprep.subr.bf16.mxu1 %v22598_v6  ;;  %v22660_v53 = vpack.c.bf16 %v15570_v61, %v15569_v47  ;;  %v22674_v61 = vld [vmem:[#allocation2 + $0xe2] sm:$0xff] }
 0x1de   : > { %19247 = vmatpush3.bf16.msra.mxu0 %v22598_v6  ;;  %17930 = vmatprep.mubr.msk.f32.mxu0 %vm373_vm0, %v22164_v28 }
 0x1df   : > { %18270 = vmatmul.mubr.msk.f32.gmra.mrb[66].mxu1 %vm373_vm0, %v22632_v60  ;;  %19249 = vmatprep.subr.bf16.mxu0 %v22618_v63  ;;  %25477 = vst [vmem:[#allocation30_spill] sm:$0xff] %v22660_v53 }
 0x1e0   : > { %19447 = vmatpush3.bf16.msra.mxu1 %v22598_v6  ;;  %18280 = vmatprep.mubr.msk.f32.mxu1 %vm373_vm0, %v22212_v49  ;;  %v15572_v6 = vld [vmem:[%s25361_s3 + $0x2b8] sm:$0xff] }
 0x1e1   : > { %17931 = vmatmul.mubr.msk.f32.vlgmr.msra.gmra.mrb[64].mxu0 %vm373_vm0, %v22171_v3  ;;  %19449 = vmatprep.subr.bf16.mxu1 %v22618_v63  ;;  %v22682_v47 = vpack.c.bf16 %v15572_v6, %v15571_v42  ;;  %v22707_v42 = vld [vmem:[#allocation2 + $0x28] sm:$0xff] }
 0x1e2   : > { %17933 = vmatprep.mubr.msk.f32.mxu0 %vm373_vm0, %v22188_v20  ;;  %19251 = vmatpush3.bf16.msra.mxu0 %v22618_v63  ;;  %25480 = vst [vmem:[#allocation33_spill] sm:$0xff] %v22707_v42 }
 0x1e3   : > { %18281 = vmatmul.mubr.msk.f32.vlgmr.msra.gmra.mrb[64].mxu1 %vm373_vm0, %v22219_v30  ;;  %19253 = vmatprep.subr.bf16.mxu0 %v22640_v12  ;;  %25478 = vst [vmem:[#allocation31_spill] sm:$0xff] %v22682_v47 }
 0x1e4   : > { %18283 = vmatprep.mubr.msk.f32.mxu1 %vm373_vm0, %v22238_v10  ;;  %19451 = vmatpush3.bf16.msra.mxu1 %v22618_v63  ;;  %v15577_v63 = vld [vmem:[%s25361_s3 + $0x2c0] sm:$0xff] }
 0x1e5   : > { %17934 = vmatmul.mubr.msk.f32.gmra.mrb[66].mxu0 %vm373_vm0, %v22632_v60  ;;  %19453 = vmatprep.subr.bf16.mxu1 %v22640_v12  ;;  %v22702_v6 = vpack.c.bf16 %v15578_v43, %v15577_v63  ;;  %v22718_v43 = vld [vmem:[#allocation2 + $0x68] sm:$0xff] }
 0x1e6   : > { %19255 = vmatpush3.bf16.msra.mxu0 %v22640_v12  ;;  %17944 = vmatprep.mubr.msk.f32.mxu0 %vm373_vm0, %v22253_v33  ;;  %25481 = vst [vmem:[#allocation34_spill] sm:$0xff] %v22718_v43 }
 0x1e7   : > { %18284 = vmatmul.mubr.msk.f32.gmra.mrb[66].mxu1 %vm373_vm0, %v22674_v61  ;;  %19257 = vmatprep.subr.bf16.mxu0 %v22660_v53  ;;  %25479 = vst [vmem:[#allocation32_spill] sm:$0xff] %v22702_v6 }
 0x1e8   : > { %19455 = vmatpush3.bf16.msra.mxu1 %v22640_v12  ;;  %18294 = vmatprep.mubr.msk.f32.mxu1 %vm373_vm0, %v22266_v59  ;;  %v15579_v12 = vld [vmem:[%s25361_s3 + $0x2d0] sm:$0xff] }
 0x1e9   : > { %17945 = vmatmul.mubr.msk.f32.vlgmr.msra.gmra.mrb[64].mxu0 %vm373_vm0, %v22264_v15  ;;  %19457 = vmatprep.subr.bf16.mxu1 %v22660_v53  ;;  %v22726_v63 = vpack.c.bf16 %v15580_v37, %v15579_v12  ;;  %v22740_v37 = vld [vmem:[#allocation2 + $0x19] sm:$0xff] }
 0x1ea   : > { %17947 = vmatprep.mubr.msk.f32.mxu0 %vm373_vm0, %v22281_v39  ;;  %19259 = vmatpush3.bf16.msra.mxu0 %v22660_v53  ;;  %25483 = vst [vmem:[#allocation36_spill] sm:$0xff] %v22740_v37 }
 0x1eb   : > { %18295 = vmatmul.mubr.msk.f32.vlgmr.msra.gmra.mrb[64].mxu1 %vm373_vm0, %v22273_v45  ;;  %19261 = vmatprep.subr.bf16.mxu0 %v22682_v47  ;;  %25482 = vst [vmem:[#allocation35_spill] sm:$0xff] %v22726_v63 }
 0x1ec   : > { %18297 = vmatprep.mubr.msk.f32.mxu1 %vm373_vm0, %v22292_v62  ;;  %19459 = vmatpush3.bf16.msra.mxu1 %v22660_v53  ;;  %v15585_v53 = vld [vmem:[%s25361_s3 + $0x2e0] sm:$0xff] }
 0x1ed   : > { %17948 = vmatmul.mubr.msk.f32.gmra.mrb[66].mxu0 %vm373_vm0, %v22707_v42  ;;  %19461 = vmatprep.subr.bf16.mxu1 %v22682_v47  ;;  %v22748_v12 = vpack.c.bf16 %v15586_v21, %v15585_v53  ;;  %v15588_v42 = vld [vmem:[%s25361_s3 + $0x2f8] sm:$0xff]  ;;  %v22762_v21 = vld [vmem:[#allocation2 + $0x29] sm:$0xff] }
 0x1ee   : > { %19263 = vmatpush3.bf16.msra.mxu0 %v22682_v47  ;;  %17958 = vmatprep.mubr.msk.f32.mxu0 %vm373_vm0, %v22266_v59  ;;  %v22769_v53 = vld [vmem:[#allocation2 + $0x51] sm:$0xff] }
 0x1ef   : > { %18298 = vmatmul.mubr.msk.f32.gmra.mrb[66].mxu1 %vm373_vm0, %v22718_v43  ;;  %19265 = vmatprep.subr.bf16.mxu0 %v22702_v6  ;;  %25484 = vst [vmem:[#allocation37_spill] sm:$0xff] %v22748_v12  ;;  %25485 = vst [vmem:[#allocation38_spill] sm:$0xff] %v22769_v53 }
 0x1f0   : > { %19463 = vmatpush3.bf16.msra.mxu1 %v22682_v47  ;;  %18308 = vmatprep.mubr.msk.f32.mxu1 %vm373_vm0, %v22316_v29  ;;  %v15587_v47 = vld [vmem:[%s25361_s3 + $0x2f0] sm:$0xff] }
 0x1f1   : > { %17959 = vmatmul.mubr.msk.f32.vlgmr.msra.gmra.mrb[64].mxu0 %vm373_vm0, %v22273_v45  ;;  %19465 = vmatprep.subr.bf16.mxu1 %v22702_v6 }
 0x1f2   : > { %17961 = vmatprep.mubr.msk.f32.mxu0 %vm373_vm0, %v22292_v62  ;;  %19267 = vmatpush3.bf16.msra.mxu0 %v22702_v6 }
 0x1f3   : > { %18309 = vmatmul.mubr.msk.f32.vlgmr.msra.gmra.mrb[64].mxu1 %vm373_vm0, %v22740_v37  ;;  %19269 = vmatprep.subr.bf16.mxu0 %v22726_v63 }
 0x1f4   : > { %18311 = vmatprep.mubr.msk.f32.mxu1 %vm373_vm0, %v22338_v31  ;;  %19467 = vmatpush3.bf16.msra.mxu1 %v22702_v6  ;;  %v22772_v6 = vpack.c.bf16 %v15588_v42, %v15587_v47  ;;  %v22786_v47 = vld [vmem:[#allocation2 + $0x59] sm:$0xff] }
 0x1f5   : > { %17962 = vmatmul.mubr.msk.f32.gmra.mrb[66].mxu0 %vm373_vm0, %v22718_v43  ;;  %19469 = vmatprep.subr.bf16.mxu1 %v22726_v63  ;;  %v15593_v43 = vld [vmem:[%s25361_s3 + $0x300] sm:$0xff] }
 0x1f6   : > { %19271 = vmatpush3.bf16.msra.mxu0 %v22726_v63  ;;  %17972 = vmatprep.mubr.msk.f32.mxu0 %vm373_vm0, %v22316_v29  ;;  %25486 = vst [vmem:[#allocation39_spill] sm:$0xff] %v22772_v6  ;;  %v22794_v42 = vpack.c.bf16 %v15594_v54, %v15593_v43  ;;  %v22808_v54 = vld [vmem:[#allocation2 + $0x69] sm:$0xff]  ;;  %v22815_v43 = vld [vmem:[#allocation2 + $0x12] sm:$0xff] }
 0x1f7   : > { %18312 = vmatmul.mubr.msk.f32.gmra.mrb[66].mxu1 %vm373_vm0, %v22762_v21  ;;  %19273 = vmatprep.subr.bf16.mxu0 %v22748_v12 }
 0x1f8   : > { %19471 = vmatpush3.bf16.msra.mxu1 %v22726_v63  ;;  %18322 = vmatprep.mubr.msk.f32.mxu1 %vm373_vm0, %v22769_v53  ;;  %25487 = vst [vmem:[#allocation40_spill] sm:$0xff] %v22794_v42  ;;  %v15595_v63 = vld [vmem:[%s25361_s3 + $0x310] sm:$0xff] }
 0x1f9   : > { %17973 = vmatmul.mubr.msk.f32.vlgmr.msra.gmra.mrb[64].mxu0 %vm373_vm0, %v22740_v37  ;;  %19473 = vmatprep.subr.bf16.mxu1 %v22748_v12  ;;  %v15596_v37 = vld [vmem:[%s25361_s3 + $0x318] sm:$0xff] }
 0x1fa   : > { %17975 = vmatprep.mubr.msk.f32.mxu0 %vm373_vm0, %v22338_v31  ;;  %19275 = vmatpush3.bf16.msra.mxu0 %v22748_v12 }
 0x1fb   : > { %18323 = vmatmul.mubr.msk.f32.vlgmr.msra.gmra.mrb[64].mxu1 %vm373_vm0, %v22786_v47  ;;  %19277 = vmatprep.subr.bf16.mxu0 %v22772_v6 }
 0x1fc   : > { %18325 = vmatprep.mubr.msk.f32.mxu1 %vm373_vm0, %v22382_v18  ;;  %19475 = vmatpush3.bf16.msra.mxu1 %v22748_v12  ;;  %v22818_v12 = vpack.c.bf16 %v15596_v37, %v15595_v63  ;;  %v22840_v63 = vld [vmem:[#allocation2 + $0x2a] sm:$0xff]  ;;  %v22847_v37 = vld [vmem:[#allocation2 + $0x52] sm:$0xff] }
 0x1fd   : > { %17976 = vmatmul.mubr.msk.f32.gmra.mrb[66].mxu0 %vm373_vm0, %v22762_v21  ;;  %19477 = vmatprep.subr.bf16.mxu1 %v22772_v6  ;;  %25490 = vst [vmem:[#allocation43_spill] sm:$0xff] %v22840_v63  ;;  %25491 = vst [vmem:[#allocation44_spill] sm:$0xff] %v22847_v37 }
 0x1fe   : > { %19279 = vmatpush3.bf16.msra.mxu0 %v22772_v6  ;;  %17986 = vmatprep.mubr.msk.f32.mxu0 %vm373_vm0, %v22769_v53  ;;  %25488 = vst [vmem:[#allocation41_spill] sm:$0xff] %v22818_v12  ;;  %v22826_v53 = vld [vmem:[#allocation2 + $0x1a] sm:$0xff] }
 0x1ff   : > { %18326 = vmatmul.mubr.msk.f32.gmra.mrb[66].mxu1 %vm373_vm0, %v22808_v54  ;;  %19281 = vmatprep.subr.bf16.mxu0 %v22794_v42  ;;  %25489 = vst [vmem:[#allocation42_spill] sm:$0xff] %v22826_v53 }
 0x200   : > { %19479 = vmatpush3.bf16.msra.mxu1 %v22772_v6  ;;  %18336 = vmatprep.mubr.msk.f32.mxu1 %vm373_vm0, %v22815_v43  ;;  %v20895_v6 = vld [vmem:[#allocation2 + $0xc0] sm:$0xff] }
 0x201   : > { %17987 = vmatmul.mubr.msk.f32.vlgmr.msra.gmra.mrb[64].mxu0 %vm373_vm0, %v22786_v47  ;;  %19481 = vmatprep.subr.bf16.mxu1 %v22794_v42 }
 0x202   : > { %17989 = vmatprep.mubr.msk.f32.mxu0 %vm373_vm0, %v22382_v18  ;;  %19283 = vmatpush3.bf16.msra.mxu0 %v22794_v42 }
 0x203   : > { %18337 = vmatmul.mubr.msk.f32.vlgmr.msra.gmra.mrb[64].mxu1 %vm373_vm0, %v22826_v53  ;;  %19285 = vmatprep.subr.bf16.mxu0 %v22818_v12 }
 0x204   : > { %18339 = vmatprep.mubr.msk.f32.mxu1 %vm373_vm0, %v22424_v23  ;;  %19483 = vmatpush3.bf16.msra.mxu1 %v22794_v42  ;;  %v22856_v42 = vld [vmem:[#allocation2 + $0x5a] sm:$0xff] }
 0x205   : > { %17990 = vmatmul.mubr.msk.f32.gmra.mrb[66].mxu0 %vm373_vm0, %v22808_v54  ;;  %19485 = vmatprep.subr.bf16.mxu1 %v22818_v12  ;;  %25492 = vst [vmem:[#allocation45_spill] sm:$0xff] %v22856_v42 }
 0x206   : > { %19287 = vmatpush3.bf16.msra.mxu0 %v22818_v12  ;;  %18000 = vmatprep.mubr.msk.f32.mxu0 %vm373_vm0, %v22815_v43 }
 0x207   : > { %18340 = vmatmul.mubr.msk.f32.gmra.mrb[66].mxu1 %vm373_vm0, %v22840_v63  ;;  %19489 = vmatprep.subr.bf16.mxu0 %v21367_v2 }
 0x208   : > { %19487 = vmatpush3.bf16.msra.mxu1 %v22818_v12  ;;  %18350 = vmatprep.mubr.msk.f32.mxu1 %vm373_vm0, %v22847_v37  ;;  %v22870_v12 = vld [vmem:[#allocation2 + $0x6a] sm:$0xff]  ;;  %v25496_v37 = vld [vmem:[#allocation8_spill] sm:$0xff] }
 0x209   : > { %18001 = vmatmul.mubr.msk.f32.vlgmr.msra.gmra.mrb[64].mxu0 %vm373_vm0, %v22826_v53  ;;  %19689 = vmatprep.subr.bf16.mxu1 %v21367_v2  ;;  %25493 = vst [vmem:[#allocation46_spill] sm:$0xff] %v22870_v12  ;;  %v25498_v53 = vld [vmem:[#allocation10_spill] sm:$0xff] }
 0x20a   : > { %18003 = vmatprep.mubr.msk.f32.mxu0 %vm373_vm0, %v22424_v23  ;;  %19491 = vmatpush3.bf16.msra.mxu0 %v21367_v2 }
 0x20b   : > { %18351 = vmatmul.mubr.msk.f32.vlgmr.msra.gmra.mrb[64].mxu1 %vm373_vm0, %v22856_v42  ;;  %19493 = vmatprep.subr.bf16.mxu0 %v21395_v11  ;;  %v25494_v42 = vld [vmem:[#allocation6_spill] sm:$0xff] }
 0x20c   : > { %18353 = vmatprep.mubr.msk.f32.mxu1 %vm373_vm0, %v22466_v34  ;;  %19691 = vmatpush3.bf16.msra.mxu1 %v21367_v2  ;;  %v22880_v2 = vld [vmem:[#allocation2 + $0xc8] sm:$0xff] }
 0x20d   : > { %18004 = vmatmul.mubr.msk.f32.gmra.mrb[66].mxu0 %vm373_vm0, %v22840_v63  ;;  %19693 = vmatprep.subr.bf16.mxu1 %v21395_v11  ;;  %v22911_v63 = vld [vmem:[#allocation2 + $0x90] sm:$0xff] }
 0x20e   : > { %19495 = vmatpush3.bf16.msra.mxu0 %v21395_v11  ;;  %18364 = vmatprep.mubr.msk.f32.mxu0 %vm373_vm0, %v20895_v6 }
 0x20f   : > { %18354 = vmatmul.mubr.msk.f32.gmra.mrb[66].mxu1 %vm373_vm0, %v22870_v12  ;;  %19497 = vmatprep.subr.bf16.mxu0 %v25494_v42  ;;  %v25495_v12 = vld [vmem:[#allocation7_spill] sm:$0xff] }
 0x210   : > { %19695 = vmatpush3.bf16.msra.mxu1 %v21395_v11  ;;  %18714 = vmatprep.mubr.msk.f32.mxu1 %vm373_vm0, %v22041_v35  ;;  %v22894_v11 = vld [vmem:[#allocation2 + $0xd8] sm:$0xff] }
 0x211   : > { %18365 = vmatmul.mubr.msk.f32.vlgmr.msra.gmra.mrb[68].mxu0 %vm373_vm0, %v22880_v2  ;;  %19697 = vmatprep.subr.bf16.mxu1 %v25494_v42 }
 0x212   : > { %18367 = vmatprep.mubr.msk.f32.mxu0 %vm373_vm0, %v21996_v8  ;;  %19499 = vmatpush3.bf16.msra.mxu0 %v25494_v42  ;;  %v20898_v8 = vld [vmem:[#allocation2 + $0x80] sm:$0xff] }
 0x213   : > { %18715 = vmatmul.mubr.msk.f32.vlgmr.msra.gmra.mrb[68].mxu1 %vm373_vm0, %v22068_v4  ;;  %19501 = vmatprep.subr.bf16.mxu0 %v25495_v12 }
 0x214   : > { %18717 = vmatprep.mubr.msk.f32.mxu1 %vm373_vm0, %v22073_v52  ;;  %19699 = vmatpush3.bf16.msra.mxu1 %v25494_v42  ;;  %v22906_v42 = vld [vmem:[#allocation2 + $0x88] sm:$0xff] }
 0x215   : > { %18368 = vmatmul.mubr.msk.f32.gmra.mrb[70].mxu0 %vm373_vm0, %v22894_v11  ;;  %19701 = vmatprep.subr.bf16.mxu1 %v25495_v12 }
 0x216   : > { %19503 = vmatpush3.bf16.msra.mxu0 %v25495_v12  ;;  %18378 = vmatprep.mubr.msk.f32.mxu0 %vm373_vm0, %v20898_v8  ;;  %v22924_v8 = vld [vmem:[#allocation2 + $0x98] sm:$0xff] }
 0x217   : > { %18718 = vmatmul.mubr.msk.f32.gmra.mrb[70].mxu1 %vm373_vm0, %v22092_v16  ;;  %19505 = vmatprep.subr.bf16.mxu0 %v25496_v37 }
 0x218   : > { %19703 = vmatpush3.bf16.msra.mxu1 %v25495_v12  ;;  %18728 = vmatprep.mubr.msk.f32.mxu1 %vm373_vm0, %v20895_v6  ;;  %v25497_v12 = vld [vmem:[#allocation9_spill] sm:$0xff]  ;;  %v22919_v6 = vld [vmem:[#allocation2 + $0xd0] sm:$0xff] }
 0x219   : > { %18379 = vmatmul.mubr.msk.f32.vlgmr.msra.gmra.mrb[68].mxu0 %vm373_vm0, %v22906_v42  ;;  %19705 = vmatprep.subr.bf16.mxu1 %v25496_v37 }
 0x21a   : > { %18381 = vmatprep.mubr.msk.f32.mxu0 %vm373_vm0, %v22911_v63  ;;  %19507 = vmatpush3.bf16.msra.mxu0 %v25496_v37 }
 0x21b   : > { %18729 = vmatmul.mubr.msk.f32.vlgmr.msra.gmra.mrb[68].mxu1 %vm373_vm0, %v22880_v2  ;;  %19509 = vmatprep.subr.bf16.mxu0 %v25497_v12 }
 0x21c   : > { %18731 = vmatprep.mubr.msk.f32.mxu1 %vm373_vm0, %v22919_v6  ;;  %19707 = vmatpush3.bf16.msra.mxu1 %v25496_v37  ;;  %v20935_v37 = vld [vmem:[#allocation2 + $0x22] sm:$0xff] }
 0x21d   : > { %18382 = vmatmul.mubr.msk.f32.gmra.mrb[70].mxu0 %vm373_vm0, %v22924_v8  ;;  %19709 = vmatprep.subr.bf16.mxu1 %v25497_v12 }
 0x21e   : > { %19511 = vmatpush3.bf16.msra.mxu0 %v25497_v12  ;;  %18392 = vmatprep.mubr.msk.f32.mxu0 %vm373_vm0, %v22041_v35  ;;  %v25499_v35 = vld [vmem:[#allocation11_spill] sm:$0xff] }
 0x21f   : > { %18732 = vmatmul.mubr.msk.f32.gmra.mrb[70].mxu1 %vm373_vm0, %v22894_v11  ;;  %19513 = vmatprep.subr.bf16.mxu0 %v25498_v53 }
 0x220   : > { %19711 = vmatpush3.bf16.msra.mxu1 %v25497_v12  ;;  %18742 = vmatprep.mubr.msk.f32.mxu1 %vm373_vm0, %v22099_v48  ;;  %v8850_v12 = vld [vmem:[#allocation2 + $0x90] sm:$0xff] }
 0x221   : > { %18393 = vmatmul.mubr.msk.f32.vlgmr.msra.gmra.mrb[68].mxu0 %vm373_vm0, %v22068_v4  ;;  %19713 = vmatprep.subr.bf16.mxu1 %v25498_v53  ;;  %v25500_v4 = vld [vmem:[#allocation12_spill] sm:$0xff] }
 0x222   : > { %18395 = vmatprep.mubr.msk.f32.mxu0 %vm373_vm0, %v22073_v52  ;;  %19515 = vmatpush3.bf16.msra.mxu0 %v25498_v53  ;;  %v25501_v52 = vld [vmem:[#allocation13_spill] sm:$0xff] }
 0x223   : > { %18743 = vmatmul.mubr.msk.f32.vlgmr.msra.gmra.mrb[68].mxu1 %vm373_vm0, %v22116_v13  ;;  %19517 = vmatprep.subr.bf16.mxu0 %v25499_v35 }
 0x224   : > { %18745 = vmatprep.mubr.msk.f32.mxu1 %vm373_vm0, %v22123_v44  ;;  %19715 = vmatpush3.bf16.msra.mxu1 %v25498_v53  ;;  %v25518_v53 = vld [vmem:[#allocation26_spill] sm:$0xff] }
 0x225   : > { %18396 = vmatmul.mubr.msk.f32.gmra.mrb[70].mxu0 %vm373_vm0, %v22092_v16  ;;  %19717 = vmatprep.subr.bf16.mxu1 %v25499_v35  ;;  %v25502_v16 = vld [vmem:[#allocation14_spill] sm:$0xff] }
 0x226   : > { %19519 = vmatpush3.bf16.msra.mxu0 %v25499_v35  ;;  %18406 = vmatprep.mubr.msk.f32.mxu0 %vm373_vm0, %v22099_v48  ;;  %v25503_v48 = vld [vmem:[#allocation15_spill] sm:$0xff] }
 0x227   : > { %18746 = vmatmul.mubr.msk.f32.gmra.mrb[70].mxu1 %vm373_vm0, %v22140_v40  ;;  %19521 = vmatprep.subr.bf16.mxu0 %v25500_v4 }
 0x228   : > { %19719 = vmatpush3.bf16.msra.mxu1 %v25499_v35  ;;  %18756 = vmatprep.mubr.msk.f32.mxu1 %vm373_vm0, %v22147_v17  ;;  %v25527_v35 = vld [vmem:[#allocation30_spill] sm:$0xff] }
 0x229   : > { %18407 = vmatmul.mubr.msk.f32.vlgmr.msra.gmra.mrb[68].mxu0 %vm373_vm0, %v22116_v13  ;;  %19721 = vmatprep.subr.bf16.mxu1 %v25500_v4  ;;  %v20908_v13 = vld [vmem:[#allocation2 + $0x1a] sm:$0xff] }
 0x22a   : > { %18409 = vmatprep.mubr.msk.f32.mxu0 %vm373_vm0, %v22123_v44  ;;  %19523 = vmatpush3.bf16.msra.mxu0 %v25500_v4  ;;  %v20910_v44 = vld [vmem:[#allocation2 + $0x52] sm:$0xff] }
 0x22b   : > { %18757 = vmatmul.mubr.msk.f32.vlgmr.msra.gmra.mrb[68].mxu1 %vm373_vm0, %v22164_v28  ;;  %19525 = vmatprep.subr.bf16.mxu0 %v25501_v52 }
 0x22c   : > { %18759 = vmatprep.mubr.msk.f32.mxu1 %vm373_vm0, %v22171_v3  ;;  %19723 = vmatpush3.bf16.msra.mxu1 %v25500_v4  ;;  %v8851_v4 = vld [vmem:[#allocation2 + $0x98] sm:$0xff] }
 0x22d   : > { %18410 = vmatmul.mubr.msk.f32.gmra.mrb[70].mxu0 %vm373_vm0, %v22140_v40  ;;  %19725 = vmatprep.subr.bf16.mxu1 %v25501_v52  ;;  %v25504_v40 = vld [vmem:[#allocation16_spill] sm:$0xff] }
 0x22e   : > { %19527 = vmatpush3.bf16.msra.mxu0 %v25501_v52  ;;  %18420 = vmatprep.mubr.msk.f32.mxu0 %vm373_vm0, %v22147_v17  ;;  %v25505_v17 = vld [vmem:[#allocation17_spill] sm:$0xff] }
 0x22f   : > { %18760 = vmatmul.mubr.msk.f32.gmra.mrb[70].mxu1 %vm373_vm0, %v22188_v20  ;;  %19529 = vmatprep.subr.bf16.mxu0 %v25502_v16 }
 0x230   : > { %19727 = vmatpush3.bf16.msra.mxu1 %v25501_v52  ;;  %18770 = vmatprep.mubr.msk.f32.mxu1 %vm373_vm0, %v22195_v25  ;;  %v25507_v25 = vld [vmem:[#allocation19_spill] sm:$0xff]  ;;  %v8852_v52 = vld [vmem:[#allocation2 + $0xa0] sm:$0xff] }
 0x231   : > { %18421 = vmatmul.mubr.msk.f32.vlgmr.msra.gmra.mrb[68].mxu0 %vm373_vm0, %v22164_v28  ;;  %19729 = vmatprep.subr.bf16.mxu1 %v25502_v16  ;;  %v20913_v28 = vld [vmem:[#allocation2 + $0xe0] sm:$0xff] }
 0x232   : > { %18423 = vmatprep.mubr.msk.f32.mxu0 %vm373_vm0, %v22171_v3  ;;  %19531 = vmatpush3.bf16.msra.mxu0 %v25502_v16  ;;  %v25506_v3 = vld [vmem:[#allocation18_spill] sm:$0xff] }
 0x233   : > { %18771 = vmatmul.mubr.msk.f32.vlgmr.msra.gmra.mrb[68].mxu1 %vm373_vm0, %v22212_v49  ;;  %19533 = vmatprep.subr.bf16.mxu0 %v25503_v48  ;;  %v25508_v49 = vld [vmem:[#allocation20_spill] sm:$0xff] }
 0x234   : > { %18773 = vmatprep.mubr.msk.f32.mxu1 %vm373_vm0, %v22219_v30  ;;  %19731 = vmatpush3.bf16.msra.mxu1 %v25502_v16  ;;  %v20917_v30 = vld [vmem:[#allocation2 + $0xc9] sm:$0xff]  ;;  %v8956_v16 = vld [vmem:[#allocation2 + $0xd8] sm:$0xff] }
 0x235   : > { %18424 = vmatmul.mubr.msk.f32.gmra.mrb[70].mxu0 %vm373_vm0, %v22188_v20  ;;  %19733 = vmatprep.subr.bf16.mxu1 %v25503_v48  ;;  %v20915_v20 = vld [vmem:[#allocation2 + $0x91] sm:$0xff] }
 0x236   : > { %19535 = vmatpush3.bf16.msra.mxu0 %v25503_v48  ;;  %18434 = vmatprep.mubr.msk.f32.mxu0 %vm373_vm0, %v22236_v50  ;;  %v20918_v50 = vld [vmem:[#allocation2 + $0xd1] sm:$0xff] }
 0x237   : > { %18774 = vmatmul.mubr.msk.f32.gmra.mrb[70].mxu1 %vm373_vm0, %v22238_v10  ;;  %19537 = vmatprep.subr.bf16.mxu0 %v21879_v51  ;;  %v20919_v10 = vld [vmem:[#allocation2 + $0xd9] sm:$0xff] }
 0x238   : > { %19735 = vmatpush3.bf16.msra.mxu1 %v25503_v48  ;;  %18784 = vmatprep.mubr.msk.f32.mxu1 %vm373_vm0, %v22245_v22  ;;  %v8957_v48 = vld [vmem:[#allocation2 + $0xe0] sm:$0xff] }
 0x239   : > { %18435 = vmatmul.mubr.msk.f32.vlgmr.msra.gmra.mrb[68].mxu0 %vm373_vm0, %v22253_v33  ;;  %19737 = vmatprep.subr.bf16.mxu1 %v21879_v51  ;;  %v20921_v33 = vld [vmem:[#allocation2 + $0x92] sm:$0xff] }
 0x23a   : > { %18437 = vmatprep.mubr.msk.f32.mxu0 %vm373_vm0, %v22264_v15  ;;  %19539 = vmatpush3.bf16.msra.mxu0 %v21879_v51  ;;  %v20922_v15 = vld [vmem:[#allocation2 + $0x9a] sm:$0xff] }
 0x23b   : > { %18785 = vmatmul.mubr.msk.f32.vlgmr.msra.gmra.mrb[68].mxu1 %vm373_vm0, %v22266_v59  ;;  %19541 = vmatprep.subr.bf16.mxu0 %v21919_v26 }
 0x23c   : > { %18787 = vmatprep.mubr.msk.f32.mxu1 %vm373_vm0, %v22273_v45  ;;  %19739 = vmatpush3.bf16.msra.mxu1 %v21879_v51  ;;  %v20903_v51 = vld [vmem:[#allocation2 + $0x49] sm:$0xff] }
 0x23d   : > { %18438 = vmatmul.mubr.msk.f32.gmra.mrb[70].mxu0 %vm373_vm0, %v22281_v39  ;;  %19741 = vmatprep.subr.bf16.mxu1 %v21919_v26  ;;  %v20925_v39 = vld [vmem:[#allocation2 + $0xda] sm:$0xff] }
 0x23e   : > { %19543 = vmatpush3.bf16.msra.mxu0 %v21919_v26  ;;  %18448 = vmatprep.mubr.msk.f32.mxu0 %vm373_vm0, %v22245_v22  ;;  %v20920_v22 = vld [vmem:[#allocation2 + $0x8a] sm:$0xff] }
 0x23f   : > { %18788 = vmatmul.mubr.msk.f32.gmra.mrb[70].mxu1 %vm373_vm0, %v22292_v62  ;;  %19545 = vmatprep.subr.bf16.mxu0 %v21921_v24 }
 0x240   : > { %19743 = vmatpush3.bf16.msra.mxu1 %v21919_v26  ;;  %18798 = vmatprep.mubr.msk.f32.mxu1 %vm373_vm0, %v22299_v0  ;;  %v20904_v26 = vld [vmem:[#allocation2 + $0x51] sm:$0xff] }
 0x241   : > { %18449 = vmatmul.mubr.msk.f32.vlgmr.msra.gmra.mrb[68].mxu0 %vm373_vm0, %v22266_v59  ;;  %19745 = vmatprep.subr.bf16.mxu1 %v21921_v24  ;;  %v20923_v59 = vld [vmem:[#allocation2 + $0xca] sm:$0xff] }
 0x242   : > { %18451 = vmatprep.mubr.msk.f32.mxu0 %vm373_vm0, %v22273_v45  ;;  %19547 = vmatpush3.bf16.msra.mxu0 %v21921_v24  ;;  %v20924_v45 = vld [vmem:[#allocation2 + $0xd2] sm:$0xff] }
 0x243   : > { %18799 = vmatmul.mubr.msk.f32.vlgmr.msra.gmra.mrb[68].mxu1 %vm373_vm0, %v22316_v29  ;;  %19549 = vmatprep.subr.bf16.mxu0 %v22052_v5 }
 0x244   : > { %18801 = vmatprep.mubr.msk.f32.mxu1 %vm373_vm0, %v22360_v38  ;;  %19747 = vmatpush3.bf16.msra.mxu1 %v21921_v24  ;;  %v20905_v24 = vld [vmem:[#allocation2 + $0x59] sm:$0xff] }
 0x245   : > { %18452 = vmatmul.mubr.msk.f32.gmra.mrb[70].mxu0 %vm373_vm0, %v22292_v62  ;;  %19749 = vmatprep.subr.bf16.mxu1 %v22052_v5  ;;  %v20926_v62 = vld [vmem:[#allocation2 + $0x10] sm:$0xff] }
 0x246   : > { %19551 = vmatpush3.bf16.msra.mxu0 %v22052_v5  ;;  %18462 = vmatprep.mubr.msk.f32.mxu0 %vm373_vm0, %v22299_v0  ;;  %v20927_v0 = vld [vmem:[#allocation2 + $0x50] sm:$0xff] }
 0x247   : > { %18802 = vmatmul.mubr.msk.f32.gmra.mrb[70].mxu1 %vm373_vm0, %v22338_v31  ;;  %19553 = vmatprep.subr.bf16.mxu0 %v22078_v27 }
 0x248   : > { %19751 = vmatpush3.bf16.msra.mxu1 %v22052_v5  ;;  %18812 = vmatprep.mubr.msk.f32.mxu1 %vm373_vm0, %v20903_v51  ;;  %v20906_v5 = vld [vmem:[#allocation2 + $0xa] sm:$0xff] }
 0x249   : > { %18463 = vmatmul.mubr.msk.f32.vlgmr.msra.gmra.mrb[68].mxu0 %vm373_vm0, %v22316_v29  ;;  %19753 = vmatprep.subr.bf16.mxu1 %v22078_v27  ;;  %v20928_v29 = vld [vmem:[#allocation2 + $0x18] sm:$0xff] }
 0x24a   : > { %18465 = vmatprep.mubr.msk.f32.mxu0 %vm373_vm0, %v22360_v38  ;;  %19555 = vmatpush3.bf16.msra.mxu0 %v22078_v27  ;;  %v25509_v38 = vld [vmem:[#allocation21_spill] sm:$0xff] }
 0x24b   : > { %18813 = vmatmul.mubr.msk.f32.vlgmr.msra.gmra.mrb[68].mxu1 %vm373_vm0, %v20904_v26  ;;  %19557 = vmatprep.subr.bf16.mxu0 %v22102_v46 }
 0x24c   : > { %18815 = vmatprep.mubr.msk.f32.mxu1 %vm373_vm0, %v20905_v24  ;;  %19755 = vmatpush3.bf16.msra.mxu1 %v22078_v27  ;;  %v20907_v27 = vld [vmem:[#allocation2 + $0x12] sm:$0xff] }
 0x24d   : > { %18466 = vmatmul.mubr.msk.f32.gmra.mrb[70].mxu0 %vm373_vm0, %v22338_v31  ;;  %19757 = vmatprep.subr.bf16.mxu1 %v22102_v46  ;;  %v20929_v31 = vld [vmem:[#allocation2 + $0x20] sm:$0xff] }
 0x24e   : > { %19559 = vmatpush3.bf16.msra.mxu0 %v22102_v46  ;;  %18476 = vmatprep.mubr.msk.f32.mxu0 %vm373_vm0, %v20903_v51  ;;  %v25528_v51 = vld [vmem:[#allocation31_spill] sm:$0xff] }
 0x24f   : > { %18816 = vmatmul.mubr.msk.f32.gmra.mrb[70].mxu1 %vm373_vm0, %v22382_v18  ;;  %19561 = vmatprep.subr.bf16.mxu0 %v22126_v57 }
 0x250   : > { %19759 = vmatpush3.bf16.msra.mxu1 %v22102_v46  ;;  %18826 = vmatprep.mubr.msk.f32.mxu1 %vm373_vm0, %v20906_v5  ;;  %v20909_v46 = vld [vmem:[#allocation2 + $0x4a] sm:$0xff] }
 0x251   : > { %18477 = vmatmul.mubr.msk.f32.vlgmr.msra.gmra.mrb[68].mxu0 %vm373_vm0, %v20904_v26  ;;  %19761 = vmatprep.subr.bf16.mxu1 %v22126_v57  ;;  %v8853_v26 = vld [vmem:[#allocation2 + $0xa8] sm:$0xff] }
 0x252   : > { %18479 = vmatprep.mubr.msk.f32.mxu0 %vm373_vm0, %v20905_v24  ;;  %19563 = vmatpush3.bf16.msra.mxu0 %v22126_v57  ;;  %v8958_v24 = vld [vmem:[#allocation2 + $0xe8] sm:$0xff] }
 0x253   : > { %18827 = vmatmul.mubr.msk.f32.vlgmr.msra.gmra.mrb[68].mxu1 %vm373_vm0, %v20907_v27  ;;  %19565 = vmatprep.subr.bf16.mxu0 %v22150_v41 }
 0x254   : > { %18829 = vmatprep.mubr.msk.f32.mxu1 %vm373_vm0, %v20908_v13  ;;  %19763 = vmatpush3.bf16.msra.mxu1 %v22126_v57  ;;  %v20911_v57 = vld [vmem:[#allocation2 + $0x5a] sm:$0xff] }
 0x255   : > { %18480 = vmatmul.mubr.msk.f32.gmra.mrb[70].mxu0 %vm373_vm0, %v22382_v18  ;;  %19765 = vmatprep.subr.bf16.mxu1 %v22150_v41  ;;  %v25510_v18 = vld [vmem:[#allocation33_spill] sm:$0xff] }
 0x256   : > { %19567 = vmatpush3.bf16.msra.mxu0 %v22150_v41  ;;  %18490 = vmatprep.mubr.msk.f32.mxu0 %vm373_vm0, %v20906_v5  ;;  %v9060_v5 = vld [vmem:[#allocation2 + $0x91] sm:$0xff] }
 0x257   : > { %18830 = vmatmul.mubr.msk.f32.gmra.mrb[70].mxu1 %vm373_vm0, %v22424_v23  ;;  %19569 = vmatprep.subr.bf16.mxu0 %v22174_v55 }
 0x258   : > { %19767 = vmatpush3.bf16.msra.mxu1 %v22150_v41  ;;  %18840 = vmatprep.mubr.msk.f32.mxu1 %vm373_vm0, %v20909_v46  ;;  %v20912_v41 = vld [vmem:[#allocation2 + $0xa0] sm:$0xff] }
 0x259   : > { %18491 = vmatmul.mubr.msk.f32.vlgmr.msra.gmra.mrb[68].mxu0 %vm373_vm0, %v20907_v27  ;;  %19769 = vmatprep.subr.bf16.mxu1 %v22174_v55  ;;  %v25529_v27 = vld [vmem:[#allocation32_spill] sm:$0xff]  ;;  %v9062_v46 = vld [vmem:[#allocation2 + $0xa1] sm:$0xff] }
 0x25a   : > { %18493 = vmatprep.mubr.msk.f32.mxu0 %vm373_vm0, %v20908_v13  ;;  %19571 = vmatpush3.bf16.msra.mxu0 %v22174_v55  ;;  %v9061_v13 = vld [vmem:[#allocation2 + $0x99] sm:$0xff] }
 0x25b   : > { %18841 = vmatmul.mubr.msk.f32.vlgmr.msra.gmra.mrb[68].mxu1 %vm373_vm0, %v20910_v44  ;;  %19573 = vmatprep.subr.bf16.mxu0 %v22198_v58  ;;  %v25530_v44 = vld [vmem:[#allocation35_spill] sm:$0xff] }
 0x25c   : > { %18843 = vmatprep.mubr.msk.f32.mxu1 %vm373_vm0, %v20911_v57  ;;  %19771 = vmatpush3.bf16.msra.mxu1 %v22174_v55  ;;  %v20914_v55 = vld [vmem:[#allocation2 + $0x89] sm:$0xff] }
 0x25d   : > { %18494 = vmatmul.mubr.msk.f32.gmra.mrb[70].mxu0 %vm373_vm0, %v22424_v23  ;;  %19773 = vmatprep.subr.bf16.mxu1 %v22198_v58  ;;  %v20932_v23 = vld [vmem:[#allocation2 + $0x11] sm:$0xff]  ;;  %v9063_v57 = vld [vmem:[#allocation2 + $0xa9] sm:$0xff] }
 0x25e   : > { %19575 = vmatpush3.bf16.msra.mxu0 %v22198_v58  ;;  %18504 = vmatprep.mubr.msk.f32.mxu0 %vm373_vm0, %v22906_v42  ;;  %v20936_v42 = vld [vmem:[#allocation2 + $0x62] sm:$0xff] }
 0x25f   : > { %18844 = vmatmul.mubr.msk.f32.gmra.mrb[70].mxu1 %vm373_vm0, %v22466_v34  ;;  %19577 = vmatprep.subr.bf16.mxu0 %v25504_v40  ;;  %v20933_v34 = vld [vmem:[#allocation2 + $0x21] sm:$0xff] }
 0x260   : > { %19775 = vmatpush3.bf16.msra.mxu1 %v22198_v58  ;;  %18854 = vmatprep.mubr.msk.f32.mxu1 %vm373_vm0, %v22880_v2  ;;  %v20916_v58 = vld [vmem:[#allocation2 + $0x99] sm:$0xff] }
 0x261   : > { %18505 = vmatmul.mubr.msk.f32.vlgmr.msra.gmra.mrb[68].mxu0 %vm373_vm0, %v22911_v63  ;;  %19777 = vmatprep.subr.bf16.mxu1 %v25504_v40  ;;  %v25520_v63 = vld [vmem:[#allocation27_spill] sm:$0xff] }
 0x262   : > { %18507 = vmatprep.mubr.msk.f32.mxu0 %vm373_vm0, %v22924_v8  ;;  %19579 = vmatpush3.bf16.msra.mxu0 %v25504_v40  ;;  %v8955_v8 = vld [vmem:[#allocation2 + $0xd0] sm:$0xff] }
 0x263   : > { %18855 = vmatmul.mubr.msk.f32.vlgmr.msra.gmra.mrb[68].mxu1 %vm373_vm0, %v22919_v6  ;;  %19581 = vmatprep.subr.bf16.mxu0 %v25505_v17 }
 0x264   : > { %18857 = vmatprep.mubr.msk.f32.mxu1 %vm373_vm0, %v22894_v11  ;;  %19779 = vmatpush3.bf16.msra.mxu1 %v25504_v40  ;;  %v9165_v40 = vld [vmem:[#allocation2 + $0xd1] sm:$0xff] }
 0x265   : > { %18508 = vmatmul.mubr.msk.f32.gmra.mrb[70].mxu0 %vm373_vm0, %v20912_v41  ;;  %19781 = vmatprep.subr.bf16.mxu1 %v25505_v17  ;;  %v9166_v41 = vld [vmem:[#allocation2 + $0xd9] sm:$0xff] }
 0x266   : > { %19583 = vmatpush3.bf16.msra.mxu0 %v25505_v17  ;;  %18518 = vmatprep.mubr.msk.f32.mxu0 %vm373_vm0, %v22880_v2  ;;  %v25522_v2 = vld [vmem:[#allocation28_spill] sm:$0xff] }
 0x267   : > { %18858 = vmatmul.mubr.msk.f32.gmra.mrb[70].mxu1 %vm373_vm0, %v20913_v28  ;;  %19585 = vmatprep.subr.bf16.mxu0 %v25506_v3 }
 0x268   : > { %19783 = vmatpush3.bf16.msra.mxu1 %v25505_v17  ;;  %18868 = vmatprep.mubr.msk.f32.mxu1 %vm373_vm0, %v20914_v55  ;;  %v25531_v17 = vld [vmem:[#allocation37_spill] sm:$0xff] }
 0x269   : > { %18519 = vmatmul.mubr.msk.f32.vlgmr.msra.gmra.mrb[68].mxu0 %vm373_vm0, %v22919_v6  ;;  %19785 = vmatprep.subr.bf16.mxu1 %v25506_v3  ;;  %v25526_v6 = vld [vmem:[#allocation46_spill] sm:$0xff] }
 0x26a   : > { %18521 = vmatprep.mubr.msk.f32.mxu0 %vm373_vm0, %v22894_v11  ;;  %19587 = vmatpush3.bf16.msra.mxu0 %v25506_v3  ;;  %v25523_v11 = vld [vmem:[#allocation44_spill] sm:$0xff] }
 0x26b   : > { %18869 = vmatmul.mubr.msk.f32.vlgmr.msra.gmra.mrb[68].mxu1 %vm373_vm0, %v20915_v20  ;;  %19589 = vmatprep.subr.bf16.mxu0 %v25507_v25 }
 0x26c   : > { %18871 = vmatprep.mubr.msk.f32.mxu1 %vm373_vm0, %v20916_v58  ;;  %19787 = vmatpush3.bf16.msra.mxu1 %v25506_v3  ;;  %v25532_v3 = vld [vmem:[#allocation39_spill] sm:$0xff] }
 0x26d   : > { %18522 = vmatmul.mubr.msk.f32.gmra.mrb[70].mxu0 %vm373_vm0, %v20913_v28  ;;  %19789 = vmatprep.subr.bf16.mxu1 %v25507_v25  ;;  %v9167_v28 = vld [vmem:[#allocation2 + $0xe1] sm:$0xff] }
 0x26e   : > { %19591 = vmatpush3.bf16.msra.mxu0 %v25507_v25  ;;  %18532 = vmatprep.mubr.msk.f32.mxu0 %vm373_vm0, %v20914_v55  ;;  %v9168_v55 = vld [vmem:[#allocation2 + $0xe9] sm:$0xff] }
 0x26f   : > { %18872 = vmatmul.mubr.msk.f32.gmra.mrb[70].mxu1 %vm373_vm0, %v22548_v19  ;;  %19593 = vmatprep.subr.bf16.mxu0 %v25508_v49 }
 0x270   : > { %19791 = vmatpush3.bf16.msra.mxu1 %v25507_v25  ;;  %18882 = vmatprep.mubr.msk.f32.mxu1 %vm373_vm0, %v20917_v30  ;;  %v25533_v25 = vld [vmem:[#allocation40_spill] sm:$0xff] }
 0x271   : > { %18533 = vmatmul.mubr.msk.f32.vlgmr.msra.gmra.mrb[68].mxu0 %vm373_vm0, %v20915_v20  ;;  %19793 = vmatprep.subr.bf16.mxu1 %v25508_v49  ;;  %v9270_v20 = vld [vmem:[#allocation2 + $0x92] sm:$0xff] }
 0x272   : > { %18535 = vmatprep.mubr.msk.f32.mxu0 %vm373_vm0, %v20916_v58  ;;  %19595 = vmatpush3.bf16.msra.mxu0 %v25508_v49  ;;  %v11634_v58 = vld [vmem:[%s25363_s5 + $0x8] sm:$0xff] }
 0x273   : > { %18883 = vmatmul.mubr.msk.f32.vlgmr.msra.gmra.mrb[68].mxu1 %vm373_vm0, %v20918_v50  ;;  %19597 = vmatprep.subr.bf16.mxu0 %v22346_v7 }
 0x274   : > { %18885 = vmatprep.mubr.msk.f32.mxu1 %vm373_vm0, %v20919_v10  ;;  %19795 = vmatpush3.bf16.msra.mxu1 %v25508_v49  ;;  %v11638_v49 = vld [vmem:[%s25363_s5 + $0x28] sm:$0xff] }
 0x275   : > { %18536 = vmatmul.mubr.msk.f32.gmra.mrb[70].mxu0 %vm373_vm0, %v22548_v19  ;;  %19797 = vmatprep.subr.bf16.mxu1 %v22346_v7  ;;  %v25515_v19 = vld [vmem:[#allocation24_spill] sm:$0xff] }
 0x276   : > { %19599 = vmatpush3.bf16.msra.mxu0 %v22346_v7  ;;  %18546 = vmatprep.mubr.msk.f32.mxu0 %vm373_vm0, %v20917_v30  ;;  %v9271_v30 = vld [vmem:[#allocation2 + $0x9a] sm:$0xff] }
 0x277   : > { %18886 = vmatmul.mubr.msk.f32.gmra.mrb[70].mxu1 %vm373_vm0, %v22590_v56  ;;  %19601 = vmatprep.subr.bf16.mxu0 %v22368_v1 }
 0x278   : > { %19799 = vmatpush3.bf16.msra.mxu1 %v22346_v7  ;;  %18896 = vmatprep.mubr.msk.f32.mxu1 %vm373_vm0, %v20920_v22  ;;  %v20930_v7 = vld [vmem:[#allocation2 + $0x58] sm:$0xff] }
 0x279   : > { %18547 = vmatmul.mubr.msk.f32.vlgmr.msra.gmra.mrb[68].mxu0 %vm373_vm0, %v20918_v50  ;;  %19801 = vmatprep.subr.bf16.mxu1 %v22368_v1  ;;  %v11636_v50 = vld [vmem:[%s25363_s5 + $0x18] sm:$0xff] }
 0x27a   : > { %18549 = vmatprep.mubr.msk.f32.mxu0 %vm373_vm0, %v20919_v10  ;;  %19603 = vmatpush3.bf16.msra.mxu0 %v22368_v1  ;;  %v11640_v10 = vld [vmem:[%s25363_s5 + $0x38] sm:$0xff] }
 0x27b   : > { %18897 = vmatmul.mubr.msk.f32.vlgmr.msra.gmra.mrb[68].mxu1 %vm373_vm0, %v20921_v33  ;;  %19605 = vmatprep.subr.bf16.mxu0 %v22390_v14 }
 0x27c   : > { %18899 = vmatprep.mubr.msk.f32.mxu1 %vm373_vm0, %v20922_v15  ;;  %19803 = vmatpush3.bf16.msra.mxu1 %v22368_v1  ;;  %v20931_v1 = vld [vmem:[#allocation2 + $0x60] sm:$0xff] }
 0x27d   : > { %18550 = vmatmul.mubr.msk.f32.gmra.mrb[70].mxu0 %vm373_vm0, %v22590_v56  ;;  %19805 = vmatprep.subr.bf16.mxu1 %v22390_v14  ;;  %v25516_v56 = vld [vmem:[#allocation38_spill] sm:$0xff] }
 0x27e   : > { %19607 = vmatpush3.bf16.msra.mxu0 %v22390_v14  ;;  %18560 = vmatprep.mubr.msk.f32.mxu0 %vm373_vm0, %v20920_v22  ;;  %v9272_v22 = vld [vmem:[#allocation2 + $0xa2] sm:$0xff] }
 0x27f   : > { %18900 = vmatmul.mubr.msk.f32.gmra.mrb[70].mxu1 %vm373_vm0, %v22632_v60  ;;  %19609 = vmatprep.subr.bf16.mxu0 %v22410_v32 }
 0x280   : > { %19807 = vmatpush3.bf16.msra.mxu1 %v22390_v14  ;;  %18910 = vmatprep.mubr.msk.f32.mxu1 %vm373_vm0, %v20923_v59  ;;  %v25511_v14 = vld [vmem:[#allocation34_spill] sm:$0xff] }
 0x281   : > { %18561 = vmatmul.mubr.msk.f32.vlgmr.msra.gmra.mrb[68].mxu0 %vm373_vm0, %v20921_v33  ;;  %19809 = vmatprep.subr.bf16.mxu1 %v22410_v32  ;;  %v25534_v33 = vld [vmem:[#allocation41_spill] sm:$0xff] }
 0x282   : > { %18563 = vmatprep.mubr.msk.f32.mxu0 %vm373_vm0, %v20922_v15  ;;  %19611 = vmatpush3.bf16.msra.mxu0 %v22410_v32  ;;  %v19888_v15 = vpack.c.bf16 %v11638_v49, %v11634_v58  ;;  %v11633_v59 = vld [vmem:[%s25363_s5] sm:$0xff]  ;;  %v11656_v49 = vld [vmem:[%s25363_s5 + $0xb8] sm:$0xff] }
 0x283   : > { %18911 = vmatmul.mubr.msk.f32.vlgmr.msra.gmra.mrb[68].mxu1 %vm373_vm0, %v20924_v45  ;;  %19613 = vmatprep.subr.bf16.mxu0 %v22432_v9  ;;  %v11637_v45 = vld [vmem:[%s25363_s5 + $0x20] sm:$0xff] }
 0x284   : > { %18913 = vmatprep.mubr.msk.f32.mxu1 %vm373_vm0, %v20925_v39  ;;  %19811 = vmatpush3.bf16.msra.mxu1 %v22410_v32  ;;  %v25512_v32 = vld [vmem:[#allocation22_spill] sm:$0xff] }
 0x285   : > { %18564 = vmatmul.mubr.msk.f32.gmra.mrb[70].mxu0 %vm373_vm0, %v22632_v60  ;;  %19813 = vmatprep.subr.bf16.mxu1 %v22432_v9  ;;  %v25517_v60 = vld [vmem:[#allocation25_spill] sm:$0xff]  ;;  %v11642_v39 = vld [vmem:[%s25363_s5 + $0x48] sm:$0xff] }
 0x286   : > { %19615 = vmatpush3.bf16.msra.mxu0 %v22432_v9  ;;  %18574 = vmatprep.mubr.msk.f32.mxu0 %vm373_vm0, %v20926_v62  ;;  %v11646_v62 = vld [vmem:[%s25363_s5 + $0x68] sm:$0xff] }
 0x287   : > { %18914 = vmatmul.mubr.msk.f32.gmra.mrb[70].mxu1 %vm373_vm0, %v22674_v61  ;;  %19617 = vmatprep.subr.bf16.mxu0 %v22452_v36  ;;  %v20934_v61 = vld [vmem:[#allocation2 + $0x61] sm:$0xff] }
 0x288   : > { %19815 = vmatpush3.bf16.msra.mxu1 %v22432_v9  ;;  %18924 = vmatprep.mubr.msk.f32.mxu1 %vm373_vm0, %v20927_v0  ;;  %v25513_v9 = vld [vmem:[#allocation36_spill] sm:$0xff] }
 0x289   : > { %18575 = vmatmul.mubr.msk.f32.vlgmr.msra.gmra.mrb[68].mxu0 %vm373_vm0, %v20928_v29  ;;  %19817 = vmatprep.subr.bf16.mxu1 %v22452_v36  ;;  %v11635_v29 = vld [vmem:[%s25363_s5 + $0x10] sm:$0xff] }
 0x28a   : > { %18577 = vmatprep.mubr.msk.f32.mxu0 %vm373_vm0, %v20929_v31  ;;  %19619 = vmatpush3.bf16.msra.mxu0 %v22452_v36  ;;  %v11639_v31 = vld [vmem:[%s25363_s5 + $0x30] sm:$0xff] }
 0x28b   : > { %18925 = vmatmul.mubr.msk.f32.vlgmr.msra.gmra.mrb[68].mxu1 %vm373_vm0, %v20930_v7  ;;  %19621 = vmatprep.subr.bf16.mxu0 %v25509_v38 }
 0x28c   : > { %18927 = vmatprep.mubr.msk.f32.mxu1 %vm373_vm0, %v20931_v1  ;;  %19819 = vmatpush3.bf16.msra.mxu1 %v22452_v36  ;;  %v25514_v36 = vld [vmem:[#allocation23_spill] sm:$0xff] }
 0x28d   : > { %18578 = vmatmul.mubr.msk.f32.gmra.mrb[70].mxu0 %vm373_vm0, %v25510_v18  ;;  %19821 = vmatprep.subr.bf16.mxu1 %v25509_v38  ;;  %v11648_v18 = vld [vmem:[%s25363_s5 + $0x78] sm:$0xff] }
 0x28e   : > { %19623 = vmatpush3.bf16.msra.mxu0 %v25509_v38  ;;  %18588 = vmatprep.mubr.msk.f32.mxu0 %vm373_vm0, %v20927_v0  ;;  %v19904_v0 = vpack.c.bf16 %v11640_v10, %v11636_v50  ;;  %v11653_v50 = vld [vmem:[%s25363_s5 + $0xa0] sm:$0xff] }
 0x28f   : > { %18928 = vmatmul.mubr.msk.f32.gmra.mrb[70].mxu1 %vm373_vm0, %v25511_v14  ;;  %19625 = vmatprep.subr.bf16.mxu0 %v25512_v32 }
 0x290   : > { %19823 = vmatpush3.bf16.msra.mxu1 %v25509_v38  ;;  %18938 = vmatprep.mubr.msk.f32.mxu1 %vm373_vm0, %v20932_v23  ;;  %v19890_v38 = vpack.c.bf16 %v11637_v45, %v11633_v59  ;;  %v11658_v45 = vld [vmem:[%s25363_s5 + $0xc8] sm:$0xff] }
 0x291   : > { %18589 = vmatmul.mubr.msk.f32.vlgmr.msra.gmra.mrb[68].mxu0 %vm373_vm0, %v20930_v7  ;;  %19825 = vmatprep.subr.bf16.mxu1 %v25512_v32  ;;  %v9273_v7 = vld [vmem:[#allocation2 + $0xaa] sm:$0xff] }
 0x292   : > { %18591 = vmatprep.mubr.msk.f32.mxu0 %vm373_vm0, %v20931_v1  ;;  %19627 = vmatpush3.bf16.msra.mxu0 %v25512_v32  ;;  %v11644_v1 = vld [vmem:[%s25363_s5 + $0x58] sm:$0xff] }
 0x293   : > { %18939 = vmatmul.mubr.msk.f32.vlgmr.msra.gmra.mrb[68].mxu1 %vm373_vm0, %v25513_v9  ;;  %19629 = vmatprep.subr.bf16.mxu0 %v25514_v36 }
 0x294   : > { %18941 = vmatprep.mubr.msk.f32.mxu1 %vm373_vm0, %v20933_v34  ;;  %19827 = vmatpush3.bf16.msra.mxu1 %v25512_v32  ;;  %v19892_v32 = vpack.c.bf16 %v11646_v62, %v11642_v39  ;;  %v11662_v39 = vld [vmem:[%s25363_s5 + $0xe8] sm:$0xff]  ;;  %v11660_v62 = vld [vmem:[%s25363_s5 + $0xd8] sm:$0xff] }
 0x295   : > { %18592 = vmatmul.mubr.msk.f32.gmra.mrb[70].mxu0 %vm373_vm0, %v25511_v14  ;;  %19829 = vmatprep.subr.bf16.mxu1 %v25514_v36  ;;  %v11515_v14 = vld [vmem:[#allocation2 + $0xd2] sm:$0xff] }
 0x296   : > { %19631 = vmatpush3.bf16.msra.mxu0 %v25514_v36  ;;  %18602 = vmatprep.mubr.msk.f32.mxu0 %vm373_vm0, %v20932_v23  ;;  %v11641_v23 = vld [vmem:[%s25363_s5 + $0x40] sm:$0xff] }
 0x297   : > { %18942 = vmatmul.mubr.msk.f32.gmra.mrb[70].mxu1 %vm373_vm0, %v22762_v21  ;;  %19633 = vmatprep.subr.bf16.mxu0 %v25515_v19 }
 0x298   : > { %19831 = vmatpush3.bf16.msra.mxu1 %v25514_v36  ;;  %18952 = vmatprep.mubr.msk.f32.mxu1 %vm373_vm0, %v25516_v56  ;;  %v19906_v36 = vpack.c.bf16 %v11639_v31, %v11635_v29  ;;  %v11664_v29 = vld [vmem:[%s25363_s5 + $0xf8] sm:$0xff]  ;;  %v11657_v31 = vld [vmem:[%s25363_s5 + $0xc0] sm:$0xff] }
 0x299   : > { %18603 = vmatmul.mubr.msk.f32.vlgmr.msra.gmra.mrb[68].mxu0 %vm373_vm0, %v25513_v9  ;;  %19833 = vmatprep.subr.bf16.mxu1 %v25515_v19  ;;  %v11645_v9 = vld [vmem:[%s25363_s5 + $0x60] sm:$0xff] }
 0x29a   : > { %18605 = vmatprep.mubr.msk.f32.mxu0 %vm373_vm0, %v20933_v34  ;;  %19635 = vmatpush3.bf16.msra.mxu0 %v25515_v19  ;;  %v19908_v34 = vpack.c.bf16 %v11648_v18, %v11644_v1  ;;  %v19916_v1 = vpack.c.bf16 %v11664_v29, %v11660_v62  ;;  %v15927_v29 = vld [vmem:[%s25363_s5 + $0x1b8] sm:$0xff] }
 0x29b   : > { %18953 = vmatmul.mubr.msk.f32.vlgmr.msra.gmra.mrb[68].mxu1 %vm373_vm0, %v22786_v47  ;;  %19637 = vmatprep.subr.bf16.mxu0 %v25517_v60 }
 0x29c   : > { %18955 = vmatprep.mubr.msk.f32.mxu1 %vm373_vm0, %v20934_v61  ;;  %19835 = vmatpush3.bf16.msra.mxu1 %v25515_v19  ;;  %v11643_v19 = vld [vmem:[%s25363_s5 + $0x50] sm:$0xff] }
 0x29d   : > { %18606 = vmatmul.mubr.msk.f32.gmra.mrb[70].mxu0 %vm373_vm0, %v22762_v21  ;;  %19837 = vmatprep.subr.bf16.mxu1 %v25517_v60  ;;  %v25519_v21 = vld [vmem:[#allocation42_spill] sm:$0xff] }
 0x29e   : > { %19639 = vmatpush3.bf16.msra.mxu0 %v25517_v60  ;;  %18616 = vmatprep.mubr.msk.f32.mxu0 %vm373_vm0, %v25516_v56  ;;  %v11647_v56 = vld [vmem:[%s25363_s5 + $0x70] sm:$0xff] }
 0x29f   : > { %18956 = vmatmul.mubr.msk.f32.gmra.mrb[70].mxu1 %vm373_vm0, %v22808_v54  ;;  %19641 = vmatprep.subr.bf16.mxu0 %v25518_v53 }
 0x2a0   : > { %19839 = vmatpush3.bf16.msra.mxu1 %v25517_v60  ;;  %18966 = vmatprep.mubr.msk.f32.mxu1 %vm373_vm0, %v22815_v43  ;;  %v11516_v60 = vld [vmem:[#allocation2 + $0xda] sm:$0xff] }
 0x2a1   : > { %18617 = vmatmul.mubr.msk.f32.vlgmr.msra.gmra.mrb[68].mxu0 %vm373_vm0, %v22786_v47  ;;  %19841 = vmatprep.subr.bf16.mxu1 %v25518_v53  ;;  %v25521_v47 = vld [vmem:[#allocation43_spill] sm:$0xff] }
 0x2a2   : > { %18619 = vmatprep.mubr.msk.f32.mxu0 %vm373_vm0, %v20934_v61  ;;  %19643 = vmatpush3.bf16.msra.mxu0 %v25518_v53  ;;  %v19894_v61 = vpack.c.bf16 %v11645_v9, %v11641_v23  ;;  %v15905_v23 = vld [vmem:[%s25363_s5 + $0x108] sm:$0xff] }
 0x2a3   : > { %18967 = vmatmul.mubr.msk.f32.vlgmr.msra.gmra.mrb[68].mxu1 %vm373_vm0, %v25519_v21  ;;  %19645 = vmatprep.subr.bf16.mxu0 %v25520_v63 }
 0x2a4   : > { %18969 = vmatprep.mubr.msk.f32.mxu1 %vm373_vm0, %v20935_v37  ;;  %19843 = vmatpush3.bf16.msra.mxu1 %v25518_v53  ;;  %v11517_v53 = vld [vmem:[#allocation2 + $0xe2] sm:$0xff] }
 0x2a5   : > { %18620 = vmatmul.mubr.msk.f32.gmra.mrb[70].mxu0 %vm373_vm0, %v22808_v54  ;;  %19845 = vmatprep.subr.bf16.mxu1 %v25520_v63  ;;  %v25524_v54 = vld [vmem:[#allocation45_spill] sm:$0xff] }
 0x2a6   : > { %19647 = vmatpush3.bf16.msra.mxu0 %v25520_v63  ;;  %18630 = vmatprep.mubr.msk.f32.mxu0 %vm373_vm0, %v22815_v43  ;;  %v25525_v43 = vld [vmem:[#allocation29_spill] sm:$0xff] }
 0x2a7   : > { %18970 = vmatmul.mubr.msk.f32.gmra.mrb[70].mxu1 %vm373_vm0, %v25521_v47  ;;  %19649 = vmatprep.subr.bf16.mxu0 %v25522_v2 }
 0x2a8   : > { %19847 = vmatpush3.bf16.msra.mxu1 %v25520_v63  ;;  %18980 = vmatprep.mubr.msk.f32.mxu1 %vm373_vm0, %v25523_v11  ;;  %v11518_v63 = vld [vmem:[#allocation2 + $0xea] sm:$0xff] }
 0x2a9   : > { %18631 = vmatmul.mubr.msk.f32.vlgmr.msra.gmra.mrb[68].mxu0 %vm373_vm0, %v25519_v21  ;;  %19849 = vmatprep.subr.bf16.mxu1 %v25522_v2  ;;  %v19910_v21 = vpack.c.bf16 %v11647_v56, %v11643_v19  ;;  %v15911_v19 = vld [vmem:[%s25363_s5 + $0x138] sm:$0xff] }
 0x2aa   : > { %18633 = vmatprep.mubr.msk.f32.mxu0 %vm373_vm0, %v20935_v37  ;;  %19651 = vmatpush3.bf16.msra.mxu0 %v25522_v2  ;;  %v23431_v37 = vld [vmem:[%s25362_s4] ss:$0 sm:$0xff] }
 0x2ab   : > { %18981 = vmatmul.mubr.msk.f32.vlgmr.msra.gmra.mrb[68].mxu1 %vm373_vm0, %v25524_v54  ;;  %19653 = vmatprep.subr.bf16.mxu0 %v25525_v43 }
 0x2ac   : > { %18983 = vmatprep.mubr.msk.f32.mxu1 %vm373_vm0, %v20936_v42  ;;  %19851 = vmatpush3.bf16.msra.mxu1 %v25522_v2 }
 0x2ad   : > { %18634 = vmatmul.mubr.msk.f32.gmra.mrb[70].mxu0 %vm373_vm0, %v25521_v47  ;;  %19853 = vmatprep.subr.bf16.mxu1 %v25525_v43 }
 0x2ae   : > { %19655 = vmatpush3.bf16.msra.mxu0 %v25525_v43  ;;  %18644 = vmatprep.mubr.msk.f32.mxu0 %vm373_vm0, %v8850_v12 }
 0x2af   : > { %18984 = vmatmul.mubr.msk.f32.gmra.mrb[70].mxu1 %vm373_vm0, %v25526_v6  ;;  %19657 = vmatprep.subr.bf16.mxu0 %v25527_v35 }
 0x2b0   : > { %19855 = vmatpush3.bf16.msra.mxu1 %v25525_v43  ;;  %18994 = vmatprep.mubr.msk.f32.mxu1 %vm373_vm0, %v8955_v8 }
 0x2b1   : > { %18645 = vmatmul.mubr.msk.f32.vlgmr.msra.gmra.mrb[68].mxu0 %vm373_vm0, %v8851_v4  ;;  %19857 = vmatprep.subr.bf16.mxu1 %v25527_v35 }
 0x2b2   : > { %18647 = vmatprep.mubr.msk.f32.mxu0 %vm373_vm0, %v8852_v52  ;;  %19659 = vmatpush3.bf16.msra.mxu0 %v25527_v35 }
 0x2b3   : > { %18995 = vmatmul.mubr.msk.f32.vlgmr.msra.gmra.mrb[68].mxu1 %vm373_vm0, %v8956_v16  ;;  %19661 = vmatprep.subr.bf16.mxu0 %v25528_v51 }
 0x2b4   : > { %18997 = vmatprep.mubr.msk.f32.mxu1 %vm373_vm0, %v8957_v48  ;;  %19859 = vmatpush3.bf16.msra.mxu1 %v25527_v35 }
 0x2b5   : > { %18648 = vmatmul.mubr.msk.f32.gmra.mrb[70].mxu0 %vm373_vm0, %v8853_v26  ;;  %19861 = vmatprep.subr.bf16.mxu1 %v25528_v51 }
 0x2b6   : > { %19663 = vmatpush3.bf16.msra.mxu0 %v25528_v51  ;;  %18658 = vmatprep.mubr.msk.f32.mxu0 %vm373_vm0, %v8955_v8 }
 0x2b7   : > { %18998 = vmatmul.mubr.msk.f32.gmra.mrb[70].mxu1 %vm373_vm0, %v8958_v24  ;;  %19665 = vmatprep.subr.bf16.mxu0 %v25529_v27 }
 0x2b8   : > { %19863 = vmatpush3.bf16.msra.mxu1 %v25528_v51  ;;  %19008 = vmatprep.mubr.msk.f32.mxu1 %vm373_vm0, %v9060_v5 }
 0x2b9   : > { %18659 = vmatmul.mubr.msk.f32.vlgmr.msra.gmra.mrb[68].mxu0 %vm373_vm0, %v8956_v16  ;;  %19865 = vmatprep.subr.bf16.mxu1 %v25529_v27 }
 0x2ba   : > { %18661 = vmatprep.mubr.msk.f32.mxu0 %vm373_vm0, %v8957_v48  ;;  %19667 = vmatpush3.bf16.msra.mxu0 %v25529_v27 }
 0x2bb   : > { %19009 = vmatmul.mubr.msk.f32.vlgmr.msra.gmra.mrb[68].mxu1 %vm373_vm0, %v9061_v13  ;;  %19669 = vmatprep.subr.bf16.mxu0 %v25530_v44 }
 0x2bc   : > { %19011 = vmatprep.mubr.msk.f32.mxu1 %vm373_vm0, %v9062_v46  ;;  %19867 = vmatpush3.bf16.msra.mxu1 %v25529_v27 }
 0x2bd   : > { %18662 = vmatmul.mubr.msk.f32.gmra.mrb[70].mxu0 %vm373_vm0, %v8958_v24  ;;  %19869 = vmatprep.subr.bf16.mxu1 %v25530_v44 }
 0x2be   : > { %19671 = vmatpush3.bf16.msra.mxu0 %v25530_v44  ;;  %18672 = vmatprep.mubr.msk.f32.mxu0 %vm373_vm0, %v9060_v5 }
 0x2bf   : > { %19012 = vmatmul.mubr.msk.f32.gmra.mrb[70].mxu1 %vm373_vm0, %v9063_v57  ;;  %19673 = vmatprep.subr.bf16.mxu0 %v25531_v17 }
 0x2c0   : > { %19871 = vmatpush3.bf16.msra.mxu1 %v25530_v44  ;;  %19022 = vmatprep.mubr.msk.f32.mxu1 %vm373_vm0, %v9165_v40 }
 0x2c1   : > { %18673 = vmatmul.mubr.msk.f32.vlgmr.msra.gmra.mrb[68].mxu0 %vm373_vm0, %v9061_v13  ;;  %19873 = vmatprep.subr.bf16.mxu1 %v25531_v17 }
 0x2c2   : > { %18675 = vmatprep.mubr.msk.f32.mxu0 %vm373_vm0, %v9062_v46  ;;  %19675 = vmatpush3.bf16.msra.mxu0 %v25531_v17 }
 0x2c3   : > { %19023 = vmatmul.mubr.msk.f32.vlgmr.msra.gmra.mrb[68].mxu1 %vm373_vm0, %v9166_v41  ;;  %19677 = vmatprep.subr.bf16.mxu0 %v25532_v3 }
 0x2c4   : > { %19025 = vmatprep.mubr.msk.f32.mxu1 %vm373_vm0, %v9167_v28  ;;  %19875 = vmatpush3.bf16.msra.mxu1 %v25531_v17 }
 0x2c5   : > { %18676 = vmatmul.mubr.msk.f32.gmra.mrb[70].mxu0 %vm373_vm0, %v9063_v57  ;;  %19877 = vmatprep.subr.bf16.mxu1 %v25532_v3 }
 0x2c6   : > { %19679 = vmatpush3.bf16.msra.mxu0 %v25532_v3  ;;  %18686 = vmatprep.mubr.msk.f32.mxu0 %vm373_vm0, %v9165_v40 }
 0x2c7   : > { %19026 = vmatmul.mubr.msk.f32.gmra.mrb[70].mxu1 %vm373_vm0, %v9168_v55  ;;  %19681 = vmatprep.subr.bf16.mxu0 %v25533_v25 }
 0x2c8   : > { %19879 = vmatpush3.bf16.msra.mxu1 %v25532_v3  ;;  %19036 = vmatprep.mubr.msk.f32.mxu1 %vm373_vm0, %v9270_v20 }
 0x2c9   : > { %18687 = vmatmul.mubr.msk.f32.vlgmr.msra.gmra.mrb[68].mxu0 %vm373_vm0, %v9166_v41  ;;  %19881 = vmatprep.subr.bf16.mxu1 %v25533_v25 }
 0x2ca   : > { %18689 = vmatprep.mubr.msk.f32.mxu0 %vm373_vm0, %v9167_v28  ;;  %19683 = vmatpush3.bf16.msra.mxu0 %v25533_v25 }
 0x2cb   : > { %19037 = vmatmul.mubr.msk.f32.vlgmr.msra.gmra.mrb[68].mxu1 %vm373_vm0, %v9271_v30  ;;  %19685 = vmatprep.subr.bf16.mxu0 %v25534_v33 }
 0x2cc   : > { %19039 = vmatprep.mubr.msk.f32.mxu1 %vm373_vm0, %v9272_v22  ;;  %19883 = vmatpush3.bf16.msra.mxu1 %v25533_v25  ;;  %v11652_v25 = vld [vmem:[%s25363_s5 + $0x98] sm:$0xff] }
 0x2cd   : > { %18690 = vmatmul.mubr.msk.f32.gmra.mrb[70].mxu0 %vm373_vm0, %v9168_v55  ;;  %19885 = vmatprep.subr.bf16.mxu1 %v25534_v33  ;;  %v11650_v55 = vld [vmem:[%s25363_s5 + $0x88] sm:$0xff]  ;;  %v19912_v10 = vpack.c.bf16 %v11656_v49, %v11652_v25 }
 0x2ce   : > { %19687 = vmatpush3.bf16.msra.mxu0 %v25534_v33  ;;  %18700 = vmatprep.mubr.msk.f32.mxu0 %vm373_vm0, %v9270_v20  ;;  %v11654_v20 = vld [vmem:[%s25363_s5 + $0xa8] sm:$0xff] }
 0x2cf   : > { %19040 = vmatmul.mubr.msk.f32.gmra.mrb[70].mxu1 %vm373_vm0, %v9273_v7  ;;  %19889 = vmatprep.subr.bf16.mxu0 %v19888_v15  ;;  %v19896_v58 = vpack.c.bf16 %v11654_v20, %v11650_v55  ;;  %v11655_v15 = vld [vmem:[%s25363_s5 + $0xb0] sm:$0xff] }
 0x2d0   : > { %19887 = vmatpush3.bf16.msra.mxu1 %v25534_v33  ;;  %19050 = vmatprep.mubr.msk.f32.mxu1 %vm373_vm0, %v11515_v14  ;;  %v11651_v33 = vld [vmem:[%s25363_s5 + $0x90] sm:$0xff] }
 0x2d1   : > { %18701 = vmatmul.mubr.msk.f32.vlgmr.msra.gmra.mrb[68].mxu0 %vm373_vm0, %v9271_v30  ;;  %19905 = vmatprep.subr.bf16.mxu1 %v19904_v0  ;;  %v11649_v30 = vld [vmem:[%s25363_s5 + $0x80] sm:$0xff]  ;;  %v19914_v59 = vpack.c.bf16 %v11655_v15, %v11651_v33  ;;  %v19900_v0 = vpack.c.bf16 %v11662_v39, %v11658_v45  ;;  %v11659_v14 = vld [vmem:[%s25363_s5 + $0xd0] sm:$0xff]  ;;  %v15921_v45 = vld [vmem:[%s25363_s5 + $0x188] sm:$0xff] }
 0x2d2   : > { %18703 = vmatprep.mubr.msk.f32.mxu0 %vm373_vm0, %v9272_v22  ;;  %19891 = vmatpush1.bf16.msra.mxu0 %v19890_v38  ;;  %v19898_v22 = vpack.c.bf16 %v11653_v50, %v11649_v30  ;;  %v21001_v38 = vmov 0.0   ;;  %v15912_v30 = vld [vmem:[%s25363_s5 + $0x140] sm:$0xff]  ;;  %v15914_v15 = vld [vmem:[%s25363_s5 + $0x150] sm:$0xff] }
 0x2d3   : > { %19051 = vmatmul.mubr.msk.f32.vlgmr.msra.gmra.mrb[68].mxu1 %vm373_vm0, %v11516_v60  ;;  %19893 = vmatprep.subr.bf16.mxu0 %v19892_v32  ;;  %v11663_v32 = vld [vmem:[%s25363_s5 + $0xf0] sm:$0xff] }
 0x2d4   : > { %19053 = vmatprep.mubr.msk.f32.mxu1 %vm373_vm0, %v11517_v53  ;;  %19907 = vmatpush1.bf16.msra.mxu1 %v19906_v36  ;;  %v19918_v9 = vpack.c.bf16 %v11663_v32, %v11659_v14  ;;  %v15909_v36 = vld [vmem:[%s25363_s5 + $0x128] sm:$0xff]  ;;  %v15920_v14 = vld [vmem:[%s25363_s5 + $0x180] sm:$0xff] }
 0x2d5   : > { %18704 = vmatmul.mubr.msk.f32.gmra.mrb[70].mxu0 %vm373_vm0, %v9273_v7  ;;  %19909 = vmatprep.subr.bf16.mxu1 %v19908_v34  ;;  %v11661_v7 = vld [vmem:[%s25363_s5 + $0xe0] sm:$0xff]  ;;  %v15907_v34 = vld [vmem:[%s25363_s5 + $0x118] sm:$0xff]  ;;  %v19920_v56 = vpack.c.bf16 %v15909_v36, %v15905_v23  ;;  %v15922_v36 = vld [vmem:[%s25363_s5 + $0x190] sm:$0xff] }
 0x2d6   : > { %19895 = vmatpush1.bf16.msra.mxu0 %v19894_v61  ;;  %11733 = vmatprep.mubr.f32.mxu0 %v21001_v38  ;;  %v19902_v18 = vpack.c.bf16 %v11661_v7, %v11657_v31  ;;  %v19936_v60 = vpack.c.bf16 %v15911_v19, %v15907_v34  ;;  %v15926_v34 = vld [vmem:[%s25363_s5 + $0x1b0] sm:$0xff]  ;;  %v15929_v19 = vld [vmem:[%s25363_s5 + $0x1c8] sm:$0xff] }
 0x2d7   : > { %19054 = vmatmul.mubr.msk.f32.gmra.mrb[70].mxu1 %vm373_vm0, %v11518_v63  ;;  %19897 = vmatprep.subr.bf16.mxu0 %v19896_v58 }
 0x2d8   : > { %19911 = vmatpush1.bf16.msra.mxu1 %v19910_v21  ;;  %11804 = vmatprep.mubr.f32.mxu1 %v21001_v38 }
 0x2d9   : > { %19913 = vmatprep.subr.bf16.mxu1 %v19912_v10 }
 0x2da   : > { %19899 = vmatpush1.bf16.msra.mxu0 %v19898_v22 }
 0x2db   : > { %19901 = vmatprep.subr.bf16.mxu0 %v19900_v0  ;;  %v15923_v0 = vld [vmem:[%s25363_s5 + $0x198] sm:$0xff] }
 0x2dc   : > { %v18002_v47 = vpop.f32.mrb[64].mxu0  ;;  %19915 = vmatpush1.bf16.msra.mxu1 %v19914_v59  ;;  %v15918_v59 = vld [vmem:[%s25363_s5 + $0x170] sm:$0xff] }
 0x2dd   : > { %v4762_v2 = vadd.f32 %v18002_v47, %v23431_v37  ;;  %v4732_v11 = vpop.f32.mrb[65].mxu0  ;;  %19917 = vmatprep.subr.bf16.mxu1 %v19916_v1 }
 0x2de   : > { %v18352_v54 = vpop.f32.mrb[64].mxu1  ;;  %v4761_v43 = vadd.f32 %v23431_v37, %v4732_v11  ;;  %19903 = vmatpush1.bf16.msra.mxu0 %v19902_v18  ;;  %v15908_v11 = vld [vmem:[%s25363_s5 + $0x120] sm:$0xff]  ;;  %v19942_v18 = vpack.c.bf16 %v15918_v59, %v15914_v15 }
 0x2df   : > { %v7067_v42 = vadd.f32 %v18352_v54, %v23431_v37  ;;  %v7043_v12 = vpop.f32.mrb[65].mxu1  ;;  %v4766_v35 = vmax.f32 %v4762_v2, 0.0  ;;  %19921 = vmatprep.subr.bf16.mxu0 %v19920_v56  ;;  %v15904_v2 = vld [vmem:[%s25363_s5 + $0x100] sm:$0xff]  ;;  %v15933_v56 = vld [vmem:[%s25363_s5 + $0x1e8] sm:$0xff] }
 0x2e0   : > { %v7066_v6 = vadd.f32 %v23431_v37, %v7043_v12  ;;  %v18005_v8 = vpop.f32.mrb[66].mxu0  ;;  %v4765_v48 = vmax.f32 %v4761_v43, 0.0  ;;  %19919 = vmatpush1.bf16.msra.mxu1 %v19918_v9  ;;  %v15906_v12 = vld [vmem:[%s25363_s5 + $0x110] sm:$0xff]  ;;  %v19944_v9 = vpack.c.bf16 %v15927_v29, %v15923_v0 }
 0x2e1   : > { %v7071_v4 = vmax.f32 %v7067_v42, 0.0  ;;  %v4764_v52 = vadd.f32 %v18005_v8, %v23431_v37  ;;  %v4742_v16 = vpop.f32.mrb[67].mxu0  ;;  %19937 = vmatprep.subr.bf16.mxu1 %v19936_v60  ;;  %v15931_v60 = vld [vmem:[%s25363_s5 + $0x1d8] sm:$0xff]  ;;  %v15956_v0 = vld [vmem:[%s25363_s5 + $0x290] sm:$0xff] }
 0x2e2   : > { %v7070_v51 = vmax.f32 %v7066_v6, 0.0  ;;  %v18355_v26 = vpop.f32.mrb[66].mxu1  ;;  %v4763_v24 = vadd.f32 %v23431_v37, %v4742_v16  ;;  %v15910_v6 = vld [vmem:[%s25363_s5 + $0x130] sm:$0xff]  ;;  %v15917_v16 = vld [vmem:[%s25363_s5 + $0x168] sm:$0xff] }
 0x2e3   : > { %v23439_v5 = vmax.f32 %v4766_v35, %v7071_v4  ;;  %v7069_v27 = vadd.f32 %v18355_v26, %v23431_v37  ;;  %v7053_v13 = vpop.f32.mrb[67].mxu1  ;;  %v4768_v57 = vmax.f32 %v4764_v52, 0.0  ;;  %v15913_v52 = vld [vmem:[%s25363_s5 + $0x148] sm:$0xff]  ;;  %v15960_v29 = vld [vmem:[%s25363_s5 + $0x2b0] sm:$0xff] }
 0x2e4   : > { %v23442_v46 = vmax.f32 %v4765_v48, %v7070_v51  ;;  %v7068_v44 = vadd.f32 %v23431_v37, %v7053_v13  ;;  %v4767_v17 = vmax.f32 %v4763_v24, 0.0  ;;  %v15915_v13 = vld [vmem:[%s25363_s5 + $0x158] sm:$0xff]  ;;  %v19924_v49 = vpack.c.bf16 %v15917_v16, %v15913_v52  ;;  %v15938_v52 = vld [vmem:[%s25363_s5 + $0x200] sm:$0xff] }
 0x2e5   : > { %v7073_v40 = vmax.f32 %v7069_v27, 0.0  ;;  %v19922_v27 = vpack.c.bf16 %v15908_v11, %v15904_v2  ;;  %v19932_v2 = vpack.c.bf16 %v15933_v56, %v15929_v19  ;;  %v15942_v16 = vld [vmem:[%s25363_s5 + $0x220] sm:$0xff]  ;;  %v15964_v19 = vld [vmem:[%s25363_s5 + $0x2d0] sm:$0xff] }
 0x2e6   : > { %v7072_v41 = vmax.f32 %v7068_v44, 0.0  ;;  %v15919_v44 = vld [vmem:[%s25363_s5 + $0x178] sm:$0xff]  ;;  %v15968_v56 = vld [vmem:[%s25363_s5 + $0x2f0] sm:$0xff] }
 0x2e7   : > { %v23445_v28 = vmax.f32 %v4768_v57, %v7073_v40  ;;  %v19940_v33 = vpack.c.bf16 %v15919_v44, %v15915_v13  ;;  %v15951_v13 = vld [vmem:[%s25363_s5 + $0x268] sm:$0xff]  ;;  %v15949_v44 = vld [vmem:[%s25363_s5 + $0x258] sm:$0xff] }
 0x2e8   : > { %v23447_v3 = vmax.f32 %v4767_v17, %v7072_v41 }
 0x3a4   : > { %v18702_v61 = vpop.f32.mrb[68].mxu0 }
 0x3a5   : > { %v9376_v53 = vadd.f32 %v18702_v61, %v23431_v37  ;;  %v9352_v21 = vpop.f32.mrb[69].mxu0  ;;  %v15935_v61 = vld [vmem:[%s25363_s5 + $0x1f8] sm:$0xff] }
 0x3a6   : > { %v19052_v63 = vpop.f32.mrb[68].mxu1  ;;  %v9375_v47 = vadd.f32 %v23431_v37, %v9352_v21  ;;  %v19946_v21 = vpack.c.bf16 %v15926_v34, %v15922_v36  ;;  %v19948_v11 = vpack.c.bf16 %v15935_v61, %v15931_v60  ;;  %v15973_v60 = vld [vmem:[%s25363_s5 + $0x308] sm:$0xff] }
 0x3a7   : > { %v9380_v54 = vmax.f32 %v9376_v53, 0.0  ;;  %v11621_v43 = vadd.f32 %v19052_v63, %v23431_v37  ;;  %v11597_v42 = vpop.f32.mrb[69].mxu1  ;;  %v15928_v63 = vld [vmem:[%s25363_s5 + $0x1c0] sm:$0xff]  ;;  %v15977_v61 = vld [vmem:[%s25363_s5 + $0x328] sm:$0xff] }
 0x3a8   : > { %v9379_v8 = vmax.f32 %v9375_v47, 0.0  ;;  %v11620_v35 = vadd.f32 %v23431_v37, %v11597_v42  ;;  %v18705_v4 = vpop.f32.mrb[70].mxu0  ;;  %v15932_v47 = vld [vmem:[%s25363_s5 + $0x1e0] sm:$0xff]  ;;  %v15939_v42 = vld [vmem:[%s25363_s5 + $0x208] sm:$0xff] }
 0x3a9   : > { %v9384_v48 = vmax.f32 %v23439_v5, %v9380_v54  ;;  %v11625_v51 = vmax.f32 %v11621_v43, 0.0  ;;  %v9378_v26 = vadd.f32 %v18705_v4, %v23431_v37  ;;  %v9362_v24 = vpop.f32.mrb[71].mxu0  ;;  %v19938_v5 = vpack.c.bf16 %v15910_v6, %v15906_v12  ;;  %v15930_v54 = vld [vmem:[%s25363_s5 + $0x1d0] sm:$0xff]  ;;  %v15943_v12 = vld [vmem:[%s25363_s5 + $0x228] sm:$0xff]  ;;  %v15941_v6 = vld [vmem:[%s25363_s5 + $0x218] sm:$0xff] }
 0x3aa   : > { %v9383_v57 = vmax.f32 %v23442_v46, %v9379_v8  ;;  %v11624_v40 = vmax.f32 %v11620_v35, 0.0  ;;  %v19055_v17 = vpop.f32.mrb[70].mxu1  ;;  %v9377_v41 = vadd.f32 %v23431_v37, %v9362_v24  ;;  %v15916_v46 = vld [vmem:[%s25363_s5 + $0x160] sm:$0xff]  ;;  %v15934_v43 = vld [vmem:[%s25363_s5 + $0x1f0] sm:$0xff]  ;;  %v15945_v8 = vld [vmem:[%s25363_s5 + $0x238] sm:$0xff]  ;;  %v19934_v35 = vpack.c.bf16 %v15932_v47, %v15928_v63 }
 0x3ab   : > { %v23543_v55 = vmax.f32 %v9384_v48, %v11625_v51  ;;  %v9382_v20 = vmax.f32 %v9378_v26, 0.0  ;;  %v11623_v25 = vadd.f32 %v19055_v17, %v23431_v37  ;;  %v11607_v58 = vpop.f32.mrb[71].mxu1  ;;  %v19926_v1 = vpack.c.bf16 %v15916_v46, %v15912_v30  ;;  %v15940_v26 = vld [vmem:[%s25363_s5 + $0x210] sm:$0xff]  ;;  %v15955_v46 = vld [vmem:[%s25363_s5 + $0x288] sm:$0xff] }
 0x3ac   : > { %v23552_v50 = vmax.f32 %v9383_v57, %v11624_v40  ;;  %v9381_v10 = vmax.f32 %v9377_v41, 0.0  ;;  %v11622_v22 = vadd.f32 %v23431_v37, %v11607_v58  ;;  %v15925_v37 = vld [vmem:[%s25363_s5 + $0x1a8] sm:$0xff]  ;;  %v19950_v4 = vpack.c.bf16 %v15934_v43, %v15930_v54  ;;  %v15944_v24 = vld [vmem:[%s25363_s5 + $0x230] sm:$0xff]  ;;  %v15953_v57 = vld [vmem:[%s25363_s5 + $0x278] sm:$0xff] }
 0x3ad   : > { %v9386_v39 = vmax.f32 %v23445_v28, %v9382_v20  ;;  %v11627_v62 = vmax.f32 %v11623_v25, 0.0  ;;  %v19928_v23 = vpack.c.bf16 %v15925_v37, %v15921_v45  ;;  %v19952_v48 = vpack.c.bf16 %v15943_v12, %v15939_v42  ;;  %v15946_v41 = vld [vmem:[%s25363_s5 + $0x240] sm:$0xff]  ;;  %v15952_v30 = vld [vmem:[%s25363_s5 + $0x270] sm:$0xff] }
 0x3ae   : > { %v9385_v31 = vmax.f32 %v23447_v3, %v9381_v10  ;;  %v11626_v7 = vmax.f32 %v11622_v22, 0.0  ;;  %15902 = vmatmul.mubr.msk.f32.vlgmr.msra.gmra.mrb[72].mxu0 %vm11665_vm1, %v23552_v50  ;;  %15903 = vmatmul.mubr.msk.f32.vlgmr.msra.gmra.mrb[72].mxu1 %vm11665_vm1, %v23552_v50  ;;  %v15924_v3 = vld [vmem:[%s25363_s5 + $0x1a0] sm:$0xff]  ;;  %v19968_v51 = vpack.c.bf16 %v15945_v8, %v15941_v6  ;;  %v19954_v40 = vpack.c.bf16 %v15942_v16, %v15938_v52  ;;  %v15959_v10 = vld [vmem:[%s25363_s5 + $0x2a8] sm:$0xff]  ;;  %v15957_v22 = vld [vmem:[%s25363_s5 + $0x298] sm:$0xff] }
 0x3af   : > { %v23579_v28 = vmax.f32 %v9386_v39, %v11627_v62  ;;  %19923 = vmatpush1.bf16.msra.mxu0 %v19922_v27  ;;  %19939 = vmatpush1.bf16.msra.mxu1 %v19938_v5  ;;  %v19930_v53 = vpack.c.bf16 %v15924_v3, %v15920_v14  ;;  %v15947_v27 = vld [vmem:[%s25363_s5 + $0x248] sm:$0xff]  ;;  %v19970_v17 = vpack.c.bf16 %v15944_v24, %v15940_v26  ;;  %v15950_v5 = vld [vmem:[%s25363_s5 + $0x260] sm:$0xff]  ;;  %v11874_v20 = vrot.slane %v23552_v50, 1  ;;  %v15974_v42 = vld [vmem:[%s25363_s5 + $0x310] sm:$0xff] }
 0x3b0   : > { %v23587_v32 = vmax.f32 %v9385_v31, %v11626_v7  ;;  %19925 = vmatprep.subr.bf16.mxu0 %v19924_v49  ;;  %19941 = vmatprep.subr.bf16.mxu1 %v19940_v33  ;;  %v19956_v25 = vpack.c.bf16 %v15951_v13, %v15947_v27  ;;  %v19972_v58 = vpack.c.bf16 %v15953_v57, %v15949_v44  ;;  %v15948_v49 = vld [vmem:[%s25363_s5 + $0x250] sm:$0xff]  ;;  %v15961_v33 = vld [vmem:[%s25363_s5 + $0x2b8] sm:$0xff]  ;;  %v15954_v45 = vld [vmem:[%s25363_s5 + $0x280] sm:$0xff]  ;;  %v12082_v26 = vrot.slane %v23552_v50, 2 }
 0x3b1   : > { %11941 = vmatprep.mubr.f32.mxu0 %v21001_v38  ;;  %12012 = vmatprep.mubr.f32.mxu1 %v21001_v38  ;;  %v19958_v15 = vpack.c.bf16 %v15950_v5, %v15946_v41  ;;  %v19974_v59 = vpack.c.bf16 %v15952_v30, %v15948_v49  ;;  %v15958_v39 = vld [vmem:[%s25363_s5 + $0x2a0] sm:$0xff]  ;;  %v19960_v62 = vpack.c.bf16 %v15959_v10, %v15955_v46  ;;  %v15963_v31 = vld [vmem:[%s25363_s5 + $0x2c8] sm:$0xff]  ;;  %v15978_v12 = vld [vmem:[%s25363_s5 + $0x330] sm:$0xff] }
 0x3b2   : > { %v19976_v37 = vpack.c.bf16 %v15961_v33, %v15957_v22  ;;  %v15967_v7 = vld [vmem:[%s25363_s5 + $0x2e8] sm:$0xff]  ;;  %v19962_v14 = vpack.c.bf16 %v15958_v39, %v15954_v45  ;;  %v19978_v3 = vpack.c.bf16 %v15960_v29, %v15956_v0  ;;  %v19982_v47 = vpack.c.bf16 %v15968_v56, %v15964_v19  ;;  %v15982_v13 = vld [vmem:[%s25363_s5 + $0x350] sm:$0xff]  ;;  %v15995_v41 = vld [vmem:[%s25363_s5 + $0x3b8] sm:$0xff] }
 0x3b3   : > { %19927 = vmatpush1.bf16.msra.mxu0 %v19926_v1  ;;  %19943 = vmatpush1.bf16.msra.mxu1 %v19942_v18  ;;  %v15965_v1 = vld [vmem:[%s25363_s5 + $0x2d8] sm:$0xff]  ;;  %v19964_v36 = vpack.c.bf16 %v15967_v7, %v15963_v31  ;;  %v19984_v54 = vpack.c.bf16 %v15977_v61, %v15973_v60  ;;  %v15981_v6 = vld [vmem:[%s25363_s5 + $0x348] sm:$0xff]  ;;  %v20002_v16 = vpack.c.bf16 %v15978_v12, %v15974_v42  ;;  %v15986_v44 = vld [vmem:[%s25363_s5 + $0x370] sm:$0xff]  ;;  %v12290_v42 = vrot.slane %v23552_v50, 3 }
 0x3b4   : > { %19929 = vmatprep.subr.bf16.mxu0 %v19928_v23  ;;  %19945 = vmatprep.subr.bf16.mxu1 %v19944_v9  ;;  %v15969_v18 = vld [vmem:[%s25363_s5 + $0x2f8] sm:$0xff]  ;;  %v15962_v23 = vld [vmem:[%s25363_s5 + $0x2c0] sm:$0xff]  ;;  %v15985_v8 = vld [vmem:[%s25363_s5 + $0x368] sm:$0xff] }
 0x3b5   : > { %v15966_v9 = vld [vmem:[%s25363_s5 + $0x2e0] sm:$0xff]  ;;  %v19980_v34 = vpack.c.bf16 %v15969_v18, %v15965_v1  ;;  %v19988_v24 = vpack.c.bf16 %v15985_v8, %v15981_v6  ;;  %v15989_v57 = vld [vmem:[%s25363_s5 + $0x388] sm:$0xff]  ;;  %v15990_v46 = vld [vmem:[%s25363_s5 + $0x390] sm:$0xff] }
 0x3b6   : > { %v19966_v63 = vpack.c.bf16 %v15966_v9, %v15962_v23  ;;  %v15994_v10 = vld [vmem:[%s25363_s5 + $0x3b0] sm:$0xff]  ;;  %v15997_v22 = vld [vmem:[%s25363_s5 + $0x3c8] sm:$0xff] }
 0x3b7   : > { %19931 = vmatpush1.bf16.msra.mxu0 %v19930_v53  ;;  %19947 = vmatpush1.bf16.msra.mxu1 %v19946_v21  ;;  %v15975_v53 = vld [vmem:[%s25363_s5 + $0x318] sm:$0xff]  ;;  %v16001_v33 = vld [vmem:[%s25363_s5 + $0x3e8] sm:$0xff]  ;;  %v20010_v39 = vpack.c.bf16 %v15994_v10, %v15990_v46  ;;  %v15998_v31 = vld [vmem:[%s25363_s5 + $0x3d0] sm:$0xff] }
 0x3b8   : > { %19933 = vmatprep.subr.bf16.mxu0 %v19932_v2  ;;  %19949 = vmatprep.subr.bf16.mxu1 %v19948_v11  ;;  %v15979_v21 = vld [vmem:[%s25363_s5 + $0x338] sm:$0xff]  ;;  %v15972_v2 = vld [vmem:[%s25363_s5 + $0x300] sm:$0xff]  ;;  %v19996_v0 = vpack.c.bf16 %v16001_v33, %v15997_v22  ;;  %v16002_v7 = vld [vmem:[%s25363_s5 + $0x3f0] sm:$0xff] }
 0x3b9   : > { %v15976_v11 = vld [vmem:[%s25363_s5 + $0x320] sm:$0xff]  ;;  %v20000_v43 = vpack.c.bf16 %v15979_v21, %v15975_v53  ;;  %v16007_v1 = vld [vmem:[%s25363_s5 + $0x408] sm:$0xff]  ;;  %v20014_v9 = vpack.c.bf16 %v16002_v7, %v15998_v31  ;;  %v16008_v60 = vld [vmem:[%s25363_s5 + $0x410] sm:$0xff] }
 0x3ba   : > { %v19986_v52 = vpack.c.bf16 %v15976_v11, %v15972_v2  ;;  %v16011_v18 = vld [vmem:[%s25363_s5 + $0x428] sm:$0xff]  ;;  %v16012_v61 = vld [vmem:[%s25363_s5 + $0x430] sm:$0xff] }
 0x3bb   : > { %19935 = vmatpush1.bf16.msra.mxu0 %v19934_v35  ;;  %19951 = vmatpush1.bf16.msra.mxu1 %v19950_v4  ;;  %v15983_v35 = vld [vmem:[%s25363_s5 + $0x358] sm:$0xff]  ;;  %v20016_v19 = vpack.c.bf16 %v16011_v18, %v16007_v1  ;;  %v16015_v53 = vld [vmem:[%s25363_s5 + $0x448] sm:$0xff]  ;;  %v20034_v11 = vpack.c.bf16 %v16012_v61, %v16008_v60  ;;  %v16016_v8 = vld [vmem:[%s25363_s5 + $0x450] sm:$0xff] }
 0x3bc   : > { %19953 = vmatprep.subr.bf16.mxu0 %v19952_v48  ;;  %19969 = vmatprep.subr.bf16.mxu1 %v19968_v51  ;;  %v15987_v4 = vld [vmem:[%s25363_s5 + $0x378] sm:$0xff]  ;;  %v15980_v48 = vld [vmem:[%s25363_s5 + $0x340] sm:$0xff]  ;;  %v16019_v21 = vld [vmem:[%s25363_s5 + $0x468] sm:$0xff] }
 0x3bd   : > { %v15984_v51 = vld [vmem:[%s25363_s5 + $0x360] sm:$0xff]  ;;  %v20004_v27 = vpack.c.bf16 %v15987_v4, %v15983_v35  ;;  %v20020_v12 = vpack.c.bf16 %v16019_v21, %v16015_v53  ;;  %v16020_v35 = vld [vmem:[%s25363_s5 + $0x470] sm:$0xff]  ;;  %v16023_v4 = vld [vmem:[%s25363_s5 + $0x488] sm:$0xff] }
 0x3be   : > { %15936 = vmatmul.mubr.msk.f32.vlgmr.msra.gmra.mrb[74].mxu0 %vm11665_vm1, %v11874_v20  ;;  %15937 = vmatmul.mubr.msk.f32.vlgmr.msra.gmra.mrb[74].mxu1 %vm11665_vm1, %v11874_v20  ;;  %v19990_v5 = vpack.c.bf16 %v15984_v51, %v15980_v48  ;;  %v20006_v20 = vpack.c.bf16 %v15986_v44, %v15982_v13  ;;  %v16027_v50 = vld [vmem:[%s25363_s5 + $0x4a8] sm:$0xff]  ;;  %v20038_v51 = vpack.c.bf16 %v16020_v35, %v16016_v8  ;;  %v16024_v44 = vld [vmem:[%s25363_s5 + $0x490] sm:$0xff] }
 0x3bf   : > { %19955 = vmatpush1.bf16.msra.mxu0 %v19954_v40  ;;  %19971 = vmatpush1.bf16.msra.mxu1 %v19970_v17  ;;  %v15993_v40 = vld [vmem:[%s25363_s5 + $0x3a8] sm:$0xff]  ;;  %v15991_v17 = vld [vmem:[%s25363_s5 + $0x398] sm:$0xff]  ;;  %v16032_v10 = vld [vmem:[%s25363_s5 + $0x4d0] sm:$0xff] }
 0x3c0   : > { %19957 = vmatprep.subr.bf16.mxu0 %v19956_v25  ;;  %19973 = vmatprep.subr.bf16.mxu1 %v19972_v58  ;;  %v15988_v25 = vld [vmem:[%s25363_s5 + $0x380] sm:$0xff]  ;;  %v19992_v49 = vpack.c.bf16 %v15993_v40, %v15989_v57  ;;  %v20008_v30 = vpack.c.bf16 %v15995_v41, %v15991_v17  ;;  %v16028_v57 = vld [vmem:[%s25363_s5 + $0x4b0] sm:$0xff]  ;;  %v16031_v40 = vld [vmem:[%s25363_s5 + $0x4c8] sm:$0xff] }
 0x3c1   : > { %12149 = vmatprep.mubr.f32.mxu0 %v21001_v38  ;;  %12220 = vmatprep.mubr.f32.mxu1 %v21001_v38  ;;  %v15992_v58 = vld [vmem:[%s25363_s5 + $0x3a0] sm:$0xff]  ;;  %v16035_v17 = vld [vmem:[%s25363_s5 + $0x4e8] sm:$0xff]  ;;  %v16033_v41 = vld [vmem:[%s25363_s5 + $0x4d8] sm:$0xff] }
 0x3c2   : > { %v19994_v45 = vpack.c.bf16 %v15992_v58, %v15988_v25  ;;  %v20042_v25 = vpack.c.bf16 %v16028_v57, %v16024_v44  ;;  %v16030_v58 = vld [vmem:[%s25363_s5 + $0x4c0] sm:$0xff]  ;;  %v16036_v22 = vld [vmem:[%s25363_s5 + $0x4f0] sm:$0xff]  ;;  %v16041_v33 = vld [vmem:[%s25363_s5 + $0x508] sm:$0xff] }
 0x3c3   : > { %19959 = vmatpush1.bf16.msra.mxu0 %v19958_v15  ;;  %19975 = vmatpush1.bf16.msra.mxu1 %v19974_v59  ;;  %v15999_v15 = vld [vmem:[%s25363_s5 + $0x3d8] sm:$0xff]  ;;  %v16042_v7 = vld [vmem:[%s25363_s5 + $0x510] sm:$0xff]  ;;  %v16049_v18 = vld [vmem:[%s25363_s5 + $0x548] sm:$0xff] }
 0x3c4   : > { %19961 = vmatprep.subr.bf16.mxu0 %v19960_v62  ;;  %19977 = vmatprep.subr.bf16.mxu1 %v19976_v37  ;;  %v16003_v59 = vld [vmem:[%s25363_s5 + $0x3f8] sm:$0xff]  ;;  %v15996_v62 = vld [vmem:[%s25363_s5 + $0x3c0] sm:$0xff]  ;;  %v16046_v1 = vld [vmem:[%s25363_s5 + $0x530] sm:$0xff] }
 0x3c5   : > { %v16000_v37 = vld [vmem:[%s25363_s5 + $0x3e0] sm:$0xff]  ;;  %v20012_v29 = vpack.c.bf16 %v16003_v59, %v15999_v15  ;;  %v16045_v15 = vld [vmem:[%s25363_s5 + $0x528] sm:$0xff]  ;;  %v16043_v59 = vld [vmem:[%s25363_s5 + $0x518] sm:$0xff] }
 0x3c6   : > { %v19998_v23 = vpack.c.bf16 %v16000_v37, %v15996_v62  ;;  %v20046_v62 = vpack.c.bf16 %v16036_v22, %v16032_v10  ;;  %v16040_v37 = vld [vmem:[%s25363_s5 + $0x500] sm:$0xff]  ;;  %v16050_v61 = vld [vmem:[%s25363_s5 + $0x550] sm:$0xff]  ;;  %v16057_v21 = vld [vmem:[%s25363_s5 + $0x588] sm:$0xff] }
 0x3c7   : > { %19963 = vmatpush1.bf16.msra.mxu0 %v19962_v14  ;;  %19979 = vmatpush1.bf16.msra.mxu1 %v19978_v3  ;;  %v16009_v14 = vld [vmem:[%s25363_s5 + $0x418] sm:$0xff]  ;;  %v16054_v53 = vld [vmem:[%s25363_s5 + $0x570] sm:$0xff] }
 0x3c8   : > { %19965 = vmatprep.subr.bf16.mxu0 %v19964_v36  ;;  %19981 = vmatprep.subr.bf16.mxu1 %v19980_v34  ;;  %v16013_v3 = vld [vmem:[%s25363_s5 + $0x438] sm:$0xff]  ;;  %v16006_v36 = vld [vmem:[%s25363_s5 + $0x400] sm:$0xff]  ;;  %v16058_v8 = vld [vmem:[%s25363_s5 + $0x590] sm:$0xff] }
 0x3c9   : > { %v16010_v34 = vld [vmem:[%s25363_s5 + $0x420] sm:$0xff]  ;;  %v20032_v56 = vpack.c.bf16 %v16013_v3, %v16009_v14  ;;  %v16053_v14 = vld [vmem:[%s25363_s5 + $0x568] sm:$0xff]  ;;  %v16051_v3 = vld [vmem:[%s25363_s5 + $0x558] sm:$0xff] }
 0x3ca   : > { %v20018_v2 = vpack.c.bf16 %v16010_v34, %v16006_v36  ;;  %v20066_v36 = vpack.c.bf16 %v16046_v1, %v16042_v7  ;;  %v16048_v34 = vld [vmem:[%s25363_s5 + $0x540] sm:$0xff]  ;;  %v16062_v35 = vld [vmem:[%s25363_s5 + $0x5b0] sm:$0xff] }
 0x3cb   : > { %19967 = vmatpush1.bf16.msra.mxu0 %v19966_v63  ;;  %19983 = vmatpush1.bf16.msra.mxu1 %v19982_v47  ;;  %v16017_v63 = vld [vmem:[%s25363_s5 + $0x458] sm:$0xff]  ;;  %v16066_v44 = vld [vmem:[%s25363_s5 + $0x5d0] sm:$0xff] }
 0x3cc   : > { %19985 = vmatprep.subr.bf16.mxu0 %v19984_v54  ;;  %20001 = vmatprep.subr.bf16.mxu1 %v20000_v43  ;;  %v16021_v47 = vld [vmem:[%s25363_s5 + $0x478] sm:$0xff]  ;;  %v16014_v54 = vld [vmem:[%s25363_s5 + $0x440] sm:$0xff]  ;;  %v16070_v57 = vld [vmem:[%s25363_s5 + $0x5f0] sm:$0xff] }
 0x3cd   : > { %v16018_v43 = vld [vmem:[%s25363_s5 + $0x460] sm:$0xff]  ;;  %v20036_v6 = vpack.c.bf16 %v16021_v47, %v16017_v63  ;;  %v16061_v63 = vld [vmem:[%s25363_s5 + $0x5a8] sm:$0xff]  ;;  %v16059_v47 = vld [vmem:[%s25363_s5 + $0x598] sm:$0xff] }
 0x3ce   : > { %15970 = vmatmul.mubr.msk.f32.vlgmr.msra.gmra.mrb[76].mxu0 %vm11665_vm1, %v12082_v26  ;;  %15971 = vmatmul.mubr.msk.f32.vlgmr.msra.gmra.mrb[76].mxu1 %vm11665_vm1, %v12082_v26  ;;  %v20022_v48 = vpack.c.bf16 %v16018_v43, %v16014_v54  ;;  %v16022_v26 = vld [vmem:[%s25363_s5 + $0x480] sm:$0xff]  ;;  %v20070_v54 = vpack.c.bf16 %v16054_v53, %v16050_v61  ;;  %v16076_v10 = vld [vmem:[%s25363_s5 + $0x610] sm:$0xff] }
 0x3cf   : > { %19987 = vmatpush1.bf16.msra.mxu0 %v19986_v52  ;;  %20003 = vmatpush1.bf16.msra.mxu1 %v20002_v16  ;;  %v16025_v52 = vld [vmem:[%s25363_s5 + $0x498] sm:$0xff]  ;;  %v16056_v43 = vld [vmem:[%s25363_s5 + $0x580] sm:$0xff]  ;;  %v16080_v22 = vld [vmem:[%s25363_s5 + $0x630] sm:$0xff] }
 0x3d0   : > { %19989 = vmatprep.subr.bf16.mxu0 %v19988_v24  ;;  %20005 = vmatprep.subr.bf16.mxu1 %v20004_v27  ;;  %v16029_v16 = vld [vmem:[%s25363_s5 + $0x4b8] sm:$0xff]  ;;  %v16026_v24 = vld [vmem:[%s25363_s5 + $0x4a0] sm:$0xff]  ;;  %v20024_v27 = vpack.c.bf16 %v16027_v50, %v16023_v4  ;;  %v16065_v4 = vld [vmem:[%s25363_s5 + $0x5c8] sm:$0xff] }
 0x3d1   : > { %12357 = vmatprep.mubr.f32.mxu0 %v21001_v38  ;;  %12428 = vmatprep.mubr.f32.mxu1 %v21001_v38  ;;  %v20040_v13 = vpack.c.bf16 %v16029_v16, %v16025_v52  ;;  %v16069_v50 = vld [vmem:[%s25363_s5 + $0x5e8] sm:$0xff]  ;;  %v16067_v52 = vld [vmem:[%s25363_s5 + $0x5d8] sm:$0xff]  ;;  %v16084_v1 = vld [vmem:[%s25363_s5 + $0x650] sm:$0xff] }
 0x3d2   : > { %v16071_v16 = vld [vmem:[%s25363_s5 + $0x5f8] sm:$0xff]  ;;  %v16092_v53 = vld [vmem:[%s25363_s5 + $0x690] sm:$0xff] }
 0x3d3   : > { %19991 = vmatpush1.bf16.msra.mxu0 %v19990_v5  ;;  %20007 = vmatpush1.bf16.msra.mxu1 %v20006_v20  ;;  %v16037_v5 = vld [vmem:[%s25363_s5 + $0x4f8] sm:$0xff]  ;;  %v20026_v20 = vpack.c.bf16 %v16026_v24, %v16022_v26  ;;  %v16064_v26 = vld [vmem:[%s25363_s5 + $0x5c0] sm:$0xff] }
 0x3d4   : > { %19993 = vmatprep.subr.bf16.mxu0 %v19992_v49  ;;  %20009 = vmatprep.subr.bf16.mxu1 %v20008_v30  ;;  %v16034_v49 = vld [vmem:[%s25363_s5 + $0x4e0] sm:$0xff]  ;;  %v20028_v30 = vpack.c.bf16 %v16035_v17, %v16031_v40  ;;  %v20044_v46 = vpack.c.bf16 %v16037_v5, %v16033_v41  ;;  %v16075_v40 = vld [vmem:[%s25363_s5 + $0x608] sm:$0xff]  ;;  %v16077_v41 = vld [vmem:[%s25363_s5 + $0x618] sm:$0xff] }
 0x3d5   : > { %v16068_v24 = vld [vmem:[%s25363_s5 + $0x5e0] sm:$0xff]  ;;  %v16079_v17 = vld [vmem:[%s25363_s5 + $0x628] sm:$0xff]  ;;  %v16081_v5 = vld [vmem:[%s25363_s5 + $0x638] sm:$0xff] }
 0x3d7   : > { %19995 = vmatpush1.bf16.msra.mxu0 %v19994_v45  ;;  %20011 = vmatpush1.bf16.msra.mxu1 %v20010_v39  ;;  %v16047_v45 = vld [vmem:[%s25363_s5 + $0x538] sm:$0xff]  ;;  %v20030_v39 = vpack.c.bf16 %v16034_v49, %v16030_v58  ;;  %v16074_v58 = vld [vmem:[%s25363_s5 + $0x600] sm:$0xff] }
 0x3d8   : > { %19997 = vmatprep.subr.bf16.mxu0 %v19996_v0  ;;  %20013 = vmatprep.subr.bf16.mxu1 %v20012_v29  ;;  %v16044_v0 = vld [vmem:[%s25363_s5 + $0x520] sm:$0xff]  ;;  %v20048_v29 = vpack.c.bf16 %v16045_v15, %v16041_v33  ;;  %v20064_v31 = vpack.c.bf16 %v16047_v45, %v16043_v59  ;;  %v16083_v33 = vld [vmem:[%s25363_s5 + $0x648] sm:$0xff]  ;;  %v16085_v59 = vld [vmem:[%s25363_s5 + $0x658] sm:$0xff] }
 0x3d9   : > { %v16078_v49 = vld [vmem:[%s25363_s5 + $0x620] sm:$0xff]  ;;  %v16087_v15 = vld [vmem:[%s25363_s5 + $0x668] sm:$0xff]  ;;  %v16089_v45 = vld [vmem:[%s25363_s5 + $0x678] sm:$0xff] }
 0x3da   : > { %v20100_v7 = vpack.c.bf16 %v16089_v45, %v16085_v59  ;;  %v16125_v59 = vld [vmem:[%s25363_s5 + $0x788] sm:$0xff] }
 0x3db   : > { %19999 = vmatpush1.bf16.msra.mxu0 %v19998_v23  ;;  %20015 = vmatpush1.bf16.msra.mxu1 %v20014_v9  ;;  %v16055_v23 = vld [vmem:[%s25363_s5 + $0x578] sm:$0xff]  ;;  %v20050_v9 = vpack.c.bf16 %v16044_v0, %v16040_v37  ;;  %v16082_v37 = vld [vmem:[%s25363_s5 + $0x640] sm:$0xff]  ;;  %v16129_v45 = vld [vmem:[%s25363_s5 + $0x7a8] sm:$0xff] }
 0x3dc   : > { %20017 = vmatprep.subr.bf16.mxu0 %v20016_v19  ;;  %20033 = vmatprep.subr.bf16.mxu1 %v20032_v56  ;;  %v16052_v19 = vld [vmem:[%s25363_s5 + $0x560] sm:$0xff]  ;;  %v20052_v56 = vpack.c.bf16 %v16053_v14, %v16049_v18  ;;  %v20068_v60 = vpack.c.bf16 %v16055_v23, %v16051_v3  ;;  %v16088_v18 = vld [vmem:[%s25363_s5 + $0x670] sm:$0xff]  ;;  %v16091_v14 = vld [vmem:[%s25363_s5 + $0x688] sm:$0xff] }
 0x3dd   : > { %v16086_v0 = vld [vmem:[%s25363_s5 + $0x660] sm:$0xff]  ;;  %v16095_v3 = vld [vmem:[%s25363_s5 + $0x6a8] sm:$0xff]  ;;  %v16093_v23 = vld [vmem:[%s25363_s5 + $0x698] sm:$0xff] }
 0x3de   : > { %16004 = vmatmul.mubr.msk.f32.vlgmr.msra.gmra.mrb[78].mxu0 %vm11665_vm1, %v12290_v42  ;;  %16005 = vmatmul.mubr.msk.f32.vlgmr.msra.gmra.mrb[78].mxu1 %vm11665_vm1, %v12290_v42  ;;  %v16060_v42 = vld [vmem:[%s25363_s5 + $0x5a0] sm:$0xff] }
 0x3df   : > { %20019 = vmatpush1.bf16.msra.mxu0 %v20018_v2  ;;  %20035 = vmatpush1.bf16.msra.mxu1 %v20034_v11  ;;  %v16063_v2 = vld [vmem:[%s25363_s5 + $0x5b8] sm:$0xff]  ;;  %v20054_v11 = vpack.c.bf16 %v16052_v19, %v16048_v34  ;;  %v20102_v34 = vpack.c.bf16 %v16088_v18, %v16084_v1  ;;  %v16090_v19 = vld [vmem:[%s25363_s5 + $0x680] sm:$0xff]  ;;  %v16126_v18 = vld [vmem:[%s25363_s5 + $0x790] sm:$0xff] }
 0x3e0   : > { %20021 = vmatprep.subr.bf16.mxu0 %v20020_v12  ;;  %20037 = vmatprep.subr.bf16.mxu1 %v20036_v6  ;;  %v20056_v12 = vpack.c.bf16 %v16061_v63, %v16057_v21  ;;  %v20072_v6 = vpack.c.bf16 %v16063_v2, %v16059_v47  ;;  %v16096_v21 = vld [vmem:[%s25363_s5 + $0x6b0] sm:$0xff]  ;;  %v16099_v63 = vld [vmem:[%s25363_s5 + $0x6c8] sm:$0xff]  ;;  %v16101_v2 = vld [vmem:[%s25363_s5 + $0x6d8] sm:$0xff] }
 0x3e1   : > { %12565 = vmatprep.mubr.f32.mxu0 %v21001_v38  ;;  %12636 = vmatprep.mubr.f32.mxu1 %v21001_v38  ;;  %v16103_v47 = vld [vmem:[%s25363_s5 + $0x6e8] sm:$0xff] }
 0x3e3   : > { %20023 = vmatpush1.bf16.msra.mxu0 %v20022_v48  ;;  %20039 = vmatpush1.bf16.msra.mxu1 %v20038_v51  ;;  %v20058_v48 = vpack.c.bf16 %v16060_v42, %v16056_v43  ;;  %v20074_v51 = vpack.c.bf16 %v16062_v35, %v16058_v8  ;;  %v20106_v43 = vpack.c.bf16 %v16096_v21, %v16092_v53  ;;  %v16098_v42 = vld [vmem:[%s25363_s5 + $0x6c0] sm:$0xff]  ;;  %v16100_v35 = vld [vmem:[%s25363_s5 + $0x6d0] sm:$0xff] }
 0x3e4   : > { %20025 = vmatprep.subr.bf16.mxu0 %v20024_v27  ;;  %20041 = vmatprep.subr.bf16.mxu1 %v20040_v13  ;;  %v20060_v27 = vpack.c.bf16 %v16069_v50, %v16065_v4  ;;  %v20076_v13 = vpack.c.bf16 %v16071_v16, %v16067_v52  ;;  %v16104_v4 = vld [vmem:[%s25363_s5 + $0x6f0] sm:$0xff]  ;;  %v16109_v50 = vld [vmem:[%s25363_s5 + $0x708] sm:$0xff]  ;;  %v16111_v16 = vld [vmem:[%s25363_s5 + $0x718] sm:$0xff] }
 0x3e5   : > { %v16113_v52 = vld [vmem:[%s25363_s5 + $0x728] sm:$0xff]  ;;  %v16134_v21 = vld [vmem:[%s25363_s5 + $0x7d0] sm:$0xff] }
 0x3e7   : > { %20027 = vmatpush1.bf16.msra.mxu0 %v20026_v20  ;;  %20043 = vmatpush1.bf16.msra.mxu1 %v20042_v25  ;;  %v20062_v20 = vpack.c.bf16 %v16068_v24, %v16064_v26  ;;  %v20078_v25 = vpack.c.bf16 %v16070_v57, %v16066_v44  ;;  %v20110_v26 = vpack.c.bf16 %v16104_v4, %v16100_v35  ;;  %v16108_v24 = vld [vmem:[%s25363_s5 + $0x700] sm:$0xff]  ;;  %v16110_v57 = vld [vmem:[%s25363_s5 + $0x710] sm:$0xff] }
 0x3e8   : > { %20029 = vmatprep.subr.bf16.mxu0 %v20028_v30  ;;  %20045 = vmatprep.subr.bf16.mxu1 %v20044_v46  ;;  %v20080_v30 = vpack.c.bf16 %v16079_v17, %v16075_v40  ;;  %v20096_v46 = vpack.c.bf16 %v16081_v5, %v16077_v41  ;;  %v16114_v40 = vld [vmem:[%s25363_s5 + $0x730] sm:$0xff]  ;;  %v16117_v17 = vld [vmem:[%s25363_s5 + $0x748] sm:$0xff]  ;;  %v16119_v5 = vld [vmem:[%s25363_s5 + $0x758] sm:$0xff] }
 0x3e9   : > { %v16121_v41 = vld [vmem:[%s25363_s5 + $0x768] sm:$0xff]  ;;  %v16144_v4 = vld [vmem:[%s25363_s5 + $0x810] sm:$0xff] }
 0x3eb   : > { %20031 = vmatpush1.bf16.msra.mxu0 %v20030_v39  ;;  %20047 = vmatpush1.bf16.msra.mxu1 %v20046_v62  ;;  %v20082_v39 = vpack.c.bf16 %v16078_v49, %v16074_v58  ;;  %v20098_v62 = vpack.c.bf16 %v16080_v22, %v16076_v10  ;;  %v20130_v58 = vpack.c.bf16 %v16114_v40, %v16110_v57  ;;  %v16116_v49 = vld [vmem:[%s25363_s5 + $0x740] sm:$0xff] }
 0x3ec   : > { %20049 = vmatprep.subr.bf16.mxu0 %v20048_v29  ;;  %20065 = vmatprep.subr.bf16.mxu1 %v20064_v31  ;;  %v12706_v29 = vrot.slane %v23543_v55, 1  ;;  %v20084_v31 = vpack.c.bf16 %v16087_v15, %v16083_v33  ;;  %v20116_v10 = vpack.c.bf16 %v16121_v41, %v16117_v17  ;;  %v16118_v33 = vld [vmem:[%s25363_s5 + $0x750] sm:$0xff] }
 0x3ed   : > { %v16122_v15 = vld [vmem:[%s25363_s5 + $0x770] sm:$0xff] }
 0x3ee   : > { %16038 = vmatmul.mubr.msk.f32.vlgmr.msra.gmra.mrb[80].mxu0 %vm11665_vm1, %v23543_v55  ;;  %16039 = vmatmul.mubr.msk.f32.vlgmr.msra.gmra.mrb[80].mxu1 %vm11665_vm1, %v23543_v55  ;;  %v16152_v17 = vld [vmem:[%s25363_s5 + $0x850] sm:$0xff] }
 0x3ef   : > { %20051 = vmatpush1.bf16.msra.mxu0 %v20050_v9  ;;  %20067 = vmatpush1.bf16.msra.mxu1 %v20066_v36  ;;  %v16097_v9 = vld [vmem:[%s25363_s5 + $0x6b8] sm:$0xff]  ;;  %v20086_v36 = vpack.c.bf16 %v16086_v0, %v16082_v37  ;;  %v20134_v0 = vpack.c.bf16 %v16122_v15, %v16118_v33  ;;  %v16156_v41 = vld [vmem:[%s25363_s5 + $0x870] sm:$0xff] }
 0x3f0   : > { %20053 = vmatprep.subr.bf16.mxu0 %v20052_v56  ;;  %20069 = vmatprep.subr.bf16.mxu1 %v20068_v60  ;;  %v16094_v56 = vld [vmem:[%s25363_s5 + $0x6a0] sm:$0xff]  ;;  %v20088_v60 = vpack.c.bf16 %v16095_v3, %v16091_v14  ;;  %v20104_v61 = vpack.c.bf16 %v16097_v9, %v16093_v23  ;;  %v16130_v14 = vld [vmem:[%s25363_s5 + $0x7b0] sm:$0xff]  ;;  %v16133_v3 = vld [vmem:[%s25363_s5 + $0x7c8] sm:$0xff] }
 0x3f1   : > { %12773 = vmatprep.mubr.f32.mxu0 %v21001_v38  ;;  %12844 = vmatprep.mubr.f32.mxu1 %v21001_v38  ;;  %v16137_v23 = vld [vmem:[%s25363_s5 + $0x7e8] sm:$0xff]  ;;  %v16135_v9 = vld [vmem:[%s25363_s5 + $0x7d8] sm:$0xff]  ;;  %v16160_v33 = vld [vmem:[%s25363_s5 + $0x890] sm:$0xff] }
 0x3f2   : > { %v16164_v15 = vld [vmem:[%s25363_s5 + $0x8b0] sm:$0xff] }
 0x3f3   : > { %20055 = vmatpush1.bf16.msra.mxu0 %v20054_v11  ;;  %20071 = vmatpush1.bf16.msra.mxu1 %v20070_v54  ;;  %v16105_v11 = vld [vmem:[%s25363_s5 + $0x6f8] sm:$0xff]  ;;  %v20090_v54 = vpack.c.bf16 %v16094_v56, %v16090_v19  ;;  %v20138_v19 = vpack.c.bf16 %v16130_v14, %v16126_v18  ;;  %v16132_v56 = vld [vmem:[%s25363_s5 + $0x7c0] sm:$0xff]  ;;  %v16168_v18 = vld [vmem:[%s25363_s5 + $0x8d0] sm:$0xff] }
 0x3f4   : > { %20057 = vmatprep.subr.bf16.mxu0 %v20056_v12  ;;  %20073 = vmatprep.subr.bf16.mxu1 %v20072_v6  ;;  %v16102_v12 = vld [vmem:[%s25363_s5 + $0x6e0] sm:$0xff]  ;;  %v20092_v6 = vpack.c.bf16 %v16103_v47, %v16099_v63  ;;  %v20108_v8 = vpack.c.bf16 %v16105_v11, %v16101_v2  ;;  %v16138_v63 = vld [vmem:[%s25363_s5 + $0x7f0] sm:$0xff]  ;;  %v16143_v47 = vld [vmem:[%s25363_s5 + $0x808] sm:$0xff] }
 0x3f5   : > { %v16147_v2 = vld [vmem:[%s25363_s5 + $0x828] sm:$0xff]  ;;  %v16145_v11 = vld [vmem:[%s25363_s5 + $0x818] sm:$0xff]  ;;  %v16172_v14 = vld [vmem:[%s25363_s5 + $0x8f0] sm:$0xff] }
 0x3f7   : > { %20059 = vmatpush1.bf16.msra.mxu0 %v20058_v48  ;;  %20075 = vmatpush1.bf16.msra.mxu1 %v20074_v51  ;;  %v16115_v48 = vld [vmem:[%s25363_s5 + $0x738] sm:$0xff]  ;;  %v20094_v51 = vpack.c.bf16 %v16102_v12, %v16098_v42  ;;  %v20142_v42 = vpack.c.bf16 %v16138_v63, %v16134_v21  ;;  %v16142_v12 = vld [vmem:[%s25363_s5 + $0x800] sm:$0xff]  ;;  %v16178_v21 = vld [vmem:[%s25363_s5 + $0x910] sm:$0xff] }
 0x3f8   : > { %20061 = vmatprep.subr.bf16.mxu0 %v20060_v27  ;;  %20077 = vmatprep.subr.bf16.mxu1 %v20076_v13  ;;  %v16112_v27 = vld [vmem:[%s25363_s5 + $0x720] sm:$0xff]  ;;  %v20112_v13 = vpack.c.bf16 %v16113_v52, %v16109_v50  ;;  %v20128_v44 = vpack.c.bf16 %v16115_v48, %v16111_v16  ;;  %v16148_v50 = vld [vmem:[%s25363_s5 + $0x830] sm:$0xff]  ;;  %v16151_v52 = vld [vmem:[%s25363_s5 + $0x848] sm:$0xff] }
 0x3f9   : > { %v16155_v16 = vld [vmem:[%s25363_s5 + $0x868] sm:$0xff]  ;;  %v16153_v48 = vld [vmem:[%s25363_s5 + $0x858] sm:$0xff]  ;;  %v16182_v63 = vld [vmem:[%s25363_s5 + $0x930] sm:$0xff] }
 0x3fa   : > { %v20148_v57 = vpack.c.bf16 %v16155_v16, %v16151_v52  ;;  %v16193_v52 = vld [vmem:[%s25363_s5 + $0x988] sm:$0xff] }
 0x3fb   : > { %20063 = vmatpush1.bf16.msra.mxu0 %v20062_v20  ;;  %20079 = vmatpush1.bf16.msra.mxu1 %v20078_v25  ;;  %v16123_v20 = vld [vmem:[%s25363_s5 + $0x778] sm:$0xff]  ;;  %v20114_v25 = vpack.c.bf16 %v16112_v27, %v16108_v24  ;;  %v20162_v24 = vpack.c.bf16 %v16148_v50, %v16144_v4  ;;  %v16150_v27 = vld [vmem:[%s25363_s5 + $0x840] sm:$0xff]  ;;  %v16186_v4 = vld [vmem:[%s25363_s5 + $0x950] sm:$0xff] }
 0x3fc   : > { %20081 = vmatprep.subr.bf16.mxu0 %v20080_v30  ;;  %20097 = vmatprep.subr.bf16.mxu1 %v20096_v46  ;;  %v16120_v30 = vld [vmem:[%s25363_s5 + $0x760] sm:$0xff]  ;;  %v12914_v46 = vrot.slane %v23543_v55, 2  ;;  %v20132_v22 = vpack.c.bf16 %v16123_v20, %v16119_v5  ;;  %v16159_v5 = vld [vmem:[%s25363_s5 + $0x888] sm:$0xff]  ;;  %v16161_v20 = vld [vmem:[%s25363_s5 + $0x898] sm:$0xff] }
 0x3fd   : > { %v20118_v37 = vpack.c.bf16 %v16120_v30, %v16116_v49  ;;  %v20166_v49 = vpack.c.bf16 %v16156_v41, %v16152_v17  ;;  %v16158_v30 = vld [vmem:[%s25363_s5 + $0x880] sm:$0xff]  ;;  %v16190_v50 = vld [vmem:[%s25363_s5 + $0x970] sm:$0xff]  ;;  %v16197_v16 = vld [vmem:[%s25363_s5 + $0x9a8] sm:$0xff] }
 0x3fe   : > { %16072 = vmatmul.mubr.msk.f32.vlgmr.msra.gmra.mrb[82].mxu0 %vm11665_vm1, %v12706_v29  ;;  %16073 = vmatmul.mubr.msk.f32.vlgmr.msra.gmra.mrb[82].mxu1 %vm11665_vm1, %v12706_v29  ;;  %v16124_v29 = vld [vmem:[%s25363_s5 + $0x780] sm:$0xff]  ;;  %v16198_v17 = vld [vmem:[%s25363_s5 + $0x9b0] sm:$0xff]  ;;  %v16201_v41 = vld [vmem:[%s25363_s5 + $0x9c8] sm:$0xff] }
 0x3ff   : > { %20083 = vmatpush1.bf16.msra.mxu0 %v20082_v39  ;;  %20099 = vmatpush1.bf16.msra.mxu1 %v20098_v62  ;;  %v16127_v39 = vld [vmem:[%s25363_s5 + $0x798] sm:$0xff] }
 0x400   : > { %20085 = vmatprep.subr.bf16.mxu0 %v20084_v31  ;;  %20101 = vmatprep.subr.bf16.mxu1 %v20100_v7  ;;  %v16131_v62 = vld [vmem:[%s25363_s5 + $0x7b8] sm:$0xff]  ;;  %v16128_v31 = vld [vmem:[%s25363_s5 + $0x7a0] sm:$0xff]  ;;  %v20120_v7 = vpack.c.bf16 %v16129_v45, %v16125_v59  ;;  %v16167_v59 = vld [vmem:[%s25363_s5 + $0x8c8] sm:$0xff] }
 0x401   : > { %12981 = vmatprep.mubr.f32.mxu0 %v21001_v38  ;;  %13052 = vmatprep.mubr.f32.mxu1 %v21001_v38  ;;  %v20136_v1 = vpack.c.bf16 %v16131_v62, %v16127_v39  ;;  %v16171_v45 = vld [vmem:[%s25363_s5 + $0x8e8] sm:$0xff]  ;;  %v16169_v39 = vld [vmem:[%s25363_s5 + $0x8d8] sm:$0xff] }
 0x402   : > { %v16173_v62 = vld [vmem:[%s25363_s5 + $0x8f8] sm:$0xff] }
 0x403   : > { %20087 = vmatpush1.bf16.msra.mxu0 %v20086_v36  ;;  %20103 = vmatpush1.bf16.msra.mxu1 %v20102_v34  ;;  %v16139_v36 = vld [vmem:[%s25363_s5 + $0x7f8] sm:$0xff]  ;;  %v20122_v34 = vpack.c.bf16 %v16128_v31, %v16124_v29  ;;  %v16166_v29 = vld [vmem:[%s25363_s5 + $0x8c0] sm:$0xff] }
 0x404   : > { %20089 = vmatprep.subr.bf16.mxu0 %v20088_v60  ;;  %20105 = vmatprep.subr.bf16.mxu1 %v20104_v61  ;;  %v16136_v60 = vld [vmem:[%s25363_s5 + $0x7e0] sm:$0xff]  ;;  %v20124_v61 = vpack.c.bf16 %v16137_v23, %v16133_v3  ;;  %v20140_v53 = vpack.c.bf16 %v16139_v36, %v16135_v9  ;;  %v16177_v3 = vld [vmem:[%s25363_s5 + $0x908] sm:$0xff]  ;;  %v16179_v9 = vld [vmem:[%s25363_s5 + $0x918] sm:$0xff] }
 0x405   : > { %v16170_v31 = vld [vmem:[%s25363_s5 + $0x8e0] sm:$0xff]  ;;  %v16181_v23 = vld [vmem:[%s25363_s5 + $0x928] sm:$0xff]  ;;  %v16183_v36 = vld [vmem:[%s25363_s5 + $0x938] sm:$0xff] }
 0x407   : > { %20091 = vmatpush1.bf16.msra.mxu0 %v20090_v54  ;;  %20107 = vmatpush1.bf16.msra.mxu1 %v20106_v43  ;;  %v16149_v54 = vld [vmem:[%s25363_s5 + $0x838] sm:$0xff]  ;;  %v20126_v43 = vpack.c.bf16 %v16136_v60, %v16132_v56  ;;  %v16176_v56 = vld [vmem:[%s25363_s5 + $0x900] sm:$0xff] }
 0x408   : > { %20093 = vmatprep.subr.bf16.mxu0 %v20092_v6  ;;  %20109 = vmatprep.subr.bf16.mxu1 %v20108_v8  ;;  %v16146_v6 = vld [vmem:[%s25363_s5 + $0x820] sm:$0xff]  ;;  %v20144_v8 = vpack.c.bf16 %v16147_v2, %v16143_v47  ;;  %v20160_v35 = vpack.c.bf16 %v16149_v54, %v16145_v11  ;;  %v16185_v47 = vld [vmem:[%s25363_s5 + $0x948] sm:$0xff]  ;;  %v16187_v11 = vld [vmem:[%s25363_s5 + $0x958] sm:$0xff] }
 0x409   : > { %v16180_v60 = vld [vmem:[%s25363_s5 + $0x920] sm:$0xff]  ;;  %v16189_v2 = vld [vmem:[%s25363_s5 + $0x968] sm:$0xff]  ;;  %v16191_v54 = vld [vmem:[%s25363_s5 + $0x978] sm:$0xff] }
 0x40b   : > { %20095 = vmatpush1.bf16.msra.mxu0 %v20094_v51  ;;  %20111 = vmatpush1.bf16.msra.mxu1 %v20110_v26  ;;  %v16157_v51 = vld [vmem:[%s25363_s5 + $0x878] sm:$0xff]  ;;  %v20146_v26 = vpack.c.bf16 %v16146_v6, %v16142_v12  ;;  %v16184_v12 = vld [vmem:[%s25363_s5 + $0x940] sm:$0xff] }
 0x40c   : > { %20113 = vmatprep.subr.bf16.mxu0 %v20112_v13  ;;  %20129 = vmatprep.subr.bf16.mxu1 %v20128_v44  ;;  %v16154_v13 = vld [vmem:[%s25363_s5 + $0x860] sm:$0xff]  ;;  %v13122_v44 = vrot.slane %v23543_v55, 3  ;;  %v20164_v40 = vpack.c.bf16 %v16157_v51, %v16153_v48  ;;  %v16163_v55 = vld [vmem:[%s25363_s5 + $0x8a8] sm:$0xff]  ;;  %v16195_v48 = vld [vmem:[%s25363_s5 + $0x998] sm:$0xff] }
 0x40d   : > { %v16188_v6 = vld [vmem:[%s25363_s5 + $0x960] sm:$0xff]  ;;  %v16199_v51 = vld [vmem:[%s25363_s5 + $0x9b8] sm:$0xff] }
 0x40e   : > { %16106 = vmatmul.mubr.msk.f32.vlgmr.msra.gmra.mrb[84].mxu0 %vm11665_vm1, %v12914_v46  ;;  %16107 = vmatmul.mubr.msk.f32.vlgmr.msra.gmra.mrb[84].mxu1 %vm11665_vm1, %v12914_v46  ;;  %v16162_v46 = vld [vmem:[%s25363_s5 + $0x8a0] sm:$0xff] }
 0x40f   : > { %20115 = vmatpush1.bf16.msra.mxu0 %v20114_v25  ;;  %20131 = vmatpush1.bf16.msra.mxu1 %v20130_v58  ;;  %v16165_v25 = vld [vmem:[%s25363_s5 + $0x8b8] sm:$0xff]  ;;  %v20150_v58 = vpack.c.bf16 %v16154_v13, %v16150_v27  ;;  %v16192_v27 = vld [vmem:[%s25363_s5 + $0x980] sm:$0xff] }
 0x410   : > { %20117 = vmatprep.subr.bf16.mxu0 %v20116_v10  ;;  %20133 = vmatprep.subr.bf16.mxu1 %v20132_v22  ;;  %v20152_v10 = vpack.c.bf16 %v16163_v55, %v16159_v5  ;;  %v20168_v22 = vpack.c.bf16 %v16165_v25, %v16161_v20  ;;  %v16196_v13 = vld [vmem:[%s25363_s5 + $0x9a0] sm:$0xff]  ;;  %v16205_v5 = vld [vmem:[%s25363_s5 + $0x9e8] sm:$0xff]  ;;  %v16203_v55 = vld [vmem:[%s25363_s5 + $0x9d8] sm:$0xff] }
 0x411   : > { %13189 = vmatprep.mubr.f32.mxu0 %v21001_v38  ;;  %13260 = vmatprep.mubr.f32.mxu1 %v21001_v38  ;;  %v16207_v20 = vld [vmem:[%s25363_s5 + $0x9f8] sm:$0xff]  ;;  %v20186_v25 = vpack.c.bf16 %v16196_v13, %v16192_v27  ;;  %v16234_v27 = vld [vmem:[%s25363_s5 + $0xac0] sm:$0xff] }
 0x412   : > { %v16238_v13 = vld [vmem:[%s25363_s5 + $0xae0] sm:$0xff] }
 0x413   : > { %20119 = vmatpush1.bf16.msra.mxu0 %v20118_v37  ;;  %20135 = vmatpush1.bf16.msra.mxu1 %v20134_v0  ;;  %v20154_v37 = vpack.c.bf16 %v16162_v46, %v16158_v30  ;;  %v20170_v0 = vpack.c.bf16 %v16164_v15, %v16160_v33  ;;  %v16204_v30 = vld [vmem:[%s25363_s5 + $0x9e0] sm:$0xff]  ;;  %v20188_v46 = vpack.c.bf16 %v16205_v5, %v16201_v41  ;;  %v16206_v33 = vld [vmem:[%s25363_s5 + $0x9f0] sm:$0xff]  ;;  %v16211_v15 = vld [vmem:[%s25363_s5 + $0xa08] sm:$0xff] }
 0x414   : > { %20121 = vmatprep.subr.bf16.mxu0 %v20120_v7  ;;  %20137 = vmatprep.subr.bf16.mxu1 %v20136_v1  ;;  %v20156_v7 = vpack.c.bf16 %v16171_v45, %v16167_v59  ;;  %v20172_v1 = vpack.c.bf16 %v16173_v62, %v16169_v39  ;;  %v16215_v59 = vld [vmem:[%s25363_s5 + $0xa28] sm:$0xff]  ;;  %v16213_v45 = vld [vmem:[%s25363_s5 + $0xa18] sm:$0xff] }
 0x415   : > { %v16217_v39 = vld [vmem:[%s25363_s5 + $0xa38] sm:$0xff]  ;;  %v16245_v41 = vld [vmem:[%s25363_s5 + $0xb08] sm:$0xff] }
 0x416   : > { %v16249_v5 = vld [vmem:[%s25363_s5 + $0xb28] sm:$0xff] }
 0x417   : > { %20123 = vmatpush1.bf16.msra.mxu0 %v20122_v34  ;;  %20139 = vmatpush1.bf16.msra.mxu1 %v20138_v19  ;;  %v20158_v34 = vpack.c.bf16 %v16170_v31, %v16166_v29  ;;  %v20174_v19 = vpack.c.bf16 %v16172_v14, %v16168_v18  ;;  %v16214_v29 = vld [vmem:[%s25363_s5 + $0xa20] sm:$0xff]  ;;  %v20208_v31 = vpack.c.bf16 %v16215_v59, %v16211_v15  ;;  %v16216_v18 = vld [vmem:[%s25363_s5 + $0xa30] sm:$0xff]  ;;  %v16219_v14 = vld [vmem:[%s25363_s5 + $0xa48] sm:$0xff] }
 0x418   : > { %20125 = vmatprep.subr.bf16.mxu0 %v20124_v61  ;;  %20141 = vmatprep.subr.bf16.mxu1 %v20140_v53  ;;  %v20176_v61 = vpack.c.bf16 %v16181_v23, %v16177_v3  ;;  %v20192_v53 = vpack.c.bf16 %v16183_v36, %v16179_v9  ;;  %v16223_v3 = vld [vmem:[%s25363_s5 + $0xa68] sm:$0xff]  ;;  %v16221_v23 = vld [vmem:[%s25363_s5 + $0xa58] sm:$0xff] }
 0x419   : > { %v16225_v9 = vld [vmem:[%s25363_s5 + $0xa78] sm:$0xff]  ;;  %v16253_v15 = vld [vmem:[%s25363_s5 + $0xb48] sm:$0xff] }
 0x41a   : > { %v16257_v59 = vld [vmem:[%s25363_s5 + $0xb68] sm:$0xff] }
 0x41b   : > { %20127 = vmatpush1.bf16.msra.mxu0 %v20126_v43  ;;  %20143 = vmatpush1.bf16.msra.mxu1 %v20142_v42  ;;  %v20178_v43 = vpack.c.bf16 %v16180_v60, %v16176_v56  ;;  %v20194_v42 = vpack.c.bf16 %v16182_v63, %v16178_v21  ;;  %v16222_v56 = vld [vmem:[%s25363_s5 + $0xa60] sm:$0xff]  ;;  %v13538_v60 = vrot.slane %v23587_v32, 1  ;;  %v16220_v21 = vld [vmem:[%s25363_s5 + $0xa50] sm:$0xff] }
 0x41c   : > { %20145 = vmatprep.subr.bf16.mxu0 %v20144_v8  ;;  %20161 = vmatprep.subr.bf16.mxu1 %v20160_v35  ;;  %v20180_v8 = vpack.c.bf16 %v16189_v2, %v16185_v47  ;;  %v20196_v35 = vpack.c.bf16 %v16191_v54, %v16187_v11  ;;  %v16224_v63 = vld [vmem:[%s25363_s5 + $0xa70] sm:$0xff]  ;;  %v16227_v47 = vld [vmem:[%s25363_s5 + $0xa88] sm:$0xff]  ;;  %v16229_v11 = vld [vmem:[%s25363_s5 + $0xa98] sm:$0xff] }
 0x41d   : > { %v16231_v2 = vld [vmem:[%s25363_s5 + $0xaa8] sm:$0xff]  ;;  %v16233_v54 = vld [vmem:[%s25363_s5 + $0xab8] sm:$0xff] }
 0x41e   : > { %16140 = vmatmul.mubr.msk.f32.vlgmr.msra.gmra.mrb[86].mxu0 %vm11665_vm1, %v13122_v44  ;;  %16141 = vmatmul.mubr.msk.f32.vlgmr.msra.gmra.mrb[86].mxu1 %vm11665_vm1, %v13122_v44  ;;  %v20184_v44 = vpack.c.bf16 %v16197_v16, %v16193_v52  ;;  %v16235_v52 = vld [vmem:[%s25363_s5 + $0xac8] sm:$0xff] }
 0x41f   : > { %20147 = vmatpush1.bf16.msra.mxu0 %v20146_v26  ;;  %20163 = vmatpush1.bf16.msra.mxu1 %v20162_v24  ;;  %v20182_v26 = vpack.c.bf16 %v16188_v6, %v16184_v12  ;;  %v20198_v24 = vpack.c.bf16 %v16190_v50, %v16186_v4  ;;  %v16226_v12 = vld [vmem:[%s25363_s5 + $0xa80] sm:$0xff]  ;;  %v16228_v4 = vld [vmem:[%s25363_s5 + $0xa90] sm:$0xff]  ;;  %v16239_v16 = vld [vmem:[%s25363_s5 + $0xae8] sm:$0xff] }
 0x420   : > { %20149 = vmatprep.subr.bf16.mxu0 %v20148_v57  ;;  %20165 = vmatprep.subr.bf16.mxu1 %v20164_v40  ;;  %v20200_v57 = vpack.c.bf16 %v16199_v51, %v16195_v48  ;;  %v16194_v40 = vld [vmem:[%s25363_s5 + $0x990] sm:$0xff]  ;;  %v16230_v6 = vld [vmem:[%s25363_s5 + $0xaa0] sm:$0xff]  ;;  %v16237_v48 = vld [vmem:[%s25363_s5 + $0xad8] sm:$0xff] }
 0x421   : > { %13397 = vmatprep.mubr.f32.mxu0 %v21001_v38  ;;  %13468 = vmatprep.mubr.f32.mxu1 %v21001_v38  ;;  %v16232_v50 = vld [vmem:[%s25363_s5 + $0xab0] sm:$0xff]  ;;  %v16241_v51 = vld [vmem:[%s25363_s5 + $0xaf8] sm:$0xff] }
 0x423   : > { %20151 = vmatpush1.bf16.msra.mxu0 %v20150_v58  ;;  %20167 = vmatpush1.bf16.msra.mxu1 %v20166_v49  ;;  %v20202_v58 = vpack.c.bf16 %v16198_v17, %v16194_v40  ;;  %v16200_v49 = vld [vmem:[%s25363_s5 + $0x9c0] sm:$0xff]  ;;  %v16236_v40 = vld [vmem:[%s25363_s5 + $0xad0] sm:$0xff] }
 0x424   : > { %20153 = vmatprep.subr.bf16.mxu0 %v20152_v10  ;;  %20169 = vmatprep.subr.bf16.mxu1 %v20168_v22  ;;  %v20204_v10 = vpack.c.bf16 %v16207_v20, %v16203_v55  ;;  %v16202_v22 = vld [vmem:[%s25363_s5 + $0x9d0] sm:$0xff]  ;;  %v20190_v62 = vpack.c.bf16 %v16204_v30, %v16200_v49  ;;  %v16247_v55 = vld [vmem:[%s25363_s5 + $0xb18] sm:$0xff]  ;;  %v16244_v49 = vld [vmem:[%s25363_s5 + $0xb00] sm:$0xff] }
 0x425   : > { %v16240_v17 = vld [vmem:[%s25363_s5 + $0xaf0] sm:$0xff]  ;;  %v16251_v20 = vld [vmem:[%s25363_s5 + $0xb38] sm:$0xff]  ;;  %v16248_v30 = vld [vmem:[%s25363_s5 + $0xb20] sm:$0xff] }
 0x427   : > { %20155 = vmatpush1.bf16.msra.mxu0 %v20154_v37  ;;  %20171 = vmatpush1.bf16.msra.mxu1 %v20170_v0  ;;  %v20206_v37 = vpack.c.bf16 %v16206_v33, %v16202_v22  ;;  %v16210_v0 = vld [vmem:[%s25363_s5 + $0xa00] sm:$0xff]  ;;  %v16246_v22 = vld [vmem:[%s25363_s5 + $0xb10] sm:$0xff] }
 0x428   : > { %20157 = vmatprep.subr.bf16.mxu0 %v20156_v7  ;;  %20173 = vmatprep.subr.bf16.mxu1 %v20172_v1  ;;  %v20224_v7 = vpack.c.bf16 %v16217_v39, %v16213_v45  ;;  %v16212_v1 = vld [vmem:[%s25363_s5 + $0xa10] sm:$0xff]  ;;  %v20210_v36 = vpack.c.bf16 %v16214_v29, %v16210_v0  ;;  %v16255_v45 = vld [vmem:[%s25363_s5 + $0xb58] sm:$0xff]  ;;  %v16252_v0 = vld [vmem:[%s25363_s5 + $0xb40] sm:$0xff] }
 0x429   : > { %v16250_v33 = vld [vmem:[%s25363_s5 + $0xb30] sm:$0xff]  ;;  %v16259_v39 = vld [vmem:[%s25363_s5 + $0xb78] sm:$0xff]  ;;  %v16256_v29 = vld [vmem:[%s25363_s5 + $0xb60] sm:$0xff] }
 0x42b   : > { %20159 = vmatpush1.bf16.msra.mxu0 %v20158_v34  ;;  %20175 = vmatpush1.bf16.msra.mxu1 %v20174_v19  ;;  %v20226_v34 = vpack.c.bf16 %v16216_v18, %v16212_v1  ;;  %v16218_v19 = vld [vmem:[%s25363_s5 + $0xa40] sm:$0xff]  ;;  %v20260_v1 = vpack.c.bf16 %v16259_v39, %v16255_v45  ;;  %v16254_v18 = vld [vmem:[%s25363_s5 + $0xb50] sm:$0xff]  ;;  %v16297_v45 = vld [vmem:[%s25363_s5 + $0xc98] sm:$0xff] }
 0x42c   : > { %20177 = vmatprep.subr.bf16.mxu0 %v20176_v61  ;;  %20193 = vmatprep.subr.bf16.mxu1 %v20192_v53  ;;  %v20212_v61 = vpack.c.bf16 %v16223_v3, %v16219_v14  ;;  %v20228_v53 = vpack.c.bf16 %v16225_v9, %v16221_v23  ;;  %v16258_v14 = vld [vmem:[%s25363_s5 + $0xb70] sm:$0xff]  ;;  %v16261_v3 = vld [vmem:[%s25363_s5 + $0xb88] sm:$0xff]  ;;  %v16263_v9 = vld [vmem:[%s25363_s5 + $0xb98] sm:$0xff] }
 0x42d   : > { %v16265_v23 = vld [vmem:[%s25363_s5 + $0xba8] sm:$0xff]  ;;  %v16301_v39 = vld [vmem:[%s25363_s5 + $0xcb8] sm:$0xff] }
 0x42e   : > { %16174 = vmatmul.mubr.msk.f32.vlgmr.msra.gmra.mrb[88].mxu0 %vm11665_vm1, %v23587_v32  ;;  %16175 = vmatmul.mubr.msk.f32.vlgmr.msra.gmra.mrb[88].mxu1 %vm11665_vm1, %v23587_v32 }
 0x42f   : > { %20179 = vmatpush1.bf16.msra.mxu0 %v20178_v43  ;;  %20195 = vmatpush1.bf16.msra.mxu1 %v20194_v42  ;;  %v20214_v43 = vpack.c.bf16 %v16222_v56, %v16218_v19  ;;  %v20230_v42 = vpack.c.bf16 %v16224_v63, %v16220_v21  ;;  %v20262_v19 = vpack.c.bf16 %v16258_v14, %v16254_v18  ;;  %v16260_v56 = vld [vmem:[%s25363_s5 + $0xb80] sm:$0xff]  ;;  %v16262_v21 = vld [vmem:[%s25363_s5 + $0xb90] sm:$0xff]  ;;  %v16303_v14 = vld [vmem:[%s25363_s5 + $0xcc8] sm:$0xff] }
 0x430   : > { %20181 = vmatprep.subr.bf16.mxu0 %v20180_v8  ;;  %20197 = vmatprep.subr.bf16.mxu1 %v20196_v35  ;;  %v20216_v8 = vpack.c.bf16 %v16231_v2, %v16227_v47  ;;  %v20232_v35 = vpack.c.bf16 %v16233_v54, %v16229_v11  ;;  %v16266_v63 = vld [vmem:[%s25363_s5 + $0xbb0] sm:$0xff]  ;;  %v16269_v47 = vld [vmem:[%s25363_s5 + $0xbc8] sm:$0xff]  ;;  %v16271_v11 = vld [vmem:[%s25363_s5 + $0xbd8] sm:$0xff] }
 0x431   : > { %13605 = vmatprep.mubr.f32.mxu0 %v21001_v38  ;;  %13676 = vmatprep.mubr.f32.mxu1 %v21001_v38  ;;  %v16273_v2 = vld [vmem:[%s25363_s5 + $0xbe8] sm:$0xff]  ;;  %v16275_v54 = vld [vmem:[%s25363_s5 + $0xbf8] sm:$0xff]  ;;  %v16300_v18 = vld [vmem:[%s25363_s5 + $0xcb0] sm:$0xff] }
 0x433   : > { %20183 = vmatpush1.bf16.msra.mxu0 %v20182_v26  ;;  %20199 = vmatpush1.bf16.msra.mxu1 %v20198_v24  ;;  %v20218_v26 = vpack.c.bf16 %v16230_v6, %v16226_v12  ;;  %v20234_v24 = vpack.c.bf16 %v16232_v50, %v16228_v4  ;;  %v16268_v12 = vld [vmem:[%s25363_s5 + $0xbc0] sm:$0xff]  ;;  %v16270_v4 = vld [vmem:[%s25363_s5 + $0xbd0] sm:$0xff] }
 0x434   : > { %20185 = vmatprep.subr.bf16.mxu0 %v20184_v44  ;;  %20201 = vmatprep.subr.bf16.mxu1 %v20200_v57  ;;  %v20220_v44 = vpack.c.bf16 %v16239_v16, %v16235_v52  ;;  %v20236_v57 = vpack.c.bf16 %v16241_v51, %v16237_v48  ;;  %v16272_v6 = vld [vmem:[%s25363_s5 + $0xbe0] sm:$0xff]  ;;  %v16274_v50 = vld [vmem:[%s25363_s5 + $0xbf0] sm:$0xff]  ;;  %v16279_v52 = vld [vmem:[%s25363_s5 + $0xc08] sm:$0xff] }
 0x435   : > { %v16283_v16 = vld [vmem:[%s25363_s5 + $0xc28] sm:$0xff]  ;;  %v16281_v48 = vld [vmem:[%s25363_s5 + $0xc18] sm:$0xff] }
 0x436   : > { %v16285_v51 = vld [vmem:[%s25363_s5 + $0xc38] sm:$0xff] }
 0x437   : > { %20187 = vmatpush1.bf16.msra.mxu0 %v20186_v25  ;;  %20203 = vmatpush1.bf16.msra.mxu1 %v20202_v58  ;;  %v20222_v25 = vpack.c.bf16 %v16238_v13, %v16234_v27  ;;  %v20238_v58 = vpack.c.bf16 %v16240_v17, %v16236_v40  ;;  %v16278_v27 = vld [vmem:[%s25363_s5 + $0xc00] sm:$0xff]  ;;  %v16280_v40 = vld [vmem:[%s25363_s5 + $0xc10] sm:$0xff] }
 0x438   : > { %20189 = vmatprep.subr.bf16.mxu0 %v20188_v46  ;;  %20205 = vmatprep.subr.bf16.mxu1 %v20204_v10  ;;  %v20240_v46 = vpack.c.bf16 %v16249_v5, %v16245_v41  ;;  %v20256_v10 = vpack.c.bf16 %v16251_v20, %v16247_v55  ;;  %v16282_v13 = vld [vmem:[%s25363_s5 + $0xc20] sm:$0xff]  ;;  %v16284_v17 = vld [vmem:[%s25363_s5 + $0xc30] sm:$0xff]  ;;  %v16287_v41 = vld [vmem:[%s25363_s5 + $0xc48] sm:$0xff] }
 0x439   : > { %v16291_v5 = vld [vmem:[%s25363_s5 + $0xc68] sm:$0xff]  ;;  %v16289_v55 = vld [vmem:[%s25363_s5 + $0xc58] sm:$0xff] }
 0x43a   : > { %v16293_v20 = vld [vmem:[%s25363_s5 + $0xc78] sm:$0xff] }
 0x43b   : > { %20191 = vmatpush1.bf16.msra.mxu0 %v20190_v62  ;;  %20207 = vmatpush1.bf16.msra.mxu1 %v20206_v37  ;;  %v20242_v62 = vpack.c.bf16 %v16248_v30, %v16244_v49  ;;  %v20258_v37 = vpack.c.bf16 %v16250_v33, %v16246_v22  ;;  %v16286_v49 = vld [vmem:[%s25363_s5 + $0xc40] sm:$0xff]  ;;  %v20292_v22 = vpack.c.bf16 %v16293_v20, %v16289_v55  ;;  %v16288_v33 = vld [vmem:[%s25363_s5 + $0xc50] sm:$0xff]  ;;  %v16335_v55 = vld [vmem:[%s25363_s5 + $0xdb8] sm:$0xff] }
 0x43c   : > { %20209 = vmatprep.subr.bf16.mxu0 %v20208_v31  ;;  %20225 = vmatprep.subr.bf16.mxu1 %v20224_v7  ;;  %v13746_v31 = vrot.slane %v23587_v32, 2  ;;  %v20244_v7 = vpack.c.bf16 %v16257_v59, %v16253_v15  ;;  %v16290_v30 = vld [vmem:[%s25363_s5 + $0xc60] sm:$0xff]  ;;  %v16292_v15 = vld [vmem:[%s25363_s5 + $0xc70] sm:$0xff]  ;;  %v16295_v59 = vld [vmem:[%s25363_s5 + $0xc88] sm:$0xff] }
 0x43e   : > { %16208 = vmatmul.mubr.msk.f32.vlgmr.msra.gmra.mrb[90].mxu0 %vm11665_vm1, %v13538_v60  ;;  %16209 = vmatmul.mubr.msk.f32.vlgmr.msra.gmra.mrb[90].mxu1 %vm11665_vm1, %v13538_v60  ;;  %v16264_v60 = vld [vmem:[%s25363_s5 + $0xba0] sm:$0xff] }
 0x43f   : > { %20211 = vmatpush1.bf16.msra.mxu0 %v20210_v36  ;;  %20227 = vmatpush1.bf16.msra.mxu1 %v20226_v34  ;;  %v16267_v36 = vld [vmem:[%s25363_s5 + $0xbb8] sm:$0xff]  ;;  %v20246_v34 = vpack.c.bf16 %v16256_v29, %v16252_v0  ;;  %v16294_v0 = vld [vmem:[%s25363_s5 + $0xc80] sm:$0xff] }
 0x440   : > { %20213 = vmatprep.subr.bf16.mxu0 %v20212_v61  ;;  %20229 = vmatprep.subr.bf16.mxu1 %v20228_v53  ;;  %v20248_v61 = vpack.c.bf16 %v16265_v23, %v16261_v3  ;;  %v20264_v53 = vpack.c.bf16 %v16267_v36, %v16263_v9  ;;  %v16298_v29 = vld [vmem:[%s25363_s5 + $0xca0] sm:$0xff]  ;;  %v16307_v3 = vld [vmem:[%s25363_s5 + $0xce8] sm:$0xff]  ;;  %v16305_v23 = vld [vmem:[%s25363_s5 + $0xcd8] sm:$0xff] }
 0x441   : > { %13813 = vmatprep.mubr.f32.mxu0 %v21001_v38  ;;  %13884 = vmatprep.mubr.f32.mxu1 %v21001_v38  ;;  %v16309_v9 = vld [vmem:[%s25363_s5 + $0xcf8] sm:$0xff]  ;;  %v20282_v36 = vpack.c.bf16 %v16298_v29, %v16294_v0 }
 0x443   : > { %20215 = vmatpush1.bf16.msra.mxu0 %v20214_v43  ;;  %20231 = vmatpush1.bf16.msra.mxu1 %v20230_v42  ;;  %v20250_v43 = vpack.c.bf16 %v16264_v60, %v16260_v56  ;;  %v20266_v42 = vpack.c.bf16 %v16266_v63, %v16262_v21  ;;  %v16306_v56 = vld [vmem:[%s25363_s5 + $0xce0] sm:$0xff]  ;;  %v20284_v60 = vpack.c.bf16 %v16307_v3, %v16303_v14  ;;  %v16308_v21 = vld [vmem:[%s25363_s5 + $0xcf0] sm:$0xff]  ;;  %v16313_v63 = vld [vmem:[%s25363_s5 + $0xd08] sm:$0xff] }
 0x444   : > { %20217 = vmatprep.subr.bf16.mxu0 %v20216_v8  ;;  %20233 = vmatprep.subr.bf16.mxu1 %v20232_v35  ;;  %v20252_v8 = vpack.c.bf16 %v16273_v2, %v16269_v47  ;;  %v20268_v35 = vpack.c.bf16 %v16275_v54, %v16271_v11  ;;  %v16317_v47 = vld [vmem:[%s25363_s5 + $0xd28] sm:$0xff]  ;;  %v16315_v2 = vld [vmem:[%s25363_s5 + $0xd18] sm:$0xff] }
 0x445   : > { %v16319_v11 = vld [vmem:[%s25363_s5 + $0xd38] sm:$0xff] }
 0x446   : > { %v16349_v14 = vld [vmem:[%s25363_s5 + $0xe18] sm:$0xff] }
 0x447   : > { %20219 = vmatpush1.bf16.msra.mxu0 %v20218_v26  ;;  %20235 = vmatpush1.bf16.msra.mxu1 %v20234_v24  ;;  %v20254_v26 = vpack.c.bf16 %v16272_v6, %v16268_v12  ;;  %v20270_v24 = vpack.c.bf16 %v16274_v50, %v16270_v4  ;;  %v16316_v12 = vld [vmem:[%s25363_s5 + $0xd20] sm:$0xff]  ;;  %v20304_v6 = vpack.c.bf16 %v16317_v47, %v16313_v63  ;;  %v16318_v4 = vld [vmem:[%s25363_s5 + $0xd30] sm:$0xff]  ;;  %v16321_v50 = vld [vmem:[%s25363_s5 + $0xd48] sm:$0xff] }
 0x448   : > { %20221 = vmatprep.subr.bf16.mxu0 %v20220_v44  ;;  %20237 = vmatprep.subr.bf16.mxu1 %v20236_v57  ;;  %v20272_v44 = vpack.c.bf16 %v16283_v16, %v16279_v52  ;;  %v20288_v57 = vpack.c.bf16 %v16285_v51, %v16281_v48  ;;  %v16325_v52 = vld [vmem:[%s25363_s5 + $0xd68] sm:$0xff]  ;;  %v16323_v16 = vld [vmem:[%s25363_s5 + $0xd58] sm:$0xff] }
 0x449   : > { %v16327_v48 = vld [vmem:[%s25363_s5 + $0xd78] sm:$0xff] }
 0x44a   : > { %v16353_v3 = vld [vmem:[%s25363_s5 + $0xe38] sm:$0xff] }
 0x44b   : > { %20223 = vmatpush1.bf16.msra.mxu0 %v20222_v25  ;;  %20239 = vmatpush1.bf16.msra.mxu1 %v20238_v58  ;;  %v20274_v25 = vpack.c.bf16 %v16282_v13, %v16278_v27  ;;  %v20290_v58 = vpack.c.bf16 %v16284_v17, %v16280_v40  ;;  %v16324_v27 = vld [vmem:[%s25363_s5 + $0xd60] sm:$0xff]  ;;  %v20308_v13 = vpack.c.bf16 %v16325_v52, %v16321_v50  ;;  %v16326_v40 = vld [vmem:[%s25363_s5 + $0xd70] sm:$0xff]  ;;  %v16329_v17 = vld [vmem:[%s25363_s5 + $0xd88] sm:$0xff] }
 0x44c   : > { %20241 = vmatprep.subr.bf16.mxu0 %v20240_v46  ;;  %20257 = vmatprep.subr.bf16.mxu1 %v20256_v10  ;;  %v13954_v46 = vrot.slane %v23587_v32, 3  ;;  %v20276_v10 = vpack.c.bf16 %v16291_v5, %v16287_v41  ;;  %v16299_v32 = vld [vmem:[%s25363_s5 + $0xca8] sm:$0xff]  ;;  %v16331_v5 = vld [vmem:[%s25363_s5 + $0xd98] sm:$0xff]  ;;  %v16356_v50 = vld [vmem:[%s25363_s5 + $0xe50] sm:$0xff] }
 0x44d   : > { %v16333_v41 = vld [vmem:[%s25363_s5 + $0xda8] sm:$0xff]  ;;  %v16357_v63 = vld [vmem:[%s25363_s5 + $0xe58] sm:$0xff]  ;;  %v16360_v52 = vld [vmem:[%s25363_s5 + $0xe70] sm:$0xff] }
 0x44e   : > { %16242 = vmatmul.mubr.msk.f32.vlgmr.msra.gmra.mrb[92].mxu0 %vm11665_vm1, %v13746_v31  ;;  %16243 = vmatmul.mubr.msk.f32.vlgmr.msra.gmra.mrb[92].mxu1 %vm11665_vm1, %v13746_v31  ;;  %v20280_v31 = vpack.c.bf16 %v16299_v32, %v16295_v59  ;;  %v16339_v59 = vld [vmem:[%s25363_s5 + $0xdd8] sm:$0xff] }
 0x44f   : > { %20243 = vmatpush1.bf16.msra.mxu0 %v20242_v62  ;;  %20259 = vmatpush1.bf16.msra.mxu1 %v20258_v37  ;;  %v20278_v62 = vpack.c.bf16 %v16290_v30, %v16286_v49  ;;  %v20294_v37 = vpack.c.bf16 %v16292_v15, %v16288_v33  ;;  %v16332_v49 = vld [vmem:[%s25363_s5 + $0xda0] sm:$0xff]  ;;  %v20312_v30 = vpack.c.bf16 %v16333_v41, %v16329_v17  ;;  %v16337_v33 = vld [vmem:[%s25363_s5 + $0xdc8] sm:$0xff]  ;;  %v16343_v32 = vld [vmem:[%s25363_s5 + $0xdf8] sm:$0xff] }
 0x450   : > { %20245 = vmatprep.subr.bf16.mxu0 %v20244_v7  ;;  %20261 = vmatprep.subr.bf16.mxu1 %v20260_v1  ;;  %v20296_v7 = vpack.c.bf16 %v16301_v39, %v16297_v45  ;;  %v16296_v1 = vld [vmem:[%s25363_s5 + $0xc90] sm:$0xff]  ;;  %v16341_v15 = vld [vmem:[%s25363_s5 + $0xde8] sm:$0xff]  ;;  %v20332_v29 = vpack.c.bf16 %v16343_v32, %v16339_v59  ;;  %v16361_v47 = vld [vmem:[%s25363_s5 + $0xe78] sm:$0xff] }
 0x451   : > { %14021 = vmatprep.mubr.f32.mxu0 %v21001_v38  ;;  %14092 = vmatprep.mubr.f32.mxu1 %v21001_v38  ;;  %v20316_v0 = vpack.c.bf16 %v16341_v15, %v16337_v33 }
 0x453   : > { %20247 = vmatpush1.bf16.msra.mxu0 %v20246_v34  ;;  %20263 = vmatpush1.bf16.msra.mxu1 %v20262_v19  ;;  %v20298_v34 = vpack.c.bf16 %v16300_v18, %v16296_v1  ;;  %v16302_v19 = vld [vmem:[%s25363_s5 + $0xcc0] sm:$0xff]  ;;  %v16347_v1 = vld [vmem:[%s25363_s5 + $0xe08] sm:$0xff] }
 0x454   : > { %20249 = vmatprep.subr.bf16.mxu0 %v20248_v61  ;;  %20265 = vmatprep.subr.bf16.mxu1 %v20264_v53  ;;  %v20300_v61 = vpack.c.bf16 %v16309_v9, %v16305_v23  ;;  %v16304_v53 = vld [vmem:[%s25363_s5 + $0xcd0] sm:$0xff]  ;;  %v20286_v54 = vpack.c.bf16 %v16306_v56, %v16302_v19  ;;  %v16351_v18 = vld [vmem:[%s25363_s5 + $0xe28] sm:$0xff]  ;;  %v20352_v56 = vpack.c.bf16 %v16353_v3, %v16349_v14  ;;  %v16383_v3 = vld [vmem:[%s25363_s5 + $0xf18] sm:$0xff] }
 0x455   : > { %v20336_v19 = vpack.c.bf16 %v16351_v18, %v16347_v1  ;;  %v16385_v14 = vld [vmem:[%s25363_s5 + $0xf28] sm:$0xff] }
 0x457   : > { %20251 = vmatpush1.bf16.msra.mxu0 %v20250_v43  ;;  %20267 = vmatpush1.bf16.msra.mxu1 %v20266_v42  ;;  %v20302_v43 = vpack.c.bf16 %v16308_v21, %v16304_v53  ;;  %v16312_v42 = vld [vmem:[%s25363_s5 + $0xd00] sm:$0xff]  ;;  %v16355_v53 = vld [vmem:[%s25363_s5 + $0xe48] sm:$0xff] }
 0x458   : > { %20253 = vmatprep.subr.bf16.mxu0 %v20252_v8  ;;  %20269 = vmatprep.subr.bf16.mxu1 %v20268_v35  ;;  %v20320_v8 = vpack.c.bf16 %v16319_v11, %v16315_v2  ;;  %v16314_v35 = vld [vmem:[%s25363_s5 + $0xd10] sm:$0xff]  ;;  %v20306_v51 = vpack.c.bf16 %v16316_v12, %v16312_v42  ;;  %v16359_v21 = vld [vmem:[%s25363_s5 + $0xe68] sm:$0xff]  ;;  %v21002_v2 = vmov 1966171168   ;;  %v16354_v12 = vld [vmem:[%s25363_s5 + $0xe40] sm:$0xff] }
 0x459   : > { %v11818_v11 = vunpack.c.l.s4 %v21002_v2  ;;  %v16391_v2 = vld [vmem:[%s25363_s5 + $0xf58] sm:$0xff] }
 0x45b   : > { %20255 = vmatpush1.bf16.msra.mxu0 %v20254_v26  ;;  %20271 = vmatpush1.bf16.msra.mxu1 %v20270_v24  ;;  %v20322_v26 = vpack.c.bf16 %v16318_v4, %v16314_v35  ;;  %v16320_v24 = vld [vmem:[%s25363_s5 + $0xd40] sm:$0xff]  ;;  %v20340_v35 = vpack.c.bf16 %v16359_v21, %v16355_v53  ;;  %v20356_v4 = vpack.c.bf16 %v16361_v47, %v16357_v63  ;;  %v16382_v53 = vld [vmem:[%s25363_s5 + $0xf10] sm:$0xff]  ;;  %v16389_v63 = vld [vmem:[%s25363_s5 + $0xf48] sm:$0xff] }
 0x45c   : > { %20273 = vmatprep.subr.bf16.mxu0 %v20272_v44  ;;  %20289 = vmatprep.subr.bf16.mxu1 %v20288_v57  ;;  %v20324_v44 = vpack.c.bf16 %v16327_v48, %v16323_v16  ;;  %v16322_v57 = vld [vmem:[%s25363_s5 + $0xd50] sm:$0xff]  ;;  %v20310_v20 = vpack.c.bf16 %v16324_v27, %v16320_v24  ;;  %v16363_v16 = vld [vmem:[%s25363_s5 + $0xe88] sm:$0xff]  ;;  %v11819_v48 = vunpack.c.0.s8 %v11818_v11  ;;  %v16365_v24 = vld [vmem:[%s25363_s5 + $0xe98] sm:$0xff] }
 0x45d   : > { %v16369_v27 = vld [vmem:[%s25363_s5 + $0xeb8] sm:$0xff]  ;;  %v16386_v21 = vld [vmem:[%s25363_s5 + $0xf30] sm:$0xff]  ;;  %v16393_v47 = vld [vmem:[%s25363_s5 + $0xf68] sm:$0xff] }
 0x45e   : > { %16276 = vmatmul.mubr.msk.f32.vlgmr.msra.gmra.mrb[94].mxu0 %vm11665_vm1, %v13954_v46  ;;  %16277 = vmatmul.mubr.msk.f32.vlgmr.msra.gmra.mrb[94].mxu1 %vm11665_vm1, %v13954_v46  ;;  %v20328_v46 = vpack.c.bf16 %v16335_v55, %v16331_v5  ;;  %v20360_v41 = vpack.c.bf16 %v16369_v27, %v16365_v24  ;;  %v16364_v5 = vld [vmem:[%s25363_s5 + $0xe90] sm:$0xff]  ;;  %v16395_v11 = vld [vmem:[%s25363_s5 + $0xf78] sm:$0xff] }
 0x45f   : > { %20275 = vmatpush1.bf16.msra.mxu0 %v20274_v25  ;;  %20291 = vmatpush1.bf16.msra.mxu1 %v20290_v58  ;;  %v20326_v25 = vpack.c.bf16 %v16326_v40, %v16322_v57  ;;  %v16328_v58 = vld [vmem:[%s25363_s5 + $0xd80] sm:$0xff]  ;;  %v16368_v55 = vld [vmem:[%s25363_s5 + $0xeb0] sm:$0xff] }
 0x460   : > { %20277 = vmatprep.subr.bf16.mxu0 %v20276_v10  ;;  %20293 = vmatprep.subr.bf16.mxu1 %v20292_v22  ;;  %v16330_v10 = vld [vmem:[%s25363_s5 + $0xd90] sm:$0xff]  ;;  %v20314_v45 = vpack.c.bf16 %v16332_v49, %v16328_v58  ;;  %v16362_v57 = vld [vmem:[%s25363_s5 + $0xe80] sm:$0xff] }
 0x461   : > { %14229 = vmatprep.mubr.f32.mxu0 %v21001_v38  ;;  %14300 = vmatprep.mubr.f32.mxu1 %v21001_v38  ;;  %v16334_v22 = vld [vmem:[%s25363_s5 + $0xdb0] sm:$0xff]  ;;  %v16366_v40 = vld [vmem:[%s25363_s5 + $0xea0] sm:$0xff] }
 0x462   : > { %v20330_v39 = vpack.c.bf16 %v16334_v22, %v16330_v10  ;;  %v16377_v10 = vld [vmem:[%s25363_s5 + $0xef8] sm:$0xff]  ;;  %v20346_v15 = vpack.c.bf16 %v16366_v40, %v16362_v57 }
 0x463   : > { %20279 = vmatpush1.bf16.msra.mxu0 %v20278_v62  ;;  %20295 = vmatpush1.bf16.msra.mxu1 %v20294_v37  ;;  %v16336_v62 = vld [vmem:[%s25363_s5 + $0xdc0] sm:$0xff] }
 0x464   : > { %20281 = vmatprep.subr.bf16.mxu0 %v20280_v31  ;;  %20297 = vmatprep.subr.bf16.mxu1 %v20296_v7  ;;  %v16340_v37 = vld [vmem:[%s25363_s5 + $0xde0] sm:$0xff]  ;;  %v16338_v31 = vld [vmem:[%s25363_s5 + $0xdd0] sm:$0xff] }
 0x465   : > { %v16342_v7 = vld [vmem:[%s25363_s5 + $0xdf0] sm:$0xff]  ;;  %v20318_v23 = vpack.c.bf16 %v16340_v37, %v16336_v62  ;;  %v16374_v62 = vld [vmem:[%s25363_s5 + $0xee0] sm:$0xff] }
 0x466   : > { %v20334_v9 = vpack.c.bf16 %v16342_v7, %v16338_v31  ;;  %v16376_v31 = vld [vmem:[%s25363_s5 + $0xef0] sm:$0xff]  ;;  %v16381_v7 = vld [vmem:[%s25363_s5 + $0xf08] sm:$0xff] }
 0x467   : > { %20283 = vmatpush1.bf16.msra.mxu0 %v20282_v36  ;;  %20299 = vmatpush1.bf16.msra.mxu1 %v20298_v34  ;;  %v16346_v36 = vld [vmem:[%s25363_s5 + $0xe00] sm:$0xff] }
 0x468   : > { %20285 = vmatprep.subr.bf16.mxu0 %v20284_v60  ;;  %20301 = vmatprep.subr.bf16.mxu1 %v20300_v61  ;;  %v16350_v34 = vld [vmem:[%s25363_s5 + $0xe20] sm:$0xff]  ;;  %v16348_v60 = vld [vmem:[%s25363_s5 + $0xe10] sm:$0xff] }
 0x469   : > { %v16352_v61 = vld [vmem:[%s25363_s5 + $0xe30] sm:$0xff] }
 0x46a   : > { %v20354_v42 = vpack.c.bf16 %v16352_v61, %v16348_v60  ;;  %v20368_v60 = vpack.c.bf16 %v16385_v14, %v16381_v7  ;;  %v11632_v7 = vld [vmem:[%s25364_s6] sm:$0xf] }
 0x46b   : > { %20287 = vmatpush1.bf16.msra.mxu0 %v20286_v54  ;;  %20303 = vmatpush1.bf16.msra.mxu1 %v20302_v43  ;;  %v11820_v54 = vlaneseq  ;;  %v20338_v43 = vpack.c.bf16 %v16350_v34, %v16346_v36 }
 0x46c   : > { %20305 = vmatprep.subr.bf16.mxu0 %v20304_v6  ;;  %20321 = vmatprep.subr.bf16.mxu1 %v20320_v8  ;;  %v16358_v6 = vld [vmem:[%s25363_s5 + $0xe60] sm:$0xff]  ;;  %v14370_v8 = vrot.slane %v23579_v28, 1 }
 0x46e   : > { %16310 = vmatmul.mubr.msk.f32.vlgmr.msra.gmra.mrb[96].mxu0 %vm11665_vm1, %v23579_v28  ;;  %16311 = vmatmul.mubr.msk.f32.vlgmr.msra.gmra.mrb[96].mxu1 %vm11665_vm1, %v23579_v28 }
 0x46f   : > { %20307 = vmatpush1.bf16.msra.mxu0 %v20306_v51  ;;  %20323 = vmatpush1.bf16.msra.mxu1 %v20322_v26  ;;  %v24888_v51 = vshrl.u32 %v11820_v54, 7  ;;  %v16367_v26 = vld [vmem:[%s25363_s5 + $0xea8] sm:$0xff] }
 0x470   : > { %20309 = vmatprep.subr.bf16.mxu0 %v20308_v13  ;;  %20325 = vmatprep.subr.bf16.mxu1 %v20324_v44  ;;  %v20342_v13 = vpack.c.bf16 %v16358_v6, %v16354_v12  ;;  %v20358_v44 = vpack.c.bf16 %v16360_v52, %v16356_v50  ;;  %v20344_v17 = vpack.c.bf16 %v16367_v26, %v16363_v16  ;;  %v16392_v12 = vld [vmem:[%s25363_s5 + $0xf60] sm:$0xff]  ;;  %v14578_v6 = vrot.slane %v23579_v28, 2  ;;  %v16394_v50 = vld [vmem:[%s25363_s5 + $0xf70] sm:$0xff]  ;;  %v16397_v52 = vld [vmem:[%s25363_s5 + $0xf88] sm:$0xff] }
 0x471   : > { %14437 = vmatprep.mubr.f32.mxu0 %v21001_v38  ;;  %14508 = vmatprep.mubr.f32.mxu1 %v21001_v38  ;;  %v24917_v49 = vsub.s32 %v11819_v48, %v24888_v51  ;;  %v16401_v16 = vld [vmem:[%s25363_s5 + $0xfa8] sm:$0xff]  ;;  %v16399_v48 = vld [vmem:[%s25363_s5 + $0xf98] sm:$0xff] }
 0x472   : > { %v16403_v26 = vld [vmem:[%s25363_s5 + $0xfb8] sm:$0xff]  ;;  %v20376_v57 = vpack.c.bf16 %v16401_v16, %v16397_v52 }
 0x473   : > { %20311 = vmatpush1.bf16.msra.mxu0 %v20310_v20  ;;  %20327 = vmatpush1.bf16.msra.mxu1 %v20326_v25  ;;  %v16371_v20 = vld [vmem:[%s25363_s5 + $0xec8] sm:$0xff]  ;;  %v20392_v40 = vpack.c.bf16 %v16403_v26, %v16399_v48 }
 0x474   : > { %20313 = vmatprep.subr.bf16.mxu0 %v20312_v30  ;;  %20329 = vmatprep.subr.bf16.mxu1 %v20328_v46  ;;  %v16375_v30 = vld [vmem:[%s25363_s5 + $0xee8] sm:$0xff]  ;;  %v16373_v46 = vld [vmem:[%s25363_s5 + $0xed8] sm:$0xff] }
 0x475   : > { %v20348_v37 = vpack.c.bf16 %v16375_v30, %v16371_v20  ;;  %v16411_v30 = vld [vmem:[%s25363_s5 + $0xff8] sm:$0xff] }
 0x477   : > { %20315 = vmatpush1.bf16.msra.mxu0 %v20314_v45  ;;  %20331 = vmatpush1.bf16.msra.mxu1 %v20330_v39  ;;  %v20362_v45 = vpack.c.bf16 %v16368_v55, %v16364_v5  ;;  %v16370_v39 = vld [vmem:[%s25363_s5 + $0xec0] sm:$0xff]  ;;  %v16405_v5 = vld [vmem:[%s25363_s5 + $0xfc8] sm:$0xff] }
 0x478   : > { %20317 = vmatprep.subr.bf16.mxu0 %v20316_v0  ;;  %20333 = vmatprep.subr.bf16.mxu1 %v20332_v29  ;;  %v20364_v0 = vpack.c.bf16 %v16377_v10, %v16373_v46  ;;  %v16372_v29 = vld [vmem:[%s25363_s5 + $0xed0] sm:$0xff]  ;;  %v20350_v36 = vpack.c.bf16 %v16374_v62, %v16370_v39 }
 0x479   : > { %v20366_v34 = vpack.c.bf16 %v16376_v31, %v16372_v29  ;;  %v16406_v62 = vld [vmem:[%s25363_s5 + $0xfd0] sm:$0xff] }
 0x47b   : > { %20319 = vmatpush1.bf16.msra.mxu0 %v20318_v23  ;;  %20335 = vmatpush1.bf16.msra.mxu1 %v20334_v9  ;;  %v16387_v23 = vld [vmem:[%s25363_s5 + $0xf38] sm:$0xff] }
 0x47c   : > { %20337 = vmatprep.subr.bf16.mxu0 %v20336_v19  ;;  %20353 = vmatprep.subr.bf16.mxu1 %v20352_v56  ;;  %v16380_v19 = vld [vmem:[%s25363_s5 + $0xf00] sm:$0xff]  ;;  %v20384_v61 = vpack.c.bf16 %v16387_v23, %v16383_v3 }
 0x47d   : > { %v16384_v56 = vld [vmem:[%s25363_s5 + $0xf20] sm:$0xff] }
 0x47e   : > { %16344 = vmatmul.mubr.msk.f32.vlgmr.msra.gmra.mrb[98].mxu0 %vm11665_vm1, %v14370_v8  ;;  %16345 = vmatmul.mubr.msk.f32.vlgmr.msra.gmra.mrb[98].mxu1 %vm11665_vm1, %v14370_v8  ;;  %v20370_v54 = vpack.c.bf16 %v16384_v56, %v16380_v19  ;;  %v20372_v8 = vpack.c.bf16 %v16393_v47, %v16389_v63 }
 0x47f   : > { %20339 = vmatpush1.bf16.msra.mxu0 %v20338_v43  ;;  %20355 = vmatpush1.bf16.msra.mxu1 %v20354_v42  ;;  %v20386_v43 = vpack.c.bf16 %v16386_v21, %v16382_v53  ;;  %v16388_v42 = vld [vmem:[%s25363_s5 + $0xf40] sm:$0xff] }
 0x480   : > { %20341 = vmatprep.subr.bf16.mxu0 %v20340_v35  ;;  %20357 = vmatprep.subr.bf16.mxu1 %v20356_v4  ;;  %v20388_v35 = vpack.c.bf16 %v16395_v11, %v16391_v2  ;;  %v16390_v4 = vld [vmem:[%s25363_s5 + $0xf50] sm:$0xff]  ;;  %v20374_v24 = vpack.c.bf16 %v16392_v12, %v16388_v42 }
 0x481   : > { %v11735_v25 = vpop.f32.mrb[72].mxu0  ;;  %v11806_v58 = vpop.f32.mrb[72].mxu1  ;;  %14645 = vmatprep.mubr.f32.mxu0 %v21001_v38  ;;  %14716 = vmatprep.mubr.f32.mxu1 %v21001_v38  ;;  %v20390_v27 = vpack.c.bf16 %v16394_v50, %v16390_v4 }
 0x482   : > { %v11737_v22 = vpop.f32.mrb[73].mxu0  ;;  %v11808_v33 = vpop.f32.mrb[73].mxu1 }
 0x483   : > { %v11815_v59 = vcombine.low %v11735_v25, %v11737_v22  ;;  %v11816_v32 = vcombine.low %v11806_v58, %v11808_v33  ;;  %20343 = vmatpush1.bf16.msra.mxu0 %v20342_v13  ;;  %20359 = vmatpush1.bf16.msra.mxu1 %v20358_v44  ;;  %v16396_v13 = vld [vmem:[%s25363_s5 + $0xf80] sm:$0xff]  ;;  %v16409_v25 = vld [vmem:[%s25363_s5 + $0xfe8] sm:$0xff]  ;;  %v16407_v58 = vld [vmem:[%s25363_s5 + $0xfd8] sm:$0xff] }
 0x484   : > { %20345 = vmatprep.subr.bf16.mxu0 %v20344_v17  ;;  %20361 = vmatprep.subr.bf16.mxu1 %v20360_v41  ;;  %v16400_v44 = vld [vmem:[%s25363_s5 + $0xfa0] sm:$0xff]  ;;  %v16398_v17 = vld [vmem:[%s25363_s5 + $0xf90] sm:$0xff]  ;;  %v20396_v39 = vpack.c.bf16 %v16411_v30, %v16407_v58 }
 0x485   : > { %v24946_v1 = vrot.slane %v11815_v59, %v24917_v49  ;;  %v24949_v18 = vrot.slane %v11816_v32, %v24917_v49  ;;  %v16402_v41 = vld [vmem:[%s25363_s5 + $0xfb0] sm:$0xff]  ;;  %v20378_v22 = vpack.c.bf16 %v16400_v44, %v16396_v13  ;;  %v16404_v32 = vld [vmem:[%s25363_s5 + $0xfc0] sm:$0xff] }
 0x486   : > { %v20394_v59 = vpack.c.bf16 %v16402_v41, %v16398_v17 }
 0x487   : > { %v11831_v9 = vcombine.low %v24946_v1, %v24949_v18  ;;  %20347 = vmatpush1.bf16.msra.mxu0 %v20346_v15  ;;  %20363 = vmatpush1.bf16.msra.mxu1 %v20362_v45  ;;  %v20380_v45 = vpack.c.bf16 %v16409_v25, %v16405_v5  ;;  %v14786_v18 = vrot.slane %v23579_v28, 3 }
 0x488   : > { %20349 = vmatprep.subr.bf16.mxu0 %v20348_v37  ;;  %20365 = vmatprep.subr.bf16.mxu1 %v20364_v0  ;;  %v16410_v37 = vld [vmem:[%s25363_s5 + $0xff0] sm:$0xff] }
 0x489   : > { %v11838_v0 = vrot.slane %v11831_v9, %v24917_v49  ;;  %v20398_v23 = vpack.c.bf16 %v16410_v37, %v16406_v62 }
 0x48b   : > { %20351 = vmatpush1.bf16.msra.mxu0 %v20350_v36  ;;  %20367 = vmatpush1.bf16.msra.mxu1 %v20366_v34  ;;  %v11840_v36 = vadd.f32 %v11838_v0, %v11632_v7 }
 0x48c   : > { %20369 = vmatprep.subr.bf16.mxu0 %v20368_v60  ;;  %20385 = vmatprep.subr.bf16.mxu1 %v20384_v61 }
 0x48e   : > { %16378 = vmatmul.mubr.msk.f32.vlgmr.msra.gmra.mrb[100].mxu0 %vm11665_vm1, %v14578_v6  ;;  %16379 = vmatmul.mubr.msk.f32.vlgmr.msra.gmra.mrb[100].mxu1 %vm11665_vm1, %v14578_v6 }
 0x48f   : > { %20371 = vmatpush1.bf16.msra.mxu0 %v20370_v54  ;;  %20387 = vmatpush1.bf16.msra.mxu1 %v20386_v43 }
 0x490   : > { %20373 = vmatprep.subr.bf16.mxu0 %v20372_v8  ;;  %20389 = vmatprep.subr.bf16.mxu1 %v20388_v35 }
 0x491   : > { %v11943_v55 = vpop.f32.mrb[74].mxu0  ;;  %v12014_v20 = vpop.f32.mrb[74].mxu1  ;;  %14853 = vmatprep.mubr.f32.mxu0 %v21001_v38  ;;  %14924 = vmatprep.mubr.f32.mxu1 %v21001_v38  ;;  %v16408_v38 = vld [vmem:[%s25363_s5 + $0xfe0] sm:$0xff] }
 0x492   : > { %v11945_v46 = vpop.f32.mrb[75].mxu0  ;;  %v12016_v10 = vpop.f32.mrb[75].mxu1  ;;  %v20382_v3 = vpack.c.bf16 %v16408_v38, %v16404_v32 }
 0x493   : > { %v12023_v33 = vcombine.low %v11943_v55, %v11945_v46  ;;  %v12024_v15 = vcombine.low %v12014_v20, %v12016_v10  ;;  %20375 = vmatpush1.bf16.msra.mxu0 %v20374_v24  ;;  %20391 = vmatpush1.bf16.msra.mxu1 %v20390_v27 }
 0x494   : > { %20377 = vmatprep.subr.bf16.mxu0 %v20376_v57  ;;  %20393 = vmatprep.subr.bf16.mxu1 %v20392_v40 }
 0x495   : > { %v12031_v29 = vrot.slane %v12023_v33, %v24917_v49  ;;  %v12038_v31 = vrot.slane %v12024_v15, %v24917_v49 }
 0x497   : > { %v12039_v14 = vcombine.low %v12031_v29, %v12038_v31  ;;  %20379 = vmatpush1.bf16.msra.mxu0 %v20378_v22  ;;  %20395 = vmatpush1.bf16.msra.mxu1 %v20394_v59 }
 0x498   : > { %20381 = vmatprep.subr.bf16.mxu0 %v20380_v45  ;;  %20397 = vmatprep.subr.bf16.mxu1 %v20396_v39 }
 0x499   : > { %v12046_v34 = vrot.slane %v12039_v14, %v24917_v49  ;;  %v14978_v14 = vld [vmem:[%s25365_s7 + $0x80] sm:$0xff] }
 0x49b   : > { %v12048_v1 = vadd.f32 %v12046_v34, %v11840_v36  ;;  %20383 = vmatpush1.bf16.msra.mxu0 %v20382_v3  ;;  %20399 = vmatpush1.bf16.msra.mxu1 %v20398_v23  ;;  %v14979_v3 = vld [vmem:[%s25365_s7 + $0x88] sm:$0xff]  ;;  %v15010_v23 = vld [vmem:[%s25365_s7 + $0x180] sm:$0xff] }
 0x49c   : > { %v20400_v36 = vpack.c.bf16 %v14979_v3, %v14978_v14  ;;  %v15011_v34 = vld [vmem:[%s25365_s7 + $0x188] sm:$0xff]  ;;  %v15018_v14 = vld [vmem:[%s25365_s7 + $0x1c0] sm:$0xff] }
 0x49e   : > { %16412 = vmatmul.mubr.msk.f32.vlgmr.msra.gmra.mrb[102].mxu0 %vm11665_vm1, %v14786_v18  ;;  %16413 = vmatmul.mubr.msk.f32.vlgmr.msra.gmra.mrb[102].mxu1 %vm11665_vm1, %v14786_v18  ;;  %v14963_v18 = vld [vmem:[%s25365_s7 + $0x8] sm:$0xff] }
 0x49f   : > { %20401 = vmatprep.subr.bf16.mxu0 %v20400_v36  ;;  %v14971_v36 = vld [vmem:[%s25365_s7 + $0x48] sm:$0xff] }
 0x4a1   : > { %v12151_v9 = vpop.f32.mrb[76].mxu0  ;;  %v12222_v19 = vpop.f32.mrb[76].mxu1 }
 0x4a2   : > { %v12153_v56 = vpop.f32.mrb[77].mxu0  ;;  %v12224_v60 = vpop.f32.mrb[77].mxu1 }
 0x4a3   : > { %v12231_v61 = vcombine.low %v12151_v9, %v12153_v56  ;;  %v12232_v53 = vcombine.low %v12222_v19, %v12224_v60  ;;  %v20432_v9 = vpack.c.bf16 %v15011_v34, %v15010_v23  ;;  %v14994_v56 = vld [vmem:[%s25365_s7 + $0x100] sm:$0xff]  ;;  %v14995_v60 = vld [vmem:[%s25365_s7 + $0x108] sm:$0xff] }
 0x4a4   : > { %v14970_v23 = vld [vmem:[%s25365_s7 + $0x40] sm:$0xff] }
 0x4a5   : > { %v12239_v21 = vrot.slane %v12231_v61, %v24917_v49  ;;  %v12246_v63 = vrot.slane %v12232_v53, %v24917_v49  ;;  %v14980_v61 = vld [vmem:[%s25365_s7 + $0x90] sm:$0xff]  ;;  %v20434_v53 = vpack.c.bf16 %v14995_v60, %v14994_v56  ;;  %20433 = vmatprep.subr.bf16.mxu1 %v20432_v9  ;;  %v15003_v9 = vld [vmem:[%s25365_s7 + $0x148] sm:$0xff]  ;;  %v14989_v60 = vld [vmem:[%s25365_s7 + $0xd8] sm:$0xff] }
 0x4a7   : > { %v12247_v47 = vcombine.low %v12239_v21, %v12246_v63  ;;  %v14981_v21 = vld [vmem:[%s25365_s7 + $0x98] sm:$0xff]  ;;  %v15012_v63 = vld [vmem:[%s25365_s7 + $0x190] sm:$0xff]  ;;  %20435 = vmatpush3.bf16.msra.mxu1 %v20434_v53 }
 0x4a8   : > { %v15021_v53 = vld [vmem:[%s25365_s7 + $0x1d8] sm:$0xff] }
 0x4a9   : > { %v12254_v2 = vrot.slane %v12247_v47, %v24917_v49  ;;  %v15013_v47 = vld [vmem:[%s25365_s7 + $0x198] sm:$0xff] }
 0x4ab   : > { %v12256_v11 = vadd.f32 %v12254_v2, %v12048_v1  ;;  %v14962_v1 = vld [vmem:[%s25365_s7] sm:$0xff]  ;;  %v20404_v2 = vpack.c.bf16 %v14981_v21, %v14980_v61  ;;  %v15020_v61 = vld [vmem:[%s25365_s7 + $0x1d0] sm:$0xff] }
 0x4ac   : > { %v20402_v19 = vpack.c.bf16 %v14963_v18, %v14962_v1  ;;  %v20418_v1 = vpack.c.bf16 %v14971_v36, %v14970_v23  ;;  %v15002_v18 = vld [vmem:[%s25365_s7 + $0x140] sm:$0xff] }
 0x4ad   : > { %v20450_v56 = vpack.c.bf16 %v15003_v9, %v15002_v18 }
 0x4ae   : > { %20403 = vmatpush3.bf16.msra.mxu0 %v20402_v19  ;;  %v14988_v19 = vld [vmem:[%s25365_s7 + $0xd0] sm:$0xff] }
 0x4af   : > { %20405 = vmatprep.subr.bf16.mxu0 %v20404_v2  ;;  %v20420_v21 = vpack.c.bf16 %v14989_v60, %v14988_v19  ;;  %v14973_v2 = vld [vmem:[%s25365_s7 + $0x58] sm:$0xff] }
 0x4b1   : > { %v12359_v54 = vpop.f32.mrb[78].mxu0  ;;  %v12430_v28 = vpop.f32.mrb[78].mxu1 }
 0x4b2   : > { %v12361_v43 = vpop.f32.mrb[79].mxu0  ;;  %v12432_v42 = vpop.f32.mrb[79].mxu1 }
 0x4b3   : > { %v12439_v12 = vcombine.low %v12359_v54, %v12361_v43  ;;  %v12440_v6 = vcombine.low %v12430_v28, %v12432_v42  ;;  %v14964_v54 = vld [vmem:[%s25365_s7 + $0x10] sm:$0xff]  ;;  %v14965_v28 = vld [vmem:[%s25365_s7 + $0x18] sm:$0xff] }
 0x4b4   : > { %v14996_v43 = vld [vmem:[%s25365_s7 + $0x110] sm:$0xff]  ;;  %v20406_v42 = vpack.c.bf16 %v14965_v28, %v14964_v54 }
 0x4b5   : > { %v12447_v8 = vrot.slane %v12439_v12, %v24917_v49  ;;  %v12454_v35 = vrot.slane %v12440_v6, %v24917_v49  ;;  %v14997_v12 = vld [vmem:[%s25365_s7 + $0x118] sm:$0xff]  ;;  %v14982_v6 = vld [vmem:[%s25365_s7 + $0xa0] sm:$0xff] }
 0x4b6   : > { %20407 = vmatpush3.bf16.msra.mxu0 %v20406_v42  ;;  %v15005_v42 = vld [vmem:[%s25365_s7 + $0x158] sm:$0xff] }
 0x4b7   : > { %v12455_v4 = vcombine.low %v12447_v8, %v12454_v35  ;;  %v14983_v8 = vld [vmem:[%s25365_s7 + $0xa8] sm:$0xff] }
 0x4b9   : > { %v12462_v50 = vrot.slane %v12455_v4, %v24917_v49 }
 0x4bb   : > { %v12464_v52 = vadd.f32 %v12462_v50, %v12256_v11  ;;  %v20436_v11 = vpack.c.bf16 %v15013_v47, %v15012_v63  ;;  %v20438_v50 = vpack.c.bf16 %v14997_v12, %v14996_v43  ;;  %v20452_v63 = vpack.c.bf16 %v15021_v53, %v15020_v61  ;;  %v14972_v47 = vld [vmem:[%s25365_s7 + $0x50] sm:$0xff]  ;;  %v14990_v12 = vld [vmem:[%s25365_s7 + $0xe0] sm:$0xff] }
 0x4bc   : > { %v20422_v43 = vpack.c.bf16 %v14973_v2, %v14972_v47 }
 0x4bd   : > { %20437 = vmatprep.subr.bf16.mxu1 %v20436_v11  ;;  %v15004_v11 = vld [vmem:[%s25365_s7 + $0x150] sm:$0xff] }
 0x4be   : > { %20439 = vmatpush3.bf16.msra.mxu1 %v20438_v50 }
 0x4c1   : > { %v12567_v16 = vpop.f32.mrb[80].mxu0  ;;  %v12638_v48 = vpop.f32.mrb[80].mxu1 }
 0x4c2   : > { %v12569_v26 = vpop.f32.mrb[81].mxu0  ;;  %v12640_v24 = vpop.f32.mrb[81].mxu1 }
 0x4c3   : > { %v12647_v27 = vcombine.low %v12567_v16, %v12569_v26  ;;  %v12648_v13 = vcombine.low %v12638_v48, %v12640_v24  ;;  %v15014_v16 = vld [vmem:[%s25365_s7 + $0x1a0] sm:$0xff]  ;;  %v15015_v48 = vld [vmem:[%s25365_s7 + $0x1a8] sm:$0xff] }
 0x4c4   : > { %v14966_v26 = vld [vmem:[%s25365_s7 + $0x20] sm:$0xff] }
 0x4c5   : > { %v12655_v44 = vrot.slane %v12647_v27, %v24917_v49  ;;  %v12662_v57 = vrot.slane %v12648_v13, %v24917_v49  ;;  %v20440_v13 = vpack.c.bf16 %v15015_v48, %v15014_v16  ;;  %v15023_v16 = vld [vmem:[%s25365_s7 + $0x1e8] sm:$0xff]  ;;  %v14974_v48 = vld [vmem:[%s25365_s7 + $0x60] sm:$0xff] }
 0x4c7   : > { %v12663_v40 = vcombine.low %v12655_v44, %v12662_v57  ;;  %v14967_v44 = vld [vmem:[%s25365_s7 + $0x28] sm:$0xff]  ;;  %v14998_v57 = vld [vmem:[%s25365_s7 + $0x120] sm:$0xff]  ;;  %20441 = vmatprep.subr.bf16.mxu1 %v20440_v13 }
 0x4c8   : > { %v14975_v13 = vld [vmem:[%s25365_s7 + $0x68] sm:$0xff] }
 0x4c9   : > { %v12670_v17 = vrot.slane %v12663_v40, %v24917_v49  ;;  %v14999_v40 = vld [vmem:[%s25365_s7 + $0x128] sm:$0xff] }
 0x4cb   : > { %v12672_v41 = vadd.f32 %v12670_v17, %v12464_v52  ;;  %v20408_v52 = vpack.c.bf16 %v14983_v8, %v14982_v6  ;;  %v14991_v6 = vld [vmem:[%s25365_s7 + $0xe8] sm:$0xff] }
 0x4cc   : > { %v20424_v50 = vpack.c.bf16 %v14991_v6, %v14990_v12 }
 0x4cd   : > { %20409 = vmatprep.subr.bf16.mxu0 %v20408_v52  ;;  %v15022_v52 = vld [vmem:[%s25365_s7 + $0x1e0] sm:$0xff] }
 0x4d1   : > { %v12775_v5 = vpop.f32.mrb[82].mxu0  ;;  %v12846_v55 = vpop.f32.mrb[82].mxu1 }
 0x4d2   : > { %v12777_v20 = vpop.f32.mrb[83].mxu0  ;;  %v12848_v25 = vpop.f32.mrb[83].mxu1 }
 0x4d3   : > { %v12855_v58 = vcombine.low %v12775_v5, %v12777_v20  ;;  %v12856_v30 = vcombine.low %v12846_v55, %v12848_v25  ;;  %v20410_v5 = vpack.c.bf16 %v14967_v44, %v14966_v26  ;;  %v14984_v55 = vld [vmem:[%s25365_s7 + $0xb0] sm:$0xff]  ;;  %v14985_v20 = vld [vmem:[%s25365_s7 + $0xb8] sm:$0xff]  ;;  %v15006_v44 = vld [vmem:[%s25365_s7 + $0x160] sm:$0xff] }
 0x4d4   : > { %v15016_v25 = vld [vmem:[%s25365_s7 + $0x1b0] sm:$0xff] }
 0x4d5   : > { %v12863_v46 = vrot.slane %v12855_v58, %v24917_v49  ;;  %v12870_v10 = vrot.slane %v12856_v30, %v24917_v49  ;;  %v20442_v58 = vpack.c.bf16 %v14999_v40, %v14998_v57  ;;  %v20412_v30 = vpack.c.bf16 %v14985_v20, %v14984_v55  ;;  %20411 = vmatpush3.bf16.msra.mxu0 %v20410_v5  ;;  %v15007_v57 = vld [vmem:[%s25365_s7 + $0x168] sm:$0xff]  ;;  %v14993_v5 = vld [vmem:[%s25365_s7 + $0xf8] sm:$0xff]  ;;  %v15024_v55 = vld [vmem:[%s25365_s7 + $0x1f0] sm:$0xff] }
 0x4d6   : > { %v20426_v40 = vpack.c.bf16 %v14975_v13, %v14974_v48 }
 0x4d7   : > { %v12871_v22 = vcombine.low %v12863_v46, %v12870_v10  ;;  %v15017_v46 = vld [vmem:[%s25365_s7 + $0x1b8] sm:$0xff]  ;;  %v14968_v10 = vld [vmem:[%s25365_s7 + $0x30] sm:$0xff]  ;;  %20443 = vmatpush3.bf16.msra.mxu1 %v20442_v58  ;;  %20413 = vmatprep.subr.bf16.mxu0 %v20412_v30 }
 0x4d8   : > { %v15025_v30 = vld [vmem:[%s25365_s7 + $0x1f8] sm:$0xff] }
 0x4d9   : > { %v12878_v33 = vrot.slane %v12871_v22, %v24917_v49  ;;  %v14969_v22 = vld [vmem:[%s25365_s7 + $0x38] sm:$0xff] }
 0x4db   : > { %v12880_v15 = vadd.f32 %v12878_v33, %v12672_v41 }
 0x4e1   : > { %v12983_v59 = vpop.f32.mrb[84].mxu0  ;;  %v13054_v32 = vpop.f32.mrb[84].mxu1 }
 0x4e2   : > { %v12985_v45 = vpop.f32.mrb[85].mxu0  ;;  %v13056_v39 = vpop.f32.mrb[85].mxu1 }
 0x4e3   : > { %v13063_v38 = vcombine.low %v12983_v59, %v12985_v45  ;;  %v13064_v62 = vcombine.low %v13054_v32, %v13056_v39  ;;  %v20444_v59 = vpack.c.bf16 %v15017_v46, %v15016_v25  ;;  %v15000_v32 = vld [vmem:[%s25365_s7 + $0x130] sm:$0xff]  ;;  %v15001_v45 = vld [vmem:[%s25365_s7 + $0x138] sm:$0xff] }
 0x4e4   : > { %v14976_v46 = vld [vmem:[%s25365_s7 + $0x70] sm:$0xff] }
 0x4e5   : > { %v13071_v37 = vrot.slane %v13063_v38, %v24917_v49  ;;  %v13078_v0 = vrot.slane %v13064_v62, %v24917_v49  ;;  %v20414_v38 = vpack.c.bf16 %v14969_v22, %v14968_v10  ;;  %v20446_v62 = vpack.c.bf16 %v15001_v45, %v15000_v32  ;;  %20445 = vmatprep.subr.bf16.mxu1 %v20444_v59  ;;  %v14977_v10 = vld [vmem:[%s25365_s7 + $0x78] sm:$0xff] }
 0x4e6   : > { %v20460_v22 = vpack.c.bf16 %v15025_v30, %v15024_v55  ;;  %v20430_v32 = vpack.c.bf16 %v14977_v10, %v14976_v46 }
 0x4e7   : > { %v13079_v29 = vcombine.low %v13071_v37, %v13078_v0  ;;  %20415 = vmatpush3.bf16.msra.mxu0 %v20414_v38  ;;  %20447 = vmatpush3.bf16.msra.mxu1 %v20446_v62 }
 0x4e9   : > { %v13086_v31 = vrot.slane %v13079_v29, %v24917_v49  ;;  %v14986_v29 = vld [vmem:[%s25365_s7 + $0xc0] sm:$0xff] }
 0x4eb   : > { %v25079_v7 = vadd.f32 %v13086_v31, %v12880_v15  ;;  %v14987_v31 = vld [vmem:[%s25365_s7 + $0xc8] sm:$0xff] }
 0x4ec   : > { %v20416_v3 = vpack.c.bf16 %v14987_v31, %v14986_v29 }
 0x4ee   : > { %20417 = vmatprep.subr.bf16.mxu0 %v20416_v3 }
 0x4ef   : > { %20419 = vmatpush3.bf16.msra.mxu0 %v20418_v1 }
 0x4f0   : > { %20421 = vmatprep.subr.bf16.mxu0 %v20420_v21 }
 0x4f1   : > { %v13191_v35 = vpop.f32.mrb[86].mxu0  ;;  %v13262_v4 = vpop.f32.mrb[86].mxu1 }
 0x4f2   : > { %v13193_v24 = vpop.f32.mrb[87].mxu0  ;;  %v13264_v27 = vpop.f32.mrb[87].mxu1 }
 0x4f3   : > { %v13271_v17 = vcombine.low %v13191_v35, %v13193_v24  ;;  %v13272_v41 = vcombine.low %v13262_v4, %v13264_v27  ;;  %v20454_v4 = vpack.c.bf16 %v15005_v42, %v15004_v11  ;;  %v20456_v27 = vpack.c.bf16 %v15023_v16, %v15022_v52  ;;  %20423 = vmatpush3.bf16.msra.mxu0 %v20422_v43 }
 0x4f4   : > { %20425 = vmatprep.subr.bf16.mxu0 %v20424_v50 }
 0x4f5   : > { %v13279_v33 = vrot.slane %v13271_v17, %v24917_v49  ;;  %v13286_v15 = vrot.slane %v13272_v41, %v24917_v49  ;;  %v20458_v17 = vpack.c.bf16 %v15007_v57, %v15006_v44  ;;  %v14992_v41 = vld [vmem:[%s25365_s7 + $0xf0] sm:$0xff] }
 0x4f6   : > { %v20428_v58 = vpack.c.bf16 %v14993_v5, %v14992_v41 }
 0x4f7   : > { %v13287_v39 = vcombine.low %v13279_v33, %v13286_v15  ;;  %v15008_v33 = vld [vmem:[%s25365_s7 + $0x170] sm:$0xff]  ;;  %v15009_v15 = vld [vmem:[%s25365_s7 + $0x178] sm:$0xff]  ;;  %20427 = vmatpush3.bf16.msra.mxu0 %v20426_v40 }
 0x4f8   : > { %20429 = vmatprep.subr.bf16.mxu0 %v20428_v58 }
 0x4f9   : > { %v13294_v37 = vrot.slane %v13287_v39, %v24917_v49  ;;  %v20462_v39 = vpack.c.bf16 %v15009_v15, %v15008_v33 }
 0x4fb   : > { %v25181_v0 = vadd.f32 %v13294_v37, %v25079_v7  ;;  %v15019_v7 = vld [vmem:[%s25365_s7 + $0x1c8] sm:$0xff]  ;;  %20431 = vmatpush3.bf16.msra.mxu0 %v20430_v32 }
 0x4fc   : > { %v20448_v34 = vpack.c.bf16 %v15019_v7, %v15018_v14 }
 0x4fe   : > { %20449 = vmatprep.subr.bf16.mxu1 %v20448_v34 }
 0x4ff   : > { %20451 = vmatpush3.bf16.msra.mxu1 %v20450_v56 }
 0x500   : > { %20453 = vmatprep.subr.bf16.mxu1 %v20452_v63 }
 0x501   : > { %v13399_v54 = vpop.f32.mrb[88].mxu0  ;;  %v13470_v28 = vpop.f32.mrb[88].mxu1 }
 0x502   : > { %v13401_v8 = vpop.f32.mrb[89].mxu0  ;;  %v13472_v35 = vpop.f32.mrb[89].mxu1 }
 0x503   : > { %v13479_v26 = vcombine.low %v13399_v54, %v13401_v8  ;;  %v13480_v24 = vcombine.low %v13470_v28, %v13472_v35  ;;  %20455 = vmatpush3.bf16.msra.mxu1 %v20454_v4 }
 0x504   : > { %20457 = vmatprep.subr.bf16.mxu1 %v20456_v27 }
 0x505   : > { %v13487_v20 = vrot.slane %v13479_v26, %v24917_v49  ;;  %v13494_v25 = vrot.slane %v13480_v24, %v24917_v49 }
 0x507   : > { %v13495_v59 = vcombine.low %v13487_v20, %v13494_v25  ;;  %20459 = vmatpush3.bf16.msra.mxu1 %v20458_v17 }
 0x508   : > { %20461 = vmatprep.subr.bf16.mxu1 %v20460_v22 }
 0x509   : > { %v13502_v45 = vrot.slane %v13495_v59, %v24917_v49 }
 0x50b   : > { %v13504_v38 = vadd.f32 %v13502_v45, %v25181_v0  ;;  %20463 = vmatpush3.bf16.msra.mxu1 %v20462_v39 }
 0x511   : > { %v13607_v62 = vpop.f32.mrb[90].mxu0  ;;  %v13678_v37 = vpop.f32.mrb[90].mxu1 }
 0x512   : > { %v13609_v29 = vpop.f32.mrb[91].mxu0  ;;  %v13680_v31 = vpop.f32.mrb[91].mxu1 }
 0x513   : > { %v13687_v14 = vcombine.low %v13607_v62, %v13609_v29  ;;  %v13688_v3 = vcombine.low %v13678_v37, %v13680_v31 }
 0x515   : > { %v13695_v7 = vrot.slane %v13687_v14, %v24917_v49  ;;  %v13702_v23 = vrot.slane %v13688_v3, %v24917_v49 }
 0x517   : > { %v13703_v36 = vcombine.low %v13695_v7, %v13702_v23 }
 0x519   : > { %v13710_v34 = vrot.slane %v13703_v36, %v24917_v49 }
 0x51b   : > { %v13712_v1 = vadd.f32 %v13710_v34, %v13504_v38 }
 0x521   : > { %v13815_v18 = vpop.f32.mrb[92].mxu0  ;;  %v13886_v9 = vpop.f32.mrb[92].mxu1 }
 0x522   : > { %v13817_v19 = vpop.f32.mrb[93].mxu0  ;;  %v13888_v0 = vpop.f32.mrb[93].mxu1 }
 0x523   : > { %v13895_v56 = vcombine.low %v13815_v18, %v13817_v19  ;;  %v13896_v60 = vcombine.low %v13886_v9, %v13888_v0  ;;  %v15034_v0 = vsub.s32 1, %v24888_v51 }
 0x525   : > { %v13903_v61 = vrot.slane %v13895_v56, %v24917_v49  ;;  %v13910_v53 = vrot.slane %v13896_v60, %v24917_v49  ;;  %v15042_v60 = vsub.s32 3, %v24888_v51 }
 0x527   : > { %v13911_v21 = vcombine.low %v13903_v61, %v13910_v53  ;;  %v15030_v61 = vsub.s32 0, %v24888_v51  ;;  %v15038_v53 = vsub.s32 2, %v24888_v51 }
 0x529   : > { %v13918_v63 = vrot.slane %v13911_v21, %v24917_v49 }
 0x52b   : > { %v13920_v47 = vadd.f32 %v13918_v63, %v13712_v1 }
 0x531   : > { %v14023_v2 = vpop.f32.mrb[94].mxu0  ;;  %v14094_v11 = vpop.f32.mrb[94].mxu1 }
 0x532   : > { %v14025_v54 = vpop.f32.mrb[95].mxu0  ;;  %v14096_v28 = vpop.f32.mrb[95].mxu1 }
 0x533   : > { %v14103_v43 = vcombine.low %v14023_v2, %v14025_v54  ;;  %v14104_v42 = vcombine.low %v14094_v11, %v14096_v28  ;;  %v15026_v28 = vld [vmem:[%s25366_s8] sm:$0x1] }
 0x535   : > { %v14111_v12 = vrot.slane %v14103_v43, %v24917_v49  ;;  %v14118_v6 = vrot.slane %v14104_v42, %v24917_v49 }
 0x537   : > { %v14119_v8 = vcombine.low %v14111_v12, %v14118_v6 }
 0x539   : > { %v14126_v35 = vrot.slane %v14119_v8, %v24917_v49 }
 0x53b   : > { %v14128_v4 = vadd.f32 %v14126_v35, %v13920_v47 }
 0x541   : > { %v14231_v50 = vpop.f32.mrb[96].mxu0  ;;  %v14302_v52 = vpop.f32.mrb[96].mxu1 }
 0x542   : > { %v14233_v16 = vpop.f32.mrb[97].mxu0  ;;  %v14304_v48 = vpop.f32.mrb[97].mxu1 }
 0x543   : > { %v14311_v26 = vcombine.low %v14231_v50, %v14233_v16  ;;  %v14312_v24 = vcombine.low %v14302_v52, %v14304_v48 }
 0x545   : > { %v14319_v27 = vrot.slane %v14311_v26, %v24917_v49  ;;  %v14326_v13 = vrot.slane %v14312_v24, %v24917_v49 }
 0x547   : > { %v14327_v44 = vcombine.low %v14319_v27, %v14326_v13 }
 0x549   : > { %v14334_v57 = vrot.slane %v14327_v44, %v24917_v49 }
 0x54b   : > { %v14336_v40 = vadd.f32 %v14334_v57, %v14128_v4 }
 0x551   : > { %v14439_v17 = vpop.f32.mrb[98].mxu0  ;;  %v14510_v41 = vpop.f32.mrb[98].mxu1 }
 0x552   : > { %v14441_v5 = vpop.f32.mrb[99].mxu0  ;;  %v14512_v55 = vpop.f32.mrb[99].mxu1 }
 0x553   : > { %v14519_v20 = vcombine.low %v14439_v17, %v14441_v5  ;;  %v14520_v25 = vcombine.low %v14510_v41, %v14512_v55 }
 0x555   : > { %v14527_v58 = vrot.slane %v14519_v20, %v24917_v49  ;;  %v14534_v30 = vrot.slane %v14520_v25, %v24917_v49 }
 0x557   : > { %v14535_v46 = vcombine.low %v14527_v58, %v14534_v30 }
 0x559   : > { %v14542_v10 = vrot.slane %v14535_v46, %v24917_v49 }
 0x55b   : > { %v14544_v22 = vadd.f32 %v14542_v10, %v14336_v40 }
 0x561   : > { %v14647_v33 = vpop.f32.mrb[100].mxu0  ;;  %v14718_v15 = vpop.f32.mrb[100].mxu1 }
 0x562   : > { %v14649_v59 = vpop.f32.mrb[101].mxu0  ;;  %v14720_v32 = vpop.f32.mrb[101].mxu1 }
 0x563   : > { %v14727_v45 = vcombine.low %v14647_v33, %v14649_v59  ;;  %v14728_v39 = vcombine.low %v14718_v15, %v14720_v32 }
 0x565   : > { %v14735_v38 = vrot.slane %v14727_v45, %v24917_v49  ;;  %v14742_v62 = vrot.slane %v14728_v39, %v24917_v49 }
 0x567   : > { %v14743_v37 = vcombine.low %v14735_v38, %v14742_v62 }
 0x569   : > { %v14750_v29 = vrot.slane %v14743_v37, %v24917_v49 }
 0x56b   : > { %v14752_v31 = vadd.f32 %v14750_v29, %v14544_v22 }
 0x571   : > { %v14855_v14 = vpop.f32.mrb[102].mxu0  ;;  %v14926_v3 = vpop.f32.mrb[102].mxu1 }
 0x572   : > { %v14857_v7 = vpop.f32.mrb[103].mxu0  ;;  %v14928_v23 = vpop.f32.mrb[103].mxu1 }
 0x573   : > { %v14935_v36 = vcombine.low %v14855_v14, %v14857_v7  ;;  %v14936_v34 = vcombine.low %v14926_v3, %v14928_v23 }
 0x575   : > { %v14943_v1 = vrot.slane %v14935_v36, %v24917_v49  ;;  %v14950_v18 = vrot.slane %v14936_v34, %v24917_v49 }
 0x577   : > { %v14951_v9 = vcombine.low %v14943_v1, %v14950_v18 }
 0x579   : > { %v14958_v19 = vrot.slane %v14951_v9, %v24917_v49 }
 0x57b   : > { %v14960_v56 = vadd.f32 %v14958_v19, %v14752_v31 }
 0x57d   : > { %v14961_v21 = vmax.f32 %v14960_v56, 0.0 }
 0x57f   : > { %v15035_v63 = vrot.slane %v14961_v21, %v15034_v0  ;;  %v15043_v47 = vrot.slane %v14961_v21, %v15042_v60  ;;  %v15031_v2 = vrot.slane %v14961_v21, %v15030_v61  ;;  %v15039_v11 = vrot.slane %v14961_v21, %v15038_v53 }
 0x581   : > { %15112 = vmatprep.mubr.f32.mxu0 %v15035_v63  ;;  %15182 = vmatprep.mubr.f32.mxu1 %v15043_v47 }
 0x582   : > { %15113 = vmatmul.mubr.f32.vlgmr.msra.gmra.mrb[104].mxu0 %v15031_v2  ;;  %15183 = vmatmul.mubr.f32.vlgmr.msra.gmra.mrb[104].mxu1 %v15039_v11 }
 0x655   : > { %v17394_v54 = vpop.f32.mrb[104].mxu0  ;;  %v17429_v49 = vpop.f32.mrb[104].mxu1 }
 0x656   : > { %v17395_v43 = vpop.f32.mrb[105].mxu0  ;;  %v17430_v42 = vpop.f32.mrb[105].mxu1 }
 0x657   : > { %v17396_v12 = vadd.f32 %v17395_v43, %v17394_v54  ;;  %v17431_v51 = vadd.f32 %v17430_v42, %v17429_v49 }
 0x659   : > { %v15115_v6 = vadd.f32 %v17396_v12, %v15026_v28 }
 0x65b   : > { %v15185_v8 = vadd.f32 %v17431_v51, %v15115_v6 }
 0x65d   : > { %v15189_v35 = vsel %vm15188_vm2, %v15185_v8, -inf }
 0x65e   : > { %15190 = vmax.xlane.f32.xlu0 %v15189_v35 }
 0x6eb   : > { %v15191_v4 = vpop.xlane.xlu0 %15190 }
 0x6ec   : > { %v15192_v50 = vsub.f32 %v15185_v8, %v15191_v4 }
 0x6ee   : > { %v15193_v52 = vmul.f32 1.442695, %v15192_v50 }
 0x6f0   : > { %20889 = vpow2.f32 %v15193_v52 }
 0x6fa   : > { %v20890_v16 = vpop.eup %20889 }
 0x6fb   : > { %v15195_v48 = vsel %vm15188_vm2, %v20890_v16, 0.0 }
 0x6fc   : > { %15196 = vadd.xlane.f32.xlu0 %v15195_v48 }
 0x789   : > { %v15197_v26 = vpop.xlane.xlu0 %15196 }
 0x78a   : > { %20891 = vlog2.f32 %v15197_v26 }
 0x794   : > { %v20892_v24 = vpop.eup %20891 }
 0x795   : > { %v15199_v27 = vmul.f32 0.6931472, %v20892_v24 }
 0x797   : > { %v15200_v13 = vsub.f32 %v15192_v50, %v15199_v27 }
 0x799   : > { %15201 = vst [vmem:[%s324_s14] sm:$0x1] %v15200_v13 }
 0x79a   : > { %20950 = shalt.err (!%p20947_p3)
}
 0x79b   : > { %s20951_s27 = scalar_lea.hbm %s25316_s22, 16  ;;  %s20955_s14 = scalar_lea.hbm %s25367_s9, 32 }
 0x79c   : > { %p20952_p4 = scmp.ne.s32.totalorder %s25316_s22, %s20951_s27  ;;  %p20956_p9 = scmp.lt.u32.totalorder %s25316_s22, %s25367_s9 }
 0x79d   : > { %p20957_p10 = scmp.lt.u32.totalorder %s20955_s14, %s20951_s27  ;;  %p20959_p12 = scmp.lt.u32.totalorder %s20951_s27, %s25316_s22 }
 0x79e   : > { %p20953_p7 = pnand %p20952_p4, %p21092_p5 }
 0x79f   : > { %p20958_p11 = por %p20957_p10, %p20956_p9 }
 0x7a0   : > { %p20954_p8 = pneg %p20953_p7 }
 0x7a1   : > { %p20960_p13 = por %p20959_p12, %p20958_p11 }
 0x7a3   : > { %p20961_p0 = pnand %p20960_p13, %p20954_p8 }
 0x7a5   : > { %20964 = shalt.err (!%p20961_p0)
}
 0x7a6   : > { %20848 = dma.vmem_to_hbm [thread:$0]  (%p21092_p5), %s25318_s16, 16, %s25316_s22, %s15203_s23  }
 0x7a7 PF: > { %p20854_p1 = scmp.ge.s32.totalorder %s20999_s12, 2  ;;  %s15227_s24 = sand.u32 1, %s20987_s30  }
 0x7a8   : > { %s15228_s13 = scalar_lea.sflag [#allocation4], %s15227_s24 }
 0x7a9   : > { %p20851_p2 = pnand %p20854_p1, %p21096_p6 }
 0x7ab   : > { %20982 = dma.done.wait (!%p20851_p2), %s15228_s13, 16  }
 0x7ac   : > { %20984 = vsyncadd (!%p20851_p2), %s15228_s13, 4294967280  ;;  %p19_p3 = scmp.ge.s32.totalorder %s21079_s15, 4   ;;  %s25535_s30 = smov %s20991_s10 }
 0x7ad   : > { %s25536_s10 = smov %s20995_s11  ;;  %s25537_s11 = smov %s21090_s18 }
 0x7ae   : > { %s25538_s12 = smov %s21079_s15  ;;  %21 = sbr.rel (!%p19_p3) target bundleno = 3 (0x3), region = 133 }
 0x7b5   :  { %15232 = vsyncpa [#allocation4], 1 }
 0x7b6   :  { %15234 = vsyncpa [#allocation4 + $0x1], 1 }

</bundles_post_ra>
